<compile_context>
chip_gen: v6e
topology: v6e:2x2x1
jax: 0.10.0
libtpu: 0.0.40
codegen_flags: <defaults>
</compile_context>

<pallas_src>
import functools
import math

import jax
import jax.numpy as jnp
from jax.experimental import pallas as pl
from jax.experimental.pallas import tpu as pltpu


# ---------------------------------------------------------------------------
# In-kernel math helpers (operate on values, not refs)
# ---------------------------------------------------------------------------

def _layer_norm(y_f32, g, b):
    """LayerNorm over the last dim (eps=1e-5), f32 statistics, bf16 output."""
    mean = jnp.mean(y_f32, axis=-1, keepdims=True)
    var = jnp.mean(jnp.square(y_f32 - mean), axis=-1, keepdims=True)
    out = (y_f32 - mean) * jax.lax.rsqrt(var + 1e-5) * g + b
    return out.astype(jnp.bfloat16)


def _split_heads(t2, n, l, h):
    """(n*l, h*hd) -> (h*n, l, hd) using static lane slices + leading-axis concat."""
    hd = t2.shape[-1] // h
    parts = [t2[:, i * hd:(i + 1) * hd].reshape(n, l, hd) for i in range(h)]
    return jnp.concatenate(parts, axis=0)


def _merge_heads(t3, n, l, h):
    """(h*n, l, hd) -> (n*l, h*hd)."""
    hd = t3.shape[-1]
    parts = [t3[i * n:(i + 1) * n] for i in range(h)]  # each (n, l, hd)
    return jnp.concatenate(parts, axis=-1).reshape(n * l, h * hd)


def _attention(qp, kp, vp, n, l, h):
    """Multi-head attention core.

    qp/kp/vp: (n*l, D) f32 projected q/k/v, rows ordered (attn_batch, attn_seq).
    The 1/sqrt(head_dim) scale is already folded into the q projection weights.
    Heads are batched into a single einsum with batch axis = h*n.
    """
    qh = _split_heads(qp, n, l, h).astype(jnp.bfloat16)
    kh = _split_heads(kp, n, l, h).astype(jnp.bfloat16)
    vh = _split_heads(vp, n, l, h).astype(jnp.bfloat16)

    s = jnp.einsum('bqd,bkd->bqk', qh, kh,
                   preferred_element_type=jnp.float32)          # (h*n, l, l)
    m = jnp.max(s, axis=-1, keepdims=True)
    p = jnp.exp(s - m)
    p = p * pl.reciprocal(jnp.sum(p, axis=-1, keepdims=True), approx=True)

    ctx = jnp.einsum('bqk,bkd->bqd', p.astype(jnp.bfloat16), vh,
                     preferred_element_type=jnp.float32)        # (h*n, l, hd)
    return _merge_heads(ctx, n, l, h)                           # (n*l, D) f32


def _mha_self(x2, w_qkv, b_qkv, w_o, b_o, g, b, n, l, h):
    """Self-attention (q=k=v=x) + residual(query) + LayerNorm.  x2 is bf16."""
    d = x2.shape[-1]
    qkv = jnp.dot(x2, w_qkv, preferred_element_type=jnp.float32) + b_qkv  # (n*l, 3D)
    ctx = _attention(qkv[:, :d], qkv[:, d:2 * d], qkv[:, 2 * d:], n, l, h)
    attn = jnp.dot(ctx.astype(jnp.bfloat16), w_o,
                   preferred_element_type=jnp.float32) + b_o
    return _layer_norm(x2.astype(jnp.float32) + attn, g, b)


def _mha_cross(q2, v2, w_qk, b_qk, w_v, b_v, w_o, b_o, g, b, n, l, h):
    """Cross attention as used by the reference: query=key=q2, value=v2,
    residual + LayerNorm against the *query* stream (reference quirk)."""
    d = q2.shape[-1]
    qk = jnp.dot(q2, w_qk, preferred_element_type=jnp.float32) + b_qk    # (n*l, 2D)
    vv = jnp.dot(v2, w_v, preferred_element_type=jnp.float32) + b_v      # (n*l, D)
    ctx = _attention(qk[:, :d], qk[:, d:], vv, n, l, h)
    attn = jnp.dot(ctx.astype(jnp.bfloat16), w_o,
                   preferred_element_type=jnp.float32) + b_o
    return _layer_norm(q2.astype(jnp.float32) + attn, g, b)


def _ffn(x2, w1, b1, w2, b2, g, b):
    """Linear -> exact GELU -> Linear + residual + LayerNorm (dropout = identity)."""
    hmid = jnp.dot(x2, w1, preferred_element_type=jnp.float32) + b1
    hmid = 0.5 * hmid * (1.0 + jax.lax.erf(hmid * (1.0 / math.sqrt(2.0))))
    f = jnp.dot(hmid.astype(jnp.bfloat16), w2,
                preferred_element_type=jnp.float32) + b2
    return _layer_norm(x2.astype(jnp.float32) + f, g, b)


# ---------------------------------------------------------------------------
# Pallas kernels
# ---------------------------------------------------------------------------

def _encoder_stack_kernel(x_ref,
                          w_qkv_ref, b_qkv_ref, w_o_ref, b_o_ref, g1_ref, be1_ref,
                          w1_ref, b1_ref, w2_ref, b2_ref, g2_ref, be2_ref,
                          o_ref, *, num_heads, attn_len):
    """grid = (row_tiles, num_layers).  One step = one encoder layer on one row
    tile (attn + FFN fused).  The resident output block is the cross-layer carry
    (constant block index along the layer axis => stays in VMEM, written back once).
    """
    layer = pl.program_id(1)

    @pl.when(layer == 0)
    def _():
        o_ref[...] = x_ref[...]

    x2 = o_ref[...]                                   # bf16 (row_tile, D)
    n = x2.shape[0] // attn_len                       # attention groups in this tile
    t = _mha_self(x2, w_qkv_ref[...], b_qkv_ref[...], w_o_ref[...], b_o_ref[...],
                  g1_ref[...], be1_ref[...], n, attn_len, num_heads)
    y2 = _ffn(t, w1_ref[...], b1_ref[...], w2_ref[...], b2_ref[...],
              g2_ref[...], be2_ref[...])
    o_ref[...] = y2


def _decoder_last_kernel(y_ref, enc_ref,
                         sw_qkv_ref, sb_qkv_ref, sw_o_ref, sb_o_ref, g1_ref, be1_ref,
                         cw_qk_ref, cb_qk_ref, cw_v_ref, cb_v_ref, cw_o_ref, cb_o_ref,
                         g2_ref, be2_ref,
                         w1_ref, b1_ref, w2_ref, b2_ref, g3_ref, be3_ref,
                         wout_ref, bout_ref,
                         logits_ref, *, num_heads, attn_len):
    """Last decoder layer (self-attn + cross-attn + FFN) fused with the final vocab
    projection.  The reference feeds `label` into every decoder layer, so layers
    0..N-2 are dead work and only this layer is evaluated."""
    y2 = y_ref[...]
    enc2 = enc_ref[...]
    n = y2.shape[0] // attn_len

    t = _mha_self(y2, sw_qkv_ref[...], sb_qkv_ref[...], sw_o_ref[...], sb_o_ref[...],
                  g1_ref[...], be1_ref[...], n, attn_len, num_heads)
    t = _mha_cross(enc2, t, cw_qk_ref[...], cb_qk_ref[...], cw_v_ref[...], cb_v_ref[...],
                   cw_o_ref[...], cb_o_ref[...], g2_ref[...], be2_ref[...],
                   n, attn_len, num_heads)
    t = _ffn(t, w1_ref[...], b1_ref[...], w2_ref[...], b2_ref[...],
             g3_ref[...], be3_ref[...])

    logits_ref[...] = (jnp.dot(t, wout_ref[...], preferred_element_type=jnp.float32)
                       + bout_ref[...]).astype(logits_ref.dtype)


# ---------------------------------------------------------------------------
# pallas_call wrappers
# ---------------------------------------------------------------------------

_ENC_ORDER = ('w_qkv', 'b_qkv', 'w_o', 'b_o', 'ln1_g', 'ln1_b',
              'w1', 'b1', 'w2', 'b2', 'ln2_g', 'ln2_b')

_DEC_ORDER = ('w_qkv', 'b_qkv', 'w_o1', 'b_o1', 'ln1_g', 'ln1_b',
              'w_qk', 'b_qk', 'w_v', 'b_v', 'w_o2', 'b_o2', 'ln2_g', 'ln2_b',
              'w1', 'b1', 'w2', 'b2', 'ln3_g', 'ln3_b')


def _pick_row_tile(m, attn_len, max_rows=256):
    """Row-tile size: multiple of lcm(8, attn_len) (sublane alignment + whole
    attention groups), divides M, capped at max_rows.  Falls back to M."""
    base = (8 * attn_len) // math.gcd(8, attn_len)
    if m < base or m % base != 0:
        return m
    tile = base
    while tile * 2 <= min(m, max_rows) and m % (tile * 2) == 0:
        tile *= 2
    return tile


def _stacked_spec(trailing_shape):
    """BlockSpec for a (num_layers, ...) stacked weight: layer dim squeezed, block
    index along the layer axis = layer grid index (row-tile axis ignored)."""
    zeros = (0,) * len(trailing_shape)
    return pl.BlockSpec((None,) + tuple(trailing_shape),
                        lambda r, layer, _z=zeros: (layer,) + _z)


def _whole_spec(arr):
    """BlockSpec covering the full array (constant block index) under a 1-D grid."""
    zeros = (0,) * arr.ndim
    return pl.BlockSpec(tuple(arr.shape), lambda r, _z=zeros: _z)


def encoder_stack(x2, p, *, num_heads, attn_len, row_tile):
    M, D = x2.shape
    num_layers = p['w_qkv'].shape[0]
    num_row_tiles = M // row_tile
    act_spec = pl.BlockSpec((row_tile, D), lambda r, layer: (r, 0))
    kernel = functools.partial(_encoder_stack_kernel, num_heads=num_heads,
                               attn_len=attn_len)
    # NOTE: for real-sized D/d_ffn, sweep pl.Buffered(3) on w1/w2 and re-budget
    # VMEM (v7x: 64 MiB) before scaling; at these sizes defaults are fine.
    return pl.pallas_call(
        kernel,
        out_shape=jax.ShapeDtypeStruct((M, D), jnp.bfloat16),
        grid_spec=pltpu.PrefetchScalarGridSpec(
            num_scalar_prefetch=0,
            grid=(num_row_tiles, num_layers),
            in_specs=[act_spec] + [_stacked_spec(p[name].shape[1:])
                                   for name in _ENC_ORDER],
            out_specs=pl.BlockSpec((row_tile, D), lambda r, layer: (r, 0)),
        ),
        compiler_params=pltpu.CompilerParams(
            dimension_semantics=("parallel", "arbitrary")),
    )(x2, *[p[name] for name in _ENC_ORDER])


def decoder_and_project(y2, enc2, p_last, w_out, b_out, *, num_heads, attn_len,
                        row_tile):
    """Single fused call: last decoder layer + final vocab projection."""
    M, D = y2.shape
    V = w_out.shape[1]
    num_row_tiles = M // row_tile
    act_spec = pl.BlockSpec((row_tile, D), lambda r: (r, 0))
    weight_args = [p_last[name] for name in _DEC_ORDER] + [w_out, b_out]
    kernel = functools.partial(_decoder_last_kernel, num_heads=num_heads,
                               attn_len=attn_len)
    return pl.pallas_call(
        kernel,
        out_shape=jax.ShapeDtypeStruct((M, V), jnp.float32),
        grid_spec=pltpu.PrefetchScalarGridSpec(
            num_scalar_prefetch=0,
            grid=(num_row_tiles,),
            in_specs=[act_spec, act_spec] + [_whole_spec(a) for a in weight_args],
            out_specs=pl.BlockSpec((row_tile, V), lambda r: (r, 0)),
        ),
        compiler_params=pltpu.CompilerParams(dimension_semantics=("parallel",)),
    )(y2, enc2, *weight_args)


# ---------------------------------------------------------------------------
# Parameters (deterministic synthetic init; shapes follow the PyTorch module)
# ---------------------------------------------------------------------------

def _init_encoder_layer(key, d_model, d_ffn, num_heads):
    ks = jax.random.split(key, 4)
    s = 0.05
    scale = 1.0 / math.sqrt(d_model // num_heads)
    bf16, f32 = jnp.bfloat16, jnp.float32
    w_qkv = jax.random.normal(ks[0], (d_model, 3 * d_model), f32) * s
    # Fold the softmax 1/sqrt(head_dim) scale into the q projection (weights + bias).
    w_qkv = w_qkv.at[:, :d_model].multiply(scale)
    return dict(
        w_qkv=w_qkv.astype(bf16),
        b_qkv=jnp.zeros((1, 3 * d_model), f32),
        w_o=(jax.random.normal(ks[1], (d_model, d_model), f32) * s).astype(bf16),
        b_o=jnp.zeros((1, d_model), f32),
        ln1_g=jnp.ones((1, d_model), f32),
        ln1_b=jnp.zeros((1, d_model), f32),
        w1=(jax.random.normal(ks[2], (d_model, d_ffn), f32) * s).astype(bf16),
        b1=jnp.zeros((1, d_ffn), f32),
        w2=(jax.random.normal(ks[3], (d_ffn, d_model), f32) * s).astype(bf16),
        b2=jnp.zeros((1, d_model), f32),
        ln2_g=jnp.ones((1, d_model), f32),
        ln2_b=jnp.zeros((1, d_model), f32),
    )


def _init_decoder_layer(key, d_model, d_ffn, num_heads):
    ks = jax.random.split(key, 7)
    s = 0.05
    scale = 1.0 / math.sqrt(d_model // num_heads)
    bf16, f32 = jnp.bfloat16, jnp.float32
    w_qkv = jax.random.normal(ks[0], (d_model, 3 * d_model), f32) * s
    w_qkv = w_qkv.at[:, :d_model].multiply(scale)          # self-attn q scale
    w_qk = jax.random.normal(ks[2], (d_model, 2 * d_model), f32) * s
    w_qk = w_qk.at[:, :d_model].multiply(scale)             # cross-attn q scale
    return dict(
        # self-attention
        w_qkv=w_qkv.astype(bf16),
        b_qkv=jnp.zeros((1, 3 * d_model), f32),
        w_o1=(jax.random.normal(ks[1], (d_model, d_model), f32) * s).astype(bf16),
        b_o1=jnp.zeros((1, d_model), f32),
        ln1_g=jnp.ones((1, d_model), f32),
        ln1_b=jnp.zeros((1, d_model), f32),
        # cross-attention (q and k share the same input -> fused qk projection)
        w_qk=w_qk.astype(bf16),
        b_qk=jnp.zeros((1, 2 * d_model), f32),
        w_v=(jax.random.normal(ks[3], (d_model, d_model), f32) * s).astype(bf16),
        b_v=jnp.zeros((1, d_model), f32),
        w_o2=(jax.random.normal(ks[4], (d_model, d_model), f32) * s).astype(bf16),
        b_o2=jnp.zeros((1, d_model), f32),
        ln2_g=jnp.ones((1, d_model), f32),
        ln2_b=jnp.zeros((1, d_model), f32),
        # feed forward
        w1=(jax.random.normal(ks[5], (d_model, d_ffn), f32) * s).astype(bf16),
        b1=jnp.zeros((1, d_ffn), f32),
        w2=(jax.random.normal(ks[6], (d_ffn, d_model), f32) * s).astype(bf16),
        b2=jnp.zeros((1, d_model), f32),
        ln3_g=jnp.ones((1, d_model), f32),
        ln3_b=jnp.zeros((1, d_model), f32),
    )


def _stack_layers(layer_dicts):
    return {k: jnp.stack([d[k] for d in layer_dicts], axis=0) for k in layer_dicts[0]}


def _positional_encoding(max_seq_len, d_model):
    even_i = jnp.arange(0, d_model, 2, dtype=jnp.float32)
    denominator = jnp.power(10000.0, even_i / d_model)
    position = jnp.arange(max_seq_len, dtype=jnp.float32).reshape(max_seq_len, 1)
    even_pe = jnp.sin(position / denominator)
    odd_pe = jnp.cos(position / denominator)
    return jnp.stack([even_pe, odd_pe], axis=2).reshape(max_seq_len, d_model)


def init_params(key, vocab_size, max_seq_len, d_model, num_layers, d_ffn, num_heads):
    keys = jax.random.split(key, 3 + 2 * num_layers)
    f32 = jnp.float32
    enc_layers = [_init_encoder_layer(keys[3 + i], d_model, d_ffn, num_heads)
                  for i in range(num_layers)]
    dec_layers = [_init_decoder_layer(keys[3 + num_layers + i], d_model, d_ffn, num_heads)
                  for i in range(num_layers)]
    return dict(
        enc_emb=jax.random.normal(keys[0], (vocab_size, d_model), f32),
        dec_emb=jax.random.normal(keys[1], (vocab_size, d_model), f32),
        pos_enc=_positional_encoding(max_seq_len, d_model),
        w_out=(jax.random.normal(keys[2], (d_model, vocab_size), f32) * 0.05
               ).astype(jnp.bfloat16),
        b_out=jnp.zeros((1, vocab_size), f32),
        enc_stack=_stack_layers(enc_layers),
        dec_stack=_stack_layers(dec_layers),
    )


# ---------------------------------------------------------------------------
# Full forward pass
# ---------------------------------------------------------------------------

def transformer_forward(params, input_ids, label_ids, attn_mask, *, num_heads):
    """input_ids/label_ids: (B, S) int32 with S == max_seq_len. Returns (B, S, V)."""
    assert attn_mask is None, "attn_mask (key_padding_mask) is not supported"

    B, S = input_ids.shape
    D = params['enc_emb'].shape[1]
    pos = params['pos_enc']                                     # (S, D)
    M = S * B
    row_tile = _pick_row_tile(M, B)

    # ---- Encoder ----
    x = jnp.take(params['enc_emb'], input_ids, axis=0) + pos[None, :, :]    # (B, S, D)
    # rows ordered (attn_batch=s, attn_seq=b): matches nn.MultiheadAttention with
    # batch_first=False being fed (B, S, D) tensors.
    x2 = jnp.transpose(x, (1, 0, 2)).reshape(M, D).astype(jnp.bfloat16)
    enc2 = encoder_stack(x2, params['enc_stack'], num_heads=num_heads,
                         attn_len=B, row_tile=row_tile)

    # ---- Decoder + final projection (only the last decoder layer matters:
    #      the reference feeds `label` into every layer and keeps only the last x)
    y = jnp.take(params['dec_emb'], label_ids, axis=0) + pos[None, :, :]
    y2 = jnp.transpose(y, (1, 0, 2)).reshape(M, D).astype(jnp.bfloat16)
    dec_last = {k: v[-1] for k, v in params['dec_stack'].items()}
    logits2 = decoder_and_project(y2, enc2, dec_last,
                                  params['w_out'], params['b_out'],
                                  num_heads=num_heads, attn_len=B,
                                  row_tile=row_tile)             # (S*B, V)

    V = params['w_out'].shape[1]
    return logits2.reshape(S, B, V).transpose(1, 0, 2)           # (B, S, V)


# ---------------------------------------------------------------------------
# Main
# ---------------------------------------------------------------------------

if __name__ == "__main__":
    B = 2                 # batch
    S = 8                 # seq length == max_seq_len
    D_MODEL = 128         # lane-dense (multiple of 128)
    NUM_HEADS = 4
    NUM_LAYERS = 2
    VOCAB = 128           # lane-dense output
    D_FFN = 4 * D_MODEL   # matches d_ffn == 0 default behaviour

    root = jax.random.PRNGKey(0)
    k_params, k_in, k_lbl = jax.random.split(root, 3)

    params = init_params(k_params, VOCAB, S, D_MODEL, NUM_LAYERS, D_FFN, NUM_HEADS)
    input_ids = jax.random.randint(k_in, (B, S), 0, VOCAB, dtype=jnp.int32)
    label_ids = jax.random.randint(k_lbl, (B, S), 0, VOCAB, dtype=jnp.int32)

    fwd = jax.jit(functools.partial(transformer_forward, num_heads=NUM_HEADS))
    logits = fwd(params, input_ids, label_ids, None)
    logits = jax.block_until_ready(logits)

    assert logits.shape == (B, S, VOCAB), logits.shape
    assert bool(jnp.all(jnp.isfinite(logits)))
    print("KERNEL_OK")
</pallas_src>

<mosaic_0001>
module attributes {stable_mosaic.version = 11 : i64} {
  func.func @_encoder_stack_kernel(%arg0: i32, %arg1: i32, %arg2: memref<16x128xbf16, #tpu.memory_space<vmem>>, %arg3: memref<1x128x384xbf16, #tpu.memory_space<vmem>>, %arg4: memref<1x1x384xf32, #tpu.memory_space<vmem>>, %arg5: memref<1x128x128xbf16, #tpu.memory_space<vmem>>, %arg6: memref<1x1x128xf32, #tpu.memory_space<vmem>>, %arg7: memref<1x1x128xf32, #tpu.memory_space<vmem>>, %arg8: memref<1x1x128xf32, #tpu.memory_space<vmem>>, %arg9: memref<1x128x512xbf16, #tpu.memory_space<vmem>>, %arg10: memref<1x1x512xf32, #tpu.memory_space<vmem>>, %arg11: memref<1x512x128xbf16, #tpu.memory_space<vmem>>, %arg12: memref<1x1x128xf32, #tpu.memory_space<vmem>>, %arg13: memref<1x1x128xf32, #tpu.memory_space<vmem>>, %arg14: memref<1x1x128xf32, #tpu.memory_space<vmem>>, %arg15: memref<16x128xbf16, #tpu.memory_space<vmem>>) attributes {dimension_semantics = [#tpu.dimension_semantics<parallel>, #tpu.dimension_semantics<arbitrary>], iteration_bounds = array<i64: 1, 2>, scalar_prefetch = 0 : i64, scratch_operands = 0 : i64, tpu.core_type = #tpu.core_type<tc>, window_params = [{transform_indices = @transform_0, window_bounds = array<i64: 16, 128>}, {transform_indices = @transform_1, window_bounds = array<i64: 1, 128, 384>}, {transform_indices = @transform_2, window_bounds = array<i64: 1, 1, 384>}, {transform_indices = @transform_3, window_bounds = array<i64: 1, 128, 128>}, {transform_indices = @transform_4, window_bounds = array<i64: 1, 1, 128>}, {transform_indices = @transform_5, window_bounds = array<i64: 1, 1, 128>}, {transform_indices = @transform_6, window_bounds = array<i64: 1, 1, 128>}, {transform_indices = @transform_7, window_bounds = array<i64: 1, 128, 512>}, {transform_indices = @transform_8, window_bounds = array<i64: 1, 1, 512>}, {transform_indices = @transform_9, window_bounds = array<i64: 1, 512, 128>}, {transform_indices = @transform_10, window_bounds = array<i64: 1, 1, 128>}, {transform_indices = @transform_11, window_bounds = array<i64: 1, 1, 128>}, {transform_indices = @transform_12, window_bounds = array<i64: 1, 1, 128>}, {transform_indices = @transform_13, window_bounds = array<i64: 16, 128>}]} {
    %c0_i32 = arith.constant 0 : i32
    %0 = arith.cmpi eq, %arg1, %c0_i32 : i32
    %1 = arith.extui %0 : i1 to i32
    %c0_i32_0 = arith.constant 0 : i32
    %2 = arith.cmpi ne, %1, %c0_i32_0 : i32
    scf.if %2 {
      %c0_60 = arith.constant 0 : index
      %c0_61 = arith.constant 0 : index
      %153 = vector.load %arg2[%c0_60, %c0_61] : memref<16x128xbf16, #tpu.memory_space<vmem>>, vector<16x128xbf16>
      %c0_62 = arith.constant 0 : index
      %c0_63 = arith.constant 0 : index
      %154 = vector.load %arg15[%c0_62, %c0_63] : memref<16x128xbf16, #tpu.memory_space<vmem>>, vector<16x128xbf16>
      tpu.vector_store %arg15[%c0_62, %c0_63], %153 {strides = array<i32>} : memref<16x128xbf16, #tpu.memory_space<vmem>>, vector<16x128xbf16>,
    } else {
    }
    %c0 = arith.constant 0 : index
    %c0_1 = arith.constant 0 : index
    %3 = vector.load %arg15[%c0, %c0_1] : memref<16x128xbf16, #tpu.memory_space<vmem>>, vector<16x128xbf16>
    %c0_2 = arith.constant 0 : index
    %c0_3 = arith.constant 0 : index
    %c0_4 = arith.constant 0 : index
    %4 = vector.load %arg3[%c0_2, %c0_3, %c0_4] : memref<1x128x384xbf16, #tpu.memory_space<vmem>>, vector<1x128x384xbf16>
    %5 = vector.shape_cast %4 : vector<1x128x384xbf16> to vector<128x384xbf16>
    %c0_5 = arith.constant 0 : index
    %c0_6 = arith.constant 0 : index
    %c0_7 = arith.constant 0 : index
    %6 = vector.load %arg4[%c0_5, %c0_6, %c0_7] : memref<1x1x384xf32, #tpu.memory_space<vmem>>, vector<1x1x384xf32>
    %7 = vector.shape_cast %6 : vector<1x1x384xf32> to vector<1x384xf32>
    %c0_8 = arith.constant 0 : index
    %c0_9 = arith.constant 0 : index
    %c0_10 = arith.constant 0 : index
    %8 = vector.load %arg5[%c0_8, %c0_9, %c0_10] : memref<1x128x128xbf16, #tpu.memory_space<vmem>>, vector<1x128x128xbf16>
    %9 = vector.shape_cast %8 : vector<1x128x128xbf16> to vector<128x128xbf16>
    %c0_11 = arith.constant 0 : index
    %c0_12 = arith.constant 0 : index
    %c0_13 = arith.constant 0 : index
    %10 = vector.load %arg6[%c0_11, %c0_12, %c0_13] : memref<1x1x128xf32, #tpu.memory_space<vmem>>, vector<1x1x128xf32>
    %11 = vector.shape_cast %10 : vector<1x1x128xf32> to vector<1x128xf32>
    %c0_14 = arith.constant 0 : index
    %c0_15 = arith.constant 0 : index
    %c0_16 = arith.constant 0 : index
    %12 = vector.load %arg7[%c0_14, %c0_15, %c0_16] : memref<1x1x128xf32, #tpu.memory_space<vmem>>, vector<1x1x128xf32>
    %13 = vector.shape_cast %12 : vector<1x1x128xf32> to vector<1x128xf32>
    %c0_17 = arith.constant 0 : index
    %c0_18 = arith.constant 0 : index
    %c0_19 = arith.constant 0 : index
    %14 = vector.load %arg8[%c0_17, %c0_18, %c0_19] : memref<1x1x128xf32, #tpu.memory_space<vmem>>, vector<1x1x128xf32>
    %15 = vector.shape_cast %14 : vector<1x1x128xf32> to vector<1x128xf32>
    %cst = arith.constant dense<0.000000e+00> : vector<16x384xf32>
    %16 = tpu.matmul %3, %5, %cst {dimension_numbers = #tpu.dot_dimension_numbers<[1], [0], [0], [1], [0, 0, 1, 1], [], []>} : vector<16x128xbf16>, vector<128x384xbf16>, vector<16x384xf32> -> vector<16x384xf32>
    %17 = vector.broadcast %7 : vector<1x384xf32> to vector<16x384xf32>
    %18 = arith.addf %16, %17 : vector<16x384xf32>
    %19 = vector.extract_strided_slice %18 {offsets = [0, 0], sizes = [16, 128], strides = [1, 1]} : vector<16x384xf32> to vector<16x128xf32>
    %20 = vector.extract_strided_slice %18 {offsets = [0, 128], sizes = [16, 128], strides = [1, 1]} : vector<16x384xf32> to vector<16x128xf32>
    %21 = vector.extract_strided_slice %18 {offsets = [0, 256], sizes = [16, 128], strides = [1, 1]} : vector<16x384xf32> to vector<16x128xf32>
    %22 = vector.extract_strided_slice %19 {offsets = [0, 0], sizes = [16, 32], strides = [1, 1]} : vector<16x128xf32> to vector<16x32xf32>
    %23 = vector.shape_cast %22 : vector<16x32xf32> to vector<8x2x32xf32>
    %24 = vector.extract_strided_slice %19 {offsets = [0, 32], sizes = [16, 32], strides = [1, 1]} : vector<16x128xf32> to vector<16x32xf32>
    %25 = vector.shape_cast %24 : vector<16x32xf32> to vector<8x2x32xf32>
    %26 = vector.extract_strided_slice %19 {offsets = [0, 64], sizes = [16, 32], strides = [1, 1]} : vector<16x128xf32> to vector<16x32xf32>
    %27 = vector.shape_cast %26 : vector<16x32xf32> to vector<8x2x32xf32>
    %28 = vector.extract_strided_slice %19 {offsets = [0, 96], sizes = [16, 32], strides = [1, 1]} : vector<16x128xf32> to vector<16x32xf32>
    %29 = vector.shape_cast %28 : vector<16x32xf32> to vector<8x2x32xf32>
    %30 = tpu.concatenate %23, %25, %27, %29 in 0 : vector<8x2x32xf32>, vector<8x2x32xf32>, vector<8x2x32xf32>, vector<8x2x32xf32> -> vector<32x2x32xf32>
    %31 = arith.truncf %30 : vector<32x2x32xf32> to vector<32x2x32xbf16>
    %32 = vector.extract_strided_slice %20 {offsets = [0, 0], sizes = [16, 32], strides = [1, 1]} : vector<16x128xf32> to vector<16x32xf32>
    %33 = vector.shape_cast %32 : vector<16x32xf32> to vector<8x2x32xf32>
    %34 = vector.extract_strided_slice %20 {offsets = [0, 32], sizes = [16, 32], strides = [1, 1]} : vector<16x128xf32> to vector<16x32xf32>
    %35 = vector.shape_cast %34 : vector<16x32xf32> to vector<8x2x32xf32>
    %36 = vector.extract_strided_slice %20 {offsets = [0, 64], sizes = [16, 32], strides = [1, 1]} : vector<16x128xf32> to vector<16x32xf32>
    %37 = vector.shape_cast %36 : vector<16x32xf32> to vector<8x2x32xf32>
    %38 = vector.extract_strided_slice %20 {offsets = [0, 96], sizes = [16, 32], strides = [1, 1]} : vector<16x128xf32> to vector<16x32xf32>
    %39 = vector.shape_cast %38 : vector<16x32xf32> to vector<8x2x32xf32>
    %40 = tpu.concatenate %33, %35, %37, %39 in 0 : vector<8x2x32xf32>, vector<8x2x32xf32>, vector<8x2x32xf32>, vector<8x2x32xf32> -> vector<32x2x32xf32>
    %41 = arith.truncf %40 : vector<32x2x32xf32> to vector<32x2x32xbf16>
    %42 = vector.extract_strided_slice %21 {offsets = [0, 0], sizes = [16, 32], strides = [1, 1]} : vector<16x128xf32> to vector<16x32xf32>
    %43 = vector.shape_cast %42 : vector<16x32xf32> to vector<8x2x32xf32>
    %44 = vector.extract_strided_slice %21 {offsets = [0, 32], sizes = [16, 32], strides = [1, 1]} : vector<16x128xf32> to vector<16x32xf32>
    %45 = vector.shape_cast %44 : vector<16x32xf32> to vector<8x2x32xf32>
    %46 = vector.extract_strided_slice %21 {offsets = [0, 64], sizes = [16, 32], strides = [1, 1]} : vector<16x128xf32> to vector<16x32xf32>
    %47 = vector.shape_cast %46 : vector<16x32xf32> to vector<8x2x32xf32>
    %48 = vector.extract_strided_slice %21 {offsets = [0, 96], sizes = [16, 32], strides = [1, 1]} : vector<16x128xf32> to vector<16x32xf32>
    %49 = vector.shape_cast %48 : vector<16x32xf32> to vector<8x2x32xf32>
    %50 = tpu.concatenate %43, %45, %47, %49 in 0 : vector<8x2x32xf32>, vector<8x2x32xf32>, vector<8x2x32xf32>, vector<8x2x32xf32> -> vector<32x2x32xf32>
    %51 = arith.truncf %50 : vector<32x2x32xf32> to vector<32x2x32xbf16>
    "tpu.trace_start"() <{level = 10 : i32, message = "bqd,bkd->bqk"}> : () -> ()
    %cst_20 = arith.constant dense<0.000000e+00> : vector<32x2x2xf32>
    %52 = tpu.matmul %31, %41, %cst_20 {dimension_numbers = #tpu.dot_dimension_numbers<[2], [2], [1], [1], [0, 0, 0, 1, 1, 1], [0], [0]>} : vector<32x2x32xbf16>, vector<32x2x32xbf16>, vector<32x2x2xf32> -> vector<32x2x2xf32>
    "tpu.trace_stop"() : () -> ()
    %cst_21 = arith.constant dense<0xFF800000> : vector<32x2xf32>
    %53 = vector.multi_reduction <maximumf>, %52, %cst_21 [2] : vector<32x2x2xf32> to vector<32x2xf32>
    %54 = vector.shape_cast %53 : vector<32x2xf32> to vector<32x2x1xf32>
    %55 = vector.broadcast %54 : vector<32x2x1xf32> to vector<32x2x2xf32>
    %56 = arith.subf %52, %55 : vector<32x2x2xf32>
    %57 = math.exp %56 : vector<32x2x2xf32>
    %cst_22 = arith.constant dense<0.000000e+00> : vector<32x2xf32>
    %58 = vector.multi_reduction <add>, %57, %cst_22 [2] : vector<32x2x2xf32> to vector<32x2xf32>
    %59 = vector.shape_cast %58 : vector<32x2xf32> to vector<32x2x1xf32>
    %60 = tpu.reciprocal %59 {approx = true} : vector<32x2x1xf32> -> vector<32x2x1xf32>
    %61 = vector.broadcast %60 : vector<32x2x1xf32> to vector<32x2x2xf32>
    %62 = arith.mulf %57, %61 : vector<32x2x2xf32>
    %63 = arith.truncf %62 : vector<32x2x2xf32> to vector<32x2x2xbf16>
    "tpu.trace_start"() <{level = 10 : i32, message = "bqk,bkd->bqd"}> : () -> ()
    %cst_23 = arith.constant dense<0.000000e+00> : vector<32x2x32xf32>
    %64 = tpu.matmul %63, %51, %cst_23 {dimension_numbers = #tpu.dot_dimension_numbers<[2], [1], [1], [2], [0, 0, 0, 1, 1, 2], [0], [0]>} : vector<32x2x2xbf16>, vector<32x2x32xbf16>, vector<32x2x32xf32> -> vector<32x2x32xf32>
    "tpu.trace_stop"() : () -> ()
    %65 = vector.extract_strided_slice %64 {offsets = [0, 0, 0], sizes = [8, 2, 32], strides = [1, 1, 1]} : vector<32x2x32xf32> to vector<8x2x32xf32>
    %66 = vector.extract_strided_slice %64 {offsets = [8, 0, 0], sizes = [8, 2, 32], strides = [1, 1, 1]} : vector<32x2x32xf32> to vector<8x2x32xf32>
    %67 = vector.extract_strided_slice %64 {offsets = [16, 0, 0], sizes = [8, 2, 32], strides = [1, 1, 1]} : vector<32x2x32xf32> to vector<8x2x32xf32>
    %68 = vector.extract_strided_slice %64 {offsets = [24, 0, 0], sizes = [8, 2, 32], strides = [1, 1, 1]} : vector<32x2x32xf32> to vector<8x2x32xf32>
    %69 = tpu.concatenate %65, %66, %67, %68 in 2 : vector<8x2x32xf32>, vector<8x2x32xf32>, vector<8x2x32xf32>, vector<8x2x32xf32> -> vector<8x2x128xf32>
    %70 = vector.shape_cast %69 : vector<8x2x128xf32> to vector<16x128xf32>
    %71 = arith.truncf %70 : vector<16x128xf32> to vector<16x128xbf16>
    %cst_24 = arith.constant dense<0.000000e+00> : vector<16x128xf32>
    %72 = tpu.matmul %71, %9, %cst_24 {dimension_numbers = #tpu.dot_dimension_numbers<[1], [0], [0], [1], [0, 0, 1, 1], [], []>} : vector<16x128xbf16>, vector<128x128xbf16>, vector<16x128xf32> -> vector<16x128xf32>
    %73 = vector.broadcast %11 : vector<1x128xf32> to vector<16x128xf32>
    %74 = arith.addf %72, %73 : vector<16x128xf32>
    %75 = arith.extf %3 : vector<16x128xbf16> to vector<16x128xf32>
    %76 = arith.addf %75, %74 : vector<16x128xf32>
    %cst_25 = arith.constant dense<0.000000e+00> : vector<16xf32>
    %77 = vector.multi_reduction <add>, %76, %cst_25 [1] : vector<16x128xf32> to vector<16xf32>
    %78 = vector.shape_cast %77 : vector<16xf32> to vector<16x1xf32>
    %cst_26 = arith.constant 1.280000e+02 : f32
    %79 = vector.broadcast %cst_26 : f32 to vector<16x1xf32>
    %80 = arith.divf %78, %79 : vector<16x1xf32>
    %81 = vector.broadcast %80 : vector<16x1xf32> to vector<16x128xf32>
    %82 = arith.subf %76, %81 : vector<16x128xf32>
    %83 = arith.mulf %82, %82 : vector<16x128xf32>
    %cst_27 = arith.constant dense<0.000000e+00> : vector<16xf32>
    %84 = vector.multi_reduction <add>, %83, %cst_27 [1] : vector<16x128xf32> to vector<16xf32>
    %85 = vector.shape_cast %84 : vector<16xf32> to vector<16x1xf32>
    %cst_28 = arith.constant 1.280000e+02 : f32
    %86 = vector.broadcast %cst_28 : f32 to vector<16x1xf32>
    %87 = arith.divf %85, %86 : vector<16x1xf32>
    %88 = vector.broadcast %80 : vector<16x1xf32> to vector<16x128xf32>
    %89 = arith.subf %76, %88 : vector<16x128xf32>
    %cst_29 = arith.constant 9.99999974E-6 : f32
    %90 = vector.broadcast %cst_29 : f32 to vector<16x1xf32>
    %91 = arith.addf %87, %90 : vector<16x1xf32>
    %92 = math.rsqrt %91 : vector<16x1xf32>
    %93 = vector.broadcast %92 : vector<16x1xf32> to vector<16x128xf32>
    %94 = arith.mulf %89, %93 : vector<16x128xf32>
    %95 = vector.broadcast %13 : vector<1x128xf32> to vector<16x128xf32>
    %96 = arith.mulf %94, %95 : vector<16x128xf32>
    %97 = vector.broadcast %15 : vector<1x128xf32> to vector<16x128xf32>
    %98 = arith.addf %96, %97 : vector<16x128xf32>
    %99 = arith.truncf %98 : vector<16x128xf32> to vector<16x128xbf16>
    %c0_30 = arith.constant 0 : index
    %c0_31 = arith.constant 0 : index
    %c0_32 = arith.constant 0 : index
    %100 = vector.load %arg9[%c0_30, %c0_31, %c0_32] : memref<1x128x512xbf16, #tpu.memory_space<vmem>>, vector<1x128x512xbf16>
    %101 = vector.shape_cast %100 : vector<1x128x512xbf16> to vector<128x512xbf16>
    %c0_33 = arith.constant 0 : index
    %c0_34 = arith.constant 0 : index
    %c0_35 = arith.constant 0 : index
    %102 = vector.load %arg10[%c0_33, %c0_34, %c0_35] : memref<1x1x512xf32, #tpu.memory_space<vmem>>, vector<1x1x512xf32>
    %103 = vector.shape_cast %102 : vector<1x1x512xf32> to vector<1x512xf32>
    %c0_36 = arith.constant 0 : index
    %c0_37 = arith.constant 0 : index
    %c0_38 = arith.constant 0 : index
    %104 = vector.load %arg11[%c0_36, %c0_37, %c0_38] : memref<1x512x128xbf16, #tpu.memory_space<vmem>>, vector<1x512x128xbf16>
    %105 = vector.shape_cast %104 : vector<1x512x128xbf16> to vector<512x128xbf16>
    %c0_39 = arith.constant 0 : index
    %c0_40 = arith.constant 0 : index
    %c0_41 = arith.constant 0 : index
    %106 = vector.load %arg12[%c0_39, %c0_40, %c0_41] : memref<1x1x128xf32, #tpu.memory_space<vmem>>, vector<1x1x128xf32>
    %107 = vector.shape_cast %106 : vector<1x1x128xf32> to vector<1x128xf32>
    %c0_42 = arith.constant 0 : index
    %c0_43 = arith.constant 0 : index
    %c0_44 = arith.constant 0 : index
    %108 = vector.load %arg13[%c0_42, %c0_43, %c0_44] : memref<1x1x128xf32, #tpu.memory_space<vmem>>, vector<1x1x128xf32>
    %109 = vector.shape_cast %108 : vector<1x1x128xf32> to vector<1x128xf32>
    %c0_45 = arith.constant 0 : index
    %c0_46 = arith.constant 0 : index
    %c0_47 = arith.constant 0 : index
    %110 = vector.load %arg14[%c0_45, %c0_46, %c0_47] : memref<1x1x128xf32, #tpu.memory_space<vmem>>, vector<1x1x128xf32>
    %111 = vector.shape_cast %110 : vector<1x1x128xf32> to vector<1x128xf32>
    %cst_48 = arith.constant dense<0.000000e+00> : vector<16x512xf32>
    %112 = tpu.matmul %99, %101, %cst_48 {dimension_numbers = #tpu.dot_dimension_numbers<[1], [0], [0], [1], [0, 0, 1, 1], [], []>} : vector<16x128xbf16>, vector<128x512xbf16>, vector<16x512xf32> -> vector<16x512xf32>
    %113 = vector.broadcast %103 : vector<1x512xf32> to vector<16x512xf32>
    %114 = arith.addf %112, %113 : vector<16x512xf32>
    %cst_49 = arith.constant 5.000000e-01 : f32
    %115 = vector.broadcast %cst_49 : f32 to vector<16x512xf32>
    %116 = arith.mulf %115, %114 : vector<16x512xf32>
    %cst_50 = arith.constant 0.707106769 : f32
    %117 = vector.broadcast %cst_50 : f32 to vector<16x512xf32>
    %118 = arith.mulf %114, %117 : vector<16x512xf32>
    %119 = math.erf %118 : vector<16x512xf32>
    %cst_51 = arith.constant 1.000000e+00 : f32
    %120 = vector.broadcast %cst_51 : f32 to vector<16x512xf32>
    %121 = arith.addf %120, %119 : vector<16x512xf32>
    %122 = arith.mulf %116, %121 : vector<16x512xf32>
    %123 = arith.truncf %122 : vector<16x512xf32> to vector<16x512xbf16>
    %cst_52 = arith.constant dense<0.000000e+00> : vector<16x128xf32>
    %124 = tpu.matmul %123, %105, %cst_52 {dimension_numbers = #tpu.dot_dimension_numbers<[1], [0], [0], [1], [0, 0, 1, 1], [], []>} : vector<16x512xbf16>, vector<512x128xbf16>, vector<16x128xf32> -> vector<16x128xf32>
    %125 = vector.broadcast %107 : vector<1x128xf32> to vector<16x128xf32>
    %126 = arith.addf %124, %125 : vector<16x128xf32>
    %127 = arith.extf %99 : vector<16x128xbf16> to vector<16x128xf32>
    %128 = arith.addf %127, %126 : vector<16x128xf32>
    %cst_53 = arith.constant dense<0.000000e+00> : vector<16xf32>
    %129 = vector.multi_reduction <add>, %128, %cst_53 [1] : vector<16x128xf32> to vector<16xf32>
    %130 = vector.shape_cast %129 : vector<16xf32> to vector<16x1xf32>
    %cst_54 = arith.constant 1.280000e+02 : f32
    %131 = vector.broadcast %cst_54 : f32 to vector<16x1xf32>
    %132 = arith.divf %130, %131 : vector<16x1xf32>
    %133 = vector.broadcast %132 : vector<16x1xf32> to vector<16x128xf32>
    %134 = arith.subf %128, %133 : vector<16x128xf32>
    %135 = arith.mulf %134, %134 : vector<16x128xf32>
    %cst_55 = arith.constant dense<0.000000e+00> : vector<16xf32>
    %136 = vector.multi_reduction <add>, %135, %cst_55 [1] : vector<16x128xf32> to vector<16xf32>
    %137 = vector.shape_cast %136 : vector<16xf32> to vector<16x1xf32>
    %cst_56 = arith.constant 1.280000e+02 : f32
    %138 = vector.broadcast %cst_56 : f32 to vector<16x1xf32>
    %139 = arith.divf %137, %138 : vector<16x1xf32>
    %140 = vector.broadcast %132 : vector<16x1xf32> to vector<16x128xf32>
    %141 = arith.subf %128, %140 : vector<16x128xf32>
    %cst_57 = arith.constant 9.99999974E-6 : f32
    %142 = vector.broadcast %cst_57 : f32 to vector<16x1xf32>
    %143 = arith.addf %139, %142 : vector<16x1xf32>
    %144 = math.rsqrt %143 : vector<16x1xf32>
    %145 = vector.broadcast %144 : vector<16x1xf32> to vector<16x128xf32>
    %146 = arith.mulf %141, %145 : vector<16x128xf32>
    %147 = vector.broadcast %109 : vector<1x128xf32> to vector<16x128xf32>
    %148 = arith.mulf %146, %147 : vector<16x128xf32>
    %149 = vector.broadcast %111 : vector<1x128xf32> to vector<16x128xf32>
    %150 = arith.addf %148, %149 : vector<16x128xf32>
    %151 = arith.truncf %150 : vector<16x128xf32> to vector<16x128xbf16>
    %c0_58 = arith.constant 0 : index
    %c0_59 = arith.constant 0 : index
    %152 = vector.load %arg15[%c0_58, %c0_59] : memref<16x128xbf16, #tpu.memory_space<vmem>>, vector<16x128xbf16>
    tpu.vector_store %arg15[%c0_58, %c0_59], %151 {strides = array<i32>} : memref<16x128xbf16, #tpu.memory_space<vmem>>, vector<16x128xbf16>,
    return
  }
  func.func @transform_0(%arg0: i32, %arg1: i32) -> (i32, i32) {
    %c0_i32 = arith.constant 0 : i32
    %c0_i32_0 = arith.constant 0 : i32
    return %arg0, %c0_i32 : i32, i32
  }
  func.func @transform_1(%arg0: i32, %arg1: i32) -> (i32, i32, i32) {
    %c0_i32 = arith.constant 0 : i32
    %c0_i32_0 = arith.constant 0 : i32
    %c0_i32_1 = arith.constant 0 : i32
    return %arg1, %c0_i32, %c0_i32_0 : i32, i32, i32
  }
  func.func @transform_2(%arg0: i32, %arg1: i32) -> (i32, i32, i32) {
    %c0_i32 = arith.constant 0 : i32
    %c0_i32_0 = arith.constant 0 : i32
    %c0_i32_1 = arith.constant 0 : i32
    return %arg1, %c0_i32, %c0_i32_0 : i32, i32, i32
  }
  func.func @transform_3(%arg0: i32, %arg1: i32) -> (i32, i32, i32) {
    %c0_i32 = arith.constant 0 : i32
    %c0_i32_0 = arith.constant 0 : i32
    %c0_i32_1 = arith.constant 0 : i32
    return %arg1, %c0_i32, %c0_i32_0 : i32, i32, i32
  }
  func.func @transform_4(%arg0: i32, %arg1: i32) -> (i32, i32, i32) {
    %c0_i32 = arith.constant 0 : i32
    %c0_i32_0 = arith.constant 0 : i32
    %c0_i32_1 = arith.constant 0 : i32
    return %arg1, %c0_i32, %c0_i32_0 : i32, i32, i32
  }
  func.func @transform_5(%arg0: i32, %arg1: i32) -> (i32, i32, i32) {
    %c0_i32 = arith.constant 0 : i32
    %c0_i32_0 = arith.constant 0 : i32
    %c0_i32_1 = arith.constant 0 : i32
    return %arg1, %c0_i32, %c0_i32_0 : i32, i32, i32
  }
  func.func @transform_6(%arg0: i32, %arg1: i32) -> (i32, i32, i32) {
    %c0_i32 = arith.constant 0 : i32
    %c0_i32_0 = arith.constant 0 : i32
    %c0_i32_1 = arith.constant 0 : i32
    return %arg1, %c0_i32, %c0_i32_0 : i32, i32, i32
  }
  func.func @transform_7(%arg0: i32, %arg1: i32) -> (i32, i32, i32) {
    %c0_i32 = arith.constant 0 : i32
    %c0_i32_0 = arith.constant 0 : i32
    %c0_i32_1 = arith.constant 0 : i32
    return %arg1, %c0_i32, %c0_i32_0 : i32, i32, i32
  }
  func.func @transform_8(%arg0: i32, %arg1: i32) -> (i32, i32, i32) {
    %c0_i32 = arith.constant 0 : i32
    %c0_i32_0 = arith.constant 0 : i32
    %c0_i32_1 = arith.constant 0 : i32
    return %arg1, %c0_i32, %c0_i32_0 : i32, i32, i32
  }
  func.func @transform_9(%arg0: i32, %arg1: i32) -> (i32, i32, i32) {
    %c0_i32 = arith.constant 0 : i32
    %c0_i32_0 = arith.constant 0 : i32
    %c0_i32_1 = arith.constant 0 : i32
    return %arg1, %c0_i32, %c0_i32_0 : i32, i32, i32
  }
  func.func @transform_10(%arg0: i32, %arg1: i32) -> (i32, i32, i32) {
    %c0_i32 = arith.constant 0 : i32
    %c0_i32_0 = arith.constant 0 : i32
    %c0_i32_1 = arith.constant 0 : i32
    return %arg1, %c0_i32, %c0_i32_0 : i32, i32, i32
  }
  func.func @transform_11(%arg0: i32, %arg1: i32) -> (i32, i32, i32) {
    %c0_i32 = arith.constant 0 : i32
    %c0_i32_0 = arith.constant 0 : i32
    %c0_i32_1 = arith.constant 0 : i32
    return %arg1, %c0_i32, %c0_i32_0 : i32, i32, i32
  }
  func.func @transform_12(%arg0: i32, %arg1: i32) -> (i32, i32, i32) {
    %c0_i32 = arith.constant 0 : i32
    %c0_i32_0 = arith.constant 0 : i32
    %c0_i32_1 = arith.constant 0 : i32
    return %arg1, %c0_i32, %c0_i32_0 : i32, i32, i32
  }
  func.func @transform_13(%arg0: i32, %arg1: i32) -> (i32, i32) {
    %c0_i32 = arith.constant 0 : i32
    %c0_i32_0 = arith.constant 0 : i32
    return %arg0, %c0_i32 : i32, i32
  }
}

module attributes {stable_mosaic.version = 11 : i64} {
  func.func @_decoder_last_kernel(%arg0: i32, %arg1: memref<16x128xbf16, #tpu.memory_space<vmem>>, %arg2: memref<16x128xbf16, #tpu.memory_space<vmem>>, %arg3: memref<128x384xbf16, #tpu.memory_space<vmem>>, %arg4: memref<1x384xf32, #tpu.memory_space<vmem>>, %arg5: memref<128x128xbf16, #tpu.memory_space<vmem>>, %arg6: memref<1x128xf32, #tpu.memory_space<vmem>>, %arg7: memref<1x128xf32, #tpu.memory_space<vmem>>, %arg8: memref<1x128xf32, #tpu.memory_space<vmem>>, %arg9: memref<128x256xbf16, #tpu.memory_space<vmem>>, %arg10: memref<1x256xf32, #tpu.memory_space<vmem>>, %arg11: memref<128x128xbf16, #tpu.memory_space<vmem>>, %arg12: memref<1x128xf32, #tpu.memory_space<vmem>>, %arg13: memref<128x128xbf16, #tpu.memory_space<vmem>>, %arg14: memref<1x128xf32, #tpu.memory_space<vmem>>, %arg15: memref<1x128xf32, #tpu.memory_space<vmem>>, %arg16: memref<1x128xf32, #tpu.memory_space<vmem>>, %arg17: memref<128x512xbf16, #tpu.memory_space<vmem>>, %arg18: memref<1x512xf32, #tpu.memory_space<vmem>>, %arg19: memref<512x128xbf16, #tpu.memory_space<vmem>>, %arg20: memref<1x128xf32, #tpu.memory_space<vmem>>, %arg21: memref<1x128xf32, #tpu.memory_space<vmem>>, %arg22: memref<1x128xf32, #tpu.memory_space<vmem>>, %arg23: memref<128x128xbf16, #tpu.memory_space<vmem>>, %arg24: memref<1x128xf32, #tpu.memory_space<vmem>>, %arg25: memref<16x128xf32, #tpu.memory_space<vmem>>) attributes {dimension_semantics = [#tpu.dimension_semantics<parallel>], iteration_bounds = array<i64: 1>, scalar_prefetch = 0 : i64, scratch_operands = 0 : i64, tpu.core_type = #tpu.core_type<tc>, window_params = [{transform_indices = @transform_0, window_bounds = array<i64: 16, 128>}, {transform_indices = @transform_1, window_bounds = array<i64: 16, 128>}, {pipeline_mode = #tpu.pipeline_mode<synchronous>, transform_indices = @transform_2, window_bounds = array<i64: 128, 384>}, {pipeline_mode = #tpu.pipeline_mode<synchronous>, transform_indices = @transform_3, window_bounds = array<i64: 1, 384>}, {pipeline_mode = #tpu.pipeline_mode<synchronous>, transform_indices = @transform_4, window_bounds = array<i64: 128, 128>}, {pipeline_mode = #tpu.pipeline_mode<synchronous>, transform_indices = @transform_5, window_bounds = array<i64: 1, 128>}, {pipeline_mode = #tpu.pipeline_mode<synchronous>, transform_indices = @transform_6, window_bounds = array<i64: 1, 128>}, {pipeline_mode = #tpu.pipeline_mode<synchronous>, transform_indices = @transform_7, window_bounds = array<i64: 1, 128>}, {pipeline_mode = #tpu.pipeline_mode<synchronous>, transform_indices = @transform_8, window_bounds = array<i64: 128, 256>}, {pipeline_mode = #tpu.pipeline_mode<synchronous>, transform_indices = @transform_9, window_bounds = array<i64: 1, 256>}, {pipeline_mode = #tpu.pipeline_mode<synchronous>, transform_indices = @transform_10, window_bounds = array<i64: 128, 128>}, {pipeline_mode = #tpu.pipeline_mode<synchronous>, transform_indices = @transform_11, window_bounds = array<i64: 1, 128>}, {pipeline_mode = #tpu.pipeline_mode<synchronous>, transform_indices = @transform_12, window_bounds = array<i64: 128, 128>}, {pipeline_mode = #tpu.pipeline_mode<synchronous>, transform_indices = @transform_13, window_bounds = array<i64: 1, 128>}, {pipeline_mode = #tpu.pipeline_mode<synchronous>, transform_indices = @transform_14, window_bounds = array<i64: 1, 128>}, {pipeline_mode = #tpu.pipeline_mode<synchronous>, transform_indices = @transform_15, window_bounds = array<i64: 1, 128>}, {pipeline_mode = #tpu.pipeline_mode<synchronous>, transform_indices = @transform_16, window_bounds = array<i64: 128, 512>}, {pipeline_mode = #tpu.pipeline_mode<synchronous>, transform_indices = @transform_17, window_bounds = array<i64: 1, 512>}, {pipeline_mode = #tpu.pipeline_mode<synchronous>, transform_indices = @transform_18, window_bounds = array<i64: 512, 128>}, {pipeline_mode = #tpu.pipeline_mode<synchronous>, transform_indices = @transform_19, window_bounds = array<i64: 1, 128>}, {pipeline_mode = #tpu.pipeline_mode<synchronous>, transform_indices = @transform_20, window_bounds = array<i64: 1, 128>}, {pipeline_mode = #tpu.pipeline_mode<synchronous>, transform_indices = @transform_21, window_bounds = array<i64: 1, 128>}, {pipeline_mode = #tpu.pipeline_mode<synchronous>, transform_indices = @transform_22, window_bounds = array<i64: 128, 128>}, {pipeline_mode = #tpu.pipeline_mode<synchronous>, transform_indices = @transform_23, window_bounds = array<i64: 1, 128>}, {transform_indices = @transform_24, window_bounds = array<i64: 16, 128>}]} {
    %c0 = arith.constant 0 : index
    %c0_0 = arith.constant 0 : index
    %0 = vector.load %arg1[%c0, %c0_0] : memref<16x128xbf16, #tpu.memory_space<vmem>>, vector<16x128xbf16>
    %c0_1 = arith.constant 0 : index
    %c0_2 = arith.constant 0 : index
    %1 = vector.load %arg2[%c0_1, %c0_2] : memref<16x128xbf16, #tpu.memory_space<vmem>>, vector<16x128xbf16>
    %c0_3 = arith.constant 0 : index
    %c0_4 = arith.constant 0 : index
    %2 = vector.load %arg3[%c0_3, %c0_4] : memref<128x384xbf16, #tpu.memory_space<vmem>>, vector<128x384xbf16>
    %c0_5 = arith.constant 0 : index
    %c0_6 = arith.constant 0 : index
    %3 = vector.load %arg4[%c0_5, %c0_6] : memref<1x384xf32, #tpu.memory_space<vmem>>, vector<1x384xf32>
    %c0_7 = arith.constant 0 : index
    %c0_8 = arith.constant 0 : index
    %4 = vector.load %arg5[%c0_7, %c0_8] : memref<128x128xbf16, #tpu.memory_space<vmem>>, vector<128x128xbf16>
    %c0_9 = arith.constant 0 : index
    %c0_10 = arith.constant 0 : index
    %5 = vector.load %arg6[%c0_9, %c0_10] : memref<1x128xf32, #tpu.memory_space<vmem>>, vector<1x128xf32>
    %c0_11 = arith.constant 0 : index
    %c0_12 = arith.constant 0 : index
    %6 = vector.load %arg7[%c0_11, %c0_12] : memref<1x128xf32, #tpu.memory_space<vmem>>, vector<1x128xf32>
    %c0_13 = arith.constant 0 : index
    %c0_14 = arith.constant 0 : index
    %7 = vector.load %arg8[%c0_13, %c0_14] : memref<1x128xf32, #tpu.memory_space<vmem>>, vector<1x128xf32>
    %cst = arith.constant dense<0.000000e+00> : vector<16x384xf32>
    %8 = tpu.matmul %0, %2, %cst {dimension_numbers = #tpu.dot_dimension_numbers<[1], [0], [0], [1], [0, 0, 1, 1], [], []>} : vector<16x128xbf16>, vector<128x384xbf16>, vector<16x384xf32> -> vector<16x384xf32>
    %9 = vector.broadcast %3 : vector<1x384xf32> to vector<16x384xf32>
    %10 = arith.addf %8, %9 : vector<16x384xf32>
    %11 = vector.extract_strided_slice %10 {offsets = [0, 0], sizes = [16, 128], strides = [1, 1]} : vector<16x384xf32> to vector<16x128xf32>
    %12 = vector.extract_strided_slice %10 {offsets = [0, 128], sizes = [16, 128], strides = [1, 1]} : vector<16x384xf32> to vector<16x128xf32>
    %13 = vector.extract_strided_slice %10 {offsets = [0, 256], sizes = [16, 128], strides = [1, 1]} : vector<16x384xf32> to vector<16x128xf32>
    %14 = vector.extract_strided_slice %11 {offsets = [0, 0], sizes = [16, 32], strides = [1, 1]} : vector<16x128xf32> to vector<16x32xf32>
    %15 = vector.shape_cast %14 : vector<16x32xf32> to vector<8x2x32xf32>
    %16 = vector.extract_strided_slice %11 {offsets = [0, 32], sizes = [16, 32], strides = [1, 1]} : vector<16x128xf32> to vector<16x32xf32>
    %17 = vector.shape_cast %16 : vector<16x32xf32> to vector<8x2x32xf32>
    %18 = vector.extract_strided_slice %11 {offsets = [0, 64], sizes = [16, 32], strides = [1, 1]} : vector<16x128xf32> to vector<16x32xf32>
    %19 = vector.shape_cast %18 : vector<16x32xf32> to vector<8x2x32xf32>
    %20 = vector.extract_strided_slice %11 {offsets = [0, 96], sizes = [16, 32], strides = [1, 1]} : vector<16x128xf32> to vector<16x32xf32>
    %21 = vector.shape_cast %20 : vector<16x32xf32> to vector<8x2x32xf32>
    %22 = tpu.concatenate %15, %17, %19, %21 in 0 : vector<8x2x32xf32>, vector<8x2x32xf32>, vector<8x2x32xf32>, vector<8x2x32xf32> -> vector<32x2x32xf32>
    %23 = arith.truncf %22 : vector<32x2x32xf32> to vector<32x2x32xbf16>
    %24 = vector.extract_strided_slice %12 {offsets = [0, 0], sizes = [16, 32], strides = [1, 1]} : vector<16x128xf32> to vector<16x32xf32>
    %25 = vector.shape_cast %24 : vector<16x32xf32> to vector<8x2x32xf32>
    %26 = vector.extract_strided_slice %12 {offsets = [0, 32], sizes = [16, 32], strides = [1, 1]} : vector<16x128xf32> to vector<16x32xf32>
    %27 = vector.shape_cast %26 : vector<16x32xf32> to vector<8x2x32xf32>
    %28 = vector.extract_strided_slice %12 {offsets = [0, 64], sizes = [16, 32], strides = [1, 1]} : vector<16x128xf32> to vector<16x32xf32>
    %29 = vector.shape_cast %28 : vector<16x32xf32> to vector<8x2x32xf32>
    %30 = vector.extract_strided_slice %12 {offsets = [0, 96], sizes = [16, 32], strides = [1, 1]} : vector<16x128xf32> to vector<16x32xf32>
    %31 = vector.shape_cast %30 : vector<16x32xf32> to vector<8x2x32xf32>
    %32 = tpu.concatenate %25, %27, %29, %31 in 0 : vector<8x2x32xf32>, vector<8x2x32xf32>, vector<8x2x32xf32>, vector<8x2x32xf32> -> vector<32x2x32xf32>
    %33 = arith.truncf %32 : vector<32x2x32xf32> to vector<32x2x32xbf16>
    %34 = vector.extract_strided_slice %13 {offsets = [0, 0], sizes = [16, 32], strides = [1, 1]} : vector<16x128xf32> to vector<16x32xf32>
    %35 = vector.shape_cast %34 : vector<16x32xf32> to vector<8x2x32xf32>
    %36 = vector.extract_strided_slice %13 {offsets = [0, 32], sizes = [16, 32], strides = [1, 1]} : vector<16x128xf32> to vector<16x32xf32>
    %37 = vector.shape_cast %36 : vector<16x32xf32> to vector<8x2x32xf32>
    %38 = vector.extract_strided_slice %13 {offsets = [0, 64], sizes = [16, 32], strides = [1, 1]} : vector<16x128xf32> to vector<16x32xf32>
    %39 = vector.shape_cast %38 : vector<16x32xf32> to vector<8x2x32xf32>
    %40 = vector.extract_strided_slice %13 {offsets = [0, 96], sizes = [16, 32], strides = [1, 1]} : vector<16x128xf32> to vector<16x32xf32>
    %41 = vector.shape_cast %40 : vector<16x32xf32> to vector<8x2x32xf32>
    %42 = tpu.concatenate %35, %37, %39, %41 in 0 : vector<8x2x32xf32>, vector<8x2x32xf32>, vector<8x2x32xf32>, vector<8x2x32xf32> -> vector<32x2x32xf32>
    %43 = arith.truncf %42 : vector<32x2x32xf32> to vector<32x2x32xbf16>
    "tpu.trace_start"() <{level = 10 : i32, message = "bqd,bkd->bqk"}> : () -> ()
    %cst_15 = arith.constant dense<0.000000e+00> : vector<32x2x2xf32>
    %44 = tpu.matmul %23, %33, %cst_15 {dimension_numbers = #tpu.dot_dimension_numbers<[2], [2], [1], [1], [0, 0, 0, 1, 1, 1], [0], [0]>} : vector<32x2x32xbf16>, vector<32x2x32xbf16>, vector<32x2x2xf32> -> vector<32x2x2xf32>
    "tpu.trace_stop"() : () -> ()
    %cst_16 = arith.constant dense<0xFF800000> : vector<32x2xf32>
    %45 = vector.multi_reduction <maximumf>, %44, %cst_16 [2] : vector<32x2x2xf32> to vector<32x2xf32>
    %46 = vector.shape_cast %45 : vector<32x2xf32> to vector<32x2x1xf32>
    %47 = vector.broadcast %46 : vector<32x2x1xf32> to vector<32x2x2xf32>
    %48 = arith.subf %44, %47 : vector<32x2x2xf32>
    %49 = math.exp %48 : vector<32x2x2xf32>
    %cst_17 = arith.constant dense<0.000000e+00> : vector<32x2xf32>
    %50 = vector.multi_reduction <add>, %49, %cst_17 [2] : vector<32x2x2xf32> to vector<32x2xf32>
    %51 = vector.shape_cast %50 : vector<32x2xf32> to vector<32x2x1xf32>
    %52 = tpu.reciprocal %51 {approx = true} : vector<32x2x1xf32> -> vector<32x2x1xf32>
    %53 = vector.broadcast %52 : vector<32x2x1xf32> to vector<32x2x2xf32>
    %54 = arith.mulf %49, %53 : vector<32x2x2xf32>
    %55 = arith.truncf %54 : vector<32x2x2xf32> to vector<32x2x2xbf16>
    "tpu.trace_start"() <{level = 10 : i32, message = "bqk,bkd->bqd"}> : () -> ()
    %cst_18 = arith.constant dense<0.000000e+00> : vector<32x2x32xf32>
    %56 = tpu.matmul %55, %43, %cst_18 {dimension_numbers = #tpu.dot_dimension_numbers<[2], [1], [1], [2], [0, 0, 0, 1, 1, 2], [0], [0]>} : vector<32x2x2xbf16>, vector<32x2x32xbf16>, vector<32x2x32xf32> -> vector<32x2x32xf32>
    "tpu.trace_stop"() : () -> ()
    %57 = vector.extract_strided_slice %56 {offsets = [0, 0, 0], sizes = [8, 2, 32], strides = [1, 1, 1]} : vector<32x2x32xf32> to vector<8x2x32xf32>
    %58 = vector.extract_strided_slice %56 {offsets = [8, 0, 0], sizes = [8, 2, 32], strides = [1, 1, 1]} : vector<32x2x32xf32> to vector<8x2x32xf32>
    %59 = vector.extract_strided_slice %56 {offsets = [16, 0, 0], sizes = [8, 2, 32], strides = [1, 1, 1]} : vector<32x2x32xf32> to vector<8x2x32xf32>
    %60 = vector.extract_strided_slice %56 {offsets = [24, 0, 0], sizes = [8, 2, 32], strides = [1, 1, 1]} : vector<32x2x32xf32> to vector<8x2x32xf32>
    %61 = tpu.concatenate %57, %58, %59, %60 in 2 : vector<8x2x32xf32>, vector<8x2x32xf32>, vector<8x2x32xf32>, vector<8x2x32xf32> -> vector<8x2x128xf32>
    %62 = vector.shape_cast %61 : vector<8x2x128xf32> to vector<16x128xf32>
    %63 = arith.truncf %62 : vector<16x128xf32> to vector<16x128xbf16>
    %cst_19 = arith.constant dense<0.000000e+00> : vector<16x128xf32>
    %64 = tpu.matmul %63, %4, %cst_19 {dimension_numbers = #tpu.dot_dimension_numbers<[1], [0], [0], [1], [0, 0, 1, 1], [], []>} : vector<16x128xbf16>, vector<128x128xbf16>, vector<16x128xf32> -> vector<16x128xf32>
    %65 = vector.broadcast %5 : vector<1x128xf32> to vector<16x128xf32>
    %66 = arith.addf %64, %65 : vector<16x128xf32>
    %67 = arith.extf %0 : vector<16x128xbf16> to vector<16x128xf32>
    %68 = arith.addf %67, %66 : vector<16x128xf32>
    %cst_20 = arith.constant dense<0.000000e+00> : vector<16xf32>
    %69 = vector.multi_reduction <add>, %68, %cst_20 [1] : vector<16x128xf32> to vector<16xf32>
    %70 = vector.shape_cast %69 : vector<16xf32> to vector<16x1xf32>
    %cst_21 = arith.constant 1.280000e+02 : f32
    %71 = vector.broadcast %cst_21 : f32 to vector<16x1xf32>
    %72 = arith.divf %70, %71 : vector<16x1xf32>
    %73 = vector.broadcast %72 : vector<16x1xf32> to vector<16x128xf32>
    %74 = arith.subf %68, %73 : vector<16x128xf32>
    %75 = arith.mulf %74, %74 : vector<16x128xf32>
    %cst_22 = arith.constant dense<0.000000e+00> : vector<16xf32>
    %76 = vector.multi_reduction <add>, %75, %cst_22 [1] : vector<16x128xf32> to vector<16xf32>
    %77 = vector.shape_cast %76 : vector<16xf32> to vector<16x1xf32>
    %cst_23 = arith.constant 1.280000e+02 : f32
    %78 = vector.broadcast %cst_23 : f32 to vector<16x1xf32>
    %79 = arith.divf %77, %78 : vector<16x1xf32>
    %80 = vector.broadcast %72 : vector<16x1xf32> to vector<16x128xf32>
    %81 = arith.subf %68, %80 : vector<16x128xf32>
    %cst_24 = arith.constant 9.99999974E-6 : f32
    %82 = vector.broadcast %cst_24 : f32 to vector<16x1xf32>
    %83 = arith.addf %79, %82 : vector<16x1xf32>
    %84 = math.rsqrt %83 : vector<16x1xf32>
    %85 = vector.broadcast %84 : vector<16x1xf32> to vector<16x128xf32>
    %86 = arith.mulf %81, %85 : vector<16x128xf32>
    %87 = vector.broadcast %6 : vector<1x128xf32> to vector<16x128xf32>
    %88 = arith.mulf %86, %87 : vector<16x128xf32>
    %89 = vector.broadcast %7 : vector<1x128xf32> to vector<16x128xf32>
    %90 = arith.addf %88, %89 : vector<16x128xf32>
    %91 = arith.truncf %90 : vector<16x128xf32> to vector<16x128xbf16>
    %c0_25 = arith.constant 0 : index
    %c0_26 = arith.constant 0 : index
    %92 = vector.load %arg9[%c0_25, %c0_26] : memref<128x256xbf16, #tpu.memory_space<vmem>>, vector<128x256xbf16>
    %c0_27 = arith.constant 0 : index
    %c0_28 = arith.constant 0 : index
    %93 = vector.load %arg10[%c0_27, %c0_28] : memref<1x256xf32, #tpu.memory_space<vmem>>, vector<1x256xf32>
    %c0_29 = arith.constant 0 : index
    %c0_30 = arith.constant 0 : index
    %94 = vector.load %arg11[%c0_29, %c0_30] : memref<128x128xbf16, #tpu.memory_space<vmem>>, vector<128x128xbf16>
    %c0_31 = arith.constant 0 : index
    %c0_32 = arith.constant 0 : index
    %95 = vector.load %arg12[%c0_31, %c0_32] : memref<1x128xf32, #tpu.memory_space<vmem>>, vector<1x128xf32>
    %c0_33 = arith.constant 0 : index
    %c0_34 = arith.constant 0 : index
    %96 = vector.load %arg13[%c0_33, %c0_34] : memref<128x128xbf16, #tpu.memory_space<vmem>>, vector<128x128xbf16>
    %c0_35 = arith.constant 0 : index
    %c0_36 = arith.constant 0 : index
    %97 = vector.load %arg14[%c0_35, %c0_36] : memref<1x128xf32, #tpu.memory_space<vmem>>, vector<1x128xf32>
    %c0_37 = arith.constant 0 : index
    %c0_38 = arith.constant 0 : index
    %98 = vector.load %arg15[%c0_37, %c0_38] : memref<1x128xf32, #tpu.memory_space<vmem>>, vector<1x128xf32>
    %c0_39 = arith.constant 0 : index
    %c0_40 = arith.constant 0 : index
    %99 = vector.load %arg16[%c0_39, %c0_40] : memref<1x128xf32, #tpu.memory_space<vmem>>, vector<1x128xf32>
    %cst_41 = arith.constant dense<0.000000e+00> : vector<16x256xf32>
    %100 = tpu.matmul %1, %92, %cst_41 {dimension_numbers = #tpu.dot_dimension_numbers<[1], [0], [0], [1], [0, 0, 1, 1], [], []>} : vector<16x128xbf16>, vector<128x256xbf16>, vector<16x256xf32> -> vector<16x256xf32>
    %101 = vector.broadcast %93 : vector<1x256xf32> to vector<16x256xf32>
    %102 = arith.addf %100, %101 : vector<16x256xf32>
    %cst_42 = arith.constant dense<0.000000e+00> : vector<16x128xf32>
    %103 = tpu.matmul %91, %94, %cst_42 {dimension_numbers = #tpu.dot_dimension_numbers<[1], [0], [0], [1], [0, 0, 1, 1], [], []>} : vector<16x128xbf16>, vector<128x128xbf16>, vector<16x128xf32> -> vector<16x128xf32>
    %104 = vector.broadcast %95 : vector<1x128xf32> to vector<16x128xf32>
    %105 = arith.addf %103, %104 : vector<16x128xf32>
    %106 = vector.extract_strided_slice %102 {offsets = [0, 0], sizes = [16, 128], strides = [1, 1]} : vector<16x256xf32> to vector<16x128xf32>
    %107 = vector.extract_strided_slice %102 {offsets = [0, 128], sizes = [16, 128], strides = [1, 1]} : vector<16x256xf32> to vector<16x128xf32>
    %108 = vector.extract_strided_slice %106 {offsets = [0, 0], sizes = [16, 32], strides = [1, 1]} : vector<16x128xf32> to vector<16x32xf32>
    %109 = vector.shape_cast %108 : vector<16x32xf32> to vector<8x2x32xf32>
    %110 = vector.extract_strided_slice %106 {offsets = [0, 32], sizes = [16, 32], strides = [1, 1]} : vector<16x128xf32> to vector<16x32xf32>
    %111 = vector.shape_cast %110 : vector<16x32xf32> to vector<8x2x32xf32>
    %112 = vector.extract_strided_slice %106 {offsets = [0, 64], sizes = [16, 32], strides = [1, 1]} : vector<16x128xf32> to vector<16x32xf32>
    %113 = vector.shape_cast %112 : vector<16x32xf32> to vector<8x2x32xf32>
    %114 = vector.extract_strided_slice %106 {offsets = [0, 96], sizes = [16, 32], strides = [1, 1]} : vector<16x128xf32> to vector<16x32xf32>
    %115 = vector.shape_cast %114 : vector<16x32xf32> to vector<8x2x32xf32>
    %116 = tpu.concatenate %109, %111, %113, %115 in 0 : vector<8x2x32xf32>, vector<8x2x32xf32>, vector<8x2x32xf32>, vector<8x2x32xf32> -> vector<32x2x32xf32>
    %117 = arith.truncf %116 : vector<32x2x32xf32> to vector<32x2x32xbf16>
    %118 = vector.extract_strided_slice %107 {offsets = [0, 0], sizes = [16, 32], strides = [1, 1]} : vector<16x128xf32> to vector<16x32xf32>
    %119 = vector.shape_cast %118 : vector<16x32xf32> to vector<8x2x32xf32>
    %120 = vector.extract_strided_slice %107 {offsets = [0, 32], sizes = [16, 32], strides = [1, 1]} : vector<16x128xf32> to vector<16x32xf32>
    %121 = vector.shape_cast %120 : vector<16x32xf32> to vector<8x2x32xf32>
    %122 = vector.extract_strided_slice %107 {offsets = [0, 64], sizes = [16, 32], strides = [1, 1]} : vector<16x128xf32> to vector<16x32xf32>
    %123 = vector.shape_cast %122 : vector<16x32xf32> to vector<8x2x32xf32>
    %124 = vector.extract_strided_slice %107 {offsets = [0, 96], sizes = [16, 32], strides = [1, 1]} : vector<16x128xf32> to vector<16x32xf32>
    %125 = vector.shape_cast %124 : vector<16x32xf32> to vector<8x2x32xf32>
    %126 = tpu.concatenate %119, %121, %123, %125 in 0 : vector<8x2x32xf32>, vector<8x2x32xf32>, vector<8x2x32xf32>, vector<8x2x32xf32> -> vector<32x2x32xf32>
    %127 = arith.truncf %126 : vector<32x2x32xf32> to vector<32x2x32xbf16>
    %128 = vector.extract_strided_slice %105 {offsets = [0, 0], sizes = [16, 32], strides = [1, 1]} : vector<16x128xf32> to vector<16x32xf32>
    %129 = vector.shape_cast %128 : vector<16x32xf32> to vector<8x2x32xf32>
    %130 = vector.extract_strided_slice %105 {offsets = [0, 32], sizes = [16, 32], strides = [1, 1]} : vector<16x128xf32> to vector<16x32xf32>
    %131 = vector.shape_cast %130 : vector<16x32xf32> to vector<8x2x32xf32>
    %132 = vector.extract_strided_slice %105 {offsets = [0, 64], sizes = [16, 32], strides = [1, 1]} : vector<16x128xf32> to vector<16x32xf32>
    %133 = vector.shape_cast %132 : vector<16x32xf32> to vector<8x2x32xf32>
    %134 = vector.extract_strided_slice %105 {offsets = [0, 96], sizes = [16, 32], strides = [1, 1]} : vector<16x128xf32> to vector<16x32xf32>
    %135 = vector.shape_cast %134 : vector<16x32xf32> to vector<8x2x32xf32>
    %136 = tpu.concatenate %129, %131, %133, %135 in 0 : vector<8x2x32xf32>, vector<8x2x32xf32>, vector<8x2x32xf32>, vector<8x2x32xf32> -> vector<32x2x32xf32>
    %137 = arith.truncf %136 : vector<32x2x32xf32> to vector<32x2x32xbf16>
    "tpu.trace_start"() <{level = 10 : i32, message = "bqd,bkd->bqk"}> : () -> ()
    %cst_43 = arith.constant dense<0.000000e+00> : vector<32x2x2xf32>
    %138 = tpu.matmul %117, %127, %cst_43 {dimension_numbers = #tpu.dot_dimension_numbers<[2], [2], [1], [1], [0, 0, 0, 1, 1, 1], [0], [0]>} : vector<32x2x32xbf16>, vector<32x2x32xbf16>, vector<32x2x2xf32> -> vector<32x2x2xf32>
    "tpu.trace_stop"() : () -> ()
    %cst_44 = arith.constant dense<0xFF800000> : vector<32x2xf32>
    %139 = vector.multi_reduction <maximumf>, %138, %cst_44 [2] : vector<32x2x2xf32> to vector<32x2xf32>
    %140 = vector.shape_cast %139 : vector<32x2xf32> to vector<32x2x1xf32>
    %141 = vector.broadcast %140 : vector<32x2x1xf32> to vector<32x2x2xf32>
    %142 = arith.subf %138, %141 : vector<32x2x2xf32>
    %143 = math.exp %142 : vector<32x2x2xf32>
    %cst_45 = arith.constant dense<0.000000e+00> : vector<32x2xf32>
    %144 = vector.multi_reduction <add>, %143, %cst_45 [2] : vector<32x2x2xf32> to vector<32x2xf32>
    %145 = vector.shape_cast %144 : vector<32x2xf32> to vector<32x2x1xf32>
    %146 = tpu.reciprocal %145 {approx = true} : vector<32x2x1xf32> -> vector<32x2x1xf32>
    %147 = vector.broadcast %146 : vector<32x2x1xf32> to vector<32x2x2xf32>
    %148 = arith.mulf %143, %147 : vector<32x2x2xf32>
    %149 = arith.truncf %148 : vector<32x2x2xf32> to vector<32x2x2xbf16>
    "tpu.trace_start"() <{level = 10 : i32, message = "bqk,bkd->bqd"}> : () -> ()
    %cst_46 = arith.constant dense<0.000000e+00> : vector<32x2x32xf32>
    %150 = tpu.matmul %149, %137, %cst_46 {dimension_numbers = #tpu.dot_dimension_numbers<[2], [1], [1], [2], [0, 0, 0, 1, 1, 2], [0], [0]>} : vector<32x2x2xbf16>, vector<32x2x32xbf16>, vector<32x2x32xf32> -> vector<32x2x32xf32>
    "tpu.trace_stop"() : () -> ()
    %151 = vector.extract_strided_slice %150 {offsets = [0, 0, 0], sizes = [8, 2, 32], strides = [1, 1, 1]} : vector<32x2x32xf32> to vector<8x2x32xf32>
    %152 = vector.extract_strided_slice %150 {offsets = [8, 0, 0], sizes = [8, 2, 32], strides = [1, 1, 1]} : vector<32x2x32xf32> to vector<8x2x32xf32>
    %153 = vector.extract_strided_slice %150 {offsets = [16, 0, 0], sizes = [8, 2, 32], strides = [1, 1, 1]} : vector<32x2x32xf32> to vector<8x2x32xf32>
    %154 = vector.extract_strided_slice %150 {offsets = [24, 0, 0], sizes = [8, 2, 32], strides = [1, 1, 1]} : vector<32x2x32xf32> to vector<8x2x32xf32>
    %155 = tpu.concatenate %151, %152, %153, %154 in 2 : vector<8x2x32xf32>, vector<8x2x32xf32>, vector<8x2x32xf32>, vector<8x2x32xf32> -> vector<8x2x128xf32>
    %156 = vector.shape_cast %155 : vector<8x2x128xf32> to vector<16x128xf32>
    %157 = arith.truncf %156 : vector<16x128xf32> to vector<16x128xbf16>
    %cst_47 = arith.constant dense<0.000000e+00> : vector<16x128xf32>
    %158 = tpu.matmul %157, %96, %cst_47 {dimension_numbers = #tpu.dot_dimension_numbers<[1], [0], [0], [1], [0, 0, 1, 1], [], []>} : vector<16x128xbf16>, vector<128x128xbf16>, vector<16x128xf32> -> vector<16x128xf32>
    %159 = vector.broadcast %97 : vector<1x128xf32> to vector<16x128xf32>
    %160 = arith.addf %158, %159 : vector<16x128xf32>
    %161 = arith.extf %1 : vector<16x128xbf16> to vector<16x128xf32>
    %162 = arith.addf %161, %160 : vector<16x128xf32>
    %cst_48 = arith.constant dense<0.000000e+00> : vector<16xf32>
    %163 = vector.multi_reduction <add>, %162, %cst_48 [1] : vector<16x128xf32> to vector<16xf32>
    %164 = vector.shape_cast %163 : vector<16xf32> to vector<16x1xf32>
    %cst_49 = arith.constant 1.280000e+02 : f32
    %165 = vector.broadcast %cst_49 : f32 to vector<16x1xf32>
    %166 = arith.divf %164, %165 : vector<16x1xf32>
    %167 = vector.broadcast %166 : vector<16x1xf32> to vector<16x128xf32>
    %168 = arith.subf %162, %167 : vector<16x128xf32>
    %169 = arith.mulf %168, %168 : vector<16x128xf32>
    %cst_50 = arith.constant dense<0.000000e+00> : vector<16xf32>
    %170 = vector.multi_reduction <add>, %169, %cst_50 [1] : vector<16x128xf32> to vector<16xf32>
    %171 = vector.shape_cast %170 : vector<16xf32> to vector<16x1xf32>
    %cst_51 = arith.constant 1.280000e+02 : f32
    %172 = vector.broadcast %cst_51 : f32 to vector<16x1xf32>
    %173 = arith.divf %171, %172 : vector<16x1xf32>
    %174 = vector.broadcast %166 : vector<16x1xf32> to vector<16x128xf32>
    %175 = arith.subf %162, %174 : vector<16x128xf32>
    %cst_52 = arith.constant 9.99999974E-6 : f32
    %176 = vector.broadcast %cst_52 : f32 to vector<16x1xf32>
    %177 = arith.addf %173, %176 : vector<16x1xf32>
    %178 = math.rsqrt %177 : vector<16x1xf32>
    %179 = vector.broadcast %178 : vector<16x1xf32> to vector<16x128xf32>
    %180 = arith.mulf %175, %179 : vector<16x128xf32>
    %181 = vector.broadcast %98 : vector<1x128xf32> to vector<16x128xf32>
    %182 = arith.mulf %180, %181 : vector<16x128xf32>
    %183 = vector.broadcast %99 : vector<1x128xf32> to vector<16x128xf32>
    %184 = arith.addf %182, %183 : vector<16x128xf32>
    %185 = arith.truncf %184 : vector<16x128xf32> to vector<16x128xbf16>
    %c0_53 = arith.constant 0 : index
    %c0_54 = arith.constant 0 : index
    %186 = vector.load %arg17[%c0_53, %c0_54] : memref<128x512xbf16, #tpu.memory_space<vmem>>, vector<128x512xbf16>
    %c0_55 = arith.constant 0 : index
    %c0_56 = arith.constant 0 : index
    %187 = vector.load %arg18[%c0_55, %c0_56] : memref<1x512xf32, #tpu.memory_space<vmem>>, vector<1x512xf32>
    %c0_57 = arith.constant 0 : index
    %c0_58 = arith.constant 0 : index
    %188 = vector.load %arg19[%c0_57, %c0_58] : memref<512x128xbf16, #tpu.memory_space<vmem>>, vector<512x128xbf16>
    %c0_59 = arith.constant 0 : index
    %c0_60 = arith.constant 0 : index
    %189 = vector.load %arg20[%c0_59, %c0_60] : memref<1x128xf32, #tpu.memory_space<vmem>>, vector<1x128xf32>
    %c0_61 = arith.constant 0 : index
    %c0_62 = arith.constant 0 : index
    %190 = vector.load %arg21[%c0_61, %c0_62] : memref<1x128xf32, #tpu.memory_space<vmem>>, vector<1x128xf32>
    %c0_63 = arith.constant 0 : index
    %c0_64 = arith.constant 0 : index
    %191 = vector.load %arg22[%c0_63, %c0_64] : memref<1x128xf32, #tpu.memory_space<vmem>>, vector<1x128xf32>
    %cst_65 = arith.constant dense<0.000000e+00> : vector<16x512xf32>
    %192 = tpu.matmul %185, %186, %cst_65 {dimension_numbers = #tpu.dot_dimension_numbers<[1], [0], [0], [1], [0, 0, 1, 1], [], []>} : vector<16x128xbf16>, vector<128x512xbf16>, vector<16x512xf32> -> vector<16x512xf32>
    %193 = vector.broadcast %187 : vector<1x512xf32> to vector<16x512xf32>
    %194 = arith.addf %192, %193 : vector<16x512xf32>
    %cst_66 = arith.constant 5.000000e-01 : f32
    %195 = vector.broadcast %cst_66 : f32 to vector<16x512xf32>
    %196 = arith.mulf %195, %194 : vector<16x512xf32>
    %cst_67 = arith.constant 0.707106769 : f32
    %197 = vector.broadcast %cst_67 : f32 to vector<16x512xf32>
    %198 = arith.mulf %194, %197 : vector<16x512xf32>
    %199 = math.erf %198 : vector<16x512xf32>
    %cst_68 = arith.constant 1.000000e+00 : f32
    %200 = vector.broadcast %cst_68 : f32 to vector<16x512xf32>
    %201 = arith.addf %200, %199 : vector<16x512xf32>
    %202 = arith.mulf %196, %201 : vector<16x512xf32>
    %203 = arith.truncf %202 : vector<16x512xf32> to vector<16x512xbf16>
    %cst_69 = arith.constant dense<0.000000e+00> : vector<16x128xf32>
    %204 = tpu.matmul %203, %188, %cst_69 {dimension_numbers = #tpu.dot_dimension_numbers<[1], [0], [0], [1], [0, 0, 1, 1], [], []>} : vector<16x512xbf16>, vector<512x128xbf16>, vector<16x128xf32> -> vector<16x128xf32>
    %205 = vector.broadcast %189 : vector<1x128xf32> to vector<16x128xf32>
    %206 = arith.addf %204, %205 : vector<16x128xf32>
    %207 = arith.extf %185 : vector<16x128xbf16> to vector<16x128xf32>
    %208 = arith.addf %207, %206 : vector<16x128xf32>
    %cst_70 = arith.constant dense<0.000000e+00> : vector<16xf32>
    %209 = vector.multi_reduction <add>, %208, %cst_70 [1] : vector<16x128xf32> to vector<16xf32>
    %210 = vector.shape_cast %209 : vector<16xf32> to vector<16x1xf32>
    %cst_71 = arith.constant 1.280000e+02 : f32
    %211 = vector.broadcast %cst_71 : f32 to vector<16x1xf32>
    %212 = arith.divf %210, %211 : vector<16x1xf32>
    %213 = vector.broadcast %212 : vector<16x1xf32> to vector<16x128xf32>
    %214 = arith.subf %208, %213 : vector<16x128xf32>
    %215 = arith.mulf %214, %214 : vector<16x128xf32>
    %cst_72 = arith.constant dense<0.000000e+00> : vector<16xf32>
    %216 = vector.multi_reduction <add>, %215, %cst_72 [1] : vector<16x128xf32> to vector<16xf32>
    %217 = vector.shape_cast %216 : vector<16xf32> to vector<16x1xf32>
    %cst_73 = arith.constant 1.280000e+02 : f32
    %218 = vector.broadcast %cst_73 : f32 to vector<16x1xf32>
    %219 = arith.divf %217, %218 : vector<16x1xf32>
    %220 = vector.broadcast %212 : vector<16x1xf32> to vector<16x128xf32>
    %221 = arith.subf %208, %220 : vector<16x128xf32>
    %cst_74 = arith.constant 9.99999974E-6 : f32
    %222 = vector.broadcast %cst_74 : f32 to vector<16x1xf32>
    %223 = arith.addf %219, %222 : vector<16x1xf32>
    %224 = math.rsqrt %223 : vector<16x1xf32>
    %225 = vector.broadcast %224 : vector<16x1xf32> to vector<16x128xf32>
    %226 = arith.mulf %221, %225 : vector<16x128xf32>
    %227 = vector.broadcast %190 : vector<1x128xf32> to vector<16x128xf32>
    %228 = arith.mulf %226, %227 : vector<16x128xf32>
    %229 = vector.broadcast %191 : vector<1x128xf32> to vector<16x128xf32>
    %230 = arith.addf %228, %229 : vector<16x128xf32>
    %231 = arith.truncf %230 : vector<16x128xf32> to vector<16x128xbf16>
    %c0_75 = arith.constant 0 : index
    %c0_76 = arith.constant 0 : index
    %232 = vector.load %arg23[%c0_75, %c0_76] : memref<128x128xbf16, #tpu.memory_space<vmem>>, vector<128x128xbf16>
    %cst_77 = arith.constant dense<0.000000e+00> : vector<16x128xf32>
    %233 = tpu.matmul %231, %232, %cst_77 {dimension_numbers = #tpu.dot_dimension_numbers<[1], [0], [0], [1], [0, 0, 1, 1], [], []>} : vector<16x128xbf16>, vector<128x128xbf16>, vector<16x128xf32> -> vector<16x128xf32>
    %c0_78 = arith.constant 0 : index
    %c0_79 = arith.constant 0 : index
    %234 = vector.load %arg24[%c0_78, %c0_79] : memref<1x128xf32, #tpu.memory_space<vmem>>, vector<1x128xf32>
    %235 = vector.broadcast %234 : vector<1x128xf32> to vector<16x128xf32>
    %236 = arith.addf %233, %235 : vector<16x128xf32>
    %c0_80 = arith.constant 0 : index
    %c0_81 = arith.constant 0 : index
    %237 = vector.load %arg25[%c0_80, %c0_81] : memref<16x128xf32, #tpu.memory_space<vmem>>, vector<16x128xf32>
    tpu.vector_store %arg25[%c0_80, %c0_81], %236 {strides = array<i32>} : memref<16x128xf32, #tpu.memory_space<vmem>>, vector<16x128xf32>,
    return
  }
  func.func @transform_0(%arg0: i32) -> (i32, i32) {
    %c0_i32 = arith.constant 0 : i32
    %c0_i32_0 = arith.constant 0 : i32
    return %arg0, %c0_i32 : i32, i32
  }
  func.func @transform_1(%arg0: i32) -> (i32, i32) {
    %c0_i32 = arith.constant 0 : i32
    %c0_i32_0 = arith.constant 0 : i32
    return %arg0, %c0_i32 : i32, i32
  }
  func.func @transform_2(%arg0: i32) -> (i32, i32) {
    %c0_i32 = arith.constant 0 : i32
    %c0_i32_0 = arith.constant 0 : i32
    %c0_i32_1 = arith.constant 0 : i32
    return %c0_i32, %c0_i32_0 : i32, i32
  }
  func.func @transform_3(%arg0: i32) -> (i32, i32) {
    %c0_i32 = arith.constant 0 : i32
    %c0_i32_0 = arith.constant 0 : i32
    %c0_i32_1 = arith.constant 0 : i32
    return %c0_i32, %c0_i32_0 : i32, i32
  }
  func.func @transform_4(%arg0: i32) -> (i32, i32) {
    %c0_i32 = arith.constant 0 : i32
    %c0_i32_0 = arith.constant 0 : i32
    %c0_i32_1 = arith.constant 0 : i32
    return %c0_i32, %c0_i32_0 : i32, i32
  }
  func.func @transform_5(%arg0: i32) -> (i32, i32) {
    %c0_i32 = arith.constant 0 : i32
    %c0_i32_0 = arith.constant 0 : i32
    %c0_i32_1 = arith.constant 0 : i32
    return %c0_i32, %c0_i32_0 : i32, i32
  }
  func.func @transform_6(%arg0: i32) -> (i32, i32) {
    %c0_i32 = arith.constant 0 : i32
    %c0_i32_0 = arith.constant 0 : i32
    %c0_i32_1 = arith.constant 0 : i32
    return %c0_i32, %c0_i32_0 : i32, i32
  }
  func.func @transform_7(%arg0: i32) -> (i32, i32) {
    %c0_i32 = arith.constant 0 : i32
    %c0_i32_0 = arith.constant 0 : i32
    %c0_i32_1 = arith.constant 0 : i32
    return %c0_i32, %c0_i32_0 : i32, i32
  }
  func.func @transform_8(%arg0: i32) -> (i32, i32) {
    %c0_i32 = arith.constant 0 : i32
    %c0_i32_0 = arith.constant 0 : i32
    %c0_i32_1 = arith.constant 0 : i32
    return %c0_i32, %c0_i32_0 : i32, i32
  }
  func.func @transform_9(%arg0: i32) -> (i32, i32) {
    %c0_i32 = arith.constant 0 : i32
    %c0_i32_0 = arith.constant 0 : i32
    %c0_i32_1 = arith.constant 0 : i32
    return %c0_i32, %c0_i32_0 : i32, i32
  }
  func.func @transform_10(%arg0: i32) -> (i32, i32) {
    %c0_i32 = arith.constant 0 : i32
    %c0_i32_0 = arith.constant 0 : i32
    %c0_i32_1 = arith.constant 0 : i32
    return %c0_i32, %c0_i32_0 : i32, i32
  }
  func.func @transform_11(%arg0: i32) -> (i32, i32) {
    %c0_i32 = arith.constant 0 : i32
    %c0_i32_0 = arith.constant 0 : i32
    %c0_i32_1 = arith.constant 0 : i32
    return %c0_i32, %c0_i32_0 : i32, i32
  }
  func.func @transform_12(%arg0: i32) -> (i32, i32) {
    %c0_i32 = arith.constant 0 : i32
    %c0_i32_0 = arith.constant 0 : i32
    %c0_i32_1 = arith.constant 0 : i32
    return %c0_i32, %c0_i32_0 : i32, i32
  }
  func.func @transform_13(%arg0: i32) -> (i32, i32) {
    %c0_i32 = arith.constant 0 : i32
    %c0_i32_0 = arith.constant 0 : i32
    %c0_i32_1 = arith.constant 0 : i32
    return %c0_i32, %c0_i32_0 : i32, i32
  }
  func.func @transform_14(%arg0: i32) -> (i32, i32) {
    %c0_i32 = arith.constant 0 : i32
    %c0_i32_0 = arith.constant 0 : i32
    %c0_i32_1 = arith.constant 0 : i32
    return %c0_i32, %c0_i32_0 : i32, i32
  }
  func.func @transform_15(%arg0: i32) -> (i32, i32) {
    %c0_i32 = arith.constant 0 : i32
    %c0_i32_0 = arith.constant 0 : i32
    %c0_i32_1 = arith.constant 0 : i32
    return %c0_i32, %c0_i32_0 : i32, i32
  }
  func.func @transform_16(%arg0: i32) -> (i32, i32) {
    %c0_i32 = arith.constant 0 : i32
    %c0_i32_0 = arith.constant 0 : i32
    %c0_i32_1 = arith.constant 0 : i32
    return %c0_i32, %c0_i32_0 : i32, i32
  }
  func.func @transform_17(%arg0: i32) -> (i32, i32) {
    %c0_i32 = arith.constant 0 : i32
    %c0_i32_0 = arith.constant 0 : i32
    %c0_i32_1 = arith.constant 0 : i32
    return %c0_i32, %c0_i32_0 : i32, i32
  }
  func.func @transform_18(%arg0: i32) -> (i32, i32) {
    %c0_i32 = arith.constant 0 : i32
    %c0_i32_0 = arith.constant 0 : i32
    %c0_i32_1 = arith.constant 0 : i32
    return %c0_i32, %c0_i32_0 : i32, i32
  }
  func.func @transform_19(%arg0: i32) -> (i32, i32) {
    %c0_i32 = arith.constant 0 : i32
    %c0_i32_0 = arith.constant 0 : i32
    %c0_i32_1 = arith.constant 0 : i32
    return %c0_i32, %c0_i32_0 : i32, i32
  }
  func.func @transform_20(%arg0: i32) -> (i32, i32) {
    %c0_i32 = arith.constant 0 : i32
    %c0_i32_0 = arith.constant 0 : i32
    %c0_i32_1 = arith.constant 0 : i32
    return %c0_i32, %c0_i32_0 : i32, i32
  }
  func.func @transform_21(%arg0: i32) -> (i32, i32) {
    %c0_i32 = arith.constant 0 : i32
    %c0_i32_0 = arith.constant 0 : i32
    %c0_i32_1 = arith.constant 0 : i32
    return %c0_i32, %c0_i32_0 : i32, i32
  }
  func.func @transform_22(%arg0: i32) -> (i32, i32) {
    %c0_i32 = arith.constant 0 : i32
    %c0_i32_0 = arith.constant 0 : i32
    %c0_i32_1 = arith.constant 0 : i32
    return %c0_i32, %c0_i32_0 : i32, i32
  }
  func.func @transform_23(%arg0: i32) -> (i32, i32) {
    %c0_i32 = arith.constant 0 : i32
    %c0_i32_0 = arith.constant 0 : i32
    %c0_i32_1 = arith.constant 0 : i32
    return %c0_i32, %c0_i32_0 : i32, i32
  }
  func.func @transform_24(%arg0: i32) -> (i32, i32) {
    %c0_i32 = arith.constant 0 : i32
    %c0_i32_0 = arith.constant 0 : i32
    return %arg0, %c0_i32 : i32, i32
  }
}

</mosaic_0001>

<bundles_post_ra>
// kernel: transformer_forward.2
= control target key start
LH: loop header
LB: loop body
LE: loop exit
PB: predicated region body
PF: predicated region fallthrough
CT: control target
= control target key end

     0   :  { %s9524_s0 = inlined_call_operand.vmem [shape: bf16[16,128], index: 0, kind: input, shape index: {}]   ;;  %s9525_s1 = inlined_call_operand.hbm [shape: bf16[2,128,384], index: 1, kind: input, shape index: {}]   ;;  %s9526_s2 = inlined_call_operand.hbm [shape: f32[2,1,384], index: 2, kind: input, shape index: {}]   ;;  %s9527_s3 = inlined_call_operand.hbm [shape: bf16[2,128,128], index: 3, kind: input, shape index: {}]   ;;  %s9528_s4 = inlined_call_operand.vmem [shape: f32[2,1,128], index: 4, kind: input, shape index: {}]   ;;  %s9529_s5 = inlined_call_operand.hbm [shape: f32[2,1,128], index: 5, kind: input, shape index: {}]   ;;  %s9530_s6 = inlined_call_operand.hbm [shape: f32[2,1,128], index: 6, kind: input, shape index: {}]   ;;  %s9531_s7 = inlined_call_operand.vmem [shape: bf16[2,128,512], index: 7, kind: input, shape index: {}]   ;;  %s9532_s8 = inlined_call_operand.hbm [shape: f32[2,1,512], index: 8, kind: input, shape index: {}]   ;;  %s9533_s9 = inlined_call_operand.hbm [shape: bf16[2,512,128], index: 9, kind: input, shape index: {}]   ;;  %s9534_s10 = inlined_call_operand.hbm [shape: f32[2,1,128], index: 10, kind: input, shape index: {}]   ;;  %s9535_s11 = inlined_call_operand.hbm [shape: f32[2,1,128], index: 11, kind: input, shape index: {}]   ;;  %s9536_s12 = inlined_call_operand.hbm [shape: f32[2,1,128], index: 12, kind: input, shape index: {}]   ;;  %s9537_s13 = inlined_call_operand.vmem [shape: bf16[16,128], index: 13, kind: output, shape index: {}]  }
   0x1   :  { %9564 = sst [smem:[#allocation35_spill]] %s9524_s0 }
   0x2   :  { %9565 = sst [smem:[#allocation36_spill]] %s9525_s1 }
   0x3   :  { %9566 = sst [smem:[#allocation37_spill]] %s9526_s2 }
   0x4   :  { %9567 = sst [smem:[#allocation38_spill]] %s9527_s3 }
   0x5   :  { %9568 = sst [smem:[#allocation39_spill]] %s9528_s4 }
   0x6   :  { %9569 = sst [smem:[#allocation40_spill]] %s9529_s5 }
   0x7   :  { %9570 = sst [smem:[#allocation41_spill]] %s9531_s7 }
   0x8   :  { %9571 = sst [smem:[#allocation42_spill]] %s9537_s13 }
   0x9   :  { %18 = vsyncpa [#allocation3], 0 }
   0xa   :  { %20 = vsyncpa [#allocation3 + $0x1], 0 }
   0xb   :  { %21 = vsyncpa [#allocation5], 0 }
   0xc   :  { %23 = vsyncpa [#allocation5 + $0x1], 0 }
   0xd   :  { %24 = vsyncpa [#allocation8], 0 }
   0xe   :  { %26 = vsyncpa [#allocation8 + $0x1], 0 }
   0xf   :  { %27 = vsyncpa [#allocation11], 0 }
  0x10   :  { %29 = vsyncpa [#allocation11 + $0x1], 0 }
  0x11   :  { %30 = vsyncpa [#allocation14], 0 }
  0x12   :  { %32 = vsyncpa [#allocation14 + $0x1], 0 }
  0x13   :  { %33 = vsyncpa [#allocation17], 0 }
  0x14   :  { %35 = vsyncpa [#allocation17 + $0x1], 0  ;;  %s8095_s25 = smov 0   ;;  %s8097_s26 = smov 0  }
  0x15   :  { %s8099_s27 = smov 0   ;;  %s8101_s28 = smov 0  }
  0x16   :  { %s8103_s29 = smov 0   ;;  %s8105_s30 = smov 0  }
  0x17 LB: > { %9572 = sst [smem:[#allocation24_spill]] %s7990_s27  ;;  %s9538_s14 = sadd.s32 4294967295, %s8002_s30   ;;  %s8002_s30 = sphi %s8105_s30, %s41_s30   ;;  %s7998_s29 = sphi %s8103_s29, %s9627_s29   ;;  %s7994_s28 = sphi %s8101_s28, %s9626_s28   ;;  %s7990_s27 = sphi %s8099_s27, %s9622_s27   ;;  %s7986_s26 = sphi %s8097_s26, %s9625_s26   ;;  %s7982_s25 = sphi %s8095_s25, %s9624_s25  }
  0x18   : > { %9573 = sst [smem:[#allocation25_spill]] %s7994_s28  ;;  %s50_s15 = sadd.s32 1, %s7998_s29 }
  0x19   : > { %9574 = sst [smem:[#allocation26_spill]] %s8002_s30  ;;  %p51_p0 = scmp.ge.s32.totalorder %s50_s15, 2 }
  0x1a   : > { %s86_s16 = sadd.s32 1, %s7990_s27  ;;  %p93_p1 = scmp.ne.s32.totalorder %s7990_s27, %s7986_s26 }
  0x1b   : > { %p94_p2 = scmp.eq.s32.totalorder %s8002_s30, 0  ;;  %s9629_s15 = smov (%p51_p0, %s50_s15), 0 }
  0x1c   : > { %9575 = sst [smem:[#allocation27_spill]] %s9629_s15  ;;  %p99_p4 = scmp.ne.s32.totalorder %s7986_s26, %s7982_s25 }
  0x1d   : > { %p95_p3 = por %p94_p2, %p93_p1  ;;  %s83_s17 = ssub.s32 %s7998_s29, %s9629_s15 }
  0x1e   : > { %p100_p5 = scmp.eq.s32.totalorder %s9538_s14, 0  ;;  %p84_p6 = scmp.eq.s32.totalorder %s83_s17, 0 }
  0x1f   : > { %p7137_p8 = scmp.lt.s32.totalorder %s8002_s30, 2  ;;  %s8145_s20 = sand.u32 1, %s7990_s27  }
  0x20   : > { %p8136_p7 = por %p100_p5, %p99_p4  ;;  %s8152_s22 = sand.u32 1, %s8002_s30  }
  0x21   : > { %s8142_s19 = scalar_select %p84_p6, %s7990_s27, %s86_s16  }
  0x22   : > { %s9576_s18 = scalar_select %p8136_p7, 1, 0 }
  0x23   : > { %9578 = sst [smem:[#allocation29_spill]] %s8142_s19  ;;  %p8147_p9 = pnand %p7137_p8, %p95_p3 }
  0x24   : > { %9577 = sst [smem:[#allocation28_spill]] %s9576_s18  ;;  %s7082_s23 = smul.u32 3, %s8145_s20 }
  0x25   : > { %s7083_s24 = smul.u32 48, %s7998_s29  ;;  %p6275_p10 = scmp.ge.s32.totalorder %s8002_s30, 1 }
  0x26   : > { %s469_s25 = scalar_lea.vmem [#allocation4], %s7082_s23  ;;  %s9580_s2 = sld [smem:[#allocation37_spill]] }
  0x27   : > { %s477_s17 = sshll.u32 %s469_s25, 4  ;;  %s9542_s19 = scalar_lea.sflag [#allocation5], %s8152_s22  ;;  %s478_s17 = int_to_ptr.vmem [resolvable:$true] %s477_s17 }
  0x28   : > { %p8163_p11 = pneg %p8147_p9  ;;  %s7665_s13 = scalar_lea.vmem %s478_s17, 48 }
  0x29   : > { %p7666_p12 = scmp.ne.s32.totalorder %s478_s17, %s7665_s13  ;;  %s8004_s23 = smov [#allocation4]  }
  0x2a   : > { %s7670_s25 = sshll.u32 %s8004_s23, 4  ;;  %s7671_s25 = int_to_ptr.vmem [resolvable:$false] %s7670_s25 }
  0x2b   : > { %p7668_p13 = pnand %p7666_p12, %p8163_p11  ;;  %s7672_s0 = scalar_lea.vmem %s7671_s25, 96 }
  0x2c   : > { %s475_s16 = scalar_lea.hbm %s9580_s2, %s7083_s24  ;;  %p7673_p1 = scmp.lt.s32.totalorder %s478_s17, %s7671_s25 }
  0x2d   : > { %p7669_p0 = pneg %p7668_p13  ;;  %p7674_p2 = scmp.lt.s32.totalorder %s7672_s0, %s7665_s13 }
  0x2f   : > { %p7675_p3 = por %p7674_p2, %p7673_p1 }
  0x31   : > { %p7676_p4 = pnand %p7675_p3, %p7669_p0 }
  0x33   : > { %7679 = shalt.err (!%p7676_p4)
}
  0x34   : > { %7112 = dma.hbm_to_vmem [thread:$0]  (!%p8147_p9), %s475_s16, 48, %s478_s17, %s9542_s19  }
  0x35   : > { %p642_p5 = scmp.lt.s32.totalorder %s8002_s30, 3  ;;  %s8175_s14 = sshll.u32 %s7998_s29, 4 }
  0x36   : > { %s9583_s5 = sld [smem:[#allocation40_spill]]  ;;  %s514_s23 = scalar_lea.vmem [#allocation7], %s8145_s20 }
  0x37   : > { %p8179_p6 = pnand %p6275_p10, %p642_p5  ;;  %s521_s25 = sshll.u32 %s514_s23, 4  ;;  %s522_s25 = int_to_ptr.vmem [resolvable:$true] %s521_s25 }
  0x38   : > { %s6266_s2 = sshll.u32 %s8145_s20, 2  ;;  %s9548_s7 = scalar_lea.sflag [#allocation8], %s8152_s22 }
  0x39   : > { %s7693_s4 = scalar_lea.vmem %s522_s25, 16  ;;  %s8005_s17 = smov [#allocation7]  }
  0x3a   : > { %p7694_p8 = scmp.ne.s32.totalorder %s522_s25, %s7693_s4  ;;  %s7698_s16 = sshll.u32 %s8005_s17, 4  ;;  %s7699_s16 = int_to_ptr.vmem [resolvable:$false] %s7698_s16 }
  0x3b   : > { %s7700_s19 = scalar_lea.vmem %s7699_s16, 32  ;;  %p7701_p10 = scmp.lt.s32.totalorder %s522_s25, %s7699_s16 }
  0x3c   : > { %s519_s24 = scalar_lea.hbm %s9583_s5, %s8175_s14  ;;  %p7696_p12 = pnand %p7694_p8, %p8163_p11 }
  0x3d   : > { %p7702_p0 = scmp.lt.s32.totalorder %s7700_s19, %s7693_s4 }
  0x3e   : > { %p7697_p13 = pneg %p7696_p12 }
  0x3f   : > { %p7703_p1 = por %p7702_p0, %p7701_p10 }
  0x41   : > { %p7704_p2 = pnand %p7703_p1, %p7697_p13 }
  0x43   : > { %7707 = shalt.err (!%p7704_p2)
}
  0x44   : > { %7118 = dma.hbm_to_vmem [thread:$0]  (!%p8147_p9), %s519_s24, 16, %s522_s25, %s9548_s7  }
  0x45   : > { %s6456_s13 = sshll.u32 %s7998_s29, 6  ;;  %s557_s5 = scalar_lea.vmem [#allocation10], %s6266_s2 }
  0x46   : > { %s563_s17 = scalar_lea.hbm %s9532_s8, %s6456_s13  ;;  %s565_s28 = sshll.u32 %s557_s5, 4  ;;  %s566_s28 = int_to_ptr.vmem [resolvable:$true] %s565_s28 }
  0x47   : > { %s9547_s4 = scalar_lea.sflag [#allocation11], %s8152_s22  ;;  %s7721_s19 = scalar_lea.vmem %s566_s28, 64 }
  0x48   : > { %p7722_p3 = scmp.ne.s32.totalorder %s566_s28, %s7721_s19  ;;  %s8006_s16 = smov [#allocation10]  }
  0x49   : > { %s7726_s30 = sshll.u32 %s8006_s16, 4  ;;  %s7727_s30 = int_to_ptr.vmem [resolvable:$false] %s7726_s30 }
  0x4a   : > { %p7724_p4 = pnand %p7722_p3, %p8163_p11  ;;  %s7728_s18 = scalar_lea.vmem %s7727_s30, 128 }
  0x4b   : > { %p7729_p8 = scmp.lt.s32.totalorder %s566_s28, %s7727_s30  ;;  %p7730_p12 = scmp.lt.s32.totalorder %s7728_s18, %s7721_s19 }
  0x4c   : > { %p7725_p5 = pneg %p7724_p4 }
  0x4d   : > { %p7731_p13 = por %p7730_p12, %p7729_p8 }
  0x4f   : > { %p7732_p10 = pnand %p7731_p13, %p7725_p5 }
  0x51   : > { %7735 = shalt.err (!%p7732_p10)
}
  0x52   : > { %7124 = dma.hbm_to_vmem [thread:$0]  (!%p8147_p9), %s563_s17, 64, %s566_s28, %s9547_s4  }
  0x53   : > { %s601_s24 = scalar_lea.hbm %s9534_s10, %s8175_s14  ;;  %s596_s25 = scalar_lea.vmem [#allocation13], %s8145_s20 }
  0x54   : > { %s603_s13 = sshll.u32 %s596_s25, 4  ;;  %s9549_s30 = scalar_lea.sflag [#allocation14], %s8152_s22  ;;  %s604_s13 = int_to_ptr.vmem [resolvable:$true] %s603_s13 }
  0x55   : > { %s7749_s18 = scalar_lea.vmem %s604_s13, 16  ;;  %s8007_s15 = smov [#allocation13]  }
  0x56   : > { %p7750_p0 = scmp.ne.s32.totalorder %s604_s13, %s7749_s18  ;;  %s7754_s23 = sshll.u32 %s8007_s15, 4  ;;  %s7755_s23 = int_to_ptr.vmem [resolvable:$false] %s7754_s23 }
  0x57   : > { %s7756_s19 = scalar_lea.vmem %s7755_s23, 32  ;;  %p7757_p3 = scmp.lt.s32.totalorder %s604_s13, %s7755_s23 }
  0x58   : > { %p7752_p1 = pnand %p7750_p0, %p8163_p11  ;;  %p7758_p4 = scmp.lt.s32.totalorder %s7756_s19, %s7749_s18 }
  0x5a   : > { %p7753_p2 = pneg %p7752_p1  ;;  %p7759_p5 = por %p7758_p4, %p7757_p3 }
  0x5c   : > { %p7760_p8 = pnand %p7759_p5, %p7753_p2 }
  0x5e   : > { %7763 = shalt.err (!%p7760_p8)
}
  0x5f   : > { %7130 = dma.hbm_to_vmem [thread:$0]  (!%p8147_p9), %s601_s24, 16, %s604_s13, %s9549_s30  }
  0x60   : > { %s7080_s28 = smul.u32 192, %s8145_s20  ;;  %s9584_s1 = sld [smem:[#allocation36_spill]] }
  0x61   : > { %s7081_s17 = smul.u32 3072, %s7998_s29  ;;  %s6261_s15 = sshll.u32 %s8145_s20, 6 }
  0x62   : > { %s448_s25 = scalar_lea.vmem [#allocation2], %s7080_s28  ;;  %s445_s23 = scalar_lea.sflag [#allocation3], %s8145_s20 }
  0x63   : > { %s455_s18 = sshll.u32 %s448_s25, 4  ;;  %s8008_s4 = smov [#allocation2]   ;;  %s456_s18 = int_to_ptr.vmem [resolvable:$true] %s455_s18 }
  0x64   : > { %s7777_s19 = scalar_lea.vmem %s456_s18, 3072  ;;  %s7782_s7 = sshll.u32 %s8008_s4, 4  ;;  %s7783_s7 = int_to_ptr.vmem [resolvable:$false] %s7782_s7 }
  0x65   : > { %p7778_p12 = scmp.ne.s32.totalorder %s456_s18, %s7777_s19  ;;  %s7784_s24 = scalar_lea.vmem %s7783_s7, 6144 }
  0x66   : > { %s454_s5 = scalar_lea.hbm %s9584_s1, %s7081_s17  ;;  %p7785_p0 = scmp.lt.s32.totalorder %s456_s18, %s7783_s7 }
  0x67   : > { %p7780_p13 = pnand %p7778_p12, %p8163_p11  ;;  %p7786_p1 = scmp.lt.s32.totalorder %s7784_s24, %s7777_s19 }
  0x69   : > { %p7781_p10 = pneg %p7780_p13  ;;  %p7787_p2 = por %p7786_p1, %p7785_p0 }
  0x6b   : > { %p7788_p3 = pnand %p7787_p2, %p7781_p10 }
  0x6d   : > { %7791 = shalt.err (!%p7788_p3)
}
  0x6e   : > { %s8009_s13 = smov 192   ;;  %s8010_s28 = smov 12  }
  0x6f   : > { %7109 = dma.hbm_to_vmem [thread:$0]  (!%p8147_p9), %s454_s5, 3072, %s456_s18, %s445_s23, %s8009_s13, %s8009_s13, %s8010_s28  }
  0x70   : > { %s6455_s17 = sshll.u32 %s7998_s29, 10  ;;  %s9585_s3 = sld [smem:[#allocation38_spill]] }
  0x71   : > { %s488_s4 = scalar_lea.vmem [#allocation6], %s6261_s15  ;;  %s8011_s19 = smov [#allocation6]  }
  0x72   : > { %s495_s30 = sshll.u32 %s488_s4, 4  ;;  %s7810_s24 = sshll.u32 %s8011_s19, 4  ;;  %s496_s30 = int_to_ptr.vmem [resolvable:$true] %s495_s30  ;;  %s7811_s24 = int_to_ptr.vmem [resolvable:$false] %s7810_s24 }
  0x73   : > { %s7805_s7 = scalar_lea.vmem %s496_s30, 1024  ;;  %s7812_s1 = scalar_lea.vmem %s7811_s24, 2048 }
  0x74   : > { %p7806_p4 = scmp.ne.s32.totalorder %s496_s30, %s7805_s7  ;;  %p7813_p12 = scmp.lt.s32.totalorder %s496_s30, %s7811_s24 }
  0x75   : > { %p7814_p13 = scmp.lt.s32.totalorder %s7812_s1, %s7805_s7 }
  0x76   : > { %s494_s25 = scalar_lea.hbm %s9585_s3, %s6455_s17  ;;  %p7808_p5 = pnand %p7806_p4, %p8163_p11 }
  0x77   : > { %p7815_p10 = por %p7814_p13, %p7813_p12 }
  0x78   : > { %p7809_p8 = pneg %p7808_p5 }
  0x7a   : > { %p7816_p0 = pnand %p7815_p10, %p7809_p8 }
  0x7c   : > { %7819 = shalt.err (!%p7816_p0)
}
  0x7d   : > { %s8012_s5 = smov 64   ;;  %s8013_s18 = smov 4  }
  0x7e   : > { %s9586_s15 = scalar_lea.sflag [#allocation5], %s8152_s22  ;;  %s536_s1 = scalar_lea.hbm %s9530_s6, %s8175_s14 }
  0x7f   : > { %7115 = dma.hbm_to_vmem [thread:$0]  (!%p8147_p9), %s494_s25, 1024, %s496_s30, %s9586_s15, %s8012_s5, %s8012_s5, %s8013_s18  }
  0x80   : > { %s531_s28 = scalar_lea.vmem [#allocation9], %s8145_s20  ;;  %s6269_s16 = sshll.u32 %s8145_s20, 8 }
  0x81   : > { %s538_s17 = sshll.u32 %s531_s28, 4  ;;  %s8014_s4 = smov [#allocation9]   ;;  %s539_s17 = int_to_ptr.vmem [resolvable:$true] %s538_s17 }
  0x82   : > { %s7833_s2 = scalar_lea.vmem %s539_s17, 16  ;;  %s7838_s7 = sshll.u32 %s8014_s4, 4  ;;  %s7839_s7 = int_to_ptr.vmem [resolvable:$false] %s7838_s7 }
  0x83   : > { %p7834_p1 = scmp.ne.s32.totalorder %s539_s17, %s7833_s2  ;;  %s7840_s19 = scalar_lea.vmem %s7839_s7, 32 }
  0x84   : > { %p7841_p4 = scmp.lt.s32.totalorder %s539_s17, %s7839_s7  ;;  %p7842_p5 = scmp.lt.s32.totalorder %s7840_s19, %s7833_s2 }
  0x85   : > { %p7836_p2 = pnand %p7834_p1, %p8163_p11 }
  0x86   : > { %p7843_p8 = por %p7842_p5, %p7841_p4 }
  0x87   : > { %p7837_p3 = pneg %p7836_p2 }
  0x89   : > { %p7844_p12 = pnand %p7843_p8, %p7837_p3 }
  0x8b   : > { %7847 = shalt.err (!%p7844_p12)
}
  0x8c   : > { %s9587_s30 = scalar_lea.sflag [#allocation8], %s8152_s22  ;;  %s6457_s25 = sshll.u32 %s7998_s29, 12 }
  0x8d   : > { %7121 = dma.hbm_to_vmem [thread:$0]  (!%p8147_p9), %s536_s1, 16, %s539_s17, %s9587_s30  }
  0x8e   : > { %s582_s23 = scalar_lea.hbm %s9533_s9, %s6457_s25  ;;  %s576_s13 = scalar_lea.vmem [#allocation12], %s6269_s16 }
  0x8f   : > { %s583_s28 = sshll.u32 %s576_s13, 4  ;;  %s8015_s2 = smov [#allocation12]   ;;  %s584_s28 = int_to_ptr.vmem [resolvable:$true] %s583_s28 }
  0x90   : > { %s7861_s4 = scalar_lea.vmem %s584_s28, 4096  ;;  %s7866_s7 = sshll.u32 %s8015_s2, 4  ;;  %s7867_s7 = int_to_ptr.vmem [resolvable:$false] %s7866_s7 }
  0x91   : > { %p7862_p13 = scmp.ne.s32.totalorder %s584_s28, %s7861_s4  ;;  %s7868_s19 = scalar_lea.vmem %s7867_s7, 8192 }
  0x92   : > { %p7869_p1 = scmp.lt.s32.totalorder %s584_s28, %s7867_s7  ;;  %p7870_p2 = scmp.lt.s32.totalorder %s7868_s19, %s7861_s4 }
  0x93   : > { %p7864_p10 = pnand %p7862_p13, %p8163_p11 }
  0x94   : > { %p7871_p3 = por %p7870_p2, %p7869_p1 }
  0x95   : > { %p7865_p0 = pneg %p7864_p10 }
  0x97   : > { %p7872_p4 = pnand %p7871_p3, %p7865_p0 }
  0x99   : > { %7875 = shalt.err (!%p7872_p4)
}
  0x9a   : > { %s9588_s1 = scalar_lea.sflag [#allocation11], %s8152_s22  ;;  %s618_s30 = scalar_lea.hbm %s9535_s11, %s8175_s14 }
  0x9b   : > { %7127 = dma.hbm_to_vmem [thread:$0]  (!%p8147_p9), %s582_s23, 4096, %s584_s28, %s9588_s1, %s8012_s5, %s8012_s5, %s8013_s18  }
  0x9c   : > { %s613_s25 = scalar_lea.vmem [#allocation15], %s8145_s20  ;;  %s8016_s13 = smov [#allocation15]  }
  0x9d   : > { %s620_s24 = sshll.u32 %s613_s25, 4  ;;  %s7894_s4 = sshll.u32 %s8016_s13, 4  ;;  %s621_s24 = int_to_ptr.vmem [resolvable:$true] %s620_s24  ;;  %s7895_s4 = int_to_ptr.vmem [resolvable:$false] %s7894_s4 }
  0x9e   : > { %s7889_s15 = scalar_lea.vmem %s621_s24, 16  ;;  %s7896_s2 = scalar_lea.vmem %s7895_s4, 32 }
  0x9f   : > { %p7890_p5 = scmp.ne.s32.totalorder %s621_s24, %s7889_s15  ;;  %p7897_p13 = scmp.lt.s32.totalorder %s621_s24, %s7895_s4 }
  0xa0   : > { %p7898_p10 = scmp.lt.s32.totalorder %s7896_s2, %s7889_s15 }
  0xa1   : > { %p7892_p8 = pnand %p7890_p5, %p8163_p11 }
  0xa2   : > { %p7899_p0 = por %p7898_p10, %p7897_p13 }
  0xa3   : > { %p7893_p12 = pneg %p7892_p8 }
  0xa5   : > { %p7900_p1 = pnand %p7899_p0, %p7893_p12 }
  0xa7   : > { %7903 = shalt.err (!%p7900_p1)
}
  0xa8   : > { %s9589_s5 = scalar_lea.sflag [#allocation14], %s8152_s22  ;;  %s635_s28 = scalar_lea.hbm %s9536_s12, %s8175_s14 }
  0xa9   : > { %7133 = dma.hbm_to_vmem [thread:$0]  (!%p8147_p9), %s618_s30, 16, %s621_s24, %s9589_s5  }
  0xaa   : > { %s630_s7 = scalar_lea.vmem [#allocation16], %s8145_s20  ;;  %s628_s1 = scalar_lea.sflag [#allocation17], %s8145_s20 }
  0xab   : > { %s637_s19 = sshll.u32 %s630_s7, 4  ;;  %s8017_s16 = smov [#allocation16]   ;;  %s638_s19 = int_to_ptr.vmem [resolvable:$true] %s637_s19 }
  0xac   : > { %s7917_s17 = scalar_lea.vmem %s638_s19, 16  ;;  %s7922_s22 = sshll.u32 %s8017_s16, 4  ;;  %s7923_s22 = int_to_ptr.vmem [resolvable:$false] %s7922_s22 }
  0xad   : > { %p7918_p2 = scmp.ne.s32.totalorder %s638_s19, %s7917_s17  ;;  %s7924_s25 = scalar_lea.vmem %s7923_s22, 32 }
  0xae   : > { %p7925_p5 = scmp.lt.s32.totalorder %s638_s19, %s7923_s22  ;;  %p7926_p8 = scmp.lt.s32.totalorder %s7924_s25, %s7917_s17 }
  0xaf   : > { %p7920_p3 = pnand %p7918_p2, %p8163_p11 }
  0xb0   : > { %p7927_p12 = por %p7926_p8, %p7925_p5 }
  0xb1   : > { %p7921_p4 = pneg %p7920_p3 }
  0xb3   : > { %p7928_p13 = pnand %p7927_p12, %p7921_p4 }
  0xb5   : > { %7931 = shalt.err (!%p7928_p13)
}
  0xb6   : > { %7136 = dma.hbm_to_vmem [thread:$0]  (!%p8147_p9), %s635_s28, 16, %s638_s19, %s628_s1  }
  0xb7   : > { %646 = sbr.rel (%p8179_p6) target bundleno = 2846 (0xb1e), region = 72 }
  0xbc   : > { %s8292_s27 = sand.u32 1, %s7986_s26  }
  0xbd   : > { %s7084_s14 = smul.u32 192, %s8292_s27  ;;  %s649_s30 = scalar_lea.sflag [#allocation3], %s8292_s27 }
  0xbf   : > { %s8296_s24 = scalar_lea.vmem [#allocation2], %s7084_s14 }
  0xc0   : > { %7957 = dma.done.wait (%p8136_p7), %s649_s30, 3072  }
  0xc1   : > { %7959 = vsyncadd (%p8136_p7), %s649_s30, 4294964224  ;;  %s9591_s21 = sld [smem:[#allocation26_spill]]  ;;  %s7085_s13 = smul.u32 3, %s8292_s27 }
  0xc3   : > { %s8305_s2 = scalar_lea.vmem [#allocation4], %s7085_s13 }
  0xc7   : > { %s9592_s15 = sadd.s32 4294967295, %s9591_s21  }
  0xc8   : > { %s657_s0 = sand.u32 1, %s9592_s15  }
  0xc9   : > { %s658_s4 = scalar_lea.sflag [#allocation5], %s657_s0 }
  0xca   : > { %7961 = dma.done.wait (%p8136_p7), %s658_s4, 1072  }
  0xcb   : > { %7963 = vsyncadd (%p8136_p7), %s658_s4, 4294966224  ;;  %s6276_s5 = sshll.u32 %s8292_s27, 6  ;;  %s676_s23 = scalar_lea.sflag [#allocation8], %s657_s0 }
  0xcc   : > { %s8312_s18 = scalar_lea.vmem [#allocation6], %s6276_s5 }
  0xcd   : > { %7965 = dma.done.wait (%p8136_p7), %s676_s23, 32  }
  0xce   : > { %7967 = vsyncadd (%p8136_p7), %s676_s23, 4294967264  ;;  %s6277_s7 = sshll.u32 %s8292_s27, 2  ;;  %s692_s1 = scalar_lea.sflag [#allocation11], %s657_s0 }
  0xcf   : > { %s8321_s17 = scalar_lea.vmem [#allocation10], %s6277_s7 }
  0xd0   : > { %7969 = dma.done.wait (%p8136_p7), %s692_s1, 4160  }
  0xd1   : > { %7971 = vsyncadd (%p8136_p7), %s692_s1, 4294963136  ;;  %s6278_s16 = sshll.u32 %s8292_s27, 8  ;;  %s710_s25 = scalar_lea.sflag [#allocation14], %s657_s0 }
  0xd2   : > { %s8328_s22 = scalar_lea.vmem [#allocation12], %s6278_s16 }
  0xd3   : > { %7973 = dma.done.wait (%p8136_p7), %s710_s25, 32  }
  0xd4   : > { %7975 = vsyncadd (%p8136_p7), %s710_s25, 4294967264  ;;  %s726_s21 = scalar_lea.sflag [#allocation17], %s8292_s27 }
  0xd5   : > { %7977 = dma.done.wait (%p8136_p7), %s726_s21, 16  }
  0xd6   : > { %7979 = vsyncadd (%p8136_p7), %s726_s21, 4294967280  ;;  %s9593_s13 = sld [smem:[#allocation25_spill]] }
  0xd7   : > { %s9594_s23 = sld [smem:[#allocation39_spill]] }
  0xd8   : > { %s9595_s15 = sld [smem:[#allocation41_spill]] }
  0xdc   : > { %p830_p9 = scmp.lt.s32.totalorder %s9593_s13, 1  ;;  %p6281_p11 = scmp.ne.s32.totalorder %s9593_s13, 0 }
  0xdd   : > { %s9596_s14 = sld [smem:[#allocation35_spill]] (!%p6281_p11) }
  0xde   : > { %s8344_s0 = scalar_select %p830_p9, %s9593_s13, 1 }
  0xdf   : > { %848 = sbr.rel (%p6281_p11) target bundleno = 230 (0xe6), region = 116  ;;  %s9597_s3 = sld [smem:[#allocation42_spill]] (!%p6281_p11) }
  0xe0   : > { %s832_s7 = scalar_lea.vmem %s9594_s23, %s8344_s0  ;;  %s6458_s1 = sshll.u32 %s8344_s0, 8 }
  0xe1   : > { %s8354_s30 = scalar_lea.vmem %s9595_s15, %s6458_s1 }
  0xe4   : > { %v849_v0 = vld [vmem:[%s9596_s14] sm:$0xff]  }
  0xe5   : > { %851 = vst [vmem:[%s9597_s3] sm:$0xff] %v849_v0  }
  0xe6 PF: > { %v7377_v1 = vld [vmem:[%s8296_s24 + $0xac] ss:$12 sps:$4 sm:$0xff]   ;;  %v7379_v2 = vld [vmem:[%s8296_s24 + $0xa8] ss:$12 sps:$4 sm:$0xff]   ;;  %v9553_v3 = vmov 0   ;;  %v9555_v4 = vmov 0.0   ;;  %v908_v28 = vlaneseq }
  0xe7   : > { %1089 = vmatprep.mubr.bf16.mxu0 %v9553_v3  ;;  %6656 = vmatprep.subr.bf16.mxu1 %v9555_v4  ;;  %v7380_v5 = vld [vmem:[%s8296_s24 + $0x94] ss:$12 sps:$4 sm:$0xff]   ;;  %vm8020_vm0 = vmmov 0   ;;  %v7382_v6 = vld [vmem:[%s8296_s24 + $0x90] ss:$12 sps:$4 sm:$0xff]   ;;  %s9598_s19 = sld [smem:[#allocation42_spill]] }
  0xe8   : > { %1057 = vmatprep.subr.bf16.mxu0 %v7377_v1  ;;  %6672 = vmatprep.mubr.msk.bf16.mxu1 %vm8020_vm0, %v9555_v4  ;;  %v7383_v7 = vld [vmem:[%s8296_s24 + $0x7c] ss:$12 sps:$4 sm:$0xff]   ;;  %v7385_v8 = vld [vmem:[%s8296_s24 + $0x78] ss:$12 sps:$4 sm:$0xff]   ;;  %v7388_v10 = vld [vmem:[%s8296_s24 + $0x60] ss:$12 sps:$4 sm:$0xff]  }
  0xe9   : > { %1058 = vmatpush1.bf16.msra.mxu0 %v7379_v2  ;;  %v7386_v9 = vld [vmem:[%s8296_s24 + $0x64] ss:$12 sps:$4 sm:$0xff]   ;;  %v7389_v12 = vld [vmem:[%s8296_s24 + $0x4c] ss:$12 sps:$4 sm:$0xff]   ;;  %v7391_v14 = vld [vmem:[%s8296_s24 + $0x48] ss:$12 sps:$4 sm:$0xff]  }
  0xea   : > { %1059 = vmatprep.subr.bf16.mxu0 %v7380_v5  ;;  %v7402_v11 = vld [vmem:[%s8296_s24 + $0xb0] ss:$12 sps:$4 sm:$0xff]   ;;  %v7403_v13 = vld [vmem:[%s8296_s24 + $0x98] ss:$12 sps:$4 sm:$0xff]   ;;  %v7392_v15 = vld [vmem:[%s8296_s24 + $0x34] ss:$12 sps:$4 sm:$0xff]  }
  0xeb   : > { %6657 = vmatpush3.bf16.msra.mxu1 %v7402_v11  ;;  %v7394_v16 = vld [vmem:[%s8296_s24 + $0x30] ss:$12 sps:$4 sm:$0xff]   ;;  %v7404_v17 = vld [vmem:[%s8296_s24 + $0x80] ss:$12 sps:$4 sm:$0xff]   ;;  %v7405_v19 = vld [vmem:[%s8296_s24 + $0x68] ss:$12 sps:$4 sm:$0xff]  }
  0xec   : > { %6658 = vmatprep.subr.bf16.mxu1 %v9555_v4  ;;  %v7395_v18 = vld [vmem:[%s8296_s24 + $0x1c] ss:$12 sps:$4 sm:$0xff]   ;;  %v7397_v20 = vld [vmem:[%s8296_s24 + $0x18] ss:$12 sps:$4 sm:$0xff]   ;;  %v7400_v23 = vld [vmem:[%s8296_s24] ss:$12 sps:$4 sm:$0xff]  }
  0xed   : > { %1060 = vmatpush1.bf16.msra.mxu0 %v7382_v6  ;;  %v7398_v21 = vld [vmem:[%s8296_s24 + $0x4] ss:$12 sps:$4 sm:$0xff]   ;;  %v7408_v26 = vld [vmem:[%s8296_s24 + $0x20] ss:$12 sps:$4 sm:$0xff]   ;;  %v7409_v27 = vld [vmem:[%s8296_s24 + $0x8] ss:$12 sps:$4 sm:$0xff]  }
  0xee   : > { %1061 = vmatprep.subr.bf16.mxu0 %v7383_v7  ;;  %v7406_v22 = vld [vmem:[%s8296_s24 + $0x50] ss:$12 sps:$4 sm:$0xff]   ;;  %v853_v24 = vld [vmem:[%s9598_s19] sm:$0xff]   ;;  %v8407_v29 = vshrl.u32 %v908_v28, 7  ;;  %v8021_v32 = vmov 1983009808  }
  0xef   : > { %6659 = vmatpush3.bf16.msra.mxu1 %v7403_v13  ;;  %v7407_v25 = vld [vmem:[%s8296_s24 + $0x38] ss:$12 sps:$4 sm:$0xff]   ;;  %v1145_v33 = vunpack.c.l.s4 %v8021_v32  ;;  %vm1585_vm1 = vcmask 261120   ;;  %s8022_s24 = smov 96   ;;  %s8024_s14 = smov 32   ;;  %vm3058_vm2 = vcmask 9216  }
  0xf0   : > { %6660 = vmatprep.subr.bf16.mxu1 %v9555_v4  ;;  %9599 = vst [vmem:[#allocation30_spill] sm:$0xff] %v8407_v29  ;;  %v9552_v30 = vsub.s32 0, %v8407_v29  ;;  %v8411_v31 = vld [vmem:[%s8305_s2] sm:$0x7]  ;;  %v9550_v34 = vsub.s32 1, %v8407_v29  ;;  %s8023_s2 = smov 64  }
  0xf1   : > { %1062 = vmatpush1.bf16.msra.mxu0 %v7385_v8  ;;  %v1146_v36 = vunpack.c.0.s8 %v1145_v33  ;;  %vm3447_vm3 = vcmask 1040384   ;;  %vm3443_vm4 = vcmask 15360   ;;  %vm5021_vm5 = vcmask 523264   ;;  %s9612_s0 = scalar_lea.vmem [#allocation9], %s8292_s27  ;;  %s9619_s23 = scalar_lea.vmem [#allocation16], %s8292_s27 }
  0xf2   : > { %1063 = vmatprep.subr.bf16.mxu0 %v7386_v9  ;;  %v911_v35 = vrot.slane %v8411_v31, %v9552_v30  ;;  %v915_v37 = vrot.slane %v8411_v31, %v9550_v34  ;;  %vm5030_vm6 = vcmask 785408  }
  0xf3   : > { %6661 = vmatpush3.bf16.msra.mxu1 %v7404_v17  ;;  %v8421_v40 = vsub.s32 %v1146_v36, %v8407_v29 }
  0xf4   : > { %6662 = vmatprep.subr.bf16.mxu1 %v9555_v4 }
  0xf5   : > { %1064 = vmatpush1.bf16.msra.mxu0 %v7388_v10  ;;  %9600 = vst [vmem:[#allocation31_spill] sm:$0xff] %v8421_v40 }
  0xf6   : > { %1065 = vmatprep.subr.bf16.mxu0 %v7389_v12 }
  0xf7   : > { %6663 = vmatpush3.bf16.msra.mxu1 %v7405_v19 }
  0xf8   : > { %6664 = vmatprep.subr.bf16.mxu1 %v9555_v4 }
  0xf9   : > { %1066 = vmatpush1.bf16.msra.mxu0 %v7391_v14 }
  0xfa   : > { %1067 = vmatprep.subr.bf16.mxu0 %v7392_v15 }
  0xfb   : > { %6665 = vmatpush3.bf16.msra.mxu1 %v7406_v22 }
  0xfc   : > { %6666 = vmatprep.subr.bf16.mxu1 %v9555_v4 }
  0xfd   : > { %1068 = vmatpush1.bf16.msra.mxu0 %v7394_v16 }
  0xfe   : > { %1069 = vmatprep.subr.bf16.mxu0 %v7395_v18 }
  0xff   : > { %6667 = vmatpush3.bf16.msra.mxu1 %v7407_v25 }
 0x100   : > { %6668 = vmatprep.subr.bf16.mxu1 %v9555_v4 }
 0x101   : > { %1070 = vmatpush1.bf16.msra.mxu0 %v7397_v20 }
 0x102   : > { %1071 = vmatprep.subr.bf16.mxu0 %v7398_v21 }
 0x103   : > { %6669 = vmatpush3.bf16.msra.mxu1 %v7408_v26 }
 0x104   : > { %6670 = vmatprep.subr.bf16.mxu1 %v9555_v4 }
 0x105   : > { %1072 = vmatpush1.bf16.msra.mxu0 %v7400_v23 }
 0x106   : > { %6700 = vmatprep.subr.bf16.mxu0 %v9555_v4 }
 0x107   : > { %6671 = vmatpush3.bf16.msra.mxu1 %v7409_v27 }
 0x108   : > { %1090 = vmatmul.mubr.bf16.vlgmr.msra.gmra.mxu0 %v853_v24  ;;  %6676 = vmatprep.subr.bf16.mxu1 %v9555_v4 }
 0x109   : > { %6702 = vmatprep.mubr.msk.bf16.mxu0 %vm8020_vm0, %v9555_v4 }
 0x10a   : > { %6673 = vmatmul.mubr.bf16.vlgmr.msra.gmra.mxu1 %v853_v24 }
 0x10b   : > { %6678 = vmatprep.mubr.msk.bf16.mxu1 %vm8020_vm0, %v9555_v4 }
 0x1c8   : > { %v1091_v38 = vpop.f32.mrf.mxu0 }
 0x1c9   : > { %v1092_v39 = vadd.f32 %v1091_v38, %v911_v35 }
 0x1ca   : > { %v1093_v41 = vpop.f32.mrf.mxu0  ;;  %v1134_v32 = vpop.f32.mrf.mxu1 }
 0x1cb   : > { %v1143_v42 = vcombine.high %v1092_v39, %v1092_v39  ;;  %v1094_v43 = vadd.f32 %v1093_v41, %v915_v37  ;;  %v1150_v47 = vrot.slane %v1092_v39, %v8421_v40 }
 0x1cc   : > { %v1095_v44 = vpop.f32.mrf.mxu0  ;;  %v6674_v36 = vpop.f32.mrf.mxu1 }
 0x1cd   : > { %v1291_v45 = vcombine.high %v1094_v43, %v1094_v43  ;;  %v1298_v46 = vrot.slane %v1094_v43, %v8421_v40  ;;  %v1096_v48 = vadd.f32 %v1095_v44, %v911_v35  ;;  %v8426_v50 = vrot.slane %v1143_v42, %v8421_v40 }
 0x1ce   : > { %v1097_v49 = vpop.f32.mrf.mxu0  ;;  %v1158_v61 = vcombine.high %v1150_v47, %v1150_v47  ;;  %v1257_v12 = vpack.c.bf16 %v1150_v47, %v1150_v47  ;;  %v9551_v35 = vsub.s32 2, %v8407_v29 }
 0x1cf   : > { %v1305_v51 = vrot.slane %v1291_v45, %v8421_v40  ;;  %v1098_v52 = vadd.f32 %v1097_v49, %v915_v37  ;;  %v1405_v53 = vpack.c.bf16 %v1298_v46, %v1298_v46  ;;  %v1306_v54 = vcombine.high %v1298_v46, %v1298_v46  ;;  %v1137_v37 = vpop.f32.mrf.mxu1 }
 0x1d0   : > { %v1160_v58 = vcombine.high %v1096_v48, %v1096_v48  ;;  %v1167_v62 = vrot.slane %v1096_v48, %v8421_v40  ;;  %v8441_v1 = vcombine.high %v8426_v50, %v8426_v50  ;;  %v8450_v6 = vpack.i.bf16 %v1158_v61, %v1150_v47 }
 0x1d1   : > { %v1308_v55 = vcombine.high %v1098_v52, %v1098_v52  ;;  %v1315_v56 = vrot.slane %v1098_v52, %v8421_v40  ;;  %v8430_v57 = vcombine.high %v1305_v51, %v1305_v51  ;;  %v1590_v59 = vsel %vm1585_vm1, %v1405_v53, 0  ;;  %v6675_v41 = vpop.f32.mrf.mxu1 }
 0x1d2   : > { %v8433_v60 = vpack.i.bf16 %v1306_v54, %v1298_v46  ;;  %6677 = vmatpush3.bf16.xpose.msra.mxu1 %v1590_v59  ;;  %v1406_v7 = vpack.c.bf16 %v1306_v54, %v1306_v54  ;;  %v1174_v9 = vrot.slane %v1160_v58, %v8421_v40  ;;  %v8457_v10 = vpack.i.bf16 %v8441_v1, %v8426_v50 }
 0x1d3   : > { %v8437_v63 = vpack.i.bf16 %v8430_v57, %v1305_v51  ;;  %v1409_v0 = vpack.c.bf16 %v1315_v56, %v1315_v56  ;;  %6682 = vmatprep.subr.bf16.mxu1 %v9555_v4  ;;  %v1322_v2 = vrot.slane %v1308_v55, %v8421_v40  ;;  %v8452_v8 = vcombine.high %v1315_v56, %v1315_v56 }
 0x1d4   : > { %7198 = vrot.lane.b32.xlu0 %v8433_v60, %s8022_s24  ;;  %v8460_v11 = vcombine.high %v1167_v62, %v1167_v62  ;;  %v1636_v14 = vsel %vm1585_vm1, %v1406_v7, 0  ;;  %v1261_v17 = vpack.c.bf16 %v1167_v62, %v1167_v62  ;;  %v8478_v19 = vcombine.high %v1174_v9, %v1174_v9 }
 0x1d5   : > { %7208 = vrot.lane.b32.xlu1 %v8437_v63, %s8022_s24  ;;  %v1774_v5 = vsel %vm1585_vm1, %v1409_v0, 0  ;;  %v1411_v13 = vpack.c.bf16 %v1322_v2, %v1322_v2  ;;  %v8469_v15 = vpack.i.bf16 %v8452_v8, %v1315_v56  ;;  %v8471_v16 = vcombine.high %v1322_v2, %v1322_v2 }
 0x1d6   : > { %6701 = vmatpush3.bf16.xpose.msra.mxu0 %v1774_v5  ;;  %v8474_v18 = vpack.i.bf16 %v8460_v11, %v1167_v62  ;;  %v1407_v22 = vpack.c.bf16 %v1305_v51, %v1305_v51  ;;  %v8493_v23 = vpack.i.bf16 %v8478_v19, %v1174_v9  ;;  %v1258_v24 = vpack.c.bf16 %v1158_v61, %v1158_v61 }
 0x1d7   : > { %6712 = vmatprep.subr.bf16.mxu0 %v9555_v4  ;;  %v1866_v20 = vsel %vm1585_vm1, %v1411_v13, 0  ;;  %v8488_v21 = vpack.i.bf16 %v8471_v16, %v1322_v2  ;;  %v1263_v26 = vpack.c.bf16 %v1174_v9, %v1174_v9  ;;  %v1408_v27 = vpack.c.bf16 %v8430_v57, %v8430_v57 }
 0x1d8   : > { %7203 = vrot.lane.b32.xlu0 %v8450_v6, %s8022_s24  ;;  %v1682_v25 = vsel %vm1585_vm1, %v1407_v22, 0  ;;  %v1259_v28 = vpack.c.bf16 %v8426_v50, %v8426_v50  ;;  %v1410_v38 = vpack.c.bf16 %v8452_v8, %v8452_v8  ;;  %v919_v39 = vrot.slane %v8411_v31, %v9551_v35 }
 0x1d9   : > { %7213 = vrot.lane.b32.xlu1 %v8457_v10, %s8022_s24  ;;  %6679 = vmatmul.mubr.msk.bf16.vlgmr.msra.gmra.mxu1 %vm1585_vm1, %v1257_v12  ;;  %v1728_v33 = vsel %vm1585_vm1, %v1408_v27, 0  ;;  %v1260_v42 = vpack.c.bf16 %v8441_v1, %v8441_v1  ;;  %v1412_v45 = vpack.c.bf16 %v8471_v16, %v8471_v16  ;;  %v1262_v46 = vpack.c.bf16 %v8460_v11, %v8460_v11 }
 0x1da   : > { %6683 = vmatpush3.bf16.xpose.msra.mxu1 %v1636_v14  ;;  %6684 = vmatprep.mubr.msk.bf16.mxu1 %vm8020_vm0, %v9555_v4  ;;  %v1820_v43 = vsel %vm1585_vm1, %v1410_v38, 0  ;;  %v1135_v44 = vadd.f32 %v1134_v32, %v919_v39  ;;  %v1138_v49 = vadd.f32 %v1137_v37, %v919_v39  ;;  %v1264_v55 = vpack.c.bf16 %v8478_v19, %v8478_v19 }
 0x1db   : > { %6688 = vmatprep.subr.bf16.mxu1 %v9555_v4  ;;  %v1912_v50 = vsel %vm1585_vm1, %v1412_v45, 0 }
 0x1dc   : > { %7218 = vrot.lane.b32.xlu0 %v8469_v15, %s8022_s24  ;;  %v1439_v31 = vcombine.high %v1135_v44, %v1135_v44  ;;  %v8562_v48 = vrot.slane %v1135_v44, %v8421_v40  ;;  %v1456_v52 = vcombine.high %v1138_v49, %v1138_v49  ;;  %v8578_v53 = vrot.slane %v1138_v49, %v8421_v40 }
 0x1dd   : > { %6703 = vmatmul.mubr.msk.bf16.vlgmr.msra.gmra.mxu0 %vm1585_vm1, %v1261_v17  ;;  %7223 = vrot.lane.b32.xlu1 %v8474_v18, %s8022_s24 }
 0x1de   : > { %6713 = vmatpush3.bf16.xpose.msra.mxu0 %v1866_v20  ;;  %6714 = vmatprep.mubr.msk.bf16.mxu0 %vm8020_vm0, %v9555_v4  ;;  %v8557_v47 = vrot.slane %v1439_v31, %v8421_v40  ;;  %v8582_v54 = vcombine.high %v8562_v48, %v8562_v48  ;;  %v8595_v57 = vrot.slane %v1456_v52, %v8421_v40 }
 0x1df   : > { %6724 = vmatprep.subr.bf16.mxu0 %v9555_v4  ;;  %v8603_v59 = vcombine.high %v8578_v53, %v8578_v53 }
 0x1e0   : > { %7228 = vrot.lane.b32.xlu0 %v8488_v21, %s8022_s24  ;;  %v8573_v51 = vcombine.high %v8557_v47, %v8557_v47  ;;  %v8599_v58 = vpack.i.bf16 %v8582_v54, %v8562_v48  ;;  %v8618_v61 = vcombine.high %v8595_v57, %v8595_v57 }
 0x1e1   : > { %7233 = vrot.lane.b32.xlu1 %v8493_v23, %s8022_s24  ;;  %6685 = vmatmul.mubr.msk.bf16.vlgmr.msra.gmra.mxu1 %vm1585_vm1, %v1258_v24 }
 0x1e2   : > { %6689 = vmatpush3.bf16.xpose.msra.mxu1 %v1682_v25  ;;  %6690 = vmatprep.mubr.msk.bf16.mxu1 %vm8020_vm0, %v9555_v4  ;;  %v8590_v56 = vpack.i.bf16 %v8573_v51, %v8557_v47  ;;  %v8626_v62 = vpack.i.bf16 %v8618_v61, %v8595_v57 }
 0x1e3   : > { %6694 = vmatprep.subr.bf16.mxu1 %v9555_v4 }
 0x1e4   : > { %7238 = vrot.lane.b32.xlu0 %v8433_v60, %s8023_s2 }
 0x1e5   : > { %6715 = vmatmul.mubr.msk.bf16.vlgmr.msra.gmra.mxu0 %vm1585_vm1, %v1263_v26  ;;  %7243 = vrot.lane.b32.xlu1 %v8450_v6, %s8023_s2 }
 0x1e6   : > { %6726 = vmatprep.mubr.msk.bf16.mxu0 %vm8020_vm0, %v9555_v4 }
 0x1e8   : > { %7248 = vrot.lane.b32.xlu0 %v8437_v63, %s8023_s2 }
 0x1e9   : > { %7253 = vrot.lane.b32.xlu1 %v8457_v10, %s8023_s2  ;;  %6691 = vmatmul.mubr.msk.bf16.vlgmr.msra.gmra.mxu1 %vm1585_vm1, %v1259_v28 }
 0x1ea   : > { %6695 = vmatpush3.bf16.xpose.msra.mxu1 %v1728_v33  ;;  %6696 = vmatprep.mubr.msk.bf16.mxu1 %vm8020_vm0, %v9555_v4 }
 0x1eb   : > { %6706 = vmatprep.subr.bf16.mxu1 %v9555_v4 }
 0x1ec   : > { %7258 = vrot.lane.b32.xlu0 %v8469_v15, %s8023_s2 }
 0x1ed   : > { %7263 = vrot.lane.b32.xlu1 %v8474_v18, %s8023_s2 }
 0x1f0   : > { %7268 = vrot.lane.b32.xlu0 %v8488_v21, %s8023_s2 }
 0x1f1   : > { %7273 = vrot.lane.b32.xlu1 %v8493_v23, %s8023_s2  ;;  %6697 = vmatmul.mubr.msk.bf16.vlgmr.msra.gmra.mxu1 %vm1585_vm1, %v1260_v42 }
 0x1f2   : > { %6707 = vmatpush3.bf16.xpose.msra.mxu1 %v1820_v43  ;;  %6708 = vmatprep.mubr.msk.bf16.mxu1 %vm8020_vm0, %v9555_v4 }
 0x1f3   : > { %6718 = vmatprep.subr.bf16.mxu1 %v9555_v4 }
 0x1f4   : > { %7278 = vrot.lane.b32.xlu0 %v8433_v60, %s8024_s14  ;;  %v8614_v60 = vpack.i.bf16 %v8603_v59, %v8578_v53 }
 0x1f5   : > { %7283 = vrot.lane.b32.xlu1 %v8450_v6, %s8024_s14 }
 0x1f6   : > { %9601 = vst [vmem:[#allocation32_spill] sm:$0xff] %v8614_v60 }
 0x1f8   : > { %7288 = vrot.lane.b32.xlu0 %v8437_v63, %s8024_s14 }
 0x1f9   : > { %7293 = vrot.lane.b32.xlu1 %v8457_v10, %s8024_s14  ;;  %6709 = vmatmul.mubr.msk.bf16.vlgmr.msra.gmra.mxu1 %vm1585_vm1, %v1262_v46 }
 0x1fa   : > { %6719 = vmatpush3.bf16.xpose.msra.mxu1 %v1912_v50  ;;  %6720 = vmatprep.mubr.msk.bf16.mxu1 %vm8020_vm0, %v9555_v4 }
 0x1fb   : > { %6730 = vmatprep.subr.bf16.mxu1 %v9555_v4 }
 0x1fc   : > { %7298 = vrot.lane.b32.xlu0 %v8469_v15, %s8024_s14 }
 0x1fd   : > { %7303 = vrot.lane.b32.xlu1 %v8474_v18, %s8024_s14 }
 0x200   : > { %7308 = vrot.lane.b32.xlu0 %v8488_v21, %s8024_s14 }
 0x201   : > { %7313 = vrot.lane.b32.xlu1 %v8493_v23, %s8024_s14  ;;  %6721 = vmatmul.mubr.msk.bf16.vlgmr.msra.gmra.mxu1 %vm1585_vm1, %v1264_v55 }
 0x202   : > { %6732 = vmatprep.mubr.msk.bf16.mxu1 %vm8020_vm0, %v9555_v4 }
 0x204   : > { %7323 = vrot.lane.b32.xlu0 %v8590_v56, %s8022_s24 }
 0x205   : > { %7318 = vrot.lane.b32.xlu1 %v8599_v58, %s8022_s24 }
 0x208   : > { %7338 = vrot.lane.b32.xlu0 %v8599_v58, %s8023_s2 }
 0x209   : > { %7328 = vrot.lane.b32.xlu1 %v8614_v60, %s8022_s24 }
 0x20d   : > { %7333 = vrot.lane.b32.xlu1 %v8626_v62, %s8022_s24 }
 0x211   : > { %7343 = vrot.lane.b32.xlu1 %v8590_v56, %s8023_s2 }
 0x246   : > { %v7199_v63 = vpop.permute.xlu0 %7198 }
 0x247   : > { %v7201_v0 = vunpack.i.h.bf16 %v7199_v63  ;;  %v7200_v1 = vunpack.i.l.bf16 %v7199_v63  ;;  %v7209_v2 = vpop.permute.xlu1 %7208 }
 0x248   : > { %v7211_v8 = vunpack.i.h.bf16 %v7209_v2  ;;  %v7210_v9 = vunpack.i.l.bf16 %v7209_v2 }
 0x249   : > { %v1414_v5 = vpack.c.bf16 %v7201_v0, %v7201_v0  ;;  %v1413_v6 = vpack.c.bf16 %v7200_v1, %v7200_v1 }
 0x24a   : > { %v7204_v7 = vpop.permute.xlu0 %7203  ;;  %v1416_v14 = vpack.c.bf16 %v7211_v8, %v7211_v8  ;;  %v1415_v15 = vpack.c.bf16 %v7210_v9, %v7210_v9 }
 0x24b   : > { %v1958_v10 = vsel %vm1585_vm1, %v1413_v6, 0  ;;  %v2004_v11 = vsel %vm1585_vm1, %v1414_v5, 0  ;;  %v7206_v12 = vunpack.i.h.bf16 %v7204_v7  ;;  %v7205_v13 = vunpack.i.l.bf16 %v7204_v7  ;;  %v7214_v19 = vpop.permute.xlu1 %7213 }
 0x24c   : > { %6725 = vmatpush3.bf16.xpose.msra.mxu0 %v1958_v10  ;;  %6731 = vmatpush3.bf16.xpose.msra.mxu1 %v2004_v11  ;;  %v2050_v22 = vsel %vm1585_vm1, %v1415_v15, 0  ;;  %v2096_v23 = vsel %vm1585_vm1, %v1416_v14, 0  ;;  %v7216_v24 = vunpack.i.h.bf16 %v7214_v19  ;;  %v7215_v25 = vunpack.i.l.bf16 %v7214_v19 }
 0x24d   : > { %6736 = vmatprep.subr.bf16.mxu0 %v9555_v4  ;;  %6742 = vmatprep.subr.bf16.mxu1 %v9555_v4  ;;  %v1266_v17 = vpack.c.bf16 %v7206_v12, %v7206_v12  ;;  %v1265_v18 = vpack.c.bf16 %v7205_v13, %v7205_v13 }
 0x24e   : > { %v7219_v16 = vpop.permute.xlu0 %7218  ;;  %v1268_v32 = vpack.c.bf16 %v7216_v24, %v7216_v24  ;;  %v1267_v33 = vpack.c.bf16 %v7215_v25, %v7215_v25 }
 0x24f   : > { %v7221_v20 = vunpack.i.h.bf16 %v7219_v16  ;;  %v7220_v21 = vunpack.i.l.bf16 %v7219_v16  ;;  %v7224_v36 = vpop.permute.xlu1 %7223 }
 0x250   : > { %v7226_v42 = vunpack.i.h.bf16 %v7224_v36  ;;  %v7225_v43 = vunpack.i.l.bf16 %v7224_v36 }
 0x251   : > { %v1418_v26 = vpack.c.bf16 %v7221_v20, %v7221_v20  ;;  %v1417_v27 = vpack.c.bf16 %v7220_v21, %v7220_v21 }
 0x252   : > { %v7229_v28 = vpop.permute.xlu0 %7228  ;;  %v1270_v46 = vpack.c.bf16 %v7226_v42, %v7226_v42  ;;  %v1269_v49 = vpack.c.bf16 %v7225_v43, %v7225_v43 }
 0x253   : > { %6727 = vmatmul.mubr.msk.bf16.vlgmr.msra.gmra.mxu0 %vm1585_vm1, %v1265_v18  ;;  %6733 = vmatmul.mubr.msk.bf16.vlgmr.msra.gmra.mxu1 %vm1585_vm1, %v1266_v17  ;;  %v7231_v37 = vunpack.i.h.bf16 %v7229_v28  ;;  %v7230_v38 = vunpack.i.l.bf16 %v7229_v28  ;;  %v2142_v39 = vsel %vm1585_vm1, %v1417_v27, 0  ;;  %v2188_v41 = vsel %vm1585_vm1, %v1418_v26, 0  ;;  %v7234_v50 = vpop.permute.xlu1 %7233 }
 0x254   : > { %6737 = vmatpush3.bf16.xpose.msra.mxu0 %v2050_v22  ;;  %6743 = vmatpush3.bf16.xpose.msra.mxu1 %v2096_v23  ;;  %v7236_v1 = vunpack.i.h.bf16 %v7234_v50  ;;  %v7235_v2 = vunpack.i.l.bf16 %v7234_v50 }
 0x255   : > { %6738 = vmatprep.mubr.msk.bf16.mxu0 %vm8020_vm0, %v9555_v4  ;;  %6744 = vmatprep.mubr.msk.bf16.mxu1 %vm8020_vm0, %v9555_v4  ;;  %v1420_v44 = vpack.c.bf16 %v7231_v37, %v7231_v37  ;;  %v1419_v31 = vpack.c.bf16 %v7230_v38, %v7230_v38 }
 0x256   : > { %6748 = vmatprep.subr.bf16.mxu0 %v9555_v4  ;;  %6754 = vmatprep.subr.bf16.mxu1 %v9555_v4  ;;  %v7239_v45 = vpop.permute.xlu0 %7238  ;;  %v1272_v8 = vpack.c.bf16 %v7236_v1, %v7236_v1  ;;  %v1271_v9 = vpack.c.bf16 %v7235_v2, %v7235_v2 }
 0x257   : > { %v7241_v52 = vunpack.i.h.bf16 %v7239_v45  ;;  %v7240_v55 = vunpack.i.l.bf16 %v7239_v45  ;;  %v2234_v63 = vsel %vm1585_vm1, %v1419_v31, 0  ;;  %v2280_v0 = vsel %vm1585_vm1, %v1420_v44, 0  ;;  %v7244_v10 = vpop.permute.xlu1 %7243 }
 0x258   : > { %v7246_v15 = vunpack.i.h.bf16 %v7244_v10  ;;  %v7245_v16 = vunpack.i.l.bf16 %v7244_v10 }
 0x259   : > { %v1422_v5 = vpack.c.bf16 %v7241_v52, %v7241_v52  ;;  %v1421_v6 = vpack.c.bf16 %v7240_v55, %v7240_v55 }
 0x25a   : > { %v7249_v7 = vpop.permute.xlu0 %7248  ;;  %v1274_v20 = vpack.c.bf16 %v7246_v15, %v7246_v15  ;;  %v1273_v21 = vpack.c.bf16 %v7245_v16, %v7245_v16 }
 0x25b   : > { %6739 = vmatmul.mubr.msk.bf16.vlgmr.msra.gmra.mxu0 %vm1585_vm1, %v1267_v33  ;;  %6745 = vmatmul.mubr.msk.bf16.vlgmr.msra.gmra.mxu1 %vm1585_vm1, %v1268_v32  ;;  %v7251_v11 = vunpack.i.h.bf16 %v7249_v7  ;;  %v7250_v12 = vunpack.i.l.bf16 %v7249_v7  ;;  %v2326_v13 = vsel %vm1585_vm1, %v1421_v6, 0  ;;  %v2372_v14 = vsel %vm1585_vm1, %v1422_v5, 0  ;;  %v7254_v22 = vpop.permute.xlu1 %7253 }
 0x25c   : > { %6749 = vmatpush3.bf16.xpose.msra.mxu0 %v2142_v39  ;;  %6755 = vmatpush3.bf16.xpose.msra.mxu1 %v2188_v41  ;;  %v7256_v27 = vunpack.i.h.bf16 %v7254_v22  ;;  %v7255_v28 = vunpack.i.l.bf16 %v7254_v22 }
 0x25d   : > { %6750 = vmatprep.mubr.msk.bf16.mxu0 %vm8020_vm0, %v9555_v4  ;;  %6756 = vmatprep.mubr.msk.bf16.mxu1 %vm8020_vm0, %v9555_v4  ;;  %v1424_v17 = vpack.c.bf16 %v7251_v11, %v7251_v11  ;;  %v1423_v18 = vpack.c.bf16 %v7250_v12, %v7250_v12 }
 0x25e   : > { %6760 = vmatprep.subr.bf16.mxu0 %v9555_v4  ;;  %6766 = vmatprep.subr.bf16.mxu1 %v9555_v4  ;;  %v7259_v19 = vpop.permute.xlu0 %7258  ;;  %v1276_v37 = vpack.c.bf16 %v7256_v27, %v7256_v27  ;;  %v1275_v38 = vpack.c.bf16 %v7255_v28, %v7255_v28 }
 0x25f   : > { %v7261_v23 = vunpack.i.h.bf16 %v7259_v19  ;;  %v7260_v24 = vunpack.i.l.bf16 %v7259_v19  ;;  %v2418_v25 = vsel %vm1585_vm1, %v1423_v18, 0  ;;  %v2464_v26 = vsel %vm1585_vm1, %v1424_v17, 0  ;;  %v7264_v39 = vpop.permute.xlu1 %7263 }
 0x260   : > { %v7266_v31 = vunpack.i.h.bf16 %v7264_v39  ;;  %v7265_v45 = vunpack.i.l.bf16 %v7264_v39 }
 0x261   : > { %v1426_v32 = vpack.c.bf16 %v7261_v23, %v7261_v23  ;;  %v1425_v33 = vpack.c.bf16 %v7260_v24, %v7260_v24 }
 0x262   : > { %v7269_v36 = vpop.permute.xlu0 %7268  ;;  %v1278_v52 = vpack.c.bf16 %v7266_v31, %v7266_v31  ;;  %v1277_v55 = vpack.c.bf16 %v7265_v45, %v7265_v45 }
 0x263   : > { %6751 = vmatmul.mubr.msk.bf16.vlgmr.msra.gmra.mxu0 %vm1585_vm1, %v1269_v49  ;;  %6757 = vmatmul.mubr.msk.bf16.vlgmr.msra.gmra.mxu1 %vm1585_vm1, %v1270_v46  ;;  %v7271_v41 = vunpack.i.h.bf16 %v7269_v36  ;;  %v7270_v42 = vunpack.i.l.bf16 %v7269_v36  ;;  %v2510_v43 = vsel %vm1585_vm1, %v1425_v33, 0  ;;  %v2556_v44 = vsel %vm1585_vm1, %v1426_v32, 0 }
 0x264   : > { %6761 = vmatpush3.bf16.xpose.msra.mxu0 %v2234_v63  ;;  %6767 = vmatpush3.bf16.xpose.msra.mxu1 %v2280_v0  ;;  %v7274_v63 = vpop.permute.xlu1 %7273 }
 0x265   : > { %6762 = vmatprep.mubr.msk.bf16.mxu0 %vm8020_vm0, %v9555_v4  ;;  %6768 = vmatprep.mubr.msk.bf16.mxu1 %vm8020_vm0, %v9555_v4  ;;  %v1428_v46 = vpack.c.bf16 %v7271_v41, %v7271_v41  ;;  %v1427_v49 = vpack.c.bf16 %v7270_v42, %v7270_v42  ;;  %v7276_v6 = vunpack.i.h.bf16 %v7274_v63  ;;  %v7275_v7 = vunpack.i.l.bf16 %v7274_v63 }
 0x266   : > { %6772 = vmatprep.subr.bf16.mxu0 %v9555_v4  ;;  %6778 = vmatprep.subr.bf16.mxu1 %v9555_v4  ;;  %v7279_v50 = vpop.permute.xlu0 %7278 }
 0x267   : > { %v7281_v0 = vunpack.i.h.bf16 %v7279_v50  ;;  %v7280_v1 = vunpack.i.l.bf16 %v7279_v50  ;;  %v2602_v2 = vsel %vm1585_vm1, %v1427_v49, 0  ;;  %v2648_v5 = vsel %vm1585_vm1, %v1428_v46, 0 }
 0x268   : > { %v1280_v11 = vpack.c.bf16 %v7276_v6, %v7276_v6  ;;  %v1279_v12 = vpack.c.bf16 %v7275_v7, %v7275_v7 }
 0x26a   : > { %v7289_v10 = vpop.permute.xlu0 %7288 }
 0x26b   : > { %6763 = vmatmul.mubr.msk.bf16.vlgmr.msra.gmra.mxu0 %vm1585_vm1, %v1271_v9  ;;  %6769 = vmatmul.mubr.msk.bf16.vlgmr.msra.gmra.mxu1 %vm1585_vm1, %v1272_v8  ;;  %v1430_v8 = vpack.c.bf16 %v7281_v0, %v7281_v0  ;;  %v1429_v9 = vpack.c.bf16 %v7280_v1, %v7280_v1  ;;  %v7290_v15 = vunpack.i.l.bf16 %v7289_v10 }
 0x26c   : > { %6773 = vmatpush3.bf16.xpose.msra.mxu0 %v2326_v13  ;;  %6779 = vmatpush3.bf16.xpose.msra.mxu1 %v2372_v14  ;;  %v7284_v13 = vpop.permute.xlu1 %7283  ;;  %v7291_v14 = vunpack.i.h.bf16 %v7289_v10 }
 0x26d   : > { %6774 = vmatprep.mubr.msk.bf16.mxu0 %vm8020_vm0, %v9555_v4  ;;  %6780 = vmatprep.mubr.msk.bf16.mxu1 %vm8020_vm0, %v9555_v4  ;;  %v2694_v16 = vsel %vm1585_vm1, %v1429_v9, 0  ;;  %v2740_v17 = vsel %vm1585_vm1, %v1430_v8, 0  ;;  %v7286_v18 = vunpack.i.h.bf16 %v7284_v13  ;;  %v7285_v19 = vunpack.i.l.bf16 %v7284_v13 }
 0x26e   : > { %6784 = vmatprep.subr.bf16.mxu0 %v9555_v4  ;;  %6790 = vmatprep.subr.bf16.mxu1 %v9555_v4  ;;  %v7299_v22 = vpop.permute.xlu0 %7298 }
 0x26f   : > { %v1282_v23 = vpack.c.bf16 %v7286_v18, %v7286_v18  ;;  %v1281_v24 = vpack.c.bf16 %v7285_v19, %v7285_v19  ;;  %v7301_v32 = vunpack.i.h.bf16 %v7299_v22 }
 0x272   : > { %v7309_v42 = vpop.permute.xlu0 %7308 }
 0x273   : > { %6775 = vmatmul.mubr.msk.bf16.vlgmr.msra.gmra.mxu0 %vm1585_vm1, %v1273_v21  ;;  %6781 = vmatmul.mubr.msk.bf16.vlgmr.msra.gmra.mxu1 %vm1585_vm1, %v1274_v20  ;;  %v1432_v20 = vpack.c.bf16 %v7291_v14, %v7291_v14  ;;  %v1431_v21 = vpack.c.bf16 %v7290_v15, %v7290_v15  ;;  %v7311_v46 = vunpack.i.h.bf16 %v7309_v42  ;;  %v7310_v49 = vunpack.i.l.bf16 %v7309_v42 }
 0x274   : > { %6785 = vmatpush3.bf16.xpose.msra.mxu0 %v2418_v25  ;;  %6791 = vmatpush3.bf16.xpose.msra.mxu1 %v2464_v26  ;;  %v7294_v25 = vpop.permute.xlu1 %7293  ;;  %v7300_v26 = vunpack.i.l.bf16 %v7299_v22 }
 0x275   : > { %6786 = vmatprep.mubr.msk.bf16.mxu0 %vm8020_vm0, %v9555_v4  ;;  %6792 = vmatprep.mubr.msk.bf16.mxu1 %vm8020_vm0, %v9555_v4  ;;  %v2786_v27 = vsel %vm1585_vm1, %v1431_v21, 0  ;;  %v2832_v28 = vsel %vm1585_vm1, %v1432_v20, 0  ;;  %v7296_v33 = vunpack.i.h.bf16 %v7294_v25  ;;  %v7295_v36 = vunpack.i.l.bf16 %v7294_v25 }
 0x276   : > { %6796 = vmatprep.subr.bf16.mxu0 %v9555_v4  ;;  %6802 = vmatprep.subr.bf16.mxu1 %v9555_v4  ;;  %v1436_v6 = vpack.c.bf16 %v7311_v46, %v7311_v46  ;;  %v1435_v7 = vpack.c.bf16 %v7310_v49, %v7310_v49 }
 0x277   : > { %v1284_v39 = vpack.c.bf16 %v7296_v33, %v7296_v33  ;;  %v1283_v41 = vpack.c.bf16 %v7295_v36, %v7295_v36 }
 0x278   : > { %v3016_v18 = vsel %vm1585_vm1, %v1436_v6, 0 }
 0x27b   : > { %6787 = vmatmul.mubr.msk.bf16.vlgmr.msra.gmra.mxu0 %vm1585_vm1, %v1275_v38  ;;  %6793 = vmatmul.mubr.msk.bf16.vlgmr.msra.gmra.mxu1 %vm1585_vm1, %v1276_v37  ;;  %v1433_v37 = vpack.c.bf16 %v7300_v26, %v7300_v26  ;;  %v1434_v38 = vpack.c.bf16 %v7301_v32, %v7301_v32  ;;  %v1553_v26 = vpack.c.bf16 %v8562_v48, %v8562_v48 }
 0x27c   : > { %6797 = vmatpush3.bf16.xpose.msra.mxu0 %v2510_v43  ;;  %6803 = vmatpush3.bf16.xpose.msra.mxu1 %v2556_v44  ;;  %v7304_v43 = vpop.permute.xlu1 %7303 }
 0x27d   : > { %6798 = vmatprep.mubr.msk.bf16.mxu0 %vm8020_vm0, %v9555_v4  ;;  %6804 = vmatprep.mubr.msk.bf16.mxu1 %vm8020_vm0, %v9555_v4  ;;  %v2878_v45 = vsel %vm1585_vm1, %v1433_v37, 0  ;;  %v7306_v0 = vunpack.i.h.bf16 %v7304_v43  ;;  %v3449_v48 = vsel %vm3447_vm3, %v1553_v26, 0 }
 0x27e   : > { %6808 = vmatprep.subr.bf16.mxu0 %v9555_v4  ;;  %6814 = vmatprep.subr.bf16.mxu1 %v9555_v4 }
 0x280   : > { %v7314_v13 = vpop.permute.xlu1 %7313 }
 0x281   : > { %v7316_v20 = vunpack.i.h.bf16 %v7314_v13  ;;  %v7315_v21 = vunpack.i.l.bf16 %v7314_v13 }
 0x283   : > { %6799 = vmatmul.mubr.msk.bf16.vlgmr.msra.gmra.mxu0 %vm1585_vm1, %v1277_v55  ;;  %6805 = vmatmul.mubr.msk.bf16.vlgmr.msra.gmra.mxu1 %vm1585_vm1, %v1278_v52  ;;  %v2924_v52 = vsel %vm1585_vm1, %v1434_v38, 0  ;;  %v7305_v55 = vunpack.i.l.bf16 %v7304_v43  ;;  %v1288_v32 = vpack.c.bf16 %v7316_v20, %v7316_v20  ;;  %v1287_v33 = vpack.c.bf16 %v7315_v21, %v7315_v21 }
 0x284   : > { %6809 = vmatpush3.bf16.xpose.msra.mxu0 %v2602_v2  ;;  %6815 = vmatpush3.bf16.xpose.msra.mxu1 %v2648_v5 }
 0x285   : > { %6810 = vmatprep.mubr.msk.bf16.mxu0 %vm8020_vm0, %v9555_v4  ;;  %6816 = vmatprep.mubr.msk.bf16.mxu1 %vm8020_vm0, %v9555_v4  ;;  %v1285_v9 = vpack.c.bf16 %v7305_v55, %v7305_v55 }
 0x286   : > { %6820 = vmatprep.subr.bf16.mxu0 %v9555_v4  ;;  %6826 = vmatprep.subr.bf16.mxu1 %v9555_v4 }
 0x28b   : > { %6811 = vmatmul.mubr.msk.bf16.vlgmr.msra.gmra.mxu0 %vm1585_vm1, %v1279_v12  ;;  %6817 = vmatmul.mubr.msk.bf16.vlgmr.msra.gmra.mxu1 %vm1585_vm1, %v1280_v11  ;;  %v1286_v11 = vpack.c.bf16 %v7306_v0, %v7306_v0 }
 0x28c   : > { %6821 = vmatpush3.bf16.xpose.msra.mxu0 %v2694_v16  ;;  %6827 = vmatpush3.bf16.xpose.msra.mxu1 %v2740_v17  ;;  %v2970_v17 = vsel %vm1585_vm1, %v1435_v7, 0 }
 0x28d   : > { %6822 = vmatprep.mubr.msk.bf16.mxu0 %vm8020_vm0, %v9555_v4  ;;  %6828 = vmatprep.mubr.msk.bf16.mxu1 %vm8020_vm0, %v9555_v4 }
 0x28e   : > { %6832 = vmatprep.subr.bf16.mxu0 %v9555_v4  ;;  %6838 = vmatprep.subr.bf16.mxu1 %v9555_v4 }
 0x293   : > { %6823 = vmatmul.mubr.msk.bf16.vlgmr.msra.gmra.mxu0 %vm1585_vm1, %v1281_v24  ;;  %6829 = vmatmul.mubr.msk.bf16.vlgmr.msra.gmra.mxu1 %vm1585_vm1, %v1282_v23 }
 0x294   : > { %6833 = vmatpush3.bf16.xpose.msra.mxu0 %v2786_v27  ;;  %6839 = vmatpush3.bf16.xpose.msra.mxu1 %v2832_v28  ;;  %v1554_v28 = vpack.c.bf16 %v8582_v54, %v8582_v54 }
 0x295   : > { %6834 = vmatprep.mubr.msk.bf16.mxu0 %vm8020_vm0, %v9555_v4  ;;  %6840 = vmatprep.mubr.msk.bf16.mxu1 %vm8020_vm0, %v9555_v4 }
 0x296   : > { %6844 = vmatprep.subr.bf16.mxu0 %v9555_v4  ;;  %6850 = vmatprep.subr.bf16.mxu1 %v9555_v4 }
 0x299   : > { %v8726_v44 = vpop.f32.mrf.mxu1 }
 0x29a   : > { %v3059_v31 = vsel %vm3058_vm2, %v8726_v44, -inf }
 0x29b   : > { %6835 = vmatmul.mubr.msk.bf16.vlgmr.msra.gmra.mxu0 %vm1585_vm1, %v1283_v41  ;;  %6841 = vmatmul.mubr.msk.bf16.vlgmr.msra.gmra.mxu1 %vm1585_vm1, %v1284_v39  ;;  %v6680_v50 = vpop.f32.mrf.mxu1  ;;  %v3495_v41 = vsel %vm3447_vm3, %v1554_v28, 0 }
 0x29c   : > { %3060 = vmax.xlane.f32.xlu0 %v3059_v31  ;;  %6845 = vmatpush3.bf16.xpose.msra.mxu0 %v2878_v45 }
 0x29d   : > { %6851 = vmatpush3.bf16.xpose.msra.mxu1 %v2924_v52  ;;  %v8734_v63 = vpop.f32.mrf.mxu0  ;;  %6846 = vmatprep.mubr.msk.bf16.mxu0 %vm8020_vm0, %v9555_v4  ;;  %v1629_v1 = vpop.f32.mrf.mxu1 }
 0x29e   : > { %v3071_v2 = vsel %vm3058_vm2, %v8734_v63, -inf  ;;  %6852 = vmatprep.mubr.msk.bf16.mxu1 %vm8020_vm0, %v9555_v4  ;;  %6856 = vmatprep.subr.bf16.mxu0 %v9555_v4 }
 0x29f   : > { %v6704_v5 = vpop.f32.mrf.mxu0  ;;  %3072 = vmax.xlane.f32.xlu1 %v3071_v2  ;;  %6862 = vmatprep.subr.bf16.mxu1 %v9555_v4  ;;  %v6681_v8 = vpop.f32.mrf.mxu1 }
 0x2a1   : > { %v1813_v10 = vpop.f32.mrf.mxu0  ;;  %v8744_v12 = vpop.f32.mrf.mxu1 }
 0x2a2   : > { %v3062_v15 = vsel %vm3058_vm2, %v8744_v12, -inf }
 0x2a3   : > { %6847 = vmatmul.mubr.msk.bf16.vlgmr.msra.gmra.mxu0 %vm1585_vm1, %v1285_v9  ;;  %v6705_v14 = vpop.f32.mrf.mxu0  ;;  %v6686_v16 = vpop.f32.mrf.mxu1  ;;  %3063 = vmax.xlane.f32.xlu1 %v3062_v15 }
 0x2a4   : > { %6853 = vmatmul.mubr.msk.bf16.vlgmr.msra.gmra.mxu1 %vm1585_vm1, %v1286_v11  ;;  %6857 = vmatpush3.bf16.xpose.msra.mxu0 %v2970_v17  ;;  %v8794_v9 = vpop.permute.xlu1 %7318 }
 0x2a5   : > { %6863 = vmatpush3.bf16.xpose.msra.mxu1 %v3016_v18  ;;  %v8752_v19 = vpop.f32.mrf.mxu0  ;;  %v1675_v22 = vpop.f32.mrf.mxu1  ;;  %6858 = vmatprep.mubr.msk.bf16.mxu0 %vm8020_vm0, %v9555_v4 }
 0x2a6   : > { %v3077_v23 = vsel %vm3058_vm2, %v8752_v19, -inf  ;;  %6864 = vmatprep.mubr.msk.bf16.mxu1 %vm8020_vm0, %v9555_v4  ;;  %6868 = vmatprep.subr.bf16.mxu0 %v9555_v4 }
 0x2a7   : > { %v6716_v24 = vpop.f32.mrf.mxu0  ;;  %6874 = vmatprep.subr.bf16.mxu1 %v9555_v4  ;;  %v6687_v25 = vpop.f32.mrf.mxu1  ;;  %3078 = vmax.xlane.f32.xlu1 %v3077_v23 }
 0x2a8   : > { %v8804_v20 = vpop.permute.xlu1 %7328 }
 0x2a9   : > { %v1905_v27 = vpop.f32.mrf.mxu0  ;;  %v8766_v36 = vpop.f32.mrf.mxu1 }
 0x2aa   : > { %v3065_v38 = vsel %vm3058_vm2, %v8766_v36, -inf }
 0x2ab   : > { %v6717_v37 = vpop.f32.mrf.mxu0  ;;  %6859 = vmatmul.mubr.msk.bf16.vlgmr.msra.gmra.mxu0 %vm1585_vm1, %v1287_v33  ;;  %v6692_v39 = vpop.f32.mrf.mxu1  ;;  %3066 = vmax.xlane.f32.xlu0 %v3065_v38 }
 0x2ac   : > { %6865 = vmatmul.mubr.msk.bf16.vlgmr.msra.gmra.mxu1 %vm1585_vm1, %v1288_v32  ;;  %6869 = vmatpush3.bf16.msra.mxu0 %v3449_v48  ;;  %v8814_v32 = vpop.permute.xlu1 %7333 }
 0x2ad   : > { %6875 = vmatpush3.bf16.msra.mxu1 %v3495_v41  ;;  %v1721_v54 = vpop.f32.mrf.mxu1  ;;  %6876 = vmatprep.mubr.msk.bf16.mxu1 %vm8020_vm0, %v9555_v4 }
 0x2ae   : > { %6886 = vmatprep.subr.bf16.mxu1 %v9555_v4  ;;  %6870 = vmatprep.mubr.msk.bf16.mxu0 %vm8020_vm0, %v9555_v4 }
 0x2af   : > { %v6693_v42 = vpop.f32.mrf.mxu1  ;;  %6880 = vmatprep.subr.bf16.mxu0 %v9555_v4 }
 0x2b0   : > { %v8820_v54 = vpop.permute.xlu1 %7343 }
 0x2b1   : > { %v8780_v43 = vpop.f32.mrf.mxu1 }
 0x2b2   : > { %v3068_v31 = vsel %vm3058_vm2, %v8780_v43, -inf }
 0x2b3   : > { %3069 = vmax.xlane.f32.xlu0 %v3068_v31  ;;  %v6698_v45 = vpop.f32.mrf.mxu1 }
 0x2b5   : > { %v1767_v46 = vpop.f32.mrf.mxu1 }
 0x2b7   : > { %v6699_v49 = vpop.f32.mrf.mxu1 }
 0x2b9   : > { %v8784_v50 = vpop.f32.mrf.mxu1 }
 0x2ba   : > { %v3074_v52 = vsel %vm3058_vm2, %v8784_v50, -inf }
 0x2bb   : > { %3075 = vmax.xlane.f32.xlu0 %v3074_v52  ;;  %v6710_v55 = vpop.f32.mrf.mxu1 }
 0x2bd   : > { %v1859_v0 = vpop.f32.mrf.mxu1 }
 0x2bf   : > { %v6711_v1 = vpop.f32.mrf.mxu1 }
 0x2c1   : > { %v8788_v2 = vpop.f32.mrf.mxu1 }
 0x2c2   : > { %v3080_v5 = vsel %vm3058_vm2, %v8788_v2, -inf }
 0x2c3   : > { %3081 = vmax.xlane.f32.xlu0 %v3080_v5  ;;  %v6722_v6 = vpop.f32.mrf.mxu1 }
 0x2c4   : > { %v8830_v6 = vpop.permute.xlu0 %7323 }
 0x2c5   : > { %v1951_v7 = vpop.f32.mrf.mxu1 }
 0x2c7   : > { %v6723_v8 = vpop.f32.mrf.mxu1 }
 0x2d9   : > { %7348 = vrot.lane.b32.xlu0 %v8614_v60, %s8023_s2 }
 0x313   : > { %v8796_v10 = vpop.f32.mrf.mxu0  ;;  %v8798_v11 = vpop.f32.mrf.mxu1 }
 0x314   : > { %v3083_v13 = vsel %vm3058_vm2, %v8796_v10, -inf  ;;  %v3086_v14 = vsel %vm3058_vm2, %v8798_v11, -inf }
 0x315   : > { %v6728_v15 = vpop.f32.mrf.mxu0  ;;  %3084 = vmax.xlane.f32.xlu1 %v3083_v13  ;;  %3087 = vmax.xlane.f32.xlu0 %v3086_v14  ;;  %v6734_v16 = vpop.f32.mrf.mxu1 }
 0x317   : > { %v1997_v17 = vpop.f32.mrf.mxu0  ;;  %v2043_v18 = vpop.f32.mrf.mxu1 }
 0x319   : > { %v6729_v21 = vpop.f32.mrf.mxu0  ;;  %v6735_v22 = vpop.f32.mrf.mxu1 }
 0x31b   : > { %v8806_v23 = vpop.f32.mrf.mxu0  ;;  %v8808_v24 = vpop.f32.mrf.mxu1 }
 0x31c   : > { %v3089_v25 = vsel %vm3058_vm2, %v8806_v23, -inf  ;;  %v3092_v26 = vsel %vm3058_vm2, %v8808_v24, -inf }
 0x31d   : > { %3090 = vmax.xlane.f32.xlu1 %v3089_v25  ;;  %v6740_v27 = vpop.f32.mrf.mxu0  ;;  %3093 = vmax.xlane.f32.xlu0 %v3092_v26  ;;  %v6746_v28 = vpop.f32.mrf.mxu1 }
 0x31e   : > { %v8839_v25 = vpop.permute.xlu0 %7338 }
 0x31f   : > { %v2089_v33 = vpop.f32.mrf.mxu0  ;;  %v2135_v37 = vpop.f32.mrf.mxu1 }
 0x321   : > { %v6741_v38 = vpop.f32.mrf.mxu0  ;;  %v6747_v39 = vpop.f32.mrf.mxu1 }
 0x323   : > { %v8816_v48 = vpop.f32.mrf.mxu0  ;;  %v8818_v41 = vpop.f32.mrf.mxu1 }
 0x324   : > { %v3095_v42 = vsel %vm3058_vm2, %v8816_v48, -inf  ;;  %v3098_v31 = vsel %vm3058_vm2, %v8818_v41, -inf }
 0x325   : > { %3096 = vmax.xlane.f32.xlu1 %v3095_v42  ;;  %v6752_v45 = vpop.f32.mrf.mxu0  ;;  %3099 = vmax.xlane.f32.xlu0 %v3098_v31  ;;  %v6758_v46 = vpop.f32.mrf.mxu1 }
 0x326   : > { %v3061_v39 = vpop.xlane.xlu0 %3060 }
 0x327   : > { %v2181_v49 = vpop.f32.mrf.mxu0  ;;  %v2227_v52 = vpop.f32.mrf.mxu1 }
 0x328   : > { %v8826_v55 = vpop.xlane.xlu1 %3072 }
 0x329   : > { %v6753_v0 = vpop.f32.mrf.mxu0  ;;  %v6759_v1 = vpop.f32.mrf.mxu1 }
 0x32b   : > { %v8828_v5 = vpop.f32.mrf.mxu0  ;;  %v8832_v7 = vpop.f32.mrf.mxu1 }
 0x32c   : > { %v3101_v8 = vsel %vm3058_vm2, %v8828_v5, -inf  ;;  %v3104_v14 = vsel %vm3058_vm2, %v8832_v7, -inf  ;;  %v3064_v15 = vpop.xlane.xlu1 %3063 }
 0x32d   : > { %3102 = vmax.xlane.f32.xlu1 %v3101_v8  ;;  %v6764_v13 = vpop.f32.mrf.mxu0  ;;  %3105 = vmax.xlane.f32.xlu0 %v3104_v14  ;;  %v6770_v16 = vpop.f32.mrf.mxu1  ;;  %v3156_v21 = vsub.f32 %v8744_v12, %v3064_v15 }
 0x32f   : > { %v2273_v17 = vpop.f32.mrf.mxu0  ;;  %v2319_v18 = vpop.f32.mrf.mxu1  ;;  %v3189_v33 = vmul.f32 1.442695, %v3156_v21 }
 0x331   : > { %v6765_v22 = vpop.f32.mrf.mxu0  ;;  %v6771_v26 = vpop.f32.mrf.mxu1  ;;  %7499 = vpow2.f32 %v3189_v33 }
 0x333   : > { %v8841_v27 = vpop.f32.mrf.mxu0  ;;  %v8843_v28 = vpop.f32.mrf.mxu1 }
 0x334   : > { %v3110_v38 = vsel %vm3058_vm2, %v8843_v28, -inf  ;;  %v8847_v46 = vpop.xlane.xlu0 %3066 }
 0x335   : > { %v6776_v37 = vpop.f32.mrf.mxu0  ;;  %3111 = vmax.xlane.f32.xlu0 %v3110_v38  ;;  %v6782_v42 = vpop.f32.mrf.mxu1 }
 0x337   : > { %v2365_v31 = vpop.f32.mrf.mxu0  ;;  %v2411_v45 = vpop.f32.mrf.mxu1 }
 0x339   : > { %v6777_v12 = vpop.f32.mrf.mxu0  ;;  %v6783_v49 = vpop.f32.mrf.mxu1 }
 0x33b   : > { %v8849_v52 = vpop.f32.mrf.mxu0  ;;  %v8851_v0 = vpop.f32.mrf.mxu1 }
 0x33c   : > { %v3116_v8 = vsel %vm3058_vm2, %v8851_v0, -inf  ;;  %v3070_v13 = vpop.xlane.xlu0 %3069 }
 0x33d   : > { %v6788_v1 = vpop.f32.mrf.mxu0  ;;  %3117 = vmax.xlane.f32.xlu0 %v3116_v8  ;;  %v6794_v14 = vpop.f32.mrf.mxu1  ;;  %v3158_v17 = vsub.f32 %v8780_v43, %v3070_v13 }
 0x33e   : > { %7353 = vrot.lane.b32.xlu1 %v8626_v62, %s8023_s2  ;;  %v8864_v42 = vpop.eup %7499 }
 0x33f   : > { %v2457_v15 = vpop.f32.mrf.mxu0  ;;  %v2503_v16 = vpop.f32.mrf.mxu1  ;;  %v3193_v33 = vmul.f32 1.442695, %v3158_v17  ;;  %v3254_v8 = vsel %vm3058_vm2, %v8864_v42, 0.0 }
 0x341   : > { %v6789_v18 = vpop.f32.mrf.mxu0  ;;  %v6795_v21 = vpop.f32.mrf.mxu1  ;;  %7501 = vpow2.f32 %v3193_v33 }
 0x343   : > { %v8858_v22 = vpop.f32.mrf.mxu0  ;;  %v8860_v26 = vpop.f32.mrf.mxu1 }
 0x344   : > { %v3122_v38 = vsel %vm3058_vm2, %v8860_v26, -inf  ;;  %v3076_v31 = vpop.xlane.xlu0 %3075 }
 0x345   : > { %v6800_v37 = vpop.f32.mrf.mxu0  ;;  %3123 = vmax.xlane.f32.xlu0 %v3122_v38  ;;  %v6806_v45 = vpop.f32.mrf.mxu1  ;;  %v3160_v43 = vsub.f32 %v8784_v50, %v3076_v31  ;;  %v3155_v50 = vsub.f32 %v8726_v44, %v3061_v39 }
 0x347   : > { %v2549_v12 = vpop.f32.mrf.mxu0  ;;  %v2595_v49 = vpop.f32.mrf.mxu1  ;;  %v3197_v16 = vmul.f32 1.442695, %v3160_v43 }
 0x349   : > { %v6801_v1 = vpop.f32.mrf.mxu0  ;;  %3255 = vadd.xlane.f32.xlu0 %v3254_v8  ;;  %v6807_v13 = vpop.f32.mrf.mxu1  ;;  %7503 = vpow2.f32 %v3197_v16  ;;  %v3159_v8 = vsub.f32 %v8734_v63, %v8826_v55 }
 0x34a   : > { %v3187_v1 = vmul.f32 1.442695, %v3155_v50  ;;  %v3079_v50 = vpop.xlane.xlu1 %3078 }
 0x34b   : > { %v8869_v14 = vpop.f32.mrf.mxu0  ;;  %v8871_v15 = vpop.f32.mrf.mxu1 }
 0x34c   : > { %v3128_v18 = vsel %vm3058_vm2, %v8871_v15, -inf  ;;  %v3082_v21 = vpop.xlane.xlu0 %3081  ;;  %7505 = vpow2.f32 %v3187_v1 }
 0x34d   : > { %v6812_v17 = vpop.f32.mrf.mxu0  ;;  %3129 = vmax.xlane.f32.xlu0 %v3128_v18  ;;  %v6818_v33 = vpop.f32.mrf.mxu1  ;;  %v3162_v31 = vsub.f32 %v8788_v2, %v3082_v21  ;;  %v3195_v21 = vmul.f32 1.442695, %v3159_v8 }
 0x34e   : > { %v8885_v44 = vpop.eup %7501 }
 0x34f   : > { %v2641_v37 = vpop.f32.mrf.mxu0  ;;  %v2687_v38 = vpop.f32.mrf.mxu1  ;;  %v3201_v13 = vmul.f32 1.442695, %v3162_v31  ;;  %v3161_v31 = vsub.f32 %v8752_v19, %v3079_v50  ;;  %v3157_v50 = vsub.f32 %v8766_v36, %v8847_v46 }
 0x350   : > { %v3260_v37 = vsel %vm3058_vm2, %v8885_v44, 0.0 }
 0x351   : > { %v6813_v45 = vpop.f32.mrf.mxu0  ;;  %v6819_v12 = vpop.f32.mrf.mxu1  ;;  %7507 = vpow2.f32 %v3201_v13 }
 0x352   : > { %7509 = vpow2.f32 %v3195_v21 }
 0x353   : > { %v8877_v49 = vpop.f32.mrf.mxu0  ;;  %v8879_v43 = vpop.f32.mrf.mxu1 }
 0x354   : > { %v3134_v18 = vsel %vm3058_vm2, %v8879_v43, -inf }
 0x355   : > { %v6824_v17 = vpop.f32.mrf.mxu0  ;;  %3135 = vmax.xlane.f32.xlu0 %v3134_v18  ;;  %v6830_v39 = vpop.f32.mrf.mxu1  ;;  %v3199_v18 = vmul.f32 1.442695, %v3161_v31 }
 0x356   : > { %v8896_v1 = vpop.eup %7503 }
 0x357   : > { %v2733_v2 = vpop.f32.mrf.mxu0  ;;  %v2779_v16 = vpop.f32.mrf.mxu1  ;;  %7511 = vpow2.f32 %v3199_v18 }
 0x358   : > { %v3266_v2 = vsel %vm3058_vm2, %v8896_v1, 0.0  ;;  %v3107_v16 = vsel %vm3058_vm2, %v8841_v27, -inf }
 0x359   : > { %v6825_v33 = vpop.f32.mrf.mxu0  ;;  %3261 = vadd.xlane.f32.xlu0 %v3260_v37  ;;  %v6831_v63 = vpop.f32.mrf.mxu1 }
 0x35a   : > { %v8906_v37 = vpop.eup %7505 }
 0x35b   : > { %v8889_v55 = vpop.f32.mrf.mxu0  ;;  %v8891_v38 = vpop.f32.mrf.mxu1  ;;  %v3251_v36 = vsel %vm3058_vm2, %v8906_v37, 0.0 }
 0x35c   : > { %v3140_v12 = vsel %vm3058_vm2, %v8891_v38, -inf }
 0x35d   : > { %v6836_v45 = vpop.f32.mrf.mxu0  ;;  %3141 = vmax.xlane.f32.xlu0 %v3140_v12  ;;  %v6842_v8 = vpop.f32.mrf.mxu1 }
 0x35e   : > { %v3113_v45 = vsel %vm3058_vm2, %v8849_v52, -inf  ;;  %v8914_v12 = vpop.eup %7507 }
 0x35f   : > { %v2825_v13 = vpop.f32.mrf.mxu0  ;;  %v2871_v17 = vpop.f32.mrf.mxu1  ;;  %v3272_v18 = vsel %vm3058_vm2, %v8914_v12, 0.0 }
 0x360   : > { %v8920_v46 = vpop.eup %7509 }
 0x361   : > { %v6837_v39 = vpop.f32.mrf.mxu0  ;;  %3267 = vadd.xlane.f32.xlu0 %v3266_v2  ;;  %v6843_v19 = vpop.f32.mrf.mxu1 }
 0x362   : > { %3108 = vmax.xlane.f32.xlu1 %v3107_v16  ;;  %v3191_v39 = vmul.f32 1.442695, %v3157_v50 }
 0x363   : > { %v8902_v21 = vpop.f32.mrf.mxu0 }
 0x364   : > { %v8904_v33 = vpop.f32.mrf.mxu1  ;;  %7513 = vpow2.f32 %v3191_v39 }
 0x365   : > { %v6848_v63 = vpop.f32.mrf.mxu0  ;;  %v3146_v31 = vsel %vm3058_vm2, %v8904_v33, -inf }
 0x366   : > { %3147 = vmax.xlane.f32.xlu0 %v3146_v31  ;;  %v6854_v8 = vpop.f32.mrf.mxu1  ;;  %3114 = vmax.xlane.f32.xlu1 %v3113_v45  ;;  %v3263_v31 = vsel %vm3058_vm2, %v8920_v46, 0.0 }
 0x367   : > { %v2917_v13 = vpop.f32.mrf.mxu0 }
 0x368   : > { %v2963_v17 = vpop.f32.mrf.mxu1 }
 0x369   : > { %v6849_v2 = vpop.f32.mrf.mxu0 }
 0x36a   : > { %3273 = vadd.xlane.f32.xlu0 %v3272_v18  ;;  %v6855_v16 = vpop.f32.mrf.mxu1  ;;  %3252 = vadd.xlane.f32.xlu1 %v3251_v36  ;;  %v3119_v2 = vsel %vm3058_vm2, %v8858_v22, -inf  ;;  %v8932_v18 = vpop.eup %7511 }
 0x36b   : > { %v8922_v19 = vpop.f32.mrf.mxu0  ;;  %v3269_v39 = vsel %vm3058_vm2, %v8932_v18, 0.0 }
 0x36c   : > { %v8924_v63 = vpop.f32.mrf.mxu1 }
 0x36d   : > { %v3152_v50 = vsel %vm3058_vm2, %v8924_v63, -inf  ;;  %v6860_v45 = vpop.f32.mrf.mxu0 }
 0x36e   : > { %3153 = vmax.xlane.f32.xlu0 %v3152_v50  ;;  %v6866_v8 = vpop.f32.mrf.mxu1  ;;  %3264 = vadd.xlane.f32.xlu1 %v3263_v31  ;;  %v3125_v45 = vsel %vm3058_vm2, %v8869_v14, -inf }
 0x36f   : > { %v3009_v13 = vpop.f32.mrf.mxu0  ;;  %v3131_v8 = vsel %vm3058_vm2, %v8877_v49, -inf }
 0x370   : > { %v3055_v17 = vpop.f32.mrf.mxu1  ;;  %v3137_v13 = vsel %vm3058_vm2, %v8889_v55, -inf }
 0x371   : > { %v6861_v36 = vpop.f32.mrf.mxu0  ;;  %v8938_v50 = vpop.eup %7513  ;;  %v3143_v17 = vsel %vm3058_vm2, %v8902_v21, -inf }
 0x372   : > { %v6867_v16 = vpop.f32.mrf.mxu1  ;;  %3120 = vmax.xlane.f32.xlu1 %v3119_v2  ;;  %v3257_v31 = vsel %vm3058_vm2, %v8938_v50, 0.0  ;;  %v3149_v2 = vsel %vm3058_vm2, %v8922_v19, -inf  ;;  %v8950_v36 = vpop.permute.xlu0 %7348 }
 0x373   : > { %9602 = vst [vmem:[#allocation33_spill] sm:$0xff] %v8950_v36 }
 0x376   : > { %3270 = vadd.xlane.f32.xlu1 %v3269_v39 }
 0x37a   : > { %3126 = vmax.xlane.f32.xlu1 %v3125_v45 }
 0x37e   : > { %3258 = vadd.xlane.f32.xlu1 %v3257_v31 }
 0x382   : > { %3132 = vmax.xlane.f32.xlu1 %v3131_v8 }
 0x386   : > { %3138 = vmax.xlane.f32.xlu1 %v3137_v13 }
 0x38a   : > { %3144 = vmax.xlane.f32.xlu1 %v3143_v17 }
 0x38e   : > { %3150 = vmax.xlane.f32.xlu1 %v3149_v2 }
 0x39e   : > { %v3085_v16 = vpop.xlane.xlu1 %3084  ;;  %v3088_v39 = vpop.xlane.xlu0 %3087 }
 0x39f   : > { %v3163_v45 = vsub.f32 %v8796_v10, %v3085_v16  ;;  %v3164_v31 = vsub.f32 %v8798_v11, %v3088_v39 }
 0x3a1   : > { %v3203_v8 = vmul.f32 1.442695, %v3163_v45  ;;  %v3205_v34 = vmul.f32 1.442695, %v3164_v31 }
 0x3a3   : > { %7515 = vpow2.f32 %v3203_v8 }
 0x3a4   : > { %7517 = vpow2.f32 %v3205_v34 }
 0x3a6   : > { %v3091_v13 = vpop.xlane.xlu1 %3090  ;;  %v3094_v35 = vpop.xlane.xlu0 %3093 }
 0x3a7   : > { %v3165_v17 = vsub.f32 %v8806_v23, %v3091_v13  ;;  %v3166_v30 = vsub.f32 %v8808_v24, %v3094_v35 }
 0x3a9   : > { %v3207_v3 = vmul.f32 1.442695, %v3165_v17  ;;  %v3209_v2 = vmul.f32 1.442695, %v3166_v30 }
 0x3ab   : > { %7519 = vpow2.f32 %v3207_v3 }
 0x3ac   : > { %7521 = vpow2.f32 %v3209_v2 }
 0x3ae   : > { %v3097_v4 = vpop.xlane.xlu1 %3096  ;;  %v3100_v29 = vpop.xlane.xlu0 %3099 }
 0x3af   : > { %v3167_v10 = vsub.f32 %v8816_v48, %v3097_v4  ;;  %v3168_v11 = vsub.f32 %v8818_v41, %v3100_v29 }
 0x3b0   : > { %v8958_v16 = vpop.eup %7515 }
 0x3b1   : > { %v8960_v39 = vpop.eup %7517  ;;  %v3211_v34 = vmul.f32 1.442695, %v3167_v10  ;;  %v3213_v45 = vmul.f32 1.442695, %v3168_v11  ;;  %v3275_v23 = vsel %vm3058_vm2, %v8958_v16, 0.0 }
 0x3b2   : > { %3276 = vadd.xlane.f32.xlu1 %v3275_v23  ;;  %v3278_v3 = vsel %vm3058_vm2, %v8960_v39, 0.0 }
 0x3b3   : > { %7523 = vpow2.f32 %v3211_v34  ;;  %3279 = vadd.xlane.f32.xlu0 %v3278_v3 }
 0x3b4   : > { %7525 = vpow2.f32 %v3213_v45 }
 0x3b6   : > { %v3103_v30 = vpop.xlane.xlu1 %3102  ;;  %v3106_v29 = vpop.xlane.xlu0 %3105 }
 0x3b7   : > { %v3169_v4 = vsub.f32 %v8828_v5, %v3103_v30  ;;  %v3170_v24 = vsub.f32 %v8832_v7, %v3106_v29 }
 0x3b8   : > { %v8967_v35 = vpop.eup %7519 }
 0x3b9   : > { %v8970_v48 = vpop.eup %7521  ;;  %v3215_v41 = vmul.f32 1.442695, %v3169_v4  ;;  %v3281_v31 = vsel %vm3058_vm2, %v8967_v35, 0.0  ;;  %v3217_v8 = vmul.f32 1.442695, %v3170_v24 }
 0x3ba   : > { %3282 = vadd.xlane.f32.xlu1 %v3281_v31  ;;  %v3284_v13 = vsel %vm3058_vm2, %v8970_v48, 0.0 }
 0x3bb   : > { %7527 = vpow2.f32 %v3215_v41  ;;  %3285 = vadd.xlane.f32.xlu0 %v3284_v13 }
 0x3bc   : > { %7529 = vpow2.f32 %v3217_v8 }
 0x3be   : > { %v3112_v5 = vpop.xlane.xlu0 %3111 }
 0x3bf   : > { %v3172_v2 = vsub.f32 %v8843_v28, %v3112_v5 }
 0x3c0   : > { %v8976_v17 = vpop.eup %7523 }
 0x3c1   : > { %v8979_v7 = vpop.eup %7525  ;;  %v3287_v10 = vsel %vm3058_vm2, %v8976_v17, 0.0  ;;  %v3221_v11 = vmul.f32 1.442695, %v3172_v2 }
 0x3c2   : > { %3288 = vadd.xlane.f32.xlu1 %v3287_v10  ;;  %v3290_v34 = vsel %vm3058_vm2, %v8979_v7, 0.0  ;;  %v1556_v10 = vpack.c.bf16 %v8573_v51, %v8573_v51 }
 0x3c3   : > { %3291 = vadd.xlane.f32.xlu0 %v3290_v34  ;;  %7531 = vpow2.f32 %v3221_v11  ;;  %v9002_v34 = vpop.permute.xlu1 %7353 }
 0x3c4   : > { %9603 = vst [vmem:[#allocation34_spill] sm:$0xff] %v9002_v34 }
 0x3c6   : > { %v3118_v28 = vpop.xlane.xlu0 %3117 }
 0x3c7   : > { %v3174_v51 = vsub.f32 %v8851_v0, %v3118_v28 }
 0x3c8   : > { %v8985_v45 = vpop.eup %7527 }
 0x3c9   : > { %v3293_v23 = vsel %vm3058_vm2, %v8985_v45, 0.0  ;;  %v8989_v3 = vpop.eup %7529  ;;  %v3225_v40 = vmul.f32 1.442695, %v3174_v51 }
 0x3ca   : > { %3294 = vadd.xlane.f32.xlu0 %v3293_v23  ;;  %v3296_v30 = vsel %vm3058_vm2, %v8989_v3, 0.0  ;;  %v3587_v23 = vsel %vm3447_vm3, %v1556_v10, 0 }
 0x3ce   : > { %3297 = vadd.xlane.f32.xlu0 %v3296_v30  ;;  %v3124_v4 = vpop.xlane.xlu0 %3123 }
 0x3d0   : > { %v8993_v29 = vpop.eup %7531 }
 0x3d1   : > { %v3302_v24 = vsel %vm3058_vm2, %v8993_v29, 0.0 }
 0x3d2   : > { %v3256_v41 = vpop.xlane.xlu0 %3255  ;;  %3303 = vadd.xlane.f32.xlu0 %v3302_v24  ;;  %v9604_v24 = vmov 0.0  }
 0x3d3   : > { %7533 = vrcp.f32 %v3256_v41 }
 0x3d6   : > { %v3130_v31 = vpop.xlane.xlu0 %3129 }
 0x3de   : > { %v8997_v8 = vpop.xlane.xlu0 %3135 }
 0x3e0   : > { %v7534_v13 = vpop.eup %7533 }
 0x3e1   : > { %v3380_v2 = vmul.f32 %v7534_v13, %v8864_v42  ;;  %v3176_v42 = vsub.f32 %v8860_v26, %v3124_v4 }
 0x3e2   : > { %v3262_v5 = vpop.xlane.xlu0 %3261 }
 0x3e3   : > { %7535 = vrcp.f32 %v3262_v5  ;;  %v3412_v11 = vpack.c.bf16 %v3380_v2, %v3380_v2  ;;  %v3178_v5 = vsub.f32 %v8871_v15, %v3130_v31  ;;  %v3229_v10 = vmul.f32 1.442695, %v3176_v42 }
 0x3e5   : > { %6877 = vmatmul.mubr.msk.bf16.vlgmr.msra.gmra.mxu1 %vm3443_vm4, %v3412_v11  ;;  %v3233_v36 = vmul.f32 1.442695, %v3178_v5 }
 0x3e6   : > { %v9006_v30 = vpop.xlane.xlu0 %3141  ;;  %6887 = vmatpush3.bf16.msra.mxu1 %v3587_v23  ;;  %6888 = vmatprep.mubr.msk.bf16.mxu1 %vm8020_vm0, %v9604_v24 }
 0x3e7   : > { %6898 = vmatprep.subr.bf16.mxu1 %v9604_v24 }
 0x3ea   : > { %v3268_v41 = vpop.xlane.xlu0 %3267 }
 0x3eb   : > { %v3109_v13 = vpop.xlane.xlu1 %3108  ;;  %7537 = vrcp.f32 %v3268_v41 }
 0x3ec   : > { %v3171_v2 = vsub.f32 %v8841_v27, %v3109_v13  ;;  %v1558_v27 = vpack.c.bf16 %v8603_v59, %v8603_v59 }
 0x3ee   : > { %v3219_v11 = vmul.f32 1.442695, %v3171_v2 }
 0x3ef   : > { %v9015_v23 = vpop.xlane.xlu0 %3147  ;;  %v3115_v34 = vpop.xlane.xlu1 %3114 }
 0x3f0   : > { %7539 = vpow2.f32 %v3219_v11  ;;  %v3173_v60 = vsub.f32 %v8849_v52, %v3115_v34  ;;  %v7536_v26 = vpop.eup %7535  ;;  %v3679_v52 = vsel %vm3447_vm3, %v1558_v27, 0 }
 0x3f1   : > { %7541 = vpow2.f32 %v3229_v10  ;;  %v3382_v15 = vmul.f32 %v7536_v26, %v8885_v44  ;;  %v1560_v44 = vpack.c.bf16 %v8618_v61, %v8618_v61  ;;  %v7321_v61 = vunpack.i.h.bf16 %v8794_v9 }
 0x3f2   : > { %v3223_v0 = vmul.f32 1.442695, %v3173_v60  ;;  %7543 = vpow2.f32 %v3225_v40 }
 0x3f3   : > { %v3274_v28 = vpop.xlane.xlu0 %3273  ;;  %v3253_v4 = vpop.xlane.xlu1 %3252  ;;  %7545 = vpow2.f32 %v3233_v36  ;;  %v3414_v31 = vpack.c.bf16 %v3382_v15, %v3382_v15  ;;  %v3771_v2 = vsel %vm3447_vm3, %v1560_v44, 0  ;;  %v1562_v27 = vpack.c.bf16 %v7321_v61, %v7321_v61 }
 0x3f4   : > { %7547 = vpow2.f32 %v3223_v0 }
 0x3f5   : > { %7549 = vrcp.f32 %v3274_v28  ;;  %6889 = vmatmul.mubr.msk.bf16.vlgmr.msra.gmra.mxu1 %vm3443_vm4, %v3414_v31 }
 0x3f6   : > { %7551 = vrcp.f32 %v3253_v4  ;;  %6899 = vmatpush3.bf16.msra.mxu1 %v3679_v52  ;;  %6900 = vmatprep.mubr.msk.bf16.mxu1 %vm8020_vm0, %v9604_v24 }
 0x3f7   : > { %v3265_v34 = vpop.xlane.xlu1 %3264  ;;  %6910 = vmatprep.subr.bf16.mxu1 %v9604_v24 }
 0x3f8   : > { %v7538_v40 = vpop.eup %7537 }
 0x3f9   : > { %v3384_v59 = vmul.f32 %v7538_v40, %v8896_v1 }
 0x3fb   : > { %v3121_v60 = vpop.xlane.xlu1 %3120  ;;  %v3416_v51 = vpack.c.bf16 %v3384_v59, %v3384_v59 }
 0x3fc   : > { %v3175_v36 = vsub.f32 %v8858_v22, %v3121_v60  ;;  %v1555_v60 = vpack.c.bf16 %v8557_v47, %v8557_v47 }
 0x3fd   : > { %v9030_v42 = vpop.eup %7539  ;;  %6901 = vmatmul.mubr.msk.bf16.vlgmr.msra.gmra.mxu1 %vm3443_vm4, %v3416_v51 }
 0x3fe   : > { %v3227_v41 = vmul.f32 1.442695, %v3175_v36  ;;  %v3299_v13 = vsel %vm3058_vm2, %v9030_v42, 0.0  ;;  %v9034_v5 = vpop.eup %7541  ;;  %6911 = vmatpush3.bf16.msra.mxu1 %v3771_v2  ;;  %6912 = vmatprep.mubr.msk.bf16.mxu1 %vm8020_vm0, %v9604_v24  ;;  %v3541_v47 = vsel %vm3447_vm3, %v1555_v60, 0 }
 0x3ff   : > { %v3271_v10 = vpop.xlane.xlu1 %3270  ;;  %3300 = vadd.xlane.f32.xlu1 %v3299_v13  ;;  %v9038_v1 = vpop.eup %7543  ;;  %6922 = vmatprep.subr.bf16.mxu1 %v9604_v24  ;;  %v3314_v26 = vsel %vm3058_vm2, %v9034_v5, 0.0 }
 0x400   : > { %7553 = vpow2.f32 %v3227_v41  ;;  %v9043_v22 = vpop.eup %7545  ;;  %v3308_v13 = vsel %vm3058_vm2, %v9038_v1, 0.0 }
 0x401   : > { %v9046_v11 = vpop.eup %7547  ;;  %v3320_v36 = vsel %vm3058_vm2, %v9043_v22, 0.0 }
 0x402   : > { %v7550_v0 = vpop.eup %7549  ;;  %v3305_v4 = vsel %vm3058_vm2, %v9046_v11, 0.0 }
 0x403   : > { %v3127_v28 = vpop.xlane.xlu1 %3126  ;;  %3315 = vadd.xlane.f32.xlu1 %v3314_v26  ;;  %v7552_v15 = vpop.eup %7551  ;;  %3306 = vadd.xlane.f32.xlu0 %v3305_v4  ;;  %v3386_v52 = vmul.f32 %v7550_v0, %v8914_v12 }
 0x404   : > { %v3177_v31 = vsub.f32 %v8869_v14, %v3127_v28  ;;  %v3379_v40 = vmul.f32 %v7552_v15, %v8906_v37  ;;  %v3863_v14 = vsel %vm3447_vm3, %v1562_v27, 0  ;;  %v1557_v28 = vpack.c.bf16 %v8578_v53, %v8578_v53 }
 0x405   : > { %v3418_v44 = vpack.c.bf16 %v3386_v52, %v3386_v52  ;;  %v1559_v53 = vpack.c.bf16 %v8595_v57, %v8595_v57 }
 0x406   : > { %v3231_v59 = vmul.f32 1.442695, %v3177_v31  ;;  %v3411_v51 = vpack.c.bf16 %v3379_v40, %v3379_v40  ;;  %v3633_v15 = vsel %vm3447_vm3, %v1557_v28, 0  ;;  %v3180_v31 = vsub.f32 %v8879_v43, %v8997_v8 }
 0x407   : > { %v3259_v41 = vpop.xlane.xlu1 %3258  ;;  %3321 = vadd.xlane.f32.xlu1 %v3320_v36  ;;  %6913 = vmatmul.mubr.msk.bf16.vlgmr.msra.gmra.mxu1 %vm3443_vm4, %v3418_v44  ;;  %v3725_v52 = vsel %vm3447_vm3, %v1559_v53, 0  ;;  %v3184_v8 = vsub.f32 %v8904_v33, %v9015_v23 }
 0x408   : > { %7555 = vpow2.f32 %v3231_v59  ;;  %3309 = vadd.xlane.f32.xlu0 %v3308_v13  ;;  %6923 = vmatpush3.bf16.msra.mxu1 %v3863_v14  ;;  %v3237_v60 = vmul.f32 1.442695, %v3180_v31 }
 0x409   : > { %6871 = vmatmul.mubr.msk.bf16.vlgmr.msra.gmra.mxu0 %vm3443_vm4, %v3411_v51  ;;  %7557 = vrcp.f32 %v3259_v41  ;;  %6924 = vmatprep.mubr.msk.bf16.mxu1 %vm8020_vm0, %v9604_v24  ;;  %v3154_v51 = vpop.xlane.xlu0 %3153 }
 0x40a   : > { %6881 = vmatpush3.bf16.msra.mxu0 %v3541_v47  ;;  %6882 = vmatprep.mubr.msk.bf16.mxu0 %vm8020_vm0, %v9604_v24  ;;  %7559 = vrcp.f32 %v3265_v34 }
 0x40b   : > { %6892 = vmatprep.subr.bf16.mxu0 %v9604_v24  ;;  %6934 = vmatprep.subr.bf16.mxu1 %v9604_v24  ;;  %7561 = vrcp.f32 %v3271_v10  ;;  %v3133_v40 = vpop.xlane.xlu1 %3132 }
 0x40c   : > { %7563 = vpow2.f32 %v3237_v60  ;;  %v3179_v23 = vsub.f32 %v8877_v49, %v3133_v40 }
 0x40d   : > { %v9071_v37 = vpop.eup %7553 }
 0x40e   : > { %v3311_v12 = vsel %vm3058_vm2, %v9071_v37, 0.0  ;;  %v3235_v41 = vmul.f32 1.442695, %v3179_v23 }
 0x40f   : > { %3312 = vadd.xlane.f32.xlu0 %v3311_v12  ;;  %v3139_v44 = vpop.xlane.xlu1 %3138 }
 0x410   : > { %v3181_v13 = vsub.f32 %v8889_v55, %v3139_v44 }
 0x413   : > { %v3145_v33 = vpop.xlane.xlu1 %3144 }
 0x414   : > { %v3183_v12 = vsub.f32 %v8902_v21, %v3145_v33 }
 0x415   : > { %v9075_v2 = vpop.eup %7555 }
 0x416   : > { %v7558_v61 = vpop.eup %7557  ;;  %v3317_v26 = vsel %vm3058_vm2, %v9075_v2, 0.0  ;;  %v3243_v49 = vmul.f32 1.442695, %v3183_v12 }
 0x417   : > { %3318 = vadd.xlane.f32.xlu0 %v3317_v26  ;;  %v3381_v0 = vmul.f32 %v7558_v61, %v8938_v50  ;;  %v7560_v4 = vpop.eup %7559  ;;  %v3151_v14 = vpop.xlane.xlu1 %3150 }
 0x418   : > { %7363 = vrot.lane.b32.xlu1 %v8590_v56, %s8024_s14  ;;  %v3383_v50 = vmul.f32 %v7560_v4, %v8920_v46  ;;  %v7562_v27 = vpop.eup %7561  ;;  %v7320_v56 = vunpack.i.l.bf16 %v8794_v9  ;;  %v3182_v9 = vsub.f32 %v8891_v38, %v9006_v30  ;;  %v3245_v38 = vmul.f32 1.442695, %v3184_v8 }
 0x419   : > { %v3413_v34 = vpack.c.bf16 %v3381_v0, %v3381_v0  ;;  %v3385_v57 = vmul.f32 %v7562_v27, %v8932_v18  ;;  %v3186_v18 = vsub.f32 %v8924_v63, %v3154_v51  ;;  %v9115_v47 = vpop.eup %7563  ;;  %v3185_v55 = vsub.f32 %v8922_v19, %v3151_v14 }
 0x41a   : > { %v3415_v10 = vpack.c.bf16 %v3383_v50, %v3383_v50  ;;  %v1561_v46 = vpack.c.bf16 %v7320_v56, %v7320_v56  ;;  %v3241_v43 = vmul.f32 1.442695, %v3182_v9  ;;  %v3326_v63 = vsel %vm3058_vm2, %v9115_v47, 0.0 }
 0x41b   : > { %6883 = vmatmul.mubr.msk.bf16.vlgmr.msra.gmra.mxu0 %vm3443_vm4, %v3413_v34  ;;  %v3417_v59 = vpack.c.bf16 %v3385_v57, %v3385_v57  ;;  %v3249_v30 = vmul.f32 1.442695, %v3186_v18  ;;  %v3247_v21 = vmul.f32 1.442695, %v3185_v55  ;;  %v7325_v19 = vunpack.i.l.bf16 %v8830_v6 }
 0x41c   : > { %6893 = vmatpush3.bf16.msra.mxu0 %v3633_v15  ;;  %6894 = vmatprep.mubr.msk.bf16.mxu0 %vm8020_vm0, %v9604_v24  ;;  %v3817_v36 = vsel %vm3447_vm3, %v1561_v46, 0  ;;  %7565 = vpow2.f32 %v3241_v43  ;;  %v7331_v51 = vunpack.i.h.bf16 %v8804_v20 }
 0x41d   : > { %6904 = vmatprep.subr.bf16.mxu0 %v9604_v24  ;;  %7567 = vpow2.f32 %v3245_v38  ;;  %v1563_v40 = vpack.c.bf16 %v7325_v19, %v7325_v19 }
 0x41e   : > { %7569 = vpow2.f32 %v3249_v30 }
 0x41f   : > { %7571 = vpow2.f32 %v3235_v41  ;;  %v1566_v41 = vpack.c.bf16 %v7331_v51, %v7331_v51  ;;  %v9605_v51 = vld [vmem:[#allocation32_spill] sm:$0xff] }
 0x421   : > { %v4047_v55 = vsel %vm3447_vm3, %v1566_v41, 0 }
 0x423   : > { %6895 = vmatmul.mubr.msk.bf16.vlgmr.msra.gmra.mxu0 %vm3443_vm4, %v3415_v10  ;;  %v7326_v10 = vunpack.i.h.bf16 %v8830_v6 }
 0x424   : > { %6905 = vmatpush3.bf16.msra.mxu0 %v3725_v52  ;;  %6906 = vmatprep.mubr.msk.bf16.mxu0 %vm8020_vm0, %v9604_v24 }
 0x425   : > { %6916 = vmatprep.subr.bf16.mxu0 %v9604_v24  ;;  %v1564_v46 = vpack.c.bf16 %v7326_v10, %v7326_v10 }
 0x429   : > { %v9120_v26 = vpop.eup %7565 }
 0x42a   : > { %v3332_v28 = vsel %vm3058_vm2, %v9120_v26, 0.0  ;;  %v9125_v34 = vpop.eup %7567 }
 0x42b   : > { %6907 = vmatmul.mubr.msk.bf16.vlgmr.msra.gmra.mxu0 %vm3443_vm4, %v3417_v59  ;;  %v3338_v15 = vsel %vm3058_vm2, %v9125_v34, 0.0  ;;  %v9129_v50 = vpop.eup %7569 }
 0x42c   : > { %6917 = vmatpush3.bf16.msra.mxu0 %v3817_v36  ;;  %6918 = vmatprep.mubr.msk.bf16.mxu0 %vm8020_vm0, %v9604_v24  ;;  %v3344_v27 = vsel %vm3058_vm2, %v9129_v50, 0.0  ;;  %v9135_v56 = vpop.eup %7571  ;;  %v7330_v36 = vunpack.i.l.bf16 %v8804_v20 }
 0x42d   : > { %7358 = vrot.lane.b32.xlu0 %v8599_v58, %s8024_s14  ;;  %6928 = vmatprep.subr.bf16.mxu0 %v9604_v24  ;;  %v3239_v58 = vmul.f32 1.442695, %v3181_v13  ;;  %v3323_v9 = vsel %vm3058_vm2, %v9135_v56, 0.0 }
 0x42e   : > { %v1565_v30 = vpack.c.bf16 %v7330_v36, %v7330_v36 }
 0x43b   : > { %v3277_v61 = vpop.xlane.xlu1 %3276 }
 0x43c   : > { %7573 = vrcp.f32 %v3277_v61  ;;  %v3280_v0 = vpop.xlane.xlu0 %3279  ;;  %3327 = vadd.xlane.f32.xlu1 %v3326_v63 }
 0x43d   : > { %7575 = vrcp.f32 %v3280_v0  ;;  %v7335_v0 = vunpack.i.l.bf16 %v8814_v32 }
 0x43e   : > { %7577 = vpow2.f32 %v3239_v58 }
 0x43f   : > { %7579 = vpow2.f32 %v3243_v49  ;;  %v4001_v49 = vsel %vm3447_vm3, %v1565_v30, 0  ;;  %v7345_v30 = vunpack.i.l.bf16 %v8820_v54 }
 0x440   : > { %3333 = vadd.xlane.f32.xlu1 %v3332_v28 }
 0x443   : > { %v3283_v4 = vpop.xlane.xlu1 %3282 }
 0x444   : > { %7581 = vrcp.f32 %v3283_v4  ;;  %v3286_v53 = vpop.xlane.xlu0 %3285  ;;  %3339 = vadd.xlane.f32.xlu1 %v3338_v15  ;;  %v1567_v4 = vpack.c.bf16 %v7335_v0, %v7335_v0  ;;  %v9606_v0 = vld [vmem:[#allocation33_spill] sm:$0xff] }
 0x445   : > { %7583 = vrcp.f32 %v3286_v53 }
 0x446   : > { %7585 = vpow2.f32 %v3247_v21 }
 0x448   : > { %3345 = vadd.xlane.f32.xlu1 %v3344_v27 }
 0x449   : > { %v7574_v31 = vpop.eup %7573 }
 0x44a   : > { %v7576_v52 = vpop.eup %7575  ;;  %v3387_v57 = vmul.f32 %v7574_v31, %v8958_v16  ;;  %v3909_v16 = vsel %vm3447_vm3, %v1563_v40, 0  ;;  %v7340_v31 = vunpack.i.l.bf16 %v8839_v25  ;;  %v7341_v40 = vunpack.i.h.bf16 %v8839_v25 }
 0x44b   : > { %v3289_v60 = vpop.xlane.xlu1 %3288  ;;  %v3388_v59 = vmul.f32 %v7576_v52, %v8960_v39  ;;  %v9141_v6 = vpop.eup %7577  ;;  %v3955_v39 = vsel %vm3447_vm3, %v1564_v46, 0  ;;  %v4093_v52 = vsel %vm3447_vm3, %v1567_v4, 0 }
 0x44c   : > { %7587 = vrcp.f32 %v3289_v60  ;;  %v3292_v43 = vpop.xlane.xlu0 %3291  ;;  %3324 = vadd.xlane.f32.xlu0 %v3323_v9  ;;  %v3419_v8 = vpack.c.bf16 %v3387_v57, %v3387_v57  ;;  %v3329_v38 = vsel %vm3058_vm2, %v9141_v6, 0.0  ;;  %v9151_v18 = vpop.eup %7579  ;;  %v1569_v57 = vpack.c.bf16 %v7340_v31, %v7340_v31 }
 0x44d   : > { %7589 = vrcp.f32 %v3292_v43  ;;  %v3420_v44 = vpack.c.bf16 %v3388_v59, %v3388_v59  ;;  %v3335_v14 = vsel %vm3058_vm2, %v9151_v18, 0.0  ;;  %v1570_v59 = vpack.c.bf16 %v7341_v40, %v7341_v40 }
 0x44e   : > { %6919 = vmatmul.mubr.msk.bf16.vlgmr.msra.gmra.mxu0 %vm3443_vm4, %v3419_v8  ;;  %v4185_v43 = vsel %vm3447_vm3, %v1569_v57, 0 }
 0x44f   : > { %6925 = vmatmul.mubr.msk.bf16.vlgmr.msra.gmra.mxu1 %vm3443_vm4, %v3420_v44  ;;  %6929 = vmatpush3.bf16.msra.mxu0 %v3909_v16  ;;  %v4231_v36 = vsel %vm3447_vm3, %v1570_v59, 0 }
 0x450   : > { %6935 = vmatpush3.bf16.msra.mxu1 %v3955_v39  ;;  %3330 = vadd.xlane.f32.xlu0 %v3329_v38 }
 0x451   : > { %v7582_v33 = vpop.eup %7581  ;;  %6930 = vmatprep.mubr.msk.bf16.mxu0 %vm8020_vm0, %v9604_v24  ;;  %6936 = vmatprep.mubr.msk.bf16.mxu1 %vm8020_vm0, %v9604_v24 }
 0x452   : > { %v7584_v20 = vpop.eup %7583  ;;  %6940 = vmatprep.subr.bf16.mxu0 %v9604_v24  ;;  %6946 = vmatprep.subr.bf16.mxu1 %v9604_v24  ;;  %v3389_v23 = vmul.f32 %v7582_v33, %v8967_v35  ;;  %v7336_v35 = vunpack.i.h.bf16 %v8814_v32 }
 0x453   : > { %v3295_v13 = vpop.xlane.xlu0 %3294  ;;  %v3390_v58 = vmul.f32 %v7584_v20, %v8970_v48  ;;  %v9163_v12 = vpop.eup %7585 }
 0x454   : > { %7591 = vrcp.f32 %v3295_v13  ;;  %3336 = vadd.xlane.f32.xlu0 %v3335_v14  ;;  %v3421_v61 = vpack.c.bf16 %v3389_v23, %v3389_v23  ;;  %v3341_v28 = vsel %vm3058_vm2, %v9163_v12, 0.0  ;;  %v1568_v53 = vpack.c.bf16 %v7336_v35, %v7336_v35 }
 0x455   : > { %v3422_v63 = vpack.c.bf16 %v3390_v58, %v3390_v58  ;;  %v1571_v13 = vpack.c.bf16 %v7345_v30, %v7345_v30 }
 0x456   : > { %6931 = vmatmul.mubr.msk.bf16.vlgmr.msra.gmra.mxu0 %vm3443_vm4, %v3421_v61 }
 0x457   : > { %6937 = vmatmul.mubr.msk.bf16.vlgmr.msra.gmra.mxu1 %vm3443_vm4, %v3422_v63  ;;  %6941 = vmatpush3.bf16.msra.mxu0 %v4001_v49  ;;  %v3298_v48 = vpop.xlane.xlu0 %3297  ;;  %v7350_v49 = vunpack.i.l.bf16 %v9606_v0 }
 0x458   : > { %6947 = vmatpush3.bf16.msra.mxu1 %v4047_v55  ;;  %7593 = vrcp.f32 %v3298_v48  ;;  %3342 = vadd.xlane.f32.xlu0 %v3341_v28  ;;  %v4277_v55 = vsel %vm3447_vm3, %v1571_v13, 0  ;;  %v7351_v48 = vunpack.i.h.bf16 %v9606_v0 }
 0x459   : > { %v7588_v21 = vpop.eup %7587  ;;  %7373 = vrot.lane.b32.xlu1 %v8626_v62, %s8024_s14  ;;  %6942 = vmatprep.mubr.msk.bf16.mxu0 %vm8020_vm0, %v9604_v24  ;;  %v1573_v28 = vpack.c.bf16 %v7350_v49, %v7350_v49 }
 0x45a   : > { %v7590_v32 = vpop.eup %7589  ;;  %6948 = vmatprep.mubr.msk.bf16.mxu1 %vm8020_vm0, %v9604_v24  ;;  %6952 = vmatprep.subr.bf16.mxu0 %v9604_v24  ;;  %v3391_v15 = vmul.f32 %v7588_v21, %v8976_v17  ;;  %v4139_v17 = vsel %vm3447_vm3, %v1568_v53, 0  ;;  %v1574_v21 = vpack.c.bf16 %v7351_v48, %v7351_v48 }
 0x45b   : > { %6958 = vmatprep.subr.bf16.mxu1 %v9604_v24  ;;  %v3392_v19 = vmul.f32 %v7590_v32, %v8979_v7  ;;  %v3304_v10 = vpop.xlane.xlu0 %3303 }
 0x45c   : > { %v3423_v27 = vpack.c.bf16 %v3391_v15, %v3391_v15  ;;  %7595 = vrcp.f32 %v3304_v10  ;;  %v9607_v10 = vld [vmem:[#allocation34_spill] sm:$0xff] }
 0x45d   : > { %v3424_v62 = vpack.c.bf16 %v3392_v19, %v3392_v19  ;;  %v7356_v31 = vunpack.i.h.bf16 %v9607_v10 }
 0x45e   : > { %6943 = vmatmul.mubr.msk.bf16.vlgmr.msra.gmra.mxu0 %vm3443_vm4, %v3423_v27  ;;  %v7355_v27 = vunpack.i.l.bf16 %v9607_v10 }
 0x45f   : > { %6949 = vmatmul.mubr.msk.bf16.vlgmr.msra.gmra.mxu1 %vm3443_vm4, %v3424_v62  ;;  %6953 = vmatpush3.bf16.msra.mxu0 %v4093_v52  ;;  %v4369_v62 = vsel %vm3447_vm3, %v1573_v28, 0  ;;  %v1576_v57 = vpack.c.bf16 %v7356_v31, %v7356_v31 }
 0x460   : > { %6959 = vmatpush3.bf16.msra.mxu1 %v4139_v17  ;;  %6954 = vmatprep.mubr.msk.bf16.mxu0 %vm8020_vm0, %v9604_v24  ;;  %v1575_v17 = vpack.c.bf16 %v7355_v27, %v7355_v27 }
 0x461   : > { %v7592_v7 = vpop.eup %7591  ;;  %6964 = vmatprep.subr.bf16.mxu0 %v9604_v24  ;;  %6960 = vmatprep.mubr.msk.bf16.mxu1 %vm8020_vm0, %v9604_v24 }
 0x462   : > { %v3393_v46 = vmul.f32 %v7592_v7, %v8985_v45  ;;  %6970 = vmatprep.subr.bf16.mxu1 %v9604_v24  ;;  %v7346_v45 = vunpack.i.h.bf16 %v8820_v54 }
 0x464   : > { %v3425_v60 = vpack.c.bf16 %v3393_v46, %v3393_v46  ;;  %v1572_v16 = vpack.c.bf16 %v7346_v45, %v7346_v45  ;;  %v4507_v45 = vsel %vm3447_vm3, %v1576_v57, 0 }
 0x465   : > { %v7594_v9 = vpop.eup %7593 }
 0x466   : > { %6955 = vmatmul.mubr.msk.bf16.vlgmr.msra.gmra.mxu0 %vm3443_vm4, %v3425_v60  ;;  %v3394_v8 = vmul.f32 %v7594_v9, %v8989_v3  ;;  %v4323_v38 = vsel %vm3447_vm3, %v1572_v16, 0 }
 0x467   : > { %6965 = vmatpush3.bf16.msra.mxu0 %v4185_v43  ;;  %6966 = vmatprep.mubr.msk.bf16.mxu0 %vm8020_vm0, %v9604_v24 }
 0x468   : > { %v3426_v44 = vpack.c.bf16 %v3394_v8, %v3394_v8  ;;  %6976 = vmatprep.subr.bf16.mxu0 %v9604_v24 }
 0x469   : > { %v7596_v25 = vpop.eup %7595 }
 0x46a   : > { %6961 = vmatmul.mubr.msk.bf16.vlgmr.msra.gmra.mxu1 %vm3443_vm4, %v3426_v44  ;;  %v3396_v3 = vmul.f32 %v7596_v25, %v8993_v29  ;;  %v4461_v44 = vsel %vm3447_vm3, %v1575_v17, 0 }
 0x46b   : > { %6971 = vmatpush3.bf16.msra.mxu1 %v4231_v36  ;;  %6972 = vmatprep.mubr.msk.bf16.mxu1 %vm8020_vm0, %v9604_v24 }
 0x46c   : > { %6982 = vmatprep.subr.bf16.mxu1 %v9604_v24  ;;  %v3428_v39 = vpack.c.bf16 %v3396_v3, %v3396_v3 }
 0x46e   : > { %7368 = vrot.lane.b32.xlu0 %v9605_v51, %s8024_s14 }
 0x472   : > { %6973 = vmatmul.mubr.msk.bf16.vlgmr.msra.gmra.mxu1 %vm3443_vm4, %v3428_v39 }
 0x473   : > { %6983 = vmatpush3.bf16.msra.mxu1 %v4323_v38  ;;  %6984 = vmatprep.mubr.msk.bf16.mxu1 %vm8020_vm0, %v9604_v24 }
 0x474   : > { %6994 = vmatprep.subr.bf16.mxu1 %v9604_v24 }
 0x488   : > { %v3301_v33 = vpop.xlane.xlu1 %3300 }
 0x489   : > { %7597 = vrcp.f32 %v3301_v33 }
 0x48c   : > { %v3307_v20 = vpop.xlane.xlu0 %3306  ;;  %v3316_v23 = vpop.xlane.xlu1 %3315 }
 0x48d   : > { %7599 = vrcp.f32 %v3307_v20 }
 0x490   : > { %v3322_v35 = vpop.xlane.xlu1 %3321 }
 0x491   : > { %v3310_v29 = vpop.xlane.xlu0 %3309 }
 0x492   : > { %7601 = vrcp.f32 %v3310_v29 }
 0x493   : > { %7603 = vrcp.f32 %v3316_v23 }
 0x494   : > { %v7364_v13 = vpop.permute.xlu1 %7363 }
 0x496   : > { %v7598_v41 = vpop.eup %7597 }
 0x497   : > { %v3395_v14 = vmul.f32 %v7598_v41, %v9030_v42 }
 0x498   : > { %v3313_v58 = vpop.xlane.xlu0 %3312 }
 0x499   : > { %7605 = vrcp.f32 %v3313_v58  ;;  %v3427_v61 = vpack.c.bf16 %v3395_v14, %v3395_v14 }
 0x49a   : > { %v7600_v63 = vpop.eup %7599  ;;  %7607 = vrcp.f32 %v3322_v35 }
 0x49b   : > { %6967 = vmatmul.mubr.msk.bf16.vlgmr.msra.gmra.mxu0 %vm3443_vm4, %v3427_v61  ;;  %v3397_v54 = vmul.f32 %v7600_v63, %v9046_v11  ;;  %v4415_v11 = vsel %vm3447_vm3, %v1574_v21, 0 }
 0x49c   : > { %6977 = vmatpush3.bf16.msra.mxu0 %v4277_v55  ;;  %6978 = vmatprep.mubr.msk.bf16.mxu0 %vm8020_vm0, %v9604_v24 }
 0x49d   : > { %6988 = vmatprep.subr.bf16.mxu0 %v9604_v24  ;;  %v3429_v15 = vpack.c.bf16 %v3397_v54, %v3397_v54 }
 0x49f   : > { %v7602_v42 = vpop.eup %7601 }
 0x4a0   : > { %v3398_v32 = vmul.f32 %v7602_v42, %v9038_v1  ;;  %v3319_v4 = vpop.xlane.xlu0 %3318  ;;  %v7604_v19 = vpop.eup %7603 }
 0x4a1   : > { %7609 = vrcp.f32 %v3319_v4  ;;  %v3400_v52 = vmul.f32 %v7604_v19, %v9034_v5 }
 0x4a2   : > { %v3430_v53 = vpack.c.bf16 %v3398_v32, %v3398_v32  ;;  %v7366_v32 = vunpack.i.h.bf16 %v7364_v13 }
 0x4a3   : > { %6979 = vmatmul.mubr.msk.bf16.vlgmr.msra.gmra.mxu0 %vm3443_vm4, %v3429_v15  ;;  %v3432_v59 = vpack.c.bf16 %v3400_v52, %v3400_v52 }
 0x4a4   : > { %6985 = vmatmul.mubr.msk.bf16.vlgmr.msra.gmra.mxu1 %vm3443_vm4, %v3430_v53  ;;  %6989 = vmatpush3.bf16.msra.mxu0 %v4369_v62  ;;  %v7359_v46 = vpop.permute.xlu0 %7358  ;;  %v1580_v15 = vpack.c.bf16 %v7366_v32, %v7366_v32 }
 0x4a5   : > { %6995 = vmatpush3.bf16.msra.mxu1 %v4415_v11  ;;  %6990 = vmatprep.mubr.msk.bf16.mxu0 %vm8020_vm0, %v9604_v24  ;;  %v9239_v7 = vpop.f32.mrf.mxu1  ;;  %v7360_v8 = vunpack.i.l.bf16 %v7359_v46  ;;  %v7361_v25 = vunpack.i.h.bf16 %v7359_v46 }
 0x4a6   : > { %v7606_v1 = vpop.eup %7605  ;;  %6996 = vmatprep.mubr.msk.bf16.mxu1 %vm8020_vm0, %v9604_v24  ;;  %7000 = vmatprep.subr.bf16.mxu0 %v9604_v24  ;;  %v4691_v31 = vsel %vm3447_vm3, %v1580_v15, 0 }
 0x4a7   : > { %7006 = vmatprep.subr.bf16.mxu1 %v9604_v24  ;;  %v3399_v40 = vmul.f32 %v7606_v1, %v9071_v37  ;;  %v6878_v60 = vpop.f32.mrf.mxu1  ;;  %v7608_v43 = vpop.eup %7607  ;;  %v1577_v16 = vpack.c.bf16 %v7360_v8, %v7360_v8  ;;  %v1578_v39 = vpack.c.bf16 %v7361_v25, %v7361_v25 }
 0x4a8   : > { %v3402_v3 = vmul.f32 %v7608_v43, %v9043_v22  ;;  %v7365_v60 = vunpack.i.l.bf16 %v7364_v13 }
 0x4a9   : > { %v3431_v9 = vpack.c.bf16 %v3399_v40, %v3399_v40  ;;  %v3534_v5 = vpop.f32.mrf.mxu1  ;;  %v4553_v20 = vsel %vm3447_vm3, %v1577_v16, 0  ;;  %v4599_v22 = vsel %vm3447_vm3, %v1578_v39, 0 }
 0x4aa   : > { %v3434_v33 = vpack.c.bf16 %v3402_v3, %v3402_v3  ;;  %v1579_v5 = vpack.c.bf16 %v7365_v60, %v7365_v60 }
 0x4ab   : > { %6991 = vmatmul.mubr.msk.bf16.vlgmr.msra.gmra.mxu0 %vm3443_vm4, %v3431_v9  ;;  %v6879_v36 = vpop.f32.mrf.mxu1 }
 0x4ac   : > { %6997 = vmatmul.mubr.msk.bf16.vlgmr.msra.gmra.mxu1 %vm3443_vm4, %v3432_v59  ;;  %7001 = vmatpush3.bf16.msra.mxu0 %v4461_v44 }
 0x4ad   : > { %7007 = vmatpush3.bf16.msra.mxu1 %v4507_v45  ;;  %7002 = vmatprep.mubr.msk.bf16.mxu0 %vm8020_vm0, %v9604_v24 }
 0x4ae   : > { %v7610_v37 = vpop.eup %7609  ;;  %7008 = vmatprep.mubr.msk.bf16.mxu1 %vm8020_vm0, %v9604_v24  ;;  %7012 = vmatprep.subr.bf16.mxu0 %v9604_v24 }
 0x4af   : > { %7018 = vmatprep.subr.bf16.mxu1 %v9604_v24  ;;  %v3401_v51 = vmul.f32 %v7610_v37, %v9075_v2 }
 0x4b1   : > { %v3433_v38 = vpack.c.bf16 %v3401_v51, %v3401_v51 }
 0x4b3   : > { %7003 = vmatmul.mubr.msk.bf16.vlgmr.msra.gmra.mxu0 %vm3443_vm4, %v3433_v38 }
 0x4b4   : > { %7009 = vmatmul.mubr.msk.bf16.vlgmr.msra.gmra.mxu1 %vm3443_vm4, %v3434_v33  ;;  %7013 = vmatpush3.bf16.msra.mxu0 %v4553_v20 }
 0x4b5   : > { %7019 = vmatpush3.bf16.msra.mxu1 %v4599_v22  ;;  %7020 = vmatprep.mubr.msk.bf16.mxu1 %vm8020_vm0, %v9604_v24  ;;  %v9264_v2 = vpop.f32.mrf.mxu1  ;;  %v4645_v22 = vsel %vm3447_vm3, %v1579_v5, 0 }
 0x4b6   : > { %7030 = vmatprep.subr.bf16.mxu1 %v9604_v24  ;;  %7014 = vmatprep.mubr.msk.bf16.mxu0 %vm8020_vm0, %v9604_v24 }
 0x4b7   : > { %7024 = vmatprep.subr.bf16.mxu0 %v9604_v24  ;;  %v6890_v29 = vpop.f32.mrf.mxu1 }
 0x4b9   : > { %v3626_v30 = vpop.f32.mrf.mxu1 }
 0x4bb   : > { %v6891_v23 = vpop.f32.mrf.mxu1 }
 0x4bd   : > { %v9267_v41 = vpop.f32.mrf.mxu1 }
 0x4bf   : > { %v6902_v14 = vpop.f32.mrf.mxu1 }
 0x4c1   : > { %v3718_v58 = vpop.f32.mrf.mxu1 }
 0x4c3   : > { %v6903_v61 = vpop.f32.mrf.mxu1 }
 0x4c5   : > { %v3328_v63 = vpop.xlane.xlu1 %3327 }
 0x4c6   : > { %7611 = vrcp.f32 %v3328_v63 }
 0x4c7   : > { %v9269_v0 = vpop.f32.mrf.mxu1 }
 0x4c9   : > { %v9271_v49 = vpop.f32.mrf.mxu0  ;;  %v3334_v35 = vpop.xlane.xlu1 %3333 }
 0x4ca   : > { %v6914_v55 = vpop.f32.mrf.mxu1  ;;  %7613 = vrcp.f32 %v3334_v35 }
 0x4cb   : > { %v6872_v48 = vpop.f32.mrf.mxu0 }
 0x4cc   : > { %v3810_v54 = vpop.f32.mrf.mxu1 }
 0x4cd   : > { %v3488_v42 = vpop.f32.mrf.mxu0  ;;  %v3340_v19 = vpop.xlane.xlu1 %3339 }
 0x4ce   : > { %v6915_v28 = vpop.f32.mrf.mxu1 }
 0x4cf   : > { %v6873_v21 = vpop.f32.mrf.mxu0 }
 0x4d1   : > { %v3346_v52 = vpop.xlane.xlu1 %3345 }
 0x4d3   : > { %v7612_v4 = vpop.eup %7611 }
 0x4d4   : > { %v3404_v53 = vmul.f32 %v7612_v4, %v9115_v47 }
 0x4d5   : > { %v3325_v10 = vpop.xlane.xlu0 %3324  ;;  %v7374_v43 = vpop.permute.xlu1 %7373 }
 0x4d6   : > { %v3436_v27 = vpack.c.bf16 %v3404_v53, %v3404_v53  ;;  %7615 = vrcp.f32 %v3325_v10  ;;  %v7376_v37 = vunpack.i.h.bf16 %v7374_v43  ;;  %v7375_v54 = vunpack.i.l.bf16 %v7374_v43 }
 0x4d7   : > { %v7614_v62 = vpop.eup %7613  ;;  %7617 = vrcp.f32 %v3340_v19  ;;  %v9608_v53 = vmov 0  }
 0x4d8   : > { %7021 = vmatmul.mubr.msk.bf16.vlgmr.msra.gmra.mxu1 %vm3443_vm4, %v3436_v27  ;;  %v3406_v1 = vmul.f32 %v7614_v62, %v9120_v26  ;;  %v1583_v4 = vpack.c.bf16 %v7375_v54, %v7375_v54 }
 0x4d9   : > { %7031 = vmatpush3.bf16.msra.mxu1 %v4691_v31  ;;  %v3331_v11 = vpop.xlane.xlu0 %3330  ;;  %7032 = vmatprep.mubr.msk.bf16.mxu1 %vm8020_vm0, %v9604_v24 }
 0x4da   : > { %7619 = vrcp.f32 %v3331_v11  ;;  %7042 = vmatprep.subr.bf16.mxu1 %v9604_v24  ;;  %v3438_v57 = vpack.c.bf16 %v3406_v1, %v3406_v1  ;;  %v4829_v19 = vsel %vm3447_vm3, %v1583_v4, 0 }
 0x4db   : > { %v9280_v47 = vpop.f32.mrf.mxu0  ;;  %7621 = vrcp.f32 %v3346_v52 }
 0x4dd   : > { %v6884_v17 = vpop.f32.mrf.mxu0  ;;  %v3337_v40 = vpop.xlane.xlu0 %3336 }
 0x4de   : > { %7623 = vrcp.f32 %v3337_v40 }
 0x4df   : > { %v3580_v46 = vpop.f32.mrf.mxu0 }
 0x4e0   : > { %7033 = vmatmul.mubr.msk.bf16.vlgmr.msra.gmra.mxu1 %vm3443_vm4, %v3438_v57 }
 0x4e1   : > { %v6885_v9 = vpop.f32.mrf.mxu0  ;;  %v3343_v59 = vpop.xlane.xlu0 %3342  ;;  %7044 = vmatprep.mubr.msk.bf16.mxu1 %vm8020_vm0, %v9604_v24 }
 0x4e2   : > { %7625 = vrcp.f32 %v3343_v59 }
 0x4e3   : > { %v7616_v26 = vpop.eup %7615  ;;  %v9285_v8 = vpop.f32.mrf.mxu0 }
 0x4e4   : > { %v3403_v44 = vmul.f32 %v7616_v26, %v9135_v56  ;;  %v7618_v25 = vpop.eup %7617  ;;  %v1584_v56 = vpack.c.bf16 %v7376_v37, %v7376_v37 }
 0x4e5   : > { %v6896_v45 = vpop.f32.mrf.mxu0  ;;  %v7369_v36 = vpop.permute.xlu0 %7368  ;;  %v3408_v38 = vmul.f32 %v7618_v25, %v9125_v34 }
 0x4e6   : > { %v7371_v3 = vunpack.i.h.bf16 %v7369_v36  ;;  %v3435_v16 = vpack.c.bf16 %v3403_v44, %v3403_v44  ;;  %v7370_v20 = vunpack.i.l.bf16 %v7369_v36  ;;  %v4875_v35 = vsel %vm3447_vm3, %v1584_v56, 0 }
 0x4e7   : > { %v7620_v51 = vpop.eup %7619  ;;  %v3672_v39 = vpop.f32.mrf.mxu0  ;;  %v3440_v13 = vpack.c.bf16 %v3408_v38, %v3408_v38 }
 0x4e8   : > { %v1582_v33 = vpack.c.bf16 %v7371_v3, %v7371_v3  ;;  %7015 = vmatmul.mubr.msk.bf16.vlgmr.msra.gmra.mxu0 %vm3443_vm4, %v3435_v16  ;;  %v3405_v30 = vmul.f32 %v7620_v51, %v9141_v6  ;;  %v1581_v14 = vpack.c.bf16 %v7370_v20, %v7370_v20  ;;  %v7622_v58 = vpop.eup %7621 }
 0x4e9   : > { %v6897_v29 = vpop.f32.mrf.mxu0  ;;  %7025 = vmatpush3.bf16.msra.mxu0 %v4645_v22  ;;  %7026 = vmatprep.mubr.msk.bf16.mxu0 %vm8020_vm0, %v9604_v24  ;;  %v3410_v48 = vmul.f32 %v7622_v58, %v9129_v50 }
 0x4ea   : > { %v4783_v23 = vsel %vm3447_vm3, %v1582_v33, 0  ;;  %7036 = vmatprep.subr.bf16.mxu0 %v9604_v24  ;;  %v3437_v63 = vpack.c.bf16 %v3405_v30, %v3405_v30  ;;  %v4737_v42 = vsel %vm3447_vm3, %v1581_v14, 0 }
 0x4eb   : > { %v9296_v34 = vpop.f32.mrf.mxu0  ;;  %7043 = vmatpush3.bf16.msra.mxu1 %v4783_v23  ;;  %v7624_v6 = vpop.eup %7623  ;;  %v3442_v32 = vpack.c.bf16 %v3410_v48, %v3410_v48 }
 0x4ec   : > { %7054 = vmatprep.subr.bf16.mxu1 %v9604_v24  ;;  %v3407_v21 = vmul.f32 %v7624_v6, %v9151_v18 }
 0x4ed   : > { %v6908_v61 = vpop.f32.mrf.mxu0 }
 0x4ee   : > { %7045 = vmatmul.mubr.msk.bf16.vlgmr.msra.gmra.mxu1 %vm3443_vm4, %v3440_v13  ;;  %v3439_v15 = vpack.c.bf16 %v3407_v21, %v3407_v21 }
 0x4ef   : > { %v3764_v55 = vpop.f32.mrf.mxu0  ;;  %7055 = vmatpush3.bf16.msra.mxu1 %v4875_v35  ;;  %7056 = vmatprep.mubr.msk.bf16.mxu1 %vm8020_vm0, %v9604_v24  ;;  %v7626_v50 = vpop.eup %7625 }
 0x4f0   : > { %7027 = vmatmul.mubr.msk.bf16.vlgmr.msra.gmra.mxu0 %vm3443_vm4, %v3437_v63  ;;  %v3409_v18 = vmul.f32 %v7626_v50, %v9163_v12 }
 0x4f1   : > { %v6909_v28 = vpop.f32.mrf.mxu0  ;;  %7037 = vmatpush3.bf16.msra.mxu0 %v4737_v42  ;;  %7038 = vmatprep.mubr.msk.bf16.mxu0 %vm8020_vm0, %v9604_v24 }
 0x4f2   : > { %7048 = vmatprep.subr.bf16.mxu0 %v9604_v24  ;;  %v3441_v10 = vpack.c.bf16 %v3409_v18, %v3409_v18 }
 0x4f6   : > { %7057 = vmatmul.mubr.msk.bf16.vlgmr.msra.gmra.mxu1 %vm3443_vm4, %v3442_v32 }
 0x4f7   : > { %5536 = vmatprep.mubr.bf16.mxu1 %v9608_v53 }
 0x4f8   : > { %7039 = vmatmul.mubr.msk.bf16.vlgmr.msra.gmra.mxu0 %vm3443_vm4, %v3439_v15 }
 0x4f9   : > { %7049 = vmatpush3.bf16.msra.mxu0 %v4829_v19  ;;  %7050 = vmatprep.mubr.msk.bf16.mxu0 %vm8020_vm0, %v9604_v24 }
 0x4fa   : > { %7060 = vmatprep.subr.bf16.mxu0 %v9604_v24 }
 0x500   : > { %7051 = vmatmul.mubr.msk.bf16.vlgmr.msra.gmra.mxu0 %vm3443_vm4, %v3441_v10 }
 0x501   : > { %7076 = vmatprep.mubr.msk.bf16.mxu0 %vm8020_vm0, %v9604_v24 }
 0x50e   : > { %v3853_v27 = vpop.f32.mrf.mxu0 }
 0x50f   : > { %v3899_v62 = vpop.f32.mrf.mxu1  ;;  %4925 = vrot.lane.b32.xlu1 %v3853_v27, %s8024_s14 }
 0x510   : > { %v6920_v31 = vpop.f32.mrf.mxu0 }
 0x511   : > { %v6926_v11 = vpop.f32.mrf.mxu1 }
 0x512   : > { %v3856_v1 = vpop.f32.mrf.mxu0 }
 0x513   : > { %v3902_v52 = vpop.f32.mrf.mxu1  ;;  %4927 = vrot.lane.b32.xlu1 %v3899_v62, %s8024_s14 }
 0x514   : > { %v6921_v17 = vpop.f32.mrf.mxu0 }
 0x515   : > { %v6927_v12 = vpop.f32.mrf.mxu1 }
 0x516   : > { %v3945_v40 = vpop.f32.mrf.mxu0 }
 0x517   : > { %v3991_v57 = vpop.f32.mrf.mxu1  ;;  %4929 = vrot.lane.b32.xlu1 %v3945_v40, %s8024_s14 }
 0x518   : > { %v6932_v46 = vpop.f32.mrf.mxu0 }
 0x519   : > { %v6938_v60 = vpop.f32.mrf.mxu1 }
 0x51a   : > { %v3948_v9 = vpop.f32.mrf.mxu0 }
 0x51b   : > { %v3994_v59 = vpop.f32.mrf.mxu1  ;;  %4931 = vrot.lane.b32.xlu1 %v3991_v57, %s8024_s14 }
 0x51c   : > { %v6933_v26 = vpop.f32.mrf.mxu0 }
 0x51d   : > { %v6939_v43 = vpop.f32.mrf.mxu1  ;;  %v7410_v26 = vld [vmem:[%s8312_s18 + $0x38] sm:$0xff]  }
 0x51e   : > { %v4037_v5 = vpop.f32.mrf.mxu0  ;;  %7061 = vmatpush3.bf16.msra.mxu0 %v7410_v26 }
 0x51f   : > { %v4083_v44 = vpop.f32.mrf.mxu1  ;;  %4933 = vrot.lane.b32.xlu0 %v4037_v5, %s8024_s14  ;;  %7062 = vmatprep.subr.bf16.mxu0 %v9604_v24 }
 0x520   : > { %4935 = vrot.lane.b32.xlu1 %v4083_v44, %s8024_s14  ;;  %v6944_v25 = vpop.f32.mrf.mxu0  ;;  %v7411_v44 = vld [vmem:[%s8312_s18 + $0x30] sm:$0xff]  }
 0x521   : > { %v6950_v45 = vpop.f32.mrf.mxu1 }
 0x522   : > { %v4040_v36 = vpop.f32.mrf.mxu0  ;;  %7063 = vmatpush3.bf16.msra.mxu0 %v7411_v44 }
 0x523   : > { %v4086_v37 = vpop.f32.mrf.mxu1  ;;  %7064 = vmatprep.subr.bf16.mxu0 %v9604_v24 }
 0x524   : > { %v6945_v3 = vpop.f32.mrf.mxu0  ;;  %v7412_v37 = vld [vmem:[%s8312_s18 + $0x28] sm:$0xff]  }
 0x525   : > { %v6951_v16 = vpop.f32.mrf.mxu1 }
 0x526   : > { %v4129_v51 = vpop.f32.mrf.mxu0  ;;  %7065 = vmatpush3.bf16.msra.mxu0 %v7412_v37  ;;  %v7413_v16 = vld [vmem:[%s8312_s18 + $0x20] sm:$0xff]  }
 0x527   : > { %4937 = vrot.lane.b32.xlu0 %v4129_v51, %s8024_s14  ;;  %7066 = vmatprep.subr.bf16.mxu0 %v9604_v24 }
 0x528   : > { %v6956_v39 = vpop.f32.mrf.mxu0 }
 0x52a   : > { %v4132_v38 = vpop.f32.mrf.mxu0  ;;  %v4175_v33 = vpop.f32.mrf.mxu1  ;;  %7067 = vmatpush3.bf16.msra.mxu0 %v7413_v16 }
 0x52b   : > { %4939 = vrot.lane.b32.xlu1 %v4175_v33, %s8024_s14  ;;  %v7414_v33 = vld [vmem:[%s8312_s18 + $0x18] sm:$0xff]   ;;  %7068 = vmatprep.subr.bf16.mxu0 %v9604_v24 }
 0x52c   : > { %v6957_v20 = vpop.f32.mrf.mxu0  ;;  %v6962_v22 = vpop.f32.mrf.mxu1 }
 0x52e   : > { %v4178_v29 = vpop.f32.mrf.mxu1  ;;  %7069 = vmatpush3.bf16.msra.mxu0 %v7414_v33 }
 0x52f   : > { %7070 = vmatprep.subr.bf16.mxu0 %v9604_v24 }
 0x530   : > { %v6963_v56 = vpop.f32.mrf.mxu1 }
 0x532   : > { %v4267_v30 = vpop.f32.mrf.mxu1 }
 0x533   : > { %4959 = vrot.lane.b32.xlu1 %v4267_v30, %s8023_s2  ;;  %v7415_v30 = vld [vmem:[%s8312_s18 + $0x10] sm:$0xff]  }
 0x534   : > { %v6974_v23 = vpop.f32.mrf.mxu1  ;;  %7071 = vmatpush3.bf16.msra.mxu0 %v7415_v30 }
 0x535   : > { %7072 = vmatprep.subr.bf16.mxu0 %v9604_v24 }
 0x536   : > { %v4270_v13 = vpop.f32.mrf.mxu1 }
 0x538   : > { %v6975_v14 = vpop.f32.mrf.mxu1 }
 0x55b   : > { %v4221_v58 = vpop.f32.mrf.mxu0 }
 0x55c   : > { %4957 = vrot.lane.b32.xlu0 %v4221_v58, %s8023_s2 }
 0x55d   : > { %v6968_v61 = vpop.f32.mrf.mxu0 }
 0x55f   : > { %v4224_v63 = vpop.f32.mrf.mxu0 }
 0x561   : > { %v6969_v35 = vpop.f32.mrf.mxu0 }
 0x563   : > { %v4313_v6 = vpop.f32.mrf.mxu0 }
 0x564   : > { %v4359_v55 = vpop.f32.mrf.mxu1  ;;  %4961 = vrot.lane.b32.xlu0 %v4313_v6, %s8023_s2 }
 0x565   : > { %4963 = vrot.lane.b32.xlu1 %v4359_v55, %s8023_s2  ;;  %v6980_v48 = vpop.f32.mrf.mxu0  ;;  %v7416_v55 = vld [vmem:[%s8312_s18 + $0x8] sm:$0xff]  }
 0x566   : > { %v6986_v54 = vpop.f32.mrf.mxu1  ;;  %7073 = vmatpush3.bf16.msra.mxu0 %v7416_v55 }
 0x567   : > { %v4316_v42 = vpop.f32.mrf.mxu0  ;;  %7074 = vmatprep.subr.bf16.mxu0 %v9604_v24 }
 0x568   : > { %v4362_v28 = vpop.f32.mrf.mxu1  ;;  %v7417_v42 = vld [vmem:[%s8312_s18] sm:$0xff]  }
 0x569   : > { %v6981_v21 = vpop.f32.mrf.mxu0 }
 0x56a   : > { %v6987_v32 = vpop.f32.mrf.mxu1  ;;  %7075 = vmatpush3.bf16.msra.mxu0 %v7417_v42 }
 0x56b   : > { %v4405_v4 = vpop.f32.mrf.mxu0 }
 0x56c   : > { %v4451_v15 = vpop.f32.mrf.mxu1  ;;  %4965 = vrot.lane.b32.xlu0 %v4405_v4, %s8023_s2 }
 0x56d   : > { %4967 = vrot.lane.b32.xlu1 %v4451_v15, %s8023_s2  ;;  %v6992_v50 = vpop.f32.mrf.mxu0 }
 0x56e   : > { %v6998_v19 = vpop.f32.mrf.mxu1 }
 0x56f   : > { %v4408_v18 = vpop.f32.mrf.mxu0 }
 0x570   : > { %v4454_v10 = vpop.f32.mrf.mxu1 }
 0x571   : > { %v6993_v27 = vpop.f32.mrf.mxu0 }
 0x572   : > { %v6999_v62 = vpop.f32.mrf.mxu1 }
 0x573   : > { %v4497_v31 = vpop.f32.mrf.mxu0 }
 0x574   : > { %v4543_v11 = vpop.f32.mrf.mxu1  ;;  %4969 = vrot.lane.b32.xlu0 %v4497_v31, %s8023_s2 }
 0x575   : > { %4971 = vrot.lane.b32.xlu1 %v4543_v11, %s8023_s2  ;;  %v7004_v1 = vpop.f32.mrf.mxu0 }
 0x576   : > { %v7010_v52 = vpop.f32.mrf.mxu1 }
 0x577   : > { %v4500_v17 = vpop.f32.mrf.mxu0 }
 0x578   : > { %v4546_v12 = vpop.f32.mrf.mxu1 }
 0x579   : > { %v7005_v40 = vpop.f32.mrf.mxu0 }
 0x57a   : > { %v7011_v57 = vpop.f32.mrf.mxu1 }
 0x581   : > { %v4926_v50 = vpop.permute.xlu1 %4925 }
 0x585   : > { %v4928_v19 = vpop.permute.xlu1 %4927 }
 0x589   : > { %v4930_v18 = vpop.permute.xlu1 %4929 }
 0x58d   : > { %v4932_v10 = vpop.permute.xlu1 %4931 }
 0x591   : > { %v4934_v27 = vpop.permute.xlu0 %4933 }
 0x592   : > { %v4936_v62 = vpop.permute.xlu1 %4935  ;;  %v5017_v37 = vsel %vm1585_vm1, %v9285_v8, %v4934_v27 }
 0x598   : > { %v4635_v46 = vpop.f32.mrf.mxu1 }
 0x599   : > { %4991 = vrot.lane.b32.xlu1 %v4635_v46, %s8022_s24  ;;  %v4938_v31 = vpop.permute.xlu0 %4937 }
 0x59a   : > { %v7022_v60 = vpop.f32.mrf.mxu1 }
 0x59c   : > { %v4638_v9 = vpop.f32.mrf.mxu1 }
 0x59d   : > { %v4940_v11 = vpop.permute.xlu1 %4939 }
 0x59e   : > { %v7023_v59 = vpop.f32.mrf.mxu1 }
 0x5a0   : > { %v4727_v43 = vpop.f32.mrf.mxu1 }
 0x5a1   : > { %4995 = vrot.lane.b32.xlu1 %v4727_v43, %s8022_s24  ;;  %v5015_v43 = vsel %vm1585_vm1, %v9280_v47, %v4930_v18  ;;  %v5014_v47 = vsel %vm1585_vm1, %v9239_v7, %v4928_v19 }
 0x5a2   : > { %v7034_v5 = vpop.f32.mrf.mxu1 }
 0x5a4   : > { %v4730_v25 = vpop.f32.mrf.mxu1 }
 0x5a5   : > { %v4960_v1 = vpop.permute.xlu1 %4959 }
 0x5a6   : > { %v7035_v45 = vpop.f32.mrf.mxu1  ;;  %v5023_v33 = vsel %vm5021_vm5, %v5014_v47, %v4960_v1  ;;  %v7418_v1 = vld [vmem:[%s8354_s30 + $0xe0] ss:$16 sps:$4 sm:$0xff]   ;;  %v7438_v47 = vld [vmem:[%s8354_s30 + $0x84] ss:$16 sps:$4 sm:$0xff]  }
 0x5a7   : > { %v5013_v45 = vsel %vm1585_vm1, %v9271_v49, %v4926_v50  ;;  %v5018_v49 = vsel %vm1585_vm1, %v9267_v41, %v4936_v62 }
 0x5a8   : > { %v4589_v36 = vpop.f32.mrf.mxu0 }
 0x5a9   : > { %4989 = vrot.lane.b32.xlu0 %v4589_v36, %s8022_s24  ;;  %v5016_v36 = vsel %vm1585_vm1, %v9264_v2, %v4932_v10 }
 0x5aa   : > { %v7016_v3 = vpop.f32.mrf.mxu0 }
 0x5ac   : > { %v4592_v51 = vpop.f32.mrf.mxu0 }
 0x5ae   : > { %v7017_v39 = vpop.f32.mrf.mxu0  ;;  %v4819_v38 = vpop.f32.mrf.mxu1 }
 0x5af   : > { %4999 = vrot.lane.b32.xlu1 %v4819_v38, %s8022_s24 }
 0x5b0   : > { %v4681_v20 = vpop.f32.mrf.mxu0  ;;  %v7046_v22 = vpop.f32.mrf.mxu1 }
 0x5b1   : > { %4993 = vrot.lane.b32.xlu0 %v4681_v20, %s8022_s24 }
 0x5b2   : > { %v7028_v29 = vpop.f32.mrf.mxu0  ;;  %v4822_v56 = vpop.f32.mrf.mxu1 }
 0x5b3   : > { %v5019_v29 = vsel %vm1585_vm1, %v9296_v34, %v4938_v31  ;;  %v5020_v56 = vsel %vm1585_vm1, %v9269_v0, %v4940_v11  ;;  %v9609_v34 = vld [vmem:[#allocation31_spill] sm:$0xff] }
 0x5b4   : > { %v4684_v23 = vpop.f32.mrf.mxu0  ;;  %v7047_v13 = vpop.f32.mrf.mxu1 }
 0x5b6   : > { %v7029_v14 = vpop.f32.mrf.mxu0  ;;  %v4911_v58 = vpop.f32.mrf.mxu1 }
 0x5b7   : > { %5003 = vrot.lane.b32.xlu1 %v4911_v58, %s8022_s24 }
 0x5b8   : > { %v4773_v61 = vpop.f32.mrf.mxu0  ;;  %v7058_v63 = vpop.f32.mrf.mxu1 }
 0x5b9   : > { %4997 = vrot.lane.b32.xlu0 %v4773_v61, %s8022_s24 }
 0x5ba   : > { %v7040_v35 = vpop.f32.mrf.mxu0  ;;  %v4914_v6 = vpop.f32.mrf.mxu1 }
 0x5bc   : > { %v4776_v48 = vpop.f32.mrf.mxu0  ;;  %v7059_v54 = vpop.f32.mrf.mxu1 }
 0x5be   : > { %v7041_v28 = vpop.f32.mrf.mxu0 }
 0x5c0   : > { %v4865_v21 = vpop.f32.mrf.mxu0 }
 0x5c1   : > { %5001 = vrot.lane.b32.xlu0 %v4865_v21, %s8022_s24 }
 0x5c2   : > { %v7052_v32 = vpop.f32.mrf.mxu0 }
 0x5c3   : > { %v6371_v32 = vld [vmem:[%s832_s7] ss:$0 sm:$0xff] }
 0x5c4   : > { %v4868_v4 = vpop.f32.mrf.mxu0 }
 0x5c5   : > { %v7651_v4 = vld [vmem:[%s9598_s19] sm:$0xff]  }
 0x5c6   : > { %v7053_v15 = vpop.f32.mrf.mxu0  ;;  %v5180_v27 = vunpack.c.h.bf16 %v7651_v4 }
 0x5c7   : > { %v5179_v15 = vunpack.c.l.bf16 %v7651_v4 }
 0x5ce   : > { %v4958_v52 = vpop.permute.xlu0 %4957 }
 0x5cf   : > { %v5022_v16 = vsel %vm5021_vm5, %v5013_v45, %v4958_v52  ;;  %v7420_v52 = vld [vmem:[%s8354_s30 + $0xe4] ss:$16 sps:$4 sm:$0xff]  }
 0x5d0   : > { %5504 = vmatprep.subr.bf16.mxu1 %v7420_v52  ;;  %v7432_v45 = vld [vmem:[%s8354_s30 + $0xa4] ss:$16 sps:$4 sm:$0xff]   ;;  %v7474_v52 = vld [vmem:[%s8328_s22 + $0x68] sm:$0xff]  }
 0x5d1   : > { %5505 = vmatpush1.bf16.msra.mxu1 %v7418_v1  ;;  %v7473_v1 = vld [vmem:[%s8328_s22 + $0xb0] sm:$0xff]  }
 0x5d6   : > { %v4962_v17 = vpop.permute.xlu0 %4961 }
 0x5d7   : > { %v4964_v12 = vpop.permute.xlu1 %4963  ;;  %v5024_v5 = vsel %vm5021_vm5, %v5015_v43, %v4962_v17  ;;  %v7421_v17 = vld [vmem:[%s8354_s30 + $0xe8] ss:$16 sps:$4 sm:$0xff]   ;;  %v7426_v43 = vld [vmem:[%s8354_s30 + $0xc4] ss:$16 sps:$4 sm:$0xff]  }
 0x5d8   : > { %v5025_v51 = vsel %vm5021_vm5, %v5016_v36, %v4964_v12  ;;  %v7423_v12 = vld [vmem:[%s8354_s30 + $0xec] ss:$16 sps:$4 sm:$0xff]   ;;  %5506 = vmatprep.subr.bf16.mxu1 %v7426_v43 }
 0x5d9   : > { %5547 = vmatprep.subr.bf16.mxu0 %v7423_v12  ;;  %v7435_v36 = vld [vmem:[%s8354_s30 + $0xac] ss:$16 sps:$4 sm:$0xff]  }
 0x5da   : > { %v7476_v12 = vld [vmem:[%s8328_s22 + $0x28] sm:$0xff]   ;;  %v7485_v43 = vld [vmem:[%s8328_s22 + $0x98] sm:$0xff]  }
 0x5de   : > { %v4966_v24 = vpop.permute.xlu0 %4965 }
 0x5df   : > { %v4968_v40 = vpop.permute.xlu1 %4967  ;;  %v5026_v39 = vsel %vm5021_vm5, %v5017_v37, %v4966_v24  ;;  %v7430_v37 = vld [vmem:[%s8354_s30 + $0xa0] ss:$16 sps:$4 sm:$0xff]  }
 0x5e0   : > { %v5027_v20 = vsel %vm5021_vm5, %v5018_v49, %v4968_v40  ;;  %v7442_v49 = vld [vmem:[%s8354_s30 + $0x60] ss:$16 sps:$4 sm:$0xff]  }
 0x5e6   : > { %v4970_v57 = vpop.permute.xlu0 %4969 }
 0x5e7   : > { %v4972_v46 = vpop.permute.xlu1 %4971  ;;  %v5028_v23 = vsel %vm5021_vm5, %v5019_v29, %v4970_v57  ;;  %v7456_v29 = vld [vmem:[%s8354_s30 + $0x24] ss:$16 sps:$4 sm:$0xff]  }
 0x5e8   : > { %v5029_v13 = vsel %vm5021_vm5, %v5020_v56, %v4972_v46  ;;  %v7459_v56 = vld [vmem:[%s8354_s30 + $0x2c] ss:$16 sps:$4 sm:$0xff]  }
 0x60b   : > { %v4992_v60 = vpop.permute.xlu1 %4991 }
 0x60c   : > { %v5032_v41 = vsel %vm5030_vm6, %v5023_v33, %v4992_v60  ;;  %v7450_v33 = vld [vmem:[%s8354_s30 + $0x44] ss:$16 sps:$4 sm:$0xff]  }
 0x613   : > { %v4996_v59 = vpop.permute.xlu1 %4995 }
 0x614   : > { %v5034_v38 = vsel %vm5030_vm6, %v5025_v51, %v4996_v59  ;;  %v7436_v51 = vld [vmem:[%s8354_s30 + $0x80] ss:$16 sps:$4 sm:$0xff]  }
 0x61b   : > { %v4990_v9 = vpop.permute.xlu0 %4989 }
 0x61c   : > { %v5031_v2 = vsel %vm5030_vm6, %v5022_v16, %v4990_v9  ;;  %v7441_v16 = vld [vmem:[%s8354_s30 + $0x8c] ss:$16 sps:$4 sm:$0xff]  }
 0x61d   : > { %v5047_v14 = vcombine.low %v5031_v2, %v5032_v41  ;;  %v7445_v2 = vld [vmem:[%s8354_s30 + $0x68] ss:$16 sps:$4 sm:$0xff]   ;;  %v7454_v41 = vld [vmem:[%s8354_s30 + $0x20] ss:$16 sps:$4 sm:$0xff]  }
 0x61f   : > { %v5055_v0 = vrot.slane %v5047_v14, %v9609_v34  ;;  %v7460_v14 = vld [vmem:[%s8354_s30] ss:$16 sps:$4 sm:$0xff]  }
 0x621   : > { %v5000_v44 = vpop.permute.xlu1 %4999 }
 0x622   : > { %v5036_v30 = vsel %vm5030_vm6, %v5027_v20, %v5000_v44  ;;  %v7424_v44 = vld [vmem:[%s8354_s30 + $0xc0] ss:$16 sps:$4 sm:$0xff]   ;;  %v7453_v20 = vld [vmem:[%s8354_s30 + $0x4c] ss:$16 sps:$4 sm:$0xff]  }
 0x623   : > { %v4994_v26 = vpop.permute.xlu0 %4993  ;;  %5507 = vmatpush1.bf16.msra.mxu1 %v7424_v44  ;;  %v7487_v44 = vld [vmem:[%s8328_s22 + $0xd0] sm:$0xff]  }
 0x624   : > { %v5033_v3 = vsel %vm5030_vm6, %v5024_v5, %v4994_v26  ;;  %v7429_v5 = vld [vmem:[%s8354_s30 + $0xcc] ss:$16 sps:$4 sm:$0xff]   ;;  %5508 = vmatprep.subr.bf16.mxu1 %v7432_v45  ;;  %v7489_v45 = vld [vmem:[%s8328_s22 + $0x90] sm:$0xff]  }
 0x625   : > { %v5048_v7 = vcombine.low %v5033_v3, %v5034_v38  ;;  %v7433_v3 = vld [vmem:[%s8354_s30 + $0xa8] ss:$16 sps:$4 sm:$0xff]   ;;  %v7444_v38 = vld [vmem:[%s8354_s30 + $0x64] ss:$16 sps:$4 sm:$0xff]  }
 0x627   : > { %v5062_v6 = vrot.slane %v5048_v7, %v9609_v34  ;;  %5509 = vmatpush1.bf16.msra.mxu1 %v7430_v37  ;;  %v7448_v7 = vld [vmem:[%s8354_s30 + $0x40] ss:$16 sps:$4 sm:$0xff]  }
 0x628   : > { %5510 = vmatprep.subr.bf16.mxu1 %v7438_v47  ;;  %v7491_v37 = vld [vmem:[%s8328_s22 + $0xc8] sm:$0xff]  }
 0x629   : > { %v5004_v22 = vpop.permute.xlu1 %5003  ;;  %v5063_v42 = vcombine.low %v5055_v0, %v5062_v6  ;;  %v7493_v47 = vld [vmem:[%s8328_s22 + $0x88] sm:$0xff]  }
 0x62a   : > { %v5038_v63 = vsel %vm5030_vm6, %v5029_v13, %v5004_v22  ;;  %v7451_v22 = vld [vmem:[%s8354_s30 + $0x48] ss:$16 sps:$4 sm:$0xff]   ;;  %v7465_v13 = vld [vmem:[%s8354_s30 + $0xc] ss:$16 sps:$4 sm:$0xff]  }
 0x62b   : > { %v4998_v25 = vpop.permute.xlu0 %4997  ;;  %5511 = vmatpush1.bf16.msra.mxu1 %v7436_v51  ;;  %v7495_v51 = vld [vmem:[%s8328_s22 + $0xc0] sm:$0xff]  }
 0x62c   : > { %v5035_v8 = vsel %vm5030_vm6, %v5026_v39, %v4998_v25  ;;  %v7427_v25 = vld [vmem:[%s8354_s30 + $0xc8] ss:$16 sps:$4 sm:$0xff]   ;;  %5512 = vmatprep.subr.bf16.mxu1 %v7444_v38 }
 0x62d   : > { %v5064_v58 = vcombine.low %v5035_v8, %v5036_v30  ;;  %v7439_v39 = vld [vmem:[%s8354_s30 + $0x88] ss:$16 sps:$4 sm:$0xff]   ;;  %v7447_v8 = vld [vmem:[%s8354_s30 + $0x6c] ss:$16 sps:$4 sm:$0xff]  }
 0x62e   : > { %v7457_v30 = vld [vmem:[%s8354_s30 + $0x28] ss:$16 sps:$4 sm:$0xff]  }
 0x62f   : > { %v5072_v48 = vrot.slane %v5064_v58, %v9609_v34  ;;  %5513 = vmatpush1.bf16.msra.mxu1 %v7442_v49  ;;  %v7463_v58 = vld [vmem:[%s8354_s30 + $0x8] ss:$16 sps:$4 sm:$0xff]  }
 0x630   : > { %5514 = vmatprep.subr.bf16.mxu1 %v7450_v33  ;;  %v7497_v49 = vld [vmem:[%s8328_s22 + $0x80] sm:$0xff]   ;;  %v5255_v38 = vld [vmem:[%s8321_s17] sm:$0xf]  ;;  %s9617_s17 = scalar_lea.vmem [#allocation13], %s8292_s27 }
 0x633   : > { %v5002_v61 = vpop.permute.xlu0 %5001  ;;  %5515 = vmatpush1.bf16.msra.mxu1 %v7448_v7 }
 0x634   : > { %v5037_v35 = vsel %vm5030_vm6, %v5028_v23, %v5002_v61  ;;  %5516 = vmatprep.subr.bf16.mxu1 %v7456_v29  ;;  %v7462_v23 = vld [vmem:[%s8354_s30 + $0x4] ss:$16 sps:$4 sm:$0xff]   ;;  %s9611_s30 = scalar_lea.vmem [#allocation7], %s8292_s27 }
 0x635   : > { %v5065_v55 = vcombine.low %v5037_v35, %v5038_v63 }
 0x637   : > { %v5079_v54 = vrot.slane %v5065_v55, %v9609_v34  ;;  %5517 = vmatpush1.bf16.msra.mxu1 %v7454_v41 }
 0x638   : > { %5518 = vmatprep.subr.bf16.mxu1 %v7462_v23 }
 0x639   : > { %v5080_v28 = vcombine.low %v5072_v48, %v5079_v54  ;;  %v6380_v54 = vld [vmem:[%s9611_s30] ss:$0 sm:$0xff] }
 0x63b   : > { %v5083_v21 = vpack.c.bf16 %v5080_v28, %v5063_v42  ;;  %5519 = vmatpush1.bf16.msra.mxu1 %v7460_v14 }
 0x63d   : > { %7077 = vmatmul.mubr.bf16.vlgmr.msra.gmra.mxu0 %v5083_v21 }
 0x63e   : > { %5579 = vmatprep.mubr.bf16.mxu0 %v9608_v53  ;;  %5548 = vmatpush1.bf16.msra.mxu0 %v7421_v17  ;;  %v7475_v17 = vld [vmem:[%s8328_s22 + $0xe8] sm:$0xff]  }
 0x63f   : > { %5549 = vmatprep.subr.bf16.mxu0 %v7429_v5  ;;  %v7486_v5 = vld [vmem:[%s8328_s22 + $0x50] sm:$0xff]  }
 0x642   : > { %5550 = vmatpush1.bf16.msra.mxu0 %v7427_v25  ;;  %v7488_v25 = vld [vmem:[%s8328_s22 + $0x10] sm:$0xff]  }
 0x643   : > { %5551 = vmatprep.subr.bf16.mxu0 %v7435_v36  ;;  %v7490_v36 = vld [vmem:[%s8328_s22 + $0x48] sm:$0xff]  }
 0x646   : > { %5552 = vmatpush1.bf16.msra.mxu0 %v7433_v3  ;;  %v7492_v3 = vld [vmem:[%s8328_s22 + $0x8] sm:$0xff]  }
 0x647   : > { %5553 = vmatprep.subr.bf16.mxu0 %v7441_v16  ;;  %v7494_v16 = vld [vmem:[%s8328_s22 + $0x40] sm:$0xff]  }
 0x64a   : > { %5554 = vmatpush1.bf16.msra.mxu0 %v7439_v39  ;;  %v7496_v39 = vld [vmem:[%s8328_s22] sm:$0xff]  }
 0x64b   : > { %5555 = vmatprep.subr.bf16.mxu0 %v7447_v8 }
 0x64e   : > { %5556 = vmatpush1.bf16.msra.mxu0 %v7445_v2  ;;  %v9613_v2 = vld [vmem:[#allocation30_spill] sm:$0xff] }
 0x64f   : > { %5557 = vmatprep.subr.bf16.mxu0 %v7453_v20  ;;  %v5338_v8 = vsub.s32 3, %v9613_v2  ;;  %v9614_v33 = vsub.s32 0, %v9613_v2  ;;  %v9615_v7 = vsub.s32 2, %v9613_v2  ;;  %v9616_v41 = vsub.s32 1, %v9613_v2 }
 0x651   : > { %v5327_v20 = vrot.slane %v5255_v38, %v9614_v33  ;;  %v5339_v23 = vrot.slane %v5255_v38, %v5338_v8 }
 0x652   : > { %5558 = vmatpush1.bf16.msra.mxu0 %v7451_v22  ;;  %v5335_v22 = vrot.slane %v5255_v38, %v9615_v7 }
 0x653   : > { %5559 = vmatprep.subr.bf16.mxu0 %v7459_v56 }
 0x656   : > { %5560 = vmatpush1.bf16.msra.mxu0 %v7457_v30  ;;  %v5331_v30 = vrot.slane %v5255_v38, %v9616_v41  ;;  %v6414_v41 = vld [vmem:[%s9617_s17] ss:$0 sm:$0xff] }
 0x657   : > { %5561 = vmatprep.subr.bf16.mxu0 %v7465_v13 }
 0x65a   : > { %5562 = vmatpush1.bf16.msra.mxu0 %v7463_v58 }
 0x6fd   : > { %v5172_v50 = vpop.f32.mrf.mxu0 }
 0x6fe   : > { %v5173_v19 = vadd.f32 %v6371_v32, %v5172_v50 }
 0x6ff   : > { %v7078_v18 = vpop.f32.mrf.mxu0 }
 0x700   : > { %v5181_v10 = vadd.f32 %v5179_v15, %v5173_v19  ;;  %v7466_v18 = vld [vmem:[%s8328_s22 + $0x78] sm:$0xff]  }
 0x701   : > { %v5175_v62 = vpop.f32.mrf.mxu0  ;;  %6612 = vmatprep.subr.bf16.mxu1 %v7466_v18 }
 0x702   : > { %v5176_v53 = vadd.f32 %v6371_v32, %v5175_v62  ;;  %5183 = vadd.xlane.f32.xlu0 %v5181_v10  ;;  %v6381_v32 = vld [vmem:[%s9612_s0] ss:$0 sm:$0xff]  ;;  %v7469_v62 = vld [vmem:[%s8328_s22 + $0xb8] sm:$0xff]  }
 0x703   : > { %v7079_v31 = vpop.f32.mrf.mxu0 }
 0x704   : > { %v5182_v11 = vadd.f32 %v5180_v27, %v5176_v53  ;;  %v7468_v27 = vld [vmem:[%s8328_s22 + $0x38] sm:$0xff]   ;;  %v7470_v53 = vld [vmem:[%s8328_s22 + $0x70] sm:$0xff]  }
 0x705   : > { %v7471_v31 = vld [vmem:[%s8328_s22 + $0xf0] sm:$0xff]  }
 0x706   : > { %5185 = vadd.xlane.f32.xlu1 %v5182_v11 }
 0x78b   : > { %v5184_v24 = vpop.xlane.xlu0 %5183 }
 0x78c   : > { %v5188_v40 = vmul.f32 0.0078125, %v5184_v24  ;;  %v7477_v24 = vld [vmem:[%s8328_s22 + $0xa8] sm:$0xff]  }
 0x78e   : > { %v9409_v57 = vsub.f32 %v5181_v10, %v5188_v40  ;;  %v7467_v10 = vld [vmem:[%s8328_s22 + $0xf8] sm:$0xff]   ;;  %v7478_v40 = vld [vmem:[%s8328_s22 + $0x60] sm:$0xff]  }
 0x78f   : > { %v5186_v46 = vpop.xlane.xlu1 %5185  ;;  %6634 = vmatprep.subr.bf16.mxu0 %v7467_v10 }
 0x790   : > { %v5189_v60 = vmul.f32 0.0078125, %v5186_v46  ;;  %v5192_v9 = vmul.f32 %v9409_v57, %v9409_v57  ;;  %v7480_v46 = vld [vmem:[%s8328_s22 + $0x20] sm:$0xff]  }
 0x792   : > { %v9413_v59 = vsub.f32 %v5182_v11, %v5189_v60  ;;  %5194 = vadd.xlane.f32.xlu0 %v5192_v9  ;;  %v7472_v11 = vld [vmem:[%s8328_s22 + $0x30] sm:$0xff]   ;;  %v7481_v60 = vld [vmem:[%s8328_s22 + $0xa0] sm:$0xff]   ;;  %v7482_v9 = vld [vmem:[%s8328_s22 + $0x58] sm:$0xff]  }
 0x794   : > { %v5193_v26 = vmul.f32 %v9413_v59, %v9413_v59 }
 0x796   : > { %5196 = vadd.xlane.f32.xlu0 %v5193_v26  ;;  %v7484_v26 = vld [vmem:[%s8328_s22 + $0x18] sm:$0xff]  }
 0x81b   : > { %v5195_v61 = vpop.xlane.xlu0 %5194 }
 0x81c   : > { %v5198_v63 = vmul.f32 0.0078125, %v5195_v61 }
 0x81e   : > { %v5200_v35 = vadd.f32 1e-05, %v5198_v63 }
 0x81f   : > { %v5197_v34 = vpop.xlane.xlu0 %5196 }
 0x820   : > { %7627 = vrsqrt.f32 %v5200_v35  ;;  %v5199_v6 = vmul.f32 0.0078125, %v5197_v34 }
 0x822   : > { %v5201_v55 = vadd.f32 1e-05, %v5199_v6 }
 0x824   : > { %7629 = vrsqrt.f32 %v5201_v55 }
 0x82d   : > { %v7628_v0 = vpop.eup %7627 }
 0x82e   : > { %v5204_v48 = vmul.f32 %v7628_v0, %v9409_v57  ;;  %v7479_v57 = vld [vmem:[%s8328_s22 + $0xe0] sm:$0xff]  }
 0x830   : > { %v5212_v21 = vmul.f32 %v6380_v54, %v5204_v48 }
 0x831   : > { %v7630_v42 = vpop.eup %7629 }
 0x832   : > { %v5205_v28 = vmul.f32 %v7630_v42, %v9413_v59  ;;  %v5220_v15 = vadd.f32 %v6381_v32, %v5212_v21  ;;  %v7483_v59 = vld [vmem:[%s8328_s22 + $0xd8] sm:$0xff]   ;;  %s9618_s22 = scalar_lea.vmem [#allocation15], %s8292_s27 }
 0x834   : > { %v5213_v4 = vmul.f32 %v6380_v54, %v5205_v28 }
 0x836   : > { %v5221_v50 = vadd.f32 %v6381_v32, %v5213_v4 }
 0x838   : > { %v9451_v19 = vpack.c.bf16 %v5221_v50, %v5220_v15 }
 0x83a   : > { %5537 = vmatmul.mubr.bf16.vlgmr.msra.gmra.mxu1 %v9451_v19  ;;  %5580 = vmatmul.mubr.bf16.vlgmr.msra.gmra.mxu0 %v9451_v19 }
 0x83b   : > { %6613 = vmatpush3.bf16.msra.mxu1 %v7468_v27  ;;  %6635 = vmatpush3.bf16.msra.mxu0 %v7469_v62 }
 0x83c   : > { %6614 = vmatprep.subr.bf16.mxu1 %v7470_v53  ;;  %6636 = vmatprep.subr.bf16.mxu0 %v7471_v31 }
 0x83f   : > { %6615 = vmatpush3.bf16.msra.mxu1 %v7472_v11  ;;  %6637 = vmatpush3.bf16.msra.mxu0 %v7473_v1 }
 0x840   : > { %6616 = vmatprep.subr.bf16.mxu1 %v7474_v52  ;;  %6638 = vmatprep.subr.bf16.mxu0 %v7475_v17 }
 0x843   : > { %6617 = vmatpush3.bf16.msra.mxu1 %v7476_v12  ;;  %6639 = vmatpush3.bf16.msra.mxu0 %v7477_v24 }
 0x844   : > { %6618 = vmatprep.subr.bf16.mxu1 %v7478_v40  ;;  %6640 = vmatprep.subr.bf16.mxu0 %v7479_v57 }
 0x847   : > { %6619 = vmatpush3.bf16.msra.mxu1 %v7480_v46  ;;  %6641 = vmatpush3.bf16.msra.mxu0 %v7481_v60 }
 0x848   : > { %6620 = vmatprep.subr.bf16.mxu1 %v7482_v9  ;;  %6642 = vmatprep.subr.bf16.mxu0 %v7483_v59 }
 0x84b   : > { %6621 = vmatpush3.bf16.msra.mxu1 %v7484_v26  ;;  %6643 = vmatpush3.bf16.msra.mxu0 %v7485_v43 }
 0x84c   : > { %6622 = vmatprep.subr.bf16.mxu1 %v7486_v5  ;;  %6644 = vmatprep.subr.bf16.mxu0 %v7487_v44 }
 0x84f   : > { %6623 = vmatpush3.bf16.msra.mxu1 %v7488_v25  ;;  %6645 = vmatpush3.bf16.msra.mxu0 %v7489_v45 }
 0x850   : > { %6624 = vmatprep.subr.bf16.mxu1 %v7490_v36  ;;  %6646 = vmatprep.subr.bf16.mxu0 %v7491_v37 }
 0x853   : > { %6625 = vmatpush3.bf16.msra.mxu1 %v7492_v3  ;;  %6647 = vmatpush3.bf16.msra.mxu0 %v7493_v47 }
 0x854   : > { %6626 = vmatprep.subr.bf16.mxu1 %v7494_v16  ;;  %6648 = vmatprep.subr.bf16.mxu0 %v7495_v51 }
 0x857   : > { %6627 = vmatpush3.bf16.msra.mxu1 %v7496_v39  ;;  %6649 = vmatpush3.bf16.msra.mxu0 %v7497_v49 }
 0x8fa   : > { %v5538_v29 = vpop.f32.mrf.mxu1  ;;  %v5581_v56 = vpop.f32.mrf.mxu0 }
 0x8fb   : > { %v5539_v13 = vadd.f32 %v5538_v29, %v5327_v20  ;;  %v5582_v14 = vadd.f32 %v5581_v56, %v5335_v22 }
 0x8fc   : > { %v5540_v58 = vpop.f32.mrf.mxu1  ;;  %v5583_v61 = vpop.f32.mrf.mxu0 }
 0x8fd   : > { %v5598_v63 = vmul.f32 0.70710677, %v5539_v13  ;;  %v5600_v35 = vmul.f32 0.70710677, %v5582_v14  ;;  %v5541_v34 = vadd.f32 %v5540_v58, %v5331_v30  ;;  %v5584_v6 = vadd.f32 %v5583_v61, %v5339_v23 }
 0x8fe   : > { %v5542_v55 = vpop.f32.mrf.mxu1  ;;  %v5585_v0 = vpop.f32.mrf.mxu0  ;;  %v5590_v17 = vmul.f32 0.5, %v5539_v13  ;;  %v5592_v47 = vmul.f32 0.5, %v5582_v14 }
 0x8ff   : > { %v5543_v48 = vadd.f32 %v5542_v55, %v5327_v20  ;;  %v5586_v54 = vadd.f32 %v5585_v0, %v5335_v22  ;;  %7631 = verf.f32 %v5598_v63  ;;  %v5599_v42 = vmul.f32 0.70710677, %v5541_v34 }
 0x900   : > { %v5544_v28 = vpop.f32.mrf.mxu1  ;;  %v5587_v21 = vpop.f32.mrf.mxu0  ;;  %7633 = verf.f32 %v5600_v35  ;;  %v5601_v32 = vmul.f32 0.70710677, %v5584_v6  ;;  %v5591_v12 = vmul.f32 0.5, %v5541_v34  ;;  %v5593_v45 = vmul.f32 0.5, %v5584_v6 }
 0x901   : > { %v5602_v4 = vmul.f32 0.70710677, %v5543_v48  ;;  %7635 = verf.f32 %v5599_v42  ;;  %v5604_v15 = vmul.f32 0.70710677, %v5586_v54  ;;  %v5545_v50 = vadd.f32 %v5544_v28, %v5331_v30 }
 0x902   : > { %v5588_v18 = vadd.f32 %v5587_v21, %v5339_v23  ;;  %7637 = verf.f32 %v5601_v32  ;;  %v5594_v9 = vmul.f32 0.5, %v5543_v48  ;;  %v5596_v5 = vmul.f32 0.5, %v5586_v54 }
 0x903   : > { %7639 = verf.f32 %v5602_v4  ;;  %v5603_v10 = vmul.f32 0.70710677, %v5545_v50  ;;  %v5595_v44 = vmul.f32 0.5, %v5545_v50  ;;  %v5914_v0 = vunpack.c.l.bf16 %v9451_v19 }
 0x904   : > { %7641 = verf.f32 %v5604_v15  ;;  %v5605_v27 = vmul.f32 0.70710677, %v5588_v18  ;;  %v5597_v37 = vmul.f32 0.5, %v5588_v18  ;;  %v5915_v21 = vunpack.c.h.bf16 %v9451_v19 }
 0x905   : > { %7643 = verf.f32 %v5603_v10 }
 0x906   : > { %7645 = verf.f32 %v5605_v27 }
 0x90c   : > { %v7632_v62 = vpop.eup %7631 }
 0x90d   : > { %v7634_v53 = vpop.eup %7633  ;;  %v5614_v46 = vadd.f32 1.0, %v7632_v62 }
 0x90e   : > { %v7636_v31 = vpop.eup %7635  ;;  %v5616_v43 = vadd.f32 1.0, %v7634_v53 }
 0x90f   : > { %v7638_v11 = vpop.eup %7637  ;;  %v5615_v24 = vadd.f32 1.0, %v7636_v31  ;;  %v5622_v49 = vmul.f32 %v5614_v46, %v5590_v17 }
 0x910   : > { %v7640_v1 = vpop.eup %7639  ;;  %v5617_v60 = vadd.f32 1.0, %v7638_v11  ;;  %v5624_v8 = vmul.f32 %v5616_v43, %v5592_v47 }
 0x911   : > { %v7642_v52 = vpop.eup %7641  ;;  %v5618_v40 = vadd.f32 1.0, %v7640_v1  ;;  %v5623_v16 = vmul.f32 %v5615_v24, %v5591_v12 }
 0x912   : > { %v7644_v57 = vpop.eup %7643  ;;  %v5620_v59 = vadd.f32 1.0, %v7642_v52  ;;  %v5625_v38 = vmul.f32 %v5617_v60, %v5593_v45 }
 0x913   : > { %v7646_v26 = vpop.eup %7645  ;;  %v5619_v25 = vadd.f32 1.0, %v7644_v57  ;;  %v5626_v36 = vmul.f32 %v5618_v40, %v5594_v9  ;;  %v6447_v40 = vld [vmem:[%s9618_s22] ss:$0 sm:$0xff] }
 0x914   : > { %v5621_v3 = vadd.f32 1.0, %v7646_v26  ;;  %v5628_v51 = vmul.f32 %v5620_v59, %v5596_v5  ;;  %v6448_v9 = vld [vmem:[%s9619_s23] ss:$0 sm:$0xff] }
 0x915   : > { %v5627_v39 = vmul.f32 %v5619_v25, %v5595_v44  ;;  %v5630_v20 = vpack.c.bf16 %v5626_v36, %v5622_v49 }
 0x916   : > { %v5629_v2 = vmul.f32 %v5621_v3, %v5597_v37  ;;  %v5632_v22 = vpack.c.bf16 %v5628_v51, %v5624_v8 }
 0x917   : > { %v5631_v33 = vpack.c.bf16 %v5627_v39, %v5623_v16 }
 0x918   : > { %v5633_v7 = vpack.c.bf16 %v5629_v2, %v5625_v38 }
 0x919   : > { %5864 = vmatprep.mubr.bf16.mxu1 %v5631_v33 }
 0x91a   : > { %5905 = vmatprep.mubr.bf16.mxu0 %v5633_v7  ;;  %5865 = vmatmul.mubr.bf16.vlgmr.msra.gmra.mxu1 %v5630_v20 }
 0x91b   : > { %5906 = vmatmul.mubr.bf16.vlgmr.msra.gmra.mxu0 %v5632_v22 }
 0x9da   : > { %v6628_v29 = vpop.f32.mrf.mxu1 }
 0x9db   : > { %v6650_v56 = vpop.f32.mrf.mxu0 }
 0x9dc   : > { %v6629_v30 = vpop.f32.mrf.mxu1 }
 0x9dd   : > { %v6630_v23 = vadd.f32 %v6629_v30, %v6628_v29  ;;  %v6651_v13 = vpop.f32.mrf.mxu0 }
 0x9de   : > { %v6631_v14 = vpop.f32.mrf.mxu1  ;;  %v6652_v61 = vadd.f32 %v6651_v13, %v6650_v56 }
 0x9df   : > { %v5867_v58 = vadd.f32 %v6630_v23, %v6414_v41  ;;  %v6653_v63 = vpop.f32.mrf.mxu0 }
 0x9e0   : > { %v6632_v35 = vpop.f32.mrf.mxu1 }
 0x9e1   : > { %v5908_v34 = vadd.f32 %v6652_v61, %v5867_v58  ;;  %v6633_v6 = vadd.f32 %v6632_v35, %v6631_v14  ;;  %v6654_v55 = vpop.f32.mrf.mxu0 }
 0x9e2   : > { %v6655_v54 = vadd.f32 %v6654_v55, %v6653_v63 }
 0x9e3   : > { %v5870_v48 = vadd.f32 %v6633_v6, %v6414_v41  ;;  %v5916_v42 = vadd.f32 %v5914_v0, %v5908_v34 }
 0x9e5   : > { %v5911_v28 = vadd.f32 %v6655_v54, %v5870_v48  ;;  %5918 = vadd.xlane.f32.xlu1 %v5916_v42 }
 0x9e7   : > { %v5917_v32 = vadd.f32 %v5915_v21, %v5911_v28 }
 0x9e9   : > { %5920 = vadd.xlane.f32.xlu0 %v5917_v32 }
 0xa6e   : > { %v5919_v4 = vpop.xlane.xlu1 %5918 }
 0xa6f   : > { %v5922_v15 = vmul.f32 0.0078125, %v5919_v4 }
 0xa71   : > { %v5924_v50 = vsub.f32 %v5916_v42, %v5922_v15 }
 0xa72   : > { %v5921_v18 = vpop.xlane.xlu0 %5920 }
 0xa73   : > { %v5923_v10 = vmul.f32 0.0078125, %v5921_v18  ;;  %v5926_v27 = vmul.f32 %v5924_v50, %v5924_v50 }
 0xa75   : > { %v5925_v62 = vsub.f32 %v5917_v32, %v5923_v10  ;;  %5928 = vadd.xlane.f32.xlu1 %v5926_v27 }
 0xa77   : > { %v5927_v53 = vmul.f32 %v5925_v62, %v5925_v62 }
 0xa79   : > { %5930 = vadd.xlane.f32.xlu0 %v5927_v53 }
 0xafe   : > { %v5929_v31 = vpop.xlane.xlu1 %5928 }
 0xaff   : > { %v5932_v11 = vmul.f32 0.0078125, %v5929_v31 }
 0xb01   : > { %v5934_v1 = vadd.f32 1e-05, %v5932_v11 }
 0xb02   : > { %v5931_v52 = vpop.xlane.xlu0 %5930 }
 0xb03   : > { %7647 = vrsqrt.f32 %v5934_v1  ;;  %v5933_v19 = vmul.f32 0.0078125, %v5931_v52 }
 0xb05   : > { %v5935_v17 = vadd.f32 1e-05, %v5933_v19 }
 0xb07   : > { %7649 = vrsqrt.f32 %v5935_v17 }
 0xb10   : > { %v7648_v12 = vpop.eup %7647 }
 0xb11   : > { %v5938_v24 = vmul.f32 %v7648_v12, %v5924_v50 }
 0xb13   : > { %v5946_v46 = vmul.f32 %v6447_v40, %v5938_v24 }
 0xb14   : > { %v7650_v57 = vpop.eup %7649 }
 0xb15   : > { %v5939_v60 = vmul.f32 %v7650_v57, %v5925_v62  ;;  %v5954_v26 = vadd.f32 %v6448_v9, %v5946_v46 }
 0xb17   : > { %v5947_v59 = vmul.f32 %v6447_v40, %v5939_v60 }
 0xb19   : > { %v5955_v43 = vadd.f32 %v6448_v9, %v5947_v59 }
 0xb1b   : > { %v6464_v5 = vpack.c.bf16 %v5955_v43, %v5954_v26 }
 0xb1d   : > { %6465 = vst [vmem:[%s9598_s19] sm:$0xff] %v6464_v5  }
 0xb1e PF: > { %s9620_s16 = sld [smem:[#allocation26_spill]]  ;;  %s9624_s25 = smov %s7986_s26 }
 0xb1f   : > { %s9621_s20 = sld [smem:[#allocation24_spill]]  ;;  %s9626_s28 = smov %s7998_s29 }
 0xb20   : > { %s9622_s27 = sld [smem:[#allocation29_spill]] }
 0xb21   : > { %s9623_s21 = sld [smem:[#allocation27_spill]] }
 0xb24   : > { %s41_s30 = sadd.s32 1, %s9620_s16  }
 0xb25   : > { %p38_p7 = scmp.ge.s32.totalorder %s41_s30, 4   ;;  %s9625_s26 = smov %s9621_s20 }
 0xb27   : > { %s9627_s29 = smov %s9623_s21  ;;  %40 = sbr.rel (!%p38_p7) target bundleno = 23 (0x17), region = 234 }
 0xb2c   :  { %5988 = vsyncpa [#allocation3], 1 }
 0xb2d   :  { %5990 = vsyncpa [#allocation3 + $0x1], 1 }
 0xb2e   :  { %5991 = vsyncpa [#allocation5], 1 }
 0xb2f   :  { %5993 = vsyncpa [#allocation5 + $0x1], 1 }
 0xb30   :  { %5994 = vsyncpa [#allocation8], 1 }
 0xb31   :  { %5996 = vsyncpa [#allocation8 + $0x1], 1 }
 0xb32   :  { %5997 = vsyncpa [#allocation11], 1 }
 0xb33   :  { %5999 = vsyncpa [#allocation11 + $0x1], 1 }
 0xb34   :  { %6000 = vsyncpa [#allocation14], 1 }
 0xb35   :  { %6002 = vsyncpa [#allocation14 + $0x1], 1 }
 0xb36   :  { %6003 = vsyncpa [#allocation17], 1 }
 0xb37   :  { %6005 = vsyncpa [#allocation17 + $0x1], 1 }

// kernel: transformer_forward.3
= control target key start
LH: loop header
LB: loop body
LE: loop exit
PB: predicated region body
PF: predicated region fallthrough
CT: control target
= control target key end

     0   :  { %v14720_v1 = vmov 0   ;;  %v14722_v2 = vmov 0.0   ;;  %vm11982_vm0 = vmmov 0   ;;  %v135_v27 = vlaneseq  ;;  %s14688_s2 = inlined_call_operand.vmem [shape: bf16[128,384], index: 2, kind: input, shape index: {}]   ;;  %s14689_s0 = inlined_call_operand.vmem [shape: bf16[16,128], index: 0, kind: input, shape index: {}]   ;;  %s14690_s3 = inlined_call_operand.vmem [shape: f32[1,384], index: 3, kind: input, shape index: {}]   ;;  %s14691_s4 = inlined_call_operand.vmem [shape: bf16[128,128], index: 4, kind: input, shape index: {}]   ;;  %s14692_s8 = inlined_call_operand.vmem [shape: bf16[128,256], index: 8, kind: input, shape index: {}]   ;;  %s14693_s1 = inlined_call_operand.vmem [shape: bf16[16,128], index: 1, kind: input, shape index: {}]   ;;  %s14694_s9 = inlined_call_operand.vmem [shape: f32[1,256], index: 9, kind: input, shape index: {}]   ;;  %s14695_s5 = inlined_call_operand.vmem [shape: f32[1,128], index: 5, kind: input, shape index: {}]   ;;  %s14696_s10 = inlined_call_operand.vmem [shape: bf16[128,128], index: 10, kind: input, shape index: {}]   ;;  %s14697_s6 = inlined_call_operand.vmem [shape: f32[1,128], index: 6, kind: input, shape index: {}]   ;;  %s14698_s7 = inlined_call_operand.vmem [shape: f32[1,128], index: 7, kind: input, shape index: {}]   ;;  %s14699_s11 = inlined_call_operand.vmem [shape: f32[1,128], index: 11, kind: input, shape index: {}]   ;;  %s14700_s12 = inlined_call_operand.vmem [shape: bf16[128,128], index: 12, kind: input, shape index: {}]   ;;  %s14701_s13 = inlined_call_operand.vmem [shape: f32[1,128], index: 13, kind: input, shape index: {}]   ;;  %s14702_s16 = inlined_call_operand.vmem [shape: bf16[128,512], index: 16, kind: input, shape index: {}]   ;;  %s14703_s14 = inlined_call_operand.vmem [shape: f32[1,128], index: 14, kind: input, shape index: {}]   ;;  %s14704_s15 = inlined_call_operand.vmem [shape: f32[1,128], index: 15, kind: input, shape index: {}]   ;;  %s14705_s18 = inlined_call_operand.vmem [shape: bf16[512,128], index: 18, kind: input, shape index: {}]   ;;  %s14706_s17 = inlined_call_operand.vmem [shape: f32[1,512], index: 17, kind: input, shape index: {}]   ;;  %s14707_s19 = inlined_call_operand.vmem [shape: f32[1,128], index: 19, kind: input, shape index: {}]   ;;  %s14708_s22 = inlined_call_operand.vmem [shape: bf16[128,128], index: 22, kind: input, shape index: {}]   ;;  %s14709_s20 = inlined_call_operand.vmem [shape: f32[1,128], index: 20, kind: input, shape index: {}]   ;;  %s14710_s21 = inlined_call_operand.vmem [shape: f32[1,128], index: 21, kind: input, shape index: {}]   ;;  %s14711_s23 = inlined_call_operand.vmem [shape: f32[1,128], index: 23, kind: input, shape index: {}]   ;;  %s14712_s24 = inlined_call_operand.vmem [shape: f32[16,128], index: 24, kind: output, shape index: {}]  }
   0x1   :  { %14734 = sst [smem:[#allocation5_spill]] %s14688_s2  ;;  %316 = vmatprep.mubr.bf16.mxu0 %v14720_v1  ;;  %10287 = vmatprep.subr.bf16.mxu1 %v14722_v2  ;;  %v11983_v30 = vmov 1983009808   ;;  %vm812_vm1 = vcmask 261120   ;;  %vm2285_vm2 = vcmask 9216   ;;  %vm2674_vm3 = vcmask 1040384  }
   0x2   :  { %14735 = sst [smem:[#allocation6_spill]] %s14689_s0  ;;  %10303 = vmatprep.mubr.msk.bf16.mxu1 %vm11982_vm0, %v14722_v2  ;;  %v12204_v28 = vshrl.u32 %v135_v27, 7  ;;  %v372_v31 = vunpack.c.l.s4 %v11983_v30  ;;  %s14730_s0 = smov 32   ;;  %vm2670_vm4 = vcmask 15360   ;;  %vm4248_vm5 = vcmask 523264  }
   0x3   :  { %14736 = sst [smem:[#allocation7_spill]] %s14690_s3  ;;  %vm4257_vm6 = vcmask 785408  }
   0x4   :  { %14737 = sst [smem:[#allocation8_spill]] %s14691_s4  ;;  %14745 = vst [vmem:[#allocation2_spill] sm:$0xff] %v12204_v28  ;;  %v12207_v29 = vsub.s32 0, %v12204_v28  ;;  %v12215_v33 = vsub.s32 1, %v12204_v28  ;;  %v373_v35 = vunpack.c.0.s8 %v372_v31 }
   0x5   :  { %14738 = sst [smem:[#allocation9_spill]] %s14692_s8  ;;  %s14732_s8 = smov 64  }
   0x6   :  { %14739 = sst [smem:[#allocation10_spill]] %s14693_s1  ;;  %14746 = vst [vmem:[#allocation3_spill] sm:$0xff] %v12207_v29  ;;  %14748 = vst [vmem:[#allocation4_spill] sm:$0xff] %v12215_v33  ;;  %v12222_v39 = vsub.s32 %v373_v35, %v12204_v28 }
   0x7   :  { %14740 = sst [smem:[#allocation11_spill]] %s14694_s9 }
   0x8   :  { %14741 = sst [smem:[#allocation12_spill]] %s14695_s5 }
   0x9   :  { %14742 = sst [smem:[#allocation13_spill]] %s14696_s10  ;;  %s11984_s10 = smov 96  }
   0xa   :  { %s14743_s27 = sld [smem:[#allocation5_spill]] }
   0xb   :  { %s14744_s28 = sld [smem:[#allocation6_spill]] }
   0xc   :  { %s14751_s9 = sld [smem:[#allocation8_spill]] }
   0xd   :  { %s14752_s30 = sld [smem:[#allocation9_spill]] }
   0xe   :  { %s14753_s5 = sld [smem:[#allocation10_spill]] }
   0xf   :  { %s14754_s25 = sld [smem:[#allocation11_spill]] }
  0x10   :  { %v11522_v0 = vld [vmem:[%s14743_s27 + $0xac] ss:$12 sps:$4 sm:$0xff]   ;;  %v11524_v3 = vld [vmem:[%s14743_s27 + $0xa8] ss:$12 sps:$4 sm:$0xff]   ;;  %v11527_v5 = vld [vmem:[%s14743_s27 + $0x90] ss:$12 sps:$4 sm:$0xff]  }
  0x11   :  { %284 = vmatprep.subr.bf16.mxu0 %v11522_v0  ;;  %v11525_v4 = vld [vmem:[%s14743_s27 + $0x94] ss:$12 sps:$4 sm:$0xff]   ;;  %v11528_v6 = vld [vmem:[%s14743_s27 + $0x7c] ss:$12 sps:$4 sm:$0xff]   ;;  %v11530_v7 = vld [vmem:[%s14743_s27 + $0x78] ss:$12 sps:$4 sm:$0xff]  }
  0x12   :  { %285 = vmatpush1.bf16.msra.mxu0 %v11524_v3  ;;  %v11531_v8 = vld [vmem:[%s14743_s27 + $0x64] ss:$12 sps:$4 sm:$0xff]   ;;  %v11533_v9 = vld [vmem:[%s14743_s27 + $0x60] ss:$12 sps:$4 sm:$0xff]   ;;  %v11536_v13 = vld [vmem:[%s14743_s27 + $0x48] ss:$12 sps:$4 sm:$0xff]  }
  0x13   :  { %286 = vmatprep.subr.bf16.mxu0 %v11525_v4  ;;  %v11547_v10 = vld [vmem:[%s14743_s27 + $0xb0] ss:$12 sps:$4 sm:$0xff]   ;;  %v11534_v11 = vld [vmem:[%s14743_s27 + $0x4c] ss:$12 sps:$4 sm:$0xff]   ;;  %v11537_v14 = vld [vmem:[%s14743_s27 + $0x34] ss:$12 sps:$4 sm:$0xff]  }
  0x14   :  { %10288 = vmatpush3.bf16.msra.mxu1 %v11547_v10  ;;  %v11548_v12 = vld [vmem:[%s14743_s27 + $0x98] ss:$12 sps:$4 sm:$0xff]   ;;  %v11549_v15 = vld [vmem:[%s14743_s27 + $0x80] ss:$12 sps:$4 sm:$0xff]   ;;  %v11539_v16 = vld [vmem:[%s14743_s27 + $0x30] ss:$12 sps:$4 sm:$0xff]  }
  0x15   :  { %10289 = vmatprep.subr.bf16.mxu1 %v14722_v2  ;;  %v11540_v17 = vld [vmem:[%s14743_s27 + $0x1c] ss:$12 sps:$4 sm:$0xff]   ;;  %v11542_v19 = vld [vmem:[%s14743_s27 + $0x18] ss:$12 sps:$4 sm:$0xff]   ;;  %v11545_v22 = vld [vmem:[%s14743_s27] ss:$12 sps:$4 sm:$0xff]  }
  0x16   :  { %287 = vmatpush1.bf16.msra.mxu0 %v11527_v5  ;;  %v11550_v18 = vld [vmem:[%s14743_s27 + $0x68] ss:$12 sps:$4 sm:$0xff]   ;;  %v11543_v20 = vld [vmem:[%s14743_s27 + $0x4] ss:$12 sps:$4 sm:$0xff]   ;;  %v11553_v25 = vld [vmem:[%s14743_s27 + $0x20] ss:$12 sps:$4 sm:$0xff]  }
  0x17   :  { %288 = vmatprep.subr.bf16.mxu0 %v11528_v6  ;;  %v11551_v21 = vld [vmem:[%s14743_s27 + $0x50] ss:$12 sps:$4 sm:$0xff]   ;;  %v78_v23 = vld [vmem:[%s14744_s28] sm:$0xff]   ;;  %v11554_v26 = vld [vmem:[%s14743_s27 + $0x8] ss:$12 sps:$4 sm:$0xff]   ;;  %s14760_s2 = sld [smem:[#allocation13_spill]] }
  0x18   :  { %10290 = vmatpush3.bf16.msra.mxu1 %v11548_v12  ;;  %v11552_v24 = vld [vmem:[%s14743_s27 + $0x38] ss:$12 sps:$4 sm:$0xff]   ;;  %s14747_s27 = sld [smem:[#allocation7_spill]] }
  0x19   :  { %10291 = vmatprep.subr.bf16.mxu1 %v14722_v2 }
  0x1a   :  { %289 = vmatpush1.bf16.msra.mxu0 %v11530_v7 }
  0x1b   :  { %290 = vmatprep.subr.bf16.mxu0 %v11531_v8 }
  0x1c   :  { %10292 = vmatpush3.bf16.msra.mxu1 %v11549_v15 }
  0x1d   :  { %10293 = vmatprep.subr.bf16.mxu1 %v14722_v2 }
  0x1e   :  { %291 = vmatpush1.bf16.msra.mxu0 %v11533_v9  ;;  %v12212_v32 = vld [vmem:[%s14747_s27] sm:$0x7] }
  0x1f   :  { %292 = vmatprep.subr.bf16.mxu0 %v11534_v11  ;;  %v138_v34 = vrot.slane %v12212_v32, %v12207_v29  ;;  %v142_v36 = vrot.slane %v12212_v32, %v12215_v33 }
  0x20   :  { %10294 = vmatpush3.bf16.msra.mxu1 %v11550_v18 }
  0x21   :  { %10295 = vmatprep.subr.bf16.mxu1 %v14722_v2 }
  0x22   :  { %293 = vmatpush1.bf16.msra.mxu0 %v11536_v13 }
  0x23   :  { %294 = vmatprep.subr.bf16.mxu0 %v11537_v14 }
  0x24   :  { %10296 = vmatpush3.bf16.msra.mxu1 %v11551_v21 }
  0x25   :  { %10297 = vmatprep.subr.bf16.mxu1 %v14722_v2 }
  0x26   :  { %295 = vmatpush1.bf16.msra.mxu0 %v11539_v16 }
  0x27   :  { %296 = vmatprep.subr.bf16.mxu0 %v11540_v17 }
  0x28   :  { %10298 = vmatpush3.bf16.msra.mxu1 %v11552_v24 }
  0x29   :  { %10299 = vmatprep.subr.bf16.mxu1 %v14722_v2 }
  0x2a   :  { %297 = vmatpush1.bf16.msra.mxu0 %v11542_v19 }
  0x2b   :  { %298 = vmatprep.subr.bf16.mxu0 %v11543_v20 }
  0x2c   :  { %10300 = vmatpush3.bf16.msra.mxu1 %v11553_v25 }
  0x2d   :  { %10301 = vmatprep.subr.bf16.mxu1 %v14722_v2 }
  0x2e   :  { %299 = vmatpush1.bf16.msra.mxu0 %v11545_v22 }
  0x2f   :  { %10307 = vmatprep.subr.bf16.mxu0 %v14722_v2 }
  0x30   :  { %10302 = vmatpush3.bf16.msra.mxu1 %v11554_v26 }
  0x31   :  { %317 = vmatmul.mubr.bf16.vlgmr.msra.gmra.mxu0 %v78_v23  ;;  %10313 = vmatprep.subr.bf16.mxu1 %v14722_v2 }
  0x32   :  { %10309 = vmatprep.mubr.msk.bf16.mxu0 %vm11982_vm0, %v14722_v2 }
  0x33   :  { %10304 = vmatmul.mubr.bf16.vlgmr.msra.gmra.mxu1 %v78_v23 }
  0x34   :  { %10315 = vmatprep.mubr.msk.bf16.mxu1 %vm11982_vm0, %v14722_v2 }
  0xf1   :  { %v318_v37 = vpop.f32.mrf.mxu0 }
  0xf2   :  { %v319_v38 = vadd.f32 %v318_v37, %v138_v34 }
  0xf3   :  { %v320_v40 = vpop.f32.mrf.mxu0  ;;  %v361_v31 = vpop.f32.mrf.mxu1 }
  0xf4   :  { %v370_v41 = vcombine.high %v319_v38, %v319_v38  ;;  %v321_v42 = vadd.f32 %v320_v40, %v142_v36  ;;  %v377_v44 = vrot.slane %v319_v38, %v12222_v39  ;;  %v14719_v40 = vsub.s32 2, %v12204_v28 }
  0xf5   :  { %v322_v43 = vpop.f32.mrf.mxu0 }
  0xf6   :  { %v518_v45 = vcombine.high %v321_v42, %v321_v42  ;;  %v525_v46 = vrot.slane %v321_v42, %v12222_v39  ;;  %v384_v48 = vrot.slane %v370_v41, %v12222_v39  ;;  %v323_v50 = vadd.f32 %v322_v43, %v138_v34 }
  0xf7   :  { %v324_v47 = vpop.f32.mrf.mxu0  ;;  %v385_v56 = vcombine.high %v377_v44, %v377_v44  ;;  %v484_v11 = vpack.c.bf16 %v377_v44, %v377_v44 }
  0xf8   :  { %v532_v49 = vrot.slane %v518_v45, %v12222_v39  ;;  %v325_v51 = vadd.f32 %v324_v47, %v142_v36  ;;  %v632_v52 = vpack.c.bf16 %v525_v46, %v525_v46  ;;  %v533_v53 = vcombine.high %v525_v46, %v525_v46  ;;  %v10305_v36 = vpop.f32.mrf.mxu1 }
  0xf9   :  { %v387_v61 = vcombine.high %v323_v50, %v323_v50  ;;  %v12233_v62 = vrot.slane %v323_v50, %v12222_v39  ;;  %v386_v0 = vcombine.high %v384_v48, %v384_v48  ;;  %v12244_v5 = vpack.i.bf16 %v385_v56, %v377_v44 }
  0xfa   :  { %v535_v54 = vcombine.high %v325_v51, %v325_v51  ;;  %v534_v55 = vcombine.high %v532_v49, %v532_v49  ;;  %v542_v57 = vrot.slane %v325_v51, %v12222_v39  ;;  %v817_v58 = vsel %vm812_vm1, %v632_v52, 0  ;;  %v364_v41 = vpop.f32.mrf.mxu1 }
  0xfb   :  { %v12230_v59 = vpack.i.bf16 %v533_v53, %v525_v46  ;;  %v633_v60 = vpack.c.bf16 %v533_v53, %v533_v53  ;;  %10308 = vmatpush3.bf16.xpose.msra.mxu0 %v817_v58  ;;  %v634_v6 = vpack.c.bf16 %v532_v49, %v532_v49  ;;  %v12248_v8 = vrot.slane %v387_v61, %v12222_v39 }
  0xfc   :  { %v12235_v63 = vpack.i.bf16 %v534_v55, %v532_v49  ;;  %10319 = vmatprep.subr.bf16.mxu0 %v14722_v2  ;;  %v549_v4 = vrot.slane %v535_v54, %v12222_v39  ;;  %v550_v7 = vcombine.high %v542_v57, %v542_v57  ;;  %v12250_v9 = vpack.i.bf16 %v386_v0, %v384_v48  ;;  %v10306_v43 = vpop.f32.mrf.mxu1 }
  0xfd   :  { %11163 = vrot.lane.b32.xlu0 %v12230_v59, %s11984_s10  ;;  %v863_v3 = vsel %vm812_vm1, %v633_v60, 0  ;;  %v402_v10 = vcombine.high %v12233_v62, %v12233_v62  ;;  %v635_v12 = vpack.c.bf16 %v534_v55, %v534_v55  ;;  %v909_v13 = vsel %vm812_vm1, %v634_v6, 0 }
  0xfe   :  { %10314 = vmatpush3.bf16.xpose.msra.mxu1 %v863_v3  ;;  %11173 = vrot.lane.b32.xlu1 %v12235_v63, %s11984_s10  ;;  %v12260_v14 = vpack.i.bf16 %v550_v7, %v542_v57  ;;  %v485_v15 = vpack.c.bf16 %v385_v56, %v385_v56  ;;  %v551_v16 = vcombine.high %v549_v4, %v549_v4 }
  0xff   :  { %10325 = vmatprep.subr.bf16.mxu1 %v14722_v2  ;;  %v12263_v17 = vpack.i.bf16 %v402_v10, %v12233_v62  ;;  %v12269_v18 = vcombine.high %v12248_v8, %v12248_v8  ;;  %v955_v19 = vsel %vm812_vm1, %v635_v12, 0  ;;  %v636_v21 = vpack.c.bf16 %v542_v57, %v542_v57 }
 0x100   :  { %v12277_v20 = vpack.i.bf16 %v551_v16, %v549_v4  ;;  %v486_v23 = vpack.c.bf16 %v384_v48, %v384_v48  ;;  %v637_v24 = vpack.c.bf16 %v550_v7, %v550_v7  ;;  %v487_v26 = vpack.c.bf16 %v386_v0, %v386_v0 }
 0x101   :  { %11168 = vrot.lane.b32.xlu0 %v12244_v5, %s11984_s10  ;;  %v12284_v22 = vpack.i.bf16 %v12269_v18, %v12248_v8  ;;  %v1001_v25 = vsel %vm812_vm1, %v636_v21, 0  ;;  %v638_v30 = vpack.c.bf16 %v549_v4, %v549_v4  ;;  %v488_v34 = vpack.c.bf16 %v12233_v62, %v12233_v62 }
 0x102   :  { %11178 = vrot.lane.b32.xlu1 %v12250_v9, %s11984_s10  ;;  %10310 = vmatmul.mubr.msk.bf16.vlgmr.msra.gmra.mxu0 %vm812_vm1, %v484_v11  ;;  %v1047_v27 = vsel %vm812_vm1, %v637_v24, 0  ;;  %v639_v35 = vpack.c.bf16 %v551_v16, %v551_v16  ;;  %v489_v38 = vpack.c.bf16 %v402_v10, %v402_v10  ;;  %v146_v44 = vrot.slane %v12212_v32, %v14719_v40 }
 0x103   :  { %10320 = vmatpush3.bf16.xpose.msra.mxu0 %v909_v13  ;;  %10321 = vmatprep.mubr.msk.bf16.mxu0 %vm11982_vm0, %v14722_v2  ;;  %v1093_v37 = vsel %vm812_vm1, %v638_v30, 0  ;;  %v490_v45 = vpack.c.bf16 %v12248_v8, %v12248_v8  ;;  %v491_v46 = vpack.c.bf16 %v12269_v18, %v12269_v18 }
 0x104   :  { %10331 = vmatprep.subr.bf16.mxu0 %v14722_v2  ;;  %v1139_v42 = vsel %vm812_vm1, %v639_v35, 0  ;;  %v362_v47 = vadd.f32 %v361_v31, %v146_v44  ;;  %v365_v50 = vadd.f32 %v364_v41, %v146_v44 }
 0x105   :  { %11183 = vrot.lane.b32.xlu0 %v12260_v14, %s11984_s10  ;;  %10316 = vmatmul.mubr.msk.bf16.vlgmr.msra.gmra.mxu1 %vm812_vm1, %v485_v15 }
 0x106   :  { %10326 = vmatpush3.bf16.xpose.msra.mxu1 %v955_v19  ;;  %11188 = vrot.lane.b32.xlu1 %v12263_v17, %s11984_s10  ;;  %v666_v32 = vcombine.high %v362_v47, %v362_v47  ;;  %v12355_v49 = vrot.slane %v362_v47, %v12222_v39  ;;  %v683_v52 = vcombine.high %v365_v50, %v365_v50 }
 0x107   :  { %10327 = vmatprep.mubr.msk.bf16.mxu1 %vm11982_vm0, %v14722_v2  ;;  %10337 = vmatprep.subr.bf16.mxu1 %v14722_v2  ;;  %v12366_v53 = vrot.slane %v365_v50, %v12222_v39 }
 0x108   :  { %v12350_v48 = vrot.slane %v666_v32, %v12222_v39  ;;  %v12370_v54 = vcombine.high %v12355_v49, %v12355_v49  ;;  %v12381_v56 = vrot.slane %v683_v52, %v12222_v39 }
 0x109   :  { %11193 = vrot.lane.b32.xlu0 %v12277_v20, %s11984_s10  ;;  %v12389_v58 = vcombine.high %v12366_v53, %v12366_v53 }
 0x10a   :  { %11198 = vrot.lane.b32.xlu1 %v12284_v22, %s11984_s10  ;;  %10322 = vmatmul.mubr.msk.bf16.vlgmr.msra.gmra.mxu0 %vm812_vm1, %v486_v23  ;;  %v12361_v51 = vcombine.high %v12350_v48, %v12350_v48  ;;  %v12385_v57 = vpack.i.bf16 %v12370_v54, %v12355_v49  ;;  %v12401_v60 = vcombine.high %v12381_v56, %v12381_v56 }
 0x10b   :  { %10332 = vmatpush3.bf16.xpose.msra.mxu0 %v1001_v25  ;;  %10333 = vmatprep.mubr.msk.bf16.mxu0 %vm11982_vm0, %v14722_v2 }
 0x10c   :  { %10343 = vmatprep.subr.bf16.mxu0 %v14722_v2  ;;  %v12376_v55 = vpack.i.bf16 %v12361_v51, %v12350_v48  ;;  %v12409_v61 = vpack.i.bf16 %v12401_v60, %v12381_v56 }
 0x10d   :  { %11203 = vrot.lane.b32.xlu0 %v12230_v59, %s14732_s8  ;;  %10328 = vmatmul.mubr.msk.bf16.vlgmr.msra.gmra.mxu1 %vm812_vm1, %v487_v26 }
 0x10e   :  { %10338 = vmatpush3.bf16.xpose.msra.mxu1 %v1047_v27  ;;  %11208 = vrot.lane.b32.xlu1 %v12244_v5, %s14732_s8 }
 0x10f   :  { %10339 = vmatprep.mubr.msk.bf16.mxu1 %vm11982_vm0, %v14722_v2  ;;  %10349 = vmatprep.subr.bf16.mxu1 %v14722_v2 }
 0x111   :  { %11213 = vrot.lane.b32.xlu0 %v12235_v63, %s14732_s8 }
 0x112   :  { %11218 = vrot.lane.b32.xlu1 %v12250_v9, %s14732_s8  ;;  %10334 = vmatmul.mubr.msk.bf16.vlgmr.msra.gmra.mxu0 %vm812_vm1, %v488_v34 }
 0x113   :  { %10344 = vmatpush3.bf16.xpose.msra.mxu0 %v1093_v37  ;;  %10345 = vmatprep.mubr.msk.bf16.mxu0 %vm11982_vm0, %v14722_v2 }
 0x114   :  { %10355 = vmatprep.subr.bf16.mxu0 %v14722_v2 }
 0x115   :  { %11223 = vrot.lane.b32.xlu0 %v12260_v14, %s14732_s8  ;;  %10340 = vmatmul.mubr.msk.bf16.vlgmr.msra.gmra.mxu1 %vm812_vm1, %v489_v38 }
 0x116   :  { %10350 = vmatpush3.bf16.xpose.msra.mxu1 %v1139_v42  ;;  %11228 = vrot.lane.b32.xlu1 %v12263_v17, %s14732_s8 }
 0x117   :  { %10351 = vmatprep.mubr.msk.bf16.mxu1 %vm11982_vm0, %v14722_v2  ;;  %10361 = vmatprep.subr.bf16.mxu1 %v14722_v2 }
 0x119   :  { %11233 = vrot.lane.b32.xlu0 %v12277_v20, %s14732_s8 }
 0x11a   :  { %11238 = vrot.lane.b32.xlu1 %v12284_v22, %s14732_s8  ;;  %10346 = vmatmul.mubr.msk.bf16.vlgmr.msra.gmra.mxu0 %vm812_vm1, %v490_v45 }
 0x11b   :  { %10357 = vmatprep.mubr.msk.bf16.mxu0 %vm11982_vm0, %v14722_v2 }
 0x11d   :  { %11243 = vrot.lane.b32.xlu0 %v12230_v59, %s14730_s0  ;;  %10352 = vmatmul.mubr.msk.bf16.vlgmr.msra.gmra.mxu1 %vm812_vm1, %v491_v46  ;;  %v12397_v59 = vpack.i.bf16 %v12389_v58, %v12366_v53 }
 0x11e   :  { %11248 = vrot.lane.b32.xlu1 %v12244_v5, %s14730_s0  ;;  %10363 = vmatprep.mubr.msk.bf16.mxu1 %vm11982_vm0, %v14722_v2 }
 0x121   :  { %11253 = vrot.lane.b32.xlu0 %v12235_v63, %s14730_s0 }
 0x122   :  { %11258 = vrot.lane.b32.xlu1 %v12250_v9, %s14730_s0 }
 0x125   :  { %11263 = vrot.lane.b32.xlu0 %v12260_v14, %s14730_s0 }
 0x126   :  { %11268 = vrot.lane.b32.xlu1 %v12263_v17, %s14730_s0 }
 0x129   :  { %11273 = vrot.lane.b32.xlu0 %v12277_v20, %s14730_s0 }
 0x12a   :  { %11278 = vrot.lane.b32.xlu1 %v12284_v22, %s14730_s0 }
 0x12d   :  { %11288 = vrot.lane.b32.xlu0 %v12376_v55, %s11984_s10 }
 0x12e   :  { %11283 = vrot.lane.b32.xlu1 %v12385_v57, %s11984_s10 }
 0x131   :  { %11303 = vrot.lane.b32.xlu0 %v12385_v57, %s14732_s8 }
 0x132   :  { %11293 = vrot.lane.b32.xlu1 %v12397_v59, %s11984_s10 }
 0x136   :  { %11298 = vrot.lane.b32.xlu1 %v12409_v61, %s11984_s10 }
 0x13a   :  { %11308 = vrot.lane.b32.xlu1 %v12376_v55, %s14732_s8 }
 0x16f   :  { %v11164_v62 = vpop.permute.xlu0 %11163 }
 0x170   :  { %v11166_v63 = vunpack.i.h.bf16 %v11164_v62  ;;  %v11165_v0 = vunpack.i.l.bf16 %v11164_v62  ;;  %v11174_v3 = vpop.permute.xlu1 %11173 }
 0x171   :  { %v11176_v7 = vunpack.i.h.bf16 %v11174_v3  ;;  %v11175_v8 = vunpack.i.l.bf16 %v11174_v3 }
 0x172   :  { %v641_v4 = vpack.c.bf16 %v11166_v63, %v11166_v63  ;;  %v640_v5 = vpack.c.bf16 %v11165_v0, %v11165_v0 }
 0x173   :  { %v11169_v6 = vpop.permute.xlu0 %11168  ;;  %v643_v13 = vpack.c.bf16 %v11176_v7, %v11176_v7  ;;  %v642_v14 = vpack.c.bf16 %v11175_v8, %v11175_v8 }
 0x174   :  { %v1185_v9 = vsel %vm812_vm1, %v640_v5, 0  ;;  %v1231_v10 = vsel %vm812_vm1, %v641_v4, 0  ;;  %v11171_v11 = vunpack.i.h.bf16 %v11169_v6  ;;  %v11170_v12 = vunpack.i.l.bf16 %v11169_v6  ;;  %v11179_v18 = vpop.permute.xlu1 %11178 }
 0x175   :  { %10356 = vmatpush3.bf16.xpose.msra.mxu0 %v1185_v9  ;;  %10362 = vmatpush3.bf16.xpose.msra.mxu1 %v1231_v10  ;;  %v1277_v21 = vsel %vm812_vm1, %v642_v14, 0  ;;  %v1323_v22 = vsel %vm812_vm1, %v643_v13, 0  ;;  %v11181_v23 = vunpack.i.h.bf16 %v11179_v18  ;;  %v11180_v24 = vunpack.i.l.bf16 %v11179_v18 }
 0x176   :  { %10367 = vmatprep.subr.bf16.mxu0 %v14722_v2  ;;  %10373 = vmatprep.subr.bf16.mxu1 %v14722_v2  ;;  %v493_v16 = vpack.c.bf16 %v11171_v11, %v11171_v11  ;;  %v492_v17 = vpack.c.bf16 %v11170_v12, %v11170_v12 }
 0x177   :  { %v11184_v15 = vpop.permute.xlu0 %11183  ;;  %v495_v30 = vpack.c.bf16 %v11181_v23, %v11181_v23  ;;  %v494_v31 = vpack.c.bf16 %v11180_v24, %v11180_v24 }
 0x178   :  { %v11186_v19 = vunpack.i.h.bf16 %v11184_v15  ;;  %v11185_v20 = vunpack.i.l.bf16 %v11184_v15  ;;  %v11189_v34 = vpop.permute.xlu1 %11188 }
 0x179   :  { %v11191_v41 = vunpack.i.h.bf16 %v11189_v34  ;;  %v11190_v42 = vunpack.i.l.bf16 %v11189_v34 }
 0x17a   :  { %v645_v25 = vpack.c.bf16 %v11186_v19, %v11186_v19  ;;  %v644_v26 = vpack.c.bf16 %v11185_v20, %v11185_v20 }
 0x17b   :  { %v11194_v27 = vpop.permute.xlu0 %11193  ;;  %v497_v46 = vpack.c.bf16 %v11191_v41, %v11191_v41  ;;  %v496_v47 = vpack.c.bf16 %v11190_v42, %v11190_v42 }
 0x17c   :  { %10358 = vmatmul.mubr.msk.bf16.vlgmr.msra.gmra.mxu0 %vm812_vm1, %v492_v17  ;;  %10364 = vmatmul.mubr.msk.bf16.vlgmr.msra.gmra.mxu1 %vm812_vm1, %v493_v16  ;;  %v11196_v35 = vunpack.i.h.bf16 %v11194_v27  ;;  %v11195_v36 = vunpack.i.l.bf16 %v11194_v27  ;;  %v1369_v37 = vsel %vm812_vm1, %v644_v26, 0  ;;  %v1415_v38 = vsel %vm812_vm1, %v645_v25, 0  ;;  %v11199_v32 = vpop.permute.xlu1 %11198 }
 0x17d   :  { %10368 = vmatpush3.bf16.xpose.msra.mxu0 %v1277_v21  ;;  %10374 = vmatpush3.bf16.xpose.msra.mxu1 %v1323_v22  ;;  %v11201_v0 = vunpack.i.h.bf16 %v11199_v32  ;;  %v11200_v3 = vunpack.i.l.bf16 %v11199_v32 }
 0x17e   :  { %10369 = vmatprep.mubr.msk.bf16.mxu0 %vm11982_vm0, %v14722_v2  ;;  %10375 = vmatprep.mubr.msk.bf16.mxu1 %vm11982_vm0, %v14722_v2  ;;  %v647_v43 = vpack.c.bf16 %v11196_v35, %v11196_v35  ;;  %v646_v44 = vpack.c.bf16 %v11195_v36, %v11195_v36 }
 0x17f   :  { %10379 = vmatprep.subr.bf16.mxu0 %v14722_v2  ;;  %10385 = vmatprep.subr.bf16.mxu1 %v14722_v2  ;;  %v11204_v45 = vpop.permute.xlu0 %11203  ;;  %v499_v7 = vpack.c.bf16 %v11201_v0, %v11201_v0  ;;  %v498_v8 = vpack.c.bf16 %v11200_v3, %v11200_v3 }
 0x180   :  { %v11206_v50 = vunpack.i.h.bf16 %v11204_v45  ;;  %v11205_v52 = vunpack.i.l.bf16 %v11204_v45  ;;  %v1461_v62 = vsel %vm812_vm1, %v646_v44, 0  ;;  %v1507_v63 = vsel %vm812_vm1, %v647_v43, 0  ;;  %v11209_v9 = vpop.permute.xlu1 %11208 }
 0x181   :  { %v11211_v14 = vunpack.i.h.bf16 %v11209_v9  ;;  %v11210_v15 = vunpack.i.l.bf16 %v11209_v9 }
 0x182   :  { %v649_v4 = vpack.c.bf16 %v11206_v50, %v11206_v50  ;;  %v648_v5 = vpack.c.bf16 %v11205_v52, %v11205_v52 }
 0x183   :  { %v11214_v6 = vpop.permute.xlu0 %11213  ;;  %v501_v19 = vpack.c.bf16 %v11211_v14, %v11211_v14  ;;  %v500_v20 = vpack.c.bf16 %v11210_v15, %v11210_v15 }
 0x184   :  { %10370 = vmatmul.mubr.msk.bf16.vlgmr.msra.gmra.mxu0 %vm812_vm1, %v494_v31  ;;  %10376 = vmatmul.mubr.msk.bf16.vlgmr.msra.gmra.mxu1 %vm812_vm1, %v495_v30  ;;  %v11216_v10 = vunpack.i.h.bf16 %v11214_v6  ;;  %v11215_v11 = vunpack.i.l.bf16 %v11214_v6  ;;  %v1553_v12 = vsel %vm812_vm1, %v648_v5, 0  ;;  %v1599_v13 = vsel %vm812_vm1, %v649_v4, 0  ;;  %v11219_v21 = vpop.permute.xlu1 %11218 }
 0x185   :  { %10380 = vmatpush3.bf16.xpose.msra.mxu0 %v1369_v37  ;;  %10386 = vmatpush3.bf16.xpose.msra.mxu1 %v1415_v38  ;;  %v11221_v26 = vunpack.i.h.bf16 %v11219_v21  ;;  %v11220_v27 = vunpack.i.l.bf16 %v11219_v21 }
 0x186   :  { %10381 = vmatprep.mubr.msk.bf16.mxu0 %vm11982_vm0, %v14722_v2  ;;  %10387 = vmatprep.mubr.msk.bf16.mxu1 %vm11982_vm0, %v14722_v2  ;;  %v651_v16 = vpack.c.bf16 %v11216_v10, %v11216_v10  ;;  %v650_v17 = vpack.c.bf16 %v11215_v11, %v11215_v11 }
 0x187   :  { %10391 = vmatprep.subr.bf16.mxu0 %v14722_v2  ;;  %10397 = vmatprep.subr.bf16.mxu1 %v14722_v2  ;;  %v11224_v18 = vpop.permute.xlu0 %11223  ;;  %v503_v35 = vpack.c.bf16 %v11221_v26, %v11221_v26  ;;  %v502_v36 = vpack.c.bf16 %v11220_v27, %v11220_v27 }
 0x188   :  { %v11226_v22 = vunpack.i.h.bf16 %v11224_v18  ;;  %v11225_v23 = vunpack.i.l.bf16 %v11224_v18  ;;  %v1645_v24 = vsel %vm812_vm1, %v650_v17, 0  ;;  %v1691_v25 = vsel %vm812_vm1, %v651_v16, 0  ;;  %v11229_v37 = vpop.permute.xlu1 %11228 }
 0x189   :  { %v11231_v44 = vunpack.i.h.bf16 %v11229_v37  ;;  %v11230_v45 = vunpack.i.l.bf16 %v11229_v37 }
 0x18a   :  { %v653_v30 = vpack.c.bf16 %v11226_v22, %v11226_v22  ;;  %v652_v31 = vpack.c.bf16 %v11225_v23, %v11225_v23 }
 0x18b   :  { %v11234_v34 = vpop.permute.xlu0 %11233  ;;  %v505_v50 = vpack.c.bf16 %v11231_v44, %v11231_v44  ;;  %v504_v52 = vpack.c.bf16 %v11230_v45, %v11230_v45 }
 0x18c   :  { %10382 = vmatmul.mubr.msk.bf16.vlgmr.msra.gmra.mxu0 %vm812_vm1, %v496_v47  ;;  %10388 = vmatmul.mubr.msk.bf16.vlgmr.msra.gmra.mxu1 %vm812_vm1, %v497_v46  ;;  %v11236_v38 = vunpack.i.h.bf16 %v11234_v34  ;;  %v11235_v41 = vunpack.i.l.bf16 %v11234_v34  ;;  %v1737_v42 = vsel %vm812_vm1, %v652_v31, 0  ;;  %v1783_v43 = vsel %vm812_vm1, %v653_v30, 0 }
 0x18d   :  { %10392 = vmatpush3.bf16.xpose.msra.mxu0 %v1461_v62  ;;  %10398 = vmatpush3.bf16.xpose.msra.mxu1 %v1507_v63  ;;  %v11239_v62 = vpop.permute.xlu1 %11238 }
 0x18e   :  { %10393 = vmatprep.mubr.msk.bf16.mxu0 %vm11982_vm0, %v14722_v2  ;;  %10399 = vmatprep.mubr.msk.bf16.mxu1 %vm11982_vm0, %v14722_v2  ;;  %v655_v46 = vpack.c.bf16 %v11236_v38, %v11236_v38  ;;  %v654_v47 = vpack.c.bf16 %v11235_v41, %v11235_v41  ;;  %v11241_v5 = vunpack.i.h.bf16 %v11239_v62  ;;  %v11240_v6 = vunpack.i.l.bf16 %v11239_v62 }
 0x18f   :  { %10403 = vmatprep.subr.bf16.mxu0 %v14722_v2  ;;  %10409 = vmatprep.subr.bf16.mxu1 %v14722_v2  ;;  %v11244_v32 = vpop.permute.xlu0 %11243 }
 0x190   :  { %v11246_v63 = vunpack.i.h.bf16 %v11244_v32  ;;  %v11245_v0 = vunpack.i.l.bf16 %v11244_v32  ;;  %v1829_v3 = vsel %vm812_vm1, %v654_v47, 0  ;;  %v1875_v4 = vsel %vm812_vm1, %v655_v46, 0 }
 0x191   :  { %v507_v10 = vpack.c.bf16 %v11241_v5, %v11241_v5  ;;  %v506_v11 = vpack.c.bf16 %v11240_v6, %v11240_v6 }
 0x193   :  { %v11254_v9 = vpop.permute.xlu0 %11253 }
 0x194   :  { %10394 = vmatmul.mubr.msk.bf16.vlgmr.msra.gmra.mxu0 %vm812_vm1, %v498_v8  ;;  %10400 = vmatmul.mubr.msk.bf16.vlgmr.msra.gmra.mxu1 %vm812_vm1, %v499_v7  ;;  %v657_v7 = vpack.c.bf16 %v11246_v63, %v11246_v63  ;;  %v656_v8 = vpack.c.bf16 %v11245_v0, %v11245_v0  ;;  %v11255_v14 = vunpack.i.l.bf16 %v11254_v9 }
 0x195   :  { %10404 = vmatpush3.bf16.xpose.msra.mxu0 %v1553_v12  ;;  %10410 = vmatpush3.bf16.xpose.msra.mxu1 %v1599_v13  ;;  %v11249_v12 = vpop.permute.xlu1 %11248  ;;  %v11256_v13 = vunpack.i.h.bf16 %v11254_v9 }
 0x196   :  { %10405 = vmatprep.mubr.msk.bf16.mxu0 %vm11982_vm0, %v14722_v2  ;;  %10411 = vmatprep.mubr.msk.bf16.mxu1 %vm11982_vm0, %v14722_v2  ;;  %v1921_v15 = vsel %vm812_vm1, %v656_v8, 0  ;;  %v1967_v16 = vsel %vm812_vm1, %v657_v7, 0  ;;  %v11251_v17 = vunpack.i.h.bf16 %v11249_v12  ;;  %v11250_v18 = vunpack.i.l.bf16 %v11249_v12 }
 0x197   :  { %10415 = vmatprep.subr.bf16.mxu0 %v14722_v2  ;;  %10421 = vmatprep.subr.bf16.mxu1 %v14722_v2  ;;  %v11264_v21 = vpop.permute.xlu0 %11263 }
 0x198   :  { %v509_v22 = vpack.c.bf16 %v11251_v17, %v11251_v17  ;;  %v508_v23 = vpack.c.bf16 %v11250_v18, %v11250_v18  ;;  %v11266_v30 = vunpack.i.h.bf16 %v11264_v21 }
 0x19b   :  { %v11274_v41 = vpop.permute.xlu0 %11273 }
 0x19c   :  { %10406 = vmatmul.mubr.msk.bf16.vlgmr.msra.gmra.mxu0 %vm812_vm1, %v500_v20  ;;  %10412 = vmatmul.mubr.msk.bf16.vlgmr.msra.gmra.mxu1 %vm812_vm1, %v501_v19  ;;  %v659_v19 = vpack.c.bf16 %v11256_v13, %v11256_v13  ;;  %v658_v20 = vpack.c.bf16 %v11255_v14, %v11255_v14  ;;  %v11276_v46 = vunpack.i.h.bf16 %v11274_v41  ;;  %v11275_v47 = vunpack.i.l.bf16 %v11274_v41 }
 0x19d   :  { %10416 = vmatpush3.bf16.xpose.msra.mxu0 %v1645_v24  ;;  %10422 = vmatpush3.bf16.xpose.msra.mxu1 %v1691_v25  ;;  %v11259_v24 = vpop.permute.xlu1 %11258  ;;  %v11265_v25 = vunpack.i.l.bf16 %v11264_v21 }
 0x19e   :  { %10417 = vmatprep.mubr.msk.bf16.mxu0 %vm11982_vm0, %v14722_v2  ;;  %10423 = vmatprep.mubr.msk.bf16.mxu1 %vm11982_vm0, %v14722_v2  ;;  %v2013_v26 = vsel %vm812_vm1, %v658_v20, 0  ;;  %v2059_v27 = vsel %vm812_vm1, %v659_v19, 0  ;;  %v11261_v31 = vunpack.i.h.bf16 %v11259_v24  ;;  %v11260_v34 = vunpack.i.l.bf16 %v11259_v24 }
 0x19f   :  { %10427 = vmatprep.subr.bf16.mxu0 %v14722_v2  ;;  %10433 = vmatprep.subr.bf16.mxu1 %v14722_v2  ;;  %v663_v5 = vpack.c.bf16 %v11276_v46, %v11276_v46  ;;  %v662_v6 = vpack.c.bf16 %v11275_v47, %v11275_v47 }
 0x1a0   :  { %v511_v37 = vpack.c.bf16 %v11261_v31, %v11261_v31  ;;  %v510_v38 = vpack.c.bf16 %v11260_v34, %v11260_v34 }
 0x1a1   :  { %v2197_v17 = vsel %vm812_vm1, %v662_v6, 0  ;;  %v2243_v18 = vsel %vm812_vm1, %v663_v5, 0 }
 0x1a4   :  { %10418 = vmatmul.mubr.msk.bf16.vlgmr.msra.gmra.mxu0 %vm812_vm1, %v502_v36  ;;  %10424 = vmatmul.mubr.msk.bf16.vlgmr.msra.gmra.mxu1 %vm812_vm1, %v503_v35  ;;  %v660_v35 = vpack.c.bf16 %v11265_v25, %v11265_v25  ;;  %v661_v36 = vpack.c.bf16 %v11266_v30, %v11266_v30 }
 0x1a5   :  { %10428 = vmatpush3.bf16.xpose.msra.mxu0 %v1737_v42  ;;  %10434 = vmatpush3.bf16.xpose.msra.mxu1 %v1783_v43  ;;  %v11269_v42 = vpop.permute.xlu1 %11268 }
 0x1a6   :  { %10429 = vmatprep.mubr.msk.bf16.mxu0 %vm11982_vm0, %v14722_v2  ;;  %10435 = vmatprep.mubr.msk.bf16.mxu1 %vm11982_vm0, %v14722_v2  ;;  %v2105_v45 = vsel %vm812_vm1, %v660_v35, 0  ;;  %v11270_v62 = vunpack.i.l.bf16 %v11269_v42  ;;  %v11271_v0 = vunpack.i.h.bf16 %v11269_v42 }
 0x1a7   :  { %10439 = vmatprep.subr.bf16.mxu0 %v14722_v2  ;;  %10445 = vmatprep.subr.bf16.mxu1 %v14722_v2 }
 0x1a8   :  { %v512_v9 = vpack.c.bf16 %v11270_v62, %v11270_v62 }
 0x1a9   :  { %v11279_v13 = vpop.permute.xlu1 %11278 }
 0x1aa   :  { %v11281_v19 = vunpack.i.h.bf16 %v11279_v13  ;;  %v11280_v20 = vunpack.i.l.bf16 %v11279_v13 }
 0x1ac   :  { %10430 = vmatmul.mubr.msk.bf16.vlgmr.msra.gmra.mxu0 %vm812_vm1, %v504_v52  ;;  %10436 = vmatmul.mubr.msk.bf16.vlgmr.msra.gmra.mxu1 %vm812_vm1, %v505_v50  ;;  %v2151_v52 = vsel %vm812_vm1, %v661_v36, 0  ;;  %v515_v30 = vpack.c.bf16 %v11281_v19, %v11281_v19  ;;  %v514_v31 = vpack.c.bf16 %v11280_v20, %v11280_v20 }
 0x1ad   :  { %10440 = vmatpush3.bf16.xpose.msra.mxu0 %v1829_v3  ;;  %10446 = vmatpush3.bf16.xpose.msra.mxu1 %v1875_v4 }
 0x1ae   :  { %10441 = vmatprep.mubr.msk.bf16.mxu0 %vm11982_vm0, %v14722_v2  ;;  %10447 = vmatprep.mubr.msk.bf16.mxu1 %vm11982_vm0, %v14722_v2 }
 0x1af   :  { %10451 = vmatprep.subr.bf16.mxu0 %v14722_v2  ;;  %10457 = vmatprep.subr.bf16.mxu1 %v14722_v2 }
 0x1b4   :  { %10442 = vmatmul.mubr.msk.bf16.vlgmr.msra.gmra.mxu0 %vm812_vm1, %v506_v11  ;;  %10448 = vmatmul.mubr.msk.bf16.vlgmr.msra.gmra.mxu1 %vm812_vm1, %v507_v10  ;;  %v513_v10 = vpack.c.bf16 %v11271_v0, %v11271_v0 }
 0x1b5   :  { %10452 = vmatpush3.bf16.xpose.msra.mxu0 %v1921_v15  ;;  %10458 = vmatpush3.bf16.xpose.msra.mxu1 %v1967_v16 }
 0x1b6   :  { %10453 = vmatprep.mubr.msk.bf16.mxu0 %vm11982_vm0, %v14722_v2  ;;  %10459 = vmatprep.mubr.msk.bf16.mxu1 %vm11982_vm0, %v14722_v2 }
 0x1b7   :  { %10463 = vmatprep.subr.bf16.mxu0 %v14722_v2  ;;  %10469 = vmatprep.subr.bf16.mxu1 %v14722_v2 }
 0x1bc   :  { %10454 = vmatmul.mubr.msk.bf16.vlgmr.msra.gmra.mxu0 %vm812_vm1, %v508_v23  ;;  %10460 = vmatmul.mubr.msk.bf16.vlgmr.msra.gmra.mxu1 %vm812_vm1, %v509_v22 }
 0x1bd   :  { %10464 = vmatpush3.bf16.xpose.msra.mxu0 %v2013_v26  ;;  %10470 = vmatpush3.bf16.xpose.msra.mxu1 %v2059_v27  ;;  %v780_v26 = vpack.c.bf16 %v12355_v49, %v12355_v49  ;;  %v781_v27 = vpack.c.bf16 %v12370_v54, %v12370_v54 }
 0x1be   :  { %10465 = vmatprep.mubr.msk.bf16.mxu0 %vm11982_vm0, %v14722_v2  ;;  %10471 = vmatprep.mubr.msk.bf16.mxu1 %vm11982_vm0, %v14722_v2 }
 0x1bf   :  { %10475 = vmatprep.subr.bf16.mxu0 %v14722_v2  ;;  %10481 = vmatprep.subr.bf16.mxu1 %v14722_v2  ;;  %v2676_v49 = vsel %vm2674_vm3, %v780_v26, 0  ;;  %v2722_v54 = vsel %vm2674_vm3, %v781_v27, 0 }
 0x1c2   :  { %v12509_v43 = vpop.f32.mrf.mxu0 }
 0x1c3   :  { %v2286_v44 = vsel %vm2285_vm2, %v12509_v43, -inf }
 0x1c4   :  { %10466 = vmatmul.mubr.msk.bf16.vlgmr.msra.gmra.mxu0 %vm812_vm1, %v510_v38  ;;  %10472 = vmatmul.mubr.msk.bf16.vlgmr.msra.gmra.mxu1 %vm812_vm1, %v511_v37  ;;  %v10311_v32 = vpop.f32.mrf.mxu0 }
 0x1c5   :  { %2287 = vmax.xlane.f32.xlu0 %v2286_v44  ;;  %v12516_v50 = vpop.f32.mrf.mxu1  ;;  %10476 = vmatpush3.bf16.xpose.msra.mxu0 %v2105_v45 }
 0x1c6   :  { %10482 = vmatpush3.bf16.xpose.msra.mxu1 %v2151_v52  ;;  %v2289_v63 = vsel %vm2285_vm2, %v12516_v50, -inf  ;;  %10477 = vmatprep.mubr.msk.bf16.mxu0 %vm11982_vm0, %v14722_v2  ;;  %v856_v3 = vpop.f32.mrf.mxu0 }
 0x1c7   :  { %v10317_v4 = vpop.f32.mrf.mxu1  ;;  %2290 = vmax.xlane.f32.xlu1 %v2289_v63  ;;  %10483 = vmatprep.mubr.msk.bf16.mxu1 %vm11982_vm0, %v14722_v2 }
 0x1c8   :  { %10487 = vmatprep.subr.bf16.mxu0 %v14722_v2  ;;  %10493 = vmatprep.subr.bf16.mxu1 %v14722_v2  ;;  %v10312_v7 = vpop.f32.mrf.mxu0 }
 0x1c9   :  { %v902_v8 = vpop.f32.mrf.mxu1 }
 0x1ca   :  { %v12527_v12 = vpop.f32.mrf.mxu0  ;;  %v12577_v8 = vpop.permute.xlu1 %11283 }
 0x1cb   :  { %v10318_v11 = vpop.f32.mrf.mxu1  ;;  %v2292_v14 = vsel %vm2285_vm2, %v12527_v12, -inf }
 0x1cc   :  { %10478 = vmatmul.mubr.msk.bf16.vlgmr.msra.gmra.mxu0 %vm812_vm1, %v512_v9  ;;  %2293 = vmax.xlane.f32.xlu0 %v2292_v14  ;;  %v10323_v15 = vpop.f32.mrf.mxu0 }
 0x1cd   :  { %10484 = vmatmul.mubr.msk.bf16.vlgmr.msra.gmra.mxu1 %vm812_vm1, %v513_v10  ;;  %v12533_v16 = vpop.f32.mrf.mxu1  ;;  %10488 = vmatpush3.bf16.xpose.msra.mxu0 %v2197_v17 }
 0x1ce   :  { %10494 = vmatpush3.bf16.xpose.msra.mxu1 %v2243_v18  ;;  %v948_v21 = vpop.f32.mrf.mxu0  ;;  %10489 = vmatprep.mubr.msk.bf16.mxu0 %vm11982_vm0, %v14722_v2  ;;  %v2295_v23 = vsel %vm2285_vm2, %v12533_v16, -inf  ;;  %v12587_v17 = vpop.permute.xlu1 %11293 }
 0x1cf   :  { %v10329_v22 = vpop.f32.mrf.mxu1  ;;  %10495 = vmatprep.mubr.msk.bf16.mxu1 %vm11982_vm0, %v14722_v2  ;;  %10499 = vmatprep.subr.bf16.mxu0 %v14722_v2 }
 0x1d0   :  { %10505 = vmatprep.subr.bf16.mxu1 %v14722_v2  ;;  %v10324_v24 = vpop.f32.mrf.mxu0  ;;  %2296 = vmax.xlane.f32.xlu0 %v2295_v23 }
 0x1d1   :  { %v994_v25 = vpop.f32.mrf.mxu1 }
 0x1d2   :  { %v12549_v35 = vpop.f32.mrf.mxu0  ;;  %v12593_v24 = vpop.permute.xlu1 %11298 }
 0x1d3   :  { %v10330_v34 = vpop.f32.mrf.mxu1  ;;  %v2298_v36 = vsel %vm2285_vm2, %v12549_v35, -inf }
 0x1d4   :  { %10490 = vmatmul.mubr.msk.bf16.vlgmr.msra.gmra.mxu0 %vm812_vm1, %v514_v31  ;;  %v10335_v37 = vpop.f32.mrf.mxu0  ;;  %2299 = vmax.xlane.f32.xlu1 %v2298_v36  ;;  %v12599_v31 = vpop.permute.xlu0 %11288 }
 0x1d5   :  { %10496 = vmatmul.mubr.msk.bf16.vlgmr.msra.gmra.mxu1 %vm812_vm1, %v515_v30  ;;  %v12555_v38 = vpop.f32.mrf.mxu1  ;;  %10500 = vmatpush3.bf16.msra.mxu0 %v2676_v49 }
 0x1d6   :  { %v2301_v41 = vsel %vm2285_vm2, %v12555_v38, -inf  ;;  %10506 = vmatpush3.bf16.msra.mxu1 %v2722_v54  ;;  %v1040_v42 = vpop.f32.mrf.mxu0  ;;  %10507 = vmatprep.mubr.msk.bf16.mxu1 %vm11982_vm0, %v14722_v2  ;;  %v12601_v54 = vpop.permute.xlu1 %11308 }
 0x1d7   :  { %2302 = vmax.xlane.f32.xlu0 %v2301_v41  ;;  %v10341_v44 = vpop.f32.mrf.mxu1  ;;  %10517 = vmatprep.subr.bf16.mxu1 %v14722_v2 }
 0x1d8   :  { %v10336_v45 = vpop.f32.mrf.mxu0  ;;  %10501 = vmatprep.mubr.msk.bf16.mxu0 %vm11982_vm0, %v14722_v2  ;;  %10511 = vmatprep.subr.bf16.mxu0 %v14722_v2 }
 0x1d9   :  { %v1086_v46 = vpop.f32.mrf.mxu1 }
 0x1da   :  { %v12567_v32 = vpop.f32.mrf.mxu0  ;;  %v12611_v46 = vpop.permute.xlu0 %11303 }
 0x1db   :  { %v10342_v47 = vpop.f32.mrf.mxu1  ;;  %v2304_v52 = vsel %vm2285_vm2, %v12567_v32, -inf }
 0x1dc   :  { %v10347_v62 = vpop.f32.mrf.mxu0  ;;  %2305 = vmax.xlane.f32.xlu1 %v2304_v52 }
 0x1dd   :  { %v12571_v63 = vpop.f32.mrf.mxu1 }
 0x1de   :  { %v2307_v0 = vsel %vm2285_vm2, %v12571_v63, -inf  ;;  %v1132_v3 = vpop.f32.mrf.mxu0 }
 0x1df   :  { %2308 = vmax.xlane.f32.xlu0 %v2307_v0  ;;  %v10353_v4 = vpop.f32.mrf.mxu1 }
 0x1e0   :  { %v10348_v5 = vpop.f32.mrf.mxu0 }
 0x1e1   :  { %v1178_v6 = vpop.f32.mrf.mxu1 }
 0x1e3   :  { %v10354_v7 = vpop.f32.mrf.mxu1 }
 0x1f5   :  { %11313 = vrot.lane.b32.xlu0 %v12397_v59, %s14732_s8 }
 0x23c   :  { %v12579_v9 = vpop.f32.mrf.mxu0  ;;  %v12581_v10 = vpop.f32.mrf.mxu1 }
 0x23d   :  { %v2310_v11 = vsel %vm2285_vm2, %v12579_v9, -inf  ;;  %v2313_v13 = vsel %vm2285_vm2, %v12581_v10, -inf }
 0x23e   :  { %v10359_v14 = vpop.f32.mrf.mxu0  ;;  %2311 = vmax.xlane.f32.xlu1 %v2310_v11  ;;  %2314 = vmax.xlane.f32.xlu0 %v2313_v13  ;;  %v10365_v15 = vpop.f32.mrf.mxu1 }
 0x240   :  { %v1224_v18 = vpop.f32.mrf.mxu0  ;;  %v1270_v19 = vpop.f32.mrf.mxu1 }
 0x242   :  { %v10360_v20 = vpop.f32.mrf.mxu0  ;;  %v10366_v21 = vpop.f32.mrf.mxu1 }
 0x244   :  { %v12589_v22 = vpop.f32.mrf.mxu0  ;;  %v12591_v23 = vpop.f32.mrf.mxu1 }
 0x245   :  { %v2316_v25 = vsel %vm2285_vm2, %v12589_v22, -inf  ;;  %v2319_v26 = vsel %vm2285_vm2, %v12591_v23, -inf }
 0x246   :  { %2317 = vmax.xlane.f32.xlu1 %v2316_v25  ;;  %v10371_v27 = vpop.f32.mrf.mxu0  ;;  %2320 = vmax.xlane.f32.xlu0 %v2319_v26  ;;  %v10377_v30 = vpop.f32.mrf.mxu1 }
 0x248   :  { %v1316_v34 = vpop.f32.mrf.mxu0  ;;  %v1362_v36 = vpop.f32.mrf.mxu1 }
 0x24a   :  { %v10372_v37 = vpop.f32.mrf.mxu0  ;;  %v10378_v49 = vpop.f32.mrf.mxu1 }
 0x24c   :  { %v12603_v41 = vpop.f32.mrf.mxu0  ;;  %v12605_v42 = vpop.f32.mrf.mxu1 }
 0x24d   :  { %v2322_v44 = vsel %vm2285_vm2, %v12603_v41, -inf  ;;  %v2325_v45 = vsel %vm2285_vm2, %v12605_v42, -inf }
 0x24e   :  { %2323 = vmax.xlane.f32.xlu1 %v2322_v44  ;;  %v10383_v47 = vpop.f32.mrf.mxu0  ;;  %2326 = vmax.xlane.f32.xlu0 %v2325_v45  ;;  %v10389_v52 = vpop.f32.mrf.mxu1 }
 0x24f   :  { %v12613_v4 = vpop.xlane.xlu0 %2287 }
 0x250   :  { %v2291_v62 = vpop.xlane.xlu1 %2290  ;;  %v1408_v0 = vpop.f32.mrf.mxu0 }
 0x251   :  { %v1454_v3 = vpop.f32.mrf.mxu1  ;;  %v2383_v5 = vsub.f32 %v12516_v50, %v2291_v62 }
 0x252   :  { %v10384_v6 = vpop.f32.mrf.mxu0 }
 0x253   :  { %v10390_v7 = vpop.f32.mrf.mxu1  ;;  %v2416_v15 = vmul.f32 1.442695, %v2383_v5 }
 0x254   :  { %v12616_v11 = vpop.f32.mrf.mxu0 }
 0x255   :  { %v12618_v13 = vpop.f32.mrf.mxu1  ;;  %v2328_v14 = vsel %vm2285_vm2, %v12616_v11, -inf  ;;  %v12622_v18 = vpop.xlane.xlu0 %2293  ;;  %11694 = vpow2.f32 %v2416_v15 }
 0x256   :  { %2329 = vmax.xlane.f32.xlu1 %v2328_v14  ;;  %v10395_v19 = vpop.f32.mrf.mxu0  ;;  %v2331_v20 = vsel %vm2285_vm2, %v12618_v13, -inf }
 0x257   :  { %2332 = vmax.xlane.f32.xlu0 %v2331_v20  ;;  %v10401_v21 = vpop.f32.mrf.mxu1 }
 0x258   :  { %v1500_v50 = vpop.f32.mrf.mxu0 }
 0x259   :  { %v1546_v25 = vpop.f32.mrf.mxu1  ;;  %v2297_v27 = vpop.xlane.xlu0 %2296 }
 0x25a   :  { %v10396_v26 = vpop.f32.mrf.mxu0  ;;  %v2385_v30 = vsub.f32 %v12533_v16, %v2297_v27 }
 0x25b   :  { %v10402_v34 = vpop.f32.mrf.mxu1 }
 0x25c   :  { %v12627_v36 = vpop.f32.mrf.mxu0  ;;  %v2420_v49 = vmul.f32 1.442695, %v2385_v30 }
 0x25d   :  { %v12629_v37 = vpop.f32.mrf.mxu1 }
 0x25e   :  { %v10407_v44 = vpop.f32.mrf.mxu0  ;;  %v2337_v45 = vsel %vm2285_vm2, %v12629_v37, -inf  ;;  %11696 = vpow2.f32 %v2420_v49 }
 0x25f   :  { %2338 = vmax.xlane.f32.xlu0 %v2337_v45  ;;  %v10413_v47 = vpop.f32.mrf.mxu1 }
 0x260   :  { %v1592_v52 = vpop.f32.mrf.mxu0  ;;  %v2303_v62 = vpop.xlane.xlu0 %2302 }
 0x261   :  { %v1638_v0 = vpop.f32.mrf.mxu1  ;;  %v2387_v3 = vsub.f32 %v12555_v38, %v2303_v62 }
 0x262   :  { %v10408_v5 = vpop.f32.mrf.mxu0  ;;  %v12640_v20 = vpop.eup %11694 }
 0x263   :  { %v10414_v16 = vpop.f32.mrf.mxu1  ;;  %v2424_v14 = vmul.f32 1.442695, %v2387_v3  ;;  %v2481_v30 = vsel %vm2285_vm2, %v12640_v20, 0.0 }
 0x264   :  { %v12634_v6 = vpop.f32.mrf.mxu0 }
 0x265   :  { %v12636_v7 = vpop.f32.mrf.mxu1  ;;  %11698 = vpow2.f32 %v2424_v14 }
 0x266   :  { %v10419_v15 = vpop.f32.mrf.mxu0  ;;  %v2343_v19 = vsel %vm2285_vm2, %v12636_v7, -inf }
 0x267   :  { %2344 = vmax.xlane.f32.xlu0 %v2343_v19  ;;  %v10425_v21 = vpop.f32.mrf.mxu1  ;;  %11318 = vrot.lane.b32.xlu1 %v12409_v61, %s14732_s8 }
 0x268   :  { %v1684_v50 = vpop.f32.mrf.mxu0  ;;  %v2309_v38 = vpop.xlane.xlu0 %2308 }
 0x269   :  { %v1730_v25 = vpop.f32.mrf.mxu1  ;;  %v2389_v26 = vsub.f32 %v12571_v63, %v2309_v38 }
 0x26a   :  { %v10420_v27 = vpop.f32.mrf.mxu0 }
 0x26b   :  { %2482 = vadd.xlane.f32.xlu0 %v2481_v30  ;;  %v10426_v34 = vpop.f32.mrf.mxu1  ;;  %v2428_v45 = vmul.f32 1.442695, %v2389_v26  ;;  %v12653_v62 = vpop.eup %11696  ;;  %v2382_v30 = vsub.f32 %v12509_v43, %v12613_v4 }
 0x26c   :  { %v12647_v49 = vpop.f32.mrf.mxu0  ;;  %v2487_v16 = vsel %vm2285_vm2, %v12653_v62, 0.0 }
 0x26d   :  { %v12649_v44 = vpop.f32.mrf.mxu1  ;;  %11700 = vpow2.f32 %v2428_v45 }
 0x26e   :  { %v10431_v47 = vpop.f32.mrf.mxu0  ;;  %v2349_v52 = vsel %vm2285_vm2, %v12649_v44, -inf }
 0x26f   :  { %2350 = vmax.xlane.f32.xlu0 %v2349_v52  ;;  %v10437_v0 = vpop.f32.mrf.mxu1 }
 0x270   :  { %v1776_v63 = vpop.f32.mrf.mxu0 }
 0x271   :  { %v1822_v3 = vpop.f32.mrf.mxu1  ;;  %v2414_v63 = vmul.f32 1.442695, %v2382_v30 }
 0x272   :  { %v10432_v5 = vpop.f32.mrf.mxu0  ;;  %v12663_v38 = vpop.eup %11698 }
 0x273   :  { %2488 = vadd.xlane.f32.xlu0 %v2487_v16  ;;  %v10438_v14 = vpop.f32.mrf.mxu1  ;;  %v2493_v45 = vsel %vm2285_vm2, %v12663_v38, 0.0  ;;  %11702 = vpow2.f32 %v2414_v63 }
 0x274   :  { %v12657_v15 = vpop.f32.mrf.mxu0 }
 0x275   :  { %v12659_v19 = vpop.f32.mrf.mxu1 }
 0x276   :  { %v10443_v21 = vpop.f32.mrf.mxu0  ;;  %v2355_v50 = vsel %vm2285_vm2, %v12659_v19, -inf }
 0x277   :  { %2356 = vmax.xlane.f32.xlu0 %v2355_v50  ;;  %v10449_v25 = vpop.f32.mrf.mxu1  ;;  %v2384_v21 = vsub.f32 %v12527_v12, %v12622_v18 }
 0x278   :  { %v1868_v26 = vpop.f32.mrf.mxu0 }
 0x279   :  { %v1914_v27 = vpop.f32.mrf.mxu1 }
 0x27a   :  { %v10444_v34 = vpop.f32.mrf.mxu0  ;;  %v12675_v16 = vpop.eup %11700 }
 0x27b   :  { %2494 = vadd.xlane.f32.xlu0 %v2493_v45  ;;  %v10450_v47 = vpop.f32.mrf.mxu1  ;;  %v2499_v25 = vsel %vm2285_vm2, %v12675_v16, 0.0  ;;  %v2418_v34 = vmul.f32 1.442695, %v2384_v21 }
 0x27c   :  { %v12669_v52 = vpop.f32.mrf.mxu0 }
 0x27d   :  { %v12671_v0 = vpop.f32.mrf.mxu1  ;;  %11704 = vpow2.f32 %v2418_v34  ;;  %v2340_v34 = vsel %vm2285_vm2, %v12634_v6, -inf }
 0x27e   :  { %v10455_v3 = vpop.f32.mrf.mxu0  ;;  %v2361_v5 = vsel %vm2285_vm2, %v12671_v0, -inf }
 0x27f   :  { %2362 = vmax.xlane.f32.xlu0 %v2361_v5  ;;  %v10461_v14 = vpop.f32.mrf.mxu1  ;;  %v2300_v3 = vpop.xlane.xlu1 %2299 }
 0x280   :  { %v1960_v43 = vpop.f32.mrf.mxu0  ;;  %v2386_v18 = vsub.f32 %v12549_v35, %v2300_v3 }
 0x281   :  { %v2006_v4 = vpop.f32.mrf.mxu1  ;;  %v2334_v43 = vsel %vm2285_vm2, %v12627_v36, -inf }
 0x282   :  { %v10456_v50 = vpop.f32.mrf.mxu0 }
 0x283   :  { %2500 = vadd.xlane.f32.xlu0 %v2499_v25  ;;  %v10462_v26 = vpop.f32.mrf.mxu1  ;;  %v2422_v25 = vmul.f32 1.442695, %v2386_v18  ;;  %v2306_v35 = vpop.xlane.xlu1 %2305 }
 0x284   :  { %v12681_v27 = vpop.f32.mrf.mxu0 }
 0x285   :  { %v12683_v30 = vpop.f32.mrf.mxu1  ;;  %11706 = vpow2.f32 %v2422_v25 }
 0x286   :  { %v10467_v45 = vpop.f32.mrf.mxu0  ;;  %v2367_v47 = vsel %vm2285_vm2, %v12683_v30, -inf }
 0x287   :  { %2368 = vmax.xlane.f32.xlu0 %v2367_v47  ;;  %v10473_v63 = vpop.f32.mrf.mxu1  ;;  %v12698_v47 = vpop.eup %11702 }
 0x288   :  { %v2052_v5 = vpop.f32.mrf.mxu0  ;;  %v2478_v18 = vsel %vm2285_vm2, %v12698_v47, 0.0 }
 0x289   :  { %v2098_v12 = vpop.f32.mrf.mxu1 }
 0x28a   :  { %v10468_v14 = vpop.f32.mrf.mxu0  ;;  %v2388_v12 = vsub.f32 %v12567_v32, %v2306_v35  ;;  %v12711_v25 = vpop.eup %11704 }
 0x28b   :  { %v10474_v4 = vpop.f32.mrf.mxu1  ;;  %2335 = vmax.xlane.f32.xlu1 %v2334_v43 }
 0x28c   :  { %v12690_v50 = vpop.f32.mrf.mxu0  ;;  %v2426_v40 = vmul.f32 1.442695, %v2388_v12 }
 0x28d   :  { %v12692_v21 = vpop.f32.mrf.mxu1 }
 0x28e   :  { %v10479_v26 = vpop.f32.mrf.mxu0  ;;  %v2373_v45 = vsel %vm2285_vm2, %v12692_v21, -inf  ;;  %11708 = vpow2.f32 %v2426_v40 }
 0x28f   :  { %2374 = vmax.xlane.f32.xlu0 %v2373_v45  ;;  %v10485_v3 = vpop.f32.mrf.mxu1  ;;  %2341 = vmax.xlane.f32.xlu1 %v2340_v34  ;;  %v2346_v34 = vsel %vm2285_vm2, %v12647_v49, -inf }
 0x290   :  { %v2144_v63 = vpop.f32.mrf.mxu0 }
 0x291   :  { %v2190_v5 = vpop.f32.mrf.mxu1 }
 0x292   :  { %v10480_v14 = vpop.f32.mrf.mxu0  ;;  %v2484_v5 = vsel %vm2285_vm2, %v12711_v25, 0.0 }
 0x293   :  { %v10486_v43 = vpop.f32.mrf.mxu1  ;;  %2479 = vadd.xlane.f32.xlu1 %v2478_v18  ;;  %v2352_v18 = vsel %vm2285_vm2, %v12657_v15, -inf }
 0x294   :  { %v12703_v4 = vpop.f32.mrf.mxu0  ;;  %v12717_v43 = vpop.eup %11706 }
 0x295   :  { %v12705_v26 = vpop.f32.mrf.mxu1 }
 0x296   :  { %v2379_v45 = vsel %vm2285_vm2, %v12705_v26, -inf  ;;  %v10491_v32 = vpop.f32.mrf.mxu0 }
 0x297   :  { %2380 = vmax.xlane.f32.xlu0 %v2379_v45  ;;  %v10497_v35 = vpop.f32.mrf.mxu1  ;;  %2347 = vmax.xlane.f32.xlu1 %v2346_v34  ;;  %v2490_v45 = vsel %vm2285_vm2, %v12717_v43, 0.0  ;;  %v2358_v34 = vsel %vm2285_vm2, %v12669_v52, -inf }
 0x298   :  { %v2236_v3 = vpop.f32.mrf.mxu0  ;;  %v2364_v35 = vsel %vm2285_vm2, %v12681_v27, -inf }
 0x299   :  { %v2282_v63 = vpop.f32.mrf.mxu1  ;;  %v2370_v3 = vsel %vm2285_vm2, %v12690_v50, -inf }
 0x29a   :  { %v10492_v14 = vpop.f32.mrf.mxu0  ;;  %v2376_v63 = vsel %vm2285_vm2, %v12703_v4, -inf }
 0x29b   :  { %v10498_v12 = vpop.f32.mrf.mxu1  ;;  %2485 = vadd.xlane.f32.xlu1 %v2484_v5  ;;  %v12723_v40 = vpop.eup %11708 }
 0x29c   :  { %v2496_v32 = vsel %vm2285_vm2, %v12723_v40, 0.0  ;;  %v12733_v5 = vpop.permute.xlu0 %11313 }
 0x29f   :  { %2353 = vmax.xlane.f32.xlu1 %v2352_v18 }
 0x2a3   :  { %2491 = vadd.xlane.f32.xlu1 %v2490_v45 }
 0x2a7   :  { %2359 = vmax.xlane.f32.xlu1 %v2358_v34 }
 0x2ab   :  { %2497 = vadd.xlane.f32.xlu1 %v2496_v32 }
 0x2af   :  { %2365 = vmax.xlane.f32.xlu1 %v2364_v35 }
 0x2b3   :  { %2371 = vmax.xlane.f32.xlu1 %v2370_v3 }
 0x2b7   :  { %2377 = vmax.xlane.f32.xlu1 %v2376_v63 }
 0x2c7   :  { %v2312_v14 = vpop.xlane.xlu1 %2311  ;;  %v2315_v12 = vpop.xlane.xlu0 %2314 }
 0x2c8   :  { %v2390_v18 = vsub.f32 %v12579_v9, %v2312_v14  ;;  %v2391_v45 = vsub.f32 %v12581_v10, %v2315_v12 }
 0x2ca   :  { %v2430_v34 = vmul.f32 1.442695, %v2390_v18  ;;  %v2432_v32 = vmul.f32 1.442695, %v2391_v45 }
 0x2cc   :  { %11710 = vpow2.f32 %v2430_v34 }
 0x2cd   :  { %11712 = vpow2.f32 %v2432_v32 }
 0x2cf   :  { %v2318_v35 = vpop.xlane.xlu1 %2317  ;;  %v2321_v1 = vpop.xlane.xlu0 %2320 }
 0x2d0   :  { %v2392_v3 = vsub.f32 %v12589_v22, %v2318_v35  ;;  %v2393_v2 = vsub.f32 %v12591_v23, %v2321_v1 }
 0x2d2   :  { %v2434_v28 = vmul.f32 1.442695, %v2392_v3  ;;  %v2436_v63 = vmul.f32 1.442695, %v2393_v2 }
 0x2d4   :  { %11714 = vpow2.f32 %v2434_v28 }
 0x2d5   :  { %11716 = vpow2.f32 %v2436_v63 }
 0x2d7   :  { %v2324_v29 = vpop.xlane.xlu1 %2323  ;;  %v2327_v33 = vpop.xlane.xlu0 %2326 }
 0x2d8   :  { %v2394_v9 = vsub.f32 %v12603_v41, %v2324_v29  ;;  %v2395_v10 = vsub.f32 %v12605_v42, %v2327_v33 }
 0x2d9   :  { %v12741_v14 = vpop.eup %11710 }
 0x2da   :  { %v12743_v12 = vpop.eup %11712  ;;  %v2438_v18 = vmul.f32 1.442695, %v2394_v9  ;;  %v2440_v45 = vmul.f32 1.442695, %v2395_v10  ;;  %v2502_v22 = vsel %vm2285_vm2, %v12741_v14, 0.0 }
 0x2db   :  { %2503 = vadd.xlane.f32.xlu1 %v2502_v22  ;;  %v2505_v1 = vsel %vm2285_vm2, %v12743_v12, 0.0 }
 0x2dc   :  { %11718 = vpow2.f32 %v2438_v18  ;;  %2506 = vadd.xlane.f32.xlu0 %v2505_v1 }
 0x2dd   :  { %11720 = vpow2.f32 %v2440_v45 }
 0x2df   :  { %v2330_v2 = vpop.xlane.xlu1 %2329 }
 0x2e0   :  { %v2396_v28 = vsub.f32 %v12616_v11, %v2330_v2  ;;  %v2333_v29 = vpop.xlane.xlu0 %2332 }
 0x2e1   :  { %v12750_v33 = vpop.eup %11714  ;;  %v2397_v23 = vsub.f32 %v12618_v13, %v2333_v29 }
 0x2e2   :  { %v12753_v41 = vpop.eup %11716  ;;  %v2442_v42 = vmul.f32 1.442695, %v2396_v28  ;;  %v2508_v34 = vsel %vm2285_vm2, %v12750_v33, 0.0 }
 0x2e3   :  { %v2444_v32 = vmul.f32 1.442695, %v2397_v23  ;;  %2509 = vadd.xlane.f32.xlu1 %v2508_v34  ;;  %v2511_v35 = vsel %vm2285_vm2, %v12753_v41, 0.0 }
 0x2e4   :  { %11722 = vpow2.f32 %v2442_v42  ;;  %2512 = vadd.xlane.f32.xlu0 %v2511_v35 }
 0x2e5   :  { %11724 = vpow2.f32 %v2444_v32 }
 0x2e8   :  { %v2339_v11 = vpop.xlane.xlu0 %2338 }
 0x2e9   :  { %v12759_v3 = vpop.eup %11718  ;;  %v2399_v63 = vsub.f32 %v12629_v37, %v2339_v11 }
 0x2ea   :  { %v12762_v13 = vpop.eup %11720  ;;  %v2514_v9 = vsel %vm2285_vm2, %v12759_v3, 0.0 }
 0x2eb   :  { %v2448_v10 = vmul.f32 1.442695, %v2399_v63  ;;  %2515 = vadd.xlane.f32.xlu1 %v2514_v9  ;;  %v2517_v18 = vsel %vm2285_vm2, %v12762_v13, 0.0  ;;  %v783_v9 = vpack.c.bf16 %v12361_v51, %v12361_v51  ;;  %v785_v51 = vpack.c.bf16 %v12389_v58, %v12389_v58 }
 0x2ec   :  { %2518 = vadd.xlane.f32.xlu0 %v2517_v18 }
 0x2ed   :  { %11726 = vpow2.f32 %v2448_v10  ;;  %v2814_v18 = vsel %vm2674_vm3, %v783_v9, 0 }
 0x2f0   :  { %v12768_v45 = vpop.xlane.xlu0 %2344 }
 0x2f1   :  { %v12770_v22 = vpop.eup %11722 }
 0x2f2   :  { %v2520_v1 = vsel %vm2285_vm2, %v12770_v22, 0.0  ;;  %v12774_v37 = vpop.eup %11724 }
 0x2f3   :  { %2521 = vadd.xlane.f32.xlu0 %v2520_v1  ;;  %v2523_v28 = vsel %vm2285_vm2, %v12774_v37, 0.0 }
 0x2f4   :  { %v2483_v2 = vpop.xlane.xlu0 %2482 }
 0x2f5   :  { %11728 = vrcp.f32 %v2483_v2  ;;  %v14749_v2 = vmov 0.0  }
 0x2f7   :  { %2524 = vadd.xlane.f32.xlu0 %v2523_v28 }
 0x2f8   :  { %v2351_v29 = vpop.xlane.xlu0 %2350 }
 0x2fa   :  { %v12778_v23 = vpop.eup %11726 }
 0x2fb   :  { %v2529_v42 = vsel %vm2285_vm2, %v12778_v23, 0.0 }
 0x2fc   :  { %v2489_v34 = vpop.xlane.xlu0 %2488  ;;  %2530 = vadd.xlane.f32.xlu0 %v2529_v42 }
 0x2fd   :  { %11730 = vrcp.f32 %v2489_v34 }
 0x300   :  { %v2357_v32 = vpop.xlane.xlu0 %2356 }
 0x302   :  { %v11729_v35 = vpop.eup %11728 }
 0x303   :  { %v2607_v63 = vmul.f32 %v11729_v35, %v12640_v20  ;;  %v12795_v35 = vpop.permute.xlu1 %11318 }
 0x304   :  { %v2495_v11 = vpop.xlane.xlu0 %2494 }
 0x305   :  { %11732 = vrcp.f32 %v2495_v11  ;;  %v2639_v10 = vpack.c.bf16 %v2607_v63, %v2607_v63  ;;  %v2906_v11 = vsel %vm2674_vm3, %v785_v51, 0 }
 0x307   :  { %10508 = vmatmul.mubr.msk.bf16.vlgmr.msra.gmra.mxu1 %vm2670_vm4, %v2639_v10  ;;  %v787_v10 = vpack.c.bf16 %v12401_v60, %v12401_v60 }
 0x308   :  { %v12787_v1 = vpop.xlane.xlu0 %2362  ;;  %10518 = vmatpush3.bf16.msra.mxu1 %v2814_v18  ;;  %10519 = vmatprep.mubr.msk.bf16.mxu1 %vm11982_vm0, %v14749_v2  ;;  %v2405_v18 = vsub.f32 %v12659_v19, %v2357_v32 }
 0x309   :  { %10529 = vmatprep.subr.bf16.mxu1 %v14749_v2 }
 0x30a   :  { %v11731_v28 = vpop.eup %11730 }
 0x30b   :  { %v2609_v42 = vmul.f32 %v11731_v28, %v12653_v62  ;;  %v2403_v62 = vsub.f32 %v12649_v44, %v2351_v29  ;;  %v2998_v44 = vsel %vm2674_vm3, %v787_v10, 0  ;;  %v2460_v29 = vmul.f32 1.442695, %v2405_v18 }
 0x30c   :  { %v2501_v20 = vpop.xlane.xlu0 %2500 }
 0x30d   :  { %11734 = vrcp.f32 %v2501_v20  ;;  %v2641_v34 = vpack.c.bf16 %v2609_v42, %v2609_v42  ;;  %v2456_v42 = vmul.f32 1.442695, %v2403_v62 }
 0x30f   :  { %10520 = vmatmul.mubr.msk.bf16.vlgmr.msra.gmra.mxu1 %vm2670_vm4, %v2641_v34  ;;  %v11286_v34 = vunpack.i.h.bf16 %v12577_v8 }
 0x310   :  { %10530 = vmatpush3.bf16.msra.mxu1 %v2906_v11  ;;  %10531 = vmatprep.mubr.msk.bf16.mxu1 %vm11982_vm0, %v14749_v2  ;;  %v2401_v11 = vsub.f32 %v12636_v7, %v12768_v45 }
 0x311   :  { %10541 = vmatprep.subr.bf16.mxu1 %v14749_v2  ;;  %v789_v32 = vpack.c.bf16 %v11286_v34, %v11286_v34 }
 0x312   :  { %v11733_v63 = vpop.eup %11732  ;;  %v2452_v7 = vmul.f32 1.442695, %v2401_v11 }
 0x313   :  { %v2611_v58 = vmul.f32 %v11733_v63, %v12663_v38 }
 0x314   :  { %v2336_v9 = vpop.xlane.xlu1 %2335 }
 0x315   :  { %v2398_v28 = vsub.f32 %v12627_v36, %v2336_v9  ;;  %v2643_v20 = vpack.c.bf16 %v2611_v58, %v2611_v58 }
 0x317   :  { %v2446_v51 = vmul.f32 1.442695, %v2398_v28  ;;  %10532 = vmatmul.mubr.msk.bf16.vlgmr.msra.gmra.mxu1 %vm2670_vm4, %v2643_v20 }
 0x318   :  { %v2342_v38 = vpop.xlane.xlu1 %2341  ;;  %10542 = vmatpush3.bf16.msra.mxu1 %v2998_v44  ;;  %10543 = vmatprep.mubr.msk.bf16.mxu1 %vm11982_vm0, %v14749_v2 }
 0x319   :  { %11736 = vpow2.f32 %v2446_v51  ;;  %v2400_v60 = vsub.f32 %v12634_v6, %v2342_v38  ;;  %10553 = vmatprep.subr.bf16.mxu1 %v14749_v2  ;;  %v3090_v6 = vsel %vm2674_vm3, %v789_v32, 0 }
 0x31a   :  { %v11735_v36 = vpop.eup %11734  ;;  %11738 = vpow2.f32 %v2456_v42 }
 0x31b   :  { %v2450_v19 = vmul.f32 1.442695, %v2400_v60  ;;  %v2613_v63 = vmul.f32 %v11735_v36, %v12675_v16  ;;  %11740 = vpow2.f32 %v2460_v29 }
 0x31c   :  { %v2480_v45 = vpop.xlane.xlu1 %2479 }
 0x31d   :  { %11742 = vpow2.f32 %v2450_v19  ;;  %v2645_v62 = vpack.c.bf16 %v2613_v63, %v2613_v63  ;;  %v782_v19 = vpack.c.bf16 %v12350_v48, %v12350_v48 }
 0x31e   :  { %11744 = vrcp.f32 %v2480_v45 }
 0x31f   :  { %11746 = vpow2.f32 %v2452_v7  ;;  %10544 = vmatmul.mubr.msk.bf16.vlgmr.msra.gmra.mxu1 %vm2670_vm4, %v2645_v62  ;;  %v2768_v62 = vsel %vm2674_vm3, %v782_v19, 0  ;;  %v2369_v19 = vpop.xlane.xlu0 %2368 }
 0x320   :  { %v2348_v9 = vpop.xlane.xlu1 %2347  ;;  %10554 = vmatpush3.bf16.msra.mxu1 %v3090_v6  ;;  %10555 = vmatprep.mubr.msk.bf16.mxu1 %vm11982_vm0, %v14749_v2 }
 0x321   :  { %v2402_v58 = vsub.f32 %v12647_v49, %v2348_v9  ;;  %10565 = vmatprep.subr.bf16.mxu1 %v14749_v2 }
 0x323   :  { %v2454_v10 = vmul.f32 1.442695, %v2402_v58 }
 0x324   :  { %v2486_v16 = vpop.xlane.xlu1 %2485 }
 0x325   :  { %11748 = vpow2.f32 %v2454_v10  ;;  %v784_v10 = vpack.c.bf16 %v12366_v53, %v12366_v53 }
 0x326   :  { %v12824_v18 = vpop.eup %11736  ;;  %11750 = vrcp.f32 %v2486_v16 }
 0x327   :  { %v2526_v28 = vsel %vm2285_vm2, %v12824_v18, 0.0  ;;  %v12828_v20 = vpop.eup %11738 }
 0x328   :  { %v2354_v42 = vpop.xlane.xlu1 %2353  ;;  %2527 = vadd.xlane.f32.xlu1 %v2526_v28  ;;  %v12831_v51 = vpop.eup %11740  ;;  %v2541_v44 = vsel %vm2285_vm2, %v12828_v20, 0.0  ;;  %v2860_v28 = vsel %vm2674_vm3, %v784_v10, 0 }
 0x329   :  { %v2404_v49 = vsub.f32 %v12657_v15, %v2354_v42  ;;  %v2547_v7 = vsel %vm2285_vm2, %v12831_v51, 0.0 }
 0x32a   :  { %v12833_v34 = vpop.eup %11742 }
 0x32b   :  { %v2458_v11 = vmul.f32 1.442695, %v2404_v49  ;;  %v11745_v38 = vpop.eup %11744  ;;  %v2532_v60 = vsel %vm2285_vm2, %v12833_v34, 0.0 }
 0x32c   :  { %v2492_v29 = vpop.xlane.xlu1 %2491  ;;  %2542 = vadd.xlane.f32.xlu1 %v2541_v44  ;;  %v12839_v36 = vpop.eup %11746  ;;  %2533 = vadd.xlane.f32.xlu0 %v2532_v60  ;;  %v2606_v15 = vmul.f32 %v11745_v38, %v12698_v47  ;;  %v11285_v38 = vunpack.i.l.bf16 %v12577_v8 }
 0x32d   :  { %11752 = vpow2.f32 %v2458_v11  ;;  %v2535_v63 = vsel %vm2285_vm2, %v12839_v36, 0.0 }
 0x32e   :  { %11754 = vrcp.f32 %v2492_v29  ;;  %v2638_v32 = vpack.c.bf16 %v2606_v15, %v2606_v15 }
 0x330   :  { %v12846_v45 = vpop.xlane.xlu1 %2359  ;;  %2548 = vadd.xlane.f32.xlu1 %v2547_v7  ;;  %10502 = vmatmul.mubr.msk.bf16.vlgmr.msra.gmra.mxu0 %vm2670_vm4, %v2638_v32  ;;  %v2409_v7 = vsub.f32 %v12683_v30, %v2369_v19 }
 0x331   :  { %2536 = vadd.xlane.f32.xlu0 %v2535_v63  ;;  %10512 = vmatpush3.bf16.msra.mxu0 %v2768_v62 }
 0x332   :  { %10513 = vmatprep.mubr.msk.bf16.mxu0 %vm11982_vm0, %v14749_v2  ;;  %v12854_v48 = vpop.eup %11748  ;;  %10523 = vmatprep.subr.bf16.mxu0 %v14749_v2  ;;  %v2468_v63 = vmul.f32 1.442695, %v2409_v7 }
 0x333   :  { %v11751_v47 = vpop.eup %11750  ;;  %v2538_v9 = vsel %vm2285_vm2, %v12854_v48, 0.0 }
 0x334   :  { %v2498_v6 = vpop.xlane.xlu1 %2497  ;;  %v2608_v58 = vmul.f32 %v11751_v47, %v12711_v25  ;;  %v786_v25 = vpack.c.bf16 %v12381_v56, %v12381_v56  ;;  %v788_v56 = vpack.c.bf16 %v11285_v38, %v11285_v38 }
 0x335   :  { %2539 = vadd.xlane.f32.xlu0 %v2538_v9  ;;  %11756 = vrcp.f32 %v2498_v6 }
 0x336   :  { %v2640_v16 = vpack.c.bf16 %v2608_v58, %v2608_v58  ;;  %v2952_v29 = vsel %vm2674_vm3, %v786_v25, 0  ;;  %v3044_v8 = vsel %vm2674_vm3, %v788_v56, 0  ;;  %v11290_v56 = vunpack.i.l.bf16 %v12599_v31 }
 0x338   :  { %10514 = vmatmul.mubr.msk.bf16.vlgmr.msra.gmra.mxu0 %vm2670_vm4, %v2640_v16  ;;  %v2366_v6 = vpop.xlane.xlu1 %2365 }
 0x339   :  { %10524 = vmatpush3.bf16.msra.mxu0 %v2860_v28  ;;  %10525 = vmatprep.mubr.msk.bf16.mxu0 %vm11982_vm0, %v14749_v2  ;;  %v2408_v16 = vsub.f32 %v12681_v27, %v2366_v6 }
 0x33a   :  { %v12864_v42 = vpop.eup %11752  ;;  %10535 = vmatprep.subr.bf16.mxu0 %v14749_v2 }
 0x33b   :  { %v11755_v49 = vpop.eup %11754  ;;  %v2544_v11 = vsel %vm2285_vm2, %v12864_v42, 0.0 }
 0x33c   :  { %2545 = vadd.xlane.f32.xlu0 %v2544_v11  ;;  %v2610_v53 = vmul.f32 %v11755_v49, %v12717_v43 }
 0x33e   :  { %v2642_v44 = vpack.c.bf16 %v2610_v53, %v2610_v53 }
 0x340   :  { %10526 = vmatmul.mubr.msk.bf16.vlgmr.msra.gmra.mxu0 %vm2670_vm4, %v2642_v44 }
 0x341   :  { %11328 = vrot.lane.b32.xlu1 %v12376_v55, %s14730_s0  ;;  %10536 = vmatpush3.bf16.msra.mxu0 %v2952_v29  ;;  %v2407_v55 = vsub.f32 %v12671_v0, %v12787_v1  ;;  %v2406_v0 = vsub.f32 %v12669_v52, %v12846_v45  ;;  %v2372_v1 = vpop.xlane.xlu1 %2371 }
 0x342   :  { %10537 = vmatprep.mubr.msk.bf16.mxu0 %vm11982_vm0, %v14749_v2  ;;  %v11757_v60 = vpop.eup %11756  ;;  %10547 = vmatprep.subr.bf16.mxu0 %v14749_v2 }
 0x343   :  { %v2612_v43 = vmul.f32 %v11757_v60, %v12723_v40  ;;  %v2464_v32 = vmul.f32 1.442695, %v2407_v55  ;;  %v2375_v40 = vpop.xlane.xlu0 %2374  ;;  %v2462_v30 = vmul.f32 1.442695, %v2406_v0 }
 0x344   :  { %v2411_v62 = vsub.f32 %v12692_v21, %v2375_v40  ;;  %v2410_v21 = vsub.f32 %v12690_v50, %v2372_v1  ;;  %v790_v40 = vpack.c.bf16 %v11290_v56, %v11290_v56 }
 0x345   :  { %v2644_v15 = vpack.c.bf16 %v2612_v43, %v2612_v43  ;;  %11758 = vpow2.f32 %v2464_v32  ;;  %v2378_v28 = vpop.xlane.xlu1 %2377 }
 0x346   :  { %11760 = vpow2.f32 %v2468_v63  ;;  %v2472_v58 = vmul.f32 1.442695, %v2411_v62  ;;  %v2412_v11 = vsub.f32 %v12703_v4, %v2378_v28 }
 0x347   :  { %v2381_v47 = vpop.xlane.xlu0 %2380 }
 0x348   :  { %10538 = vmatmul.mubr.msk.bf16.vlgmr.msra.gmra.mxu0 %vm2670_vm4, %v2644_v15  ;;  %v2413_v9 = vsub.f32 %v12705_v26, %v2381_v47  ;;  %11762 = vpow2.f32 %v2472_v58  ;;  %v2470_v26 = vmul.f32 1.442695, %v2410_v21  ;;  %v2474_v25 = vmul.f32 1.442695, %v2412_v11 }
 0x349   :  { %10548 = vmatpush3.bf16.msra.mxu0 %v3044_v8  ;;  %10549 = vmatprep.mubr.msk.bf16.mxu0 %vm11982_vm0, %v14749_v2  ;;  %v11291_v15 = vunpack.i.h.bf16 %v12599_v31 }
 0x34a   :  { %10559 = vmatprep.subr.bf16.mxu0 %v14749_v2  ;;  %v2476_v10 = vmul.f32 1.442695, %v2413_v9 }
 0x34b   :  { %v791_v62 = vpack.c.bf16 %v11291_v15, %v11291_v15 }
 0x34c   :  { %11764 = vpow2.f32 %v2476_v10  ;;  %v11295_v10 = vunpack.i.l.bf16 %v12587_v17 }
 0x34d   :  { %11766 = vpow2.f32 %v2462_v30  ;;  %v11296_v30 = vunpack.i.h.bf16 %v12587_v17 }
 0x34e   :  { %v792_v28 = vpack.c.bf16 %v11295_v10, %v11295_v10 }
 0x34f   :  { %v793_v11 = vpack.c.bf16 %v11296_v30, %v11296_v30 }
 0x352   :  { %11323 = vrot.lane.b32.xlu0 %v12385_v57, %s14730_s0  ;;  %v2466_v57 = vmul.f32 1.442695, %v2408_v16  ;;  %v12899_v49 = vpop.eup %11758 }
 0x353   :  { %v2553_v52 = vsel %vm2285_vm2, %v12899_v49, 0.0  ;;  %v12904_v45 = vpop.eup %11760 }
 0x354   :  { %11768 = vpow2.f32 %v2466_v57  ;;  %v2559_v50 = vsel %vm2285_vm2, %v12904_v45, 0.0 }
 0x355   :  { %v12908_v44 = vpop.eup %11762 }
 0x356   :  { %v2565_v29 = vsel %vm2285_vm2, %v12908_v44, 0.0 }
 0x359   :  { %v12910_v38 = vpop.eup %11764 }
 0x35a   :  { %v12914_v60 = vpop.eup %11766  ;;  %v2571_v55 = vsel %vm2285_vm2, %v12910_v38, 0.0 }
 0x35b   :  { %v2550_v8 = vsel %vm2285_vm2, %v12914_v60, 0.0 }
 0x361   :  { %v12922_v19 = vpop.eup %11768 }
 0x362   :  { %v2556_v31 = vsel %vm2285_vm2, %v12922_v19, 0.0 }
 0x364   :  { %v2504_v53 = vpop.xlane.xlu1 %2503 }
 0x365   :  { %11770 = vrcp.f32 %v2504_v53  ;;  %v2507_v27 = vpop.xlane.xlu0 %2506  ;;  %2554 = vadd.xlane.f32.xlu1 %v2553_v52 }
 0x366   :  { %11772 = vrcp.f32 %v2507_v27 }
 0x367   :  { %11774 = vpow2.f32 %v2470_v26 }
 0x368   :  { %11776 = vpow2.f32 %v2474_v25 }
 0x369   :  { %2560 = vadd.xlane.f32.xlu1 %v2559_v50 }
 0x36c   :  { %v2510_v4 = vpop.xlane.xlu1 %2509 }
 0x36d   :  { %11778 = vrcp.f32 %v2510_v4  ;;  %v2513_v43 = vpop.xlane.xlu0 %2512  ;;  %2566 = vadd.xlane.f32.xlu1 %v2565_v29  ;;  %v11300_v4 = vunpack.i.l.bf16 %v12593_v24  ;;  %v3228_v29 = vsel %vm2674_vm3, %v792_v28, 0 }
 0x36e   :  { %11780 = vrcp.f32 %v2513_v43  ;;  %v11301_v43 = vunpack.i.h.bf16 %v12593_v24 }
 0x36f   :  { %v794_v24 = vpack.c.bf16 %v11300_v4, %v11300_v4 }
 0x371   :  { %2551 = vadd.xlane.f32.xlu0 %v2550_v8  ;;  %2572 = vadd.xlane.f32.xlu1 %v2571_v55  ;;  %v795_v55 = vpack.c.bf16 %v11301_v43, %v11301_v43 }
 0x372   :  { %v11771_v32 = vpop.eup %11770 }
 0x373   :  { %v11773_v7 = vpop.eup %11772  ;;  %v2614_v63 = vmul.f32 %v11771_v32, %v12741_v14  ;;  %v3136_v14 = vsel %vm2674_vm3, %v790_v40, 0 }
 0x374   :  { %v2516_v47 = vpop.xlane.xlu1 %2515  ;;  %v2615_v6 = vmul.f32 %v11773_v7, %v12743_v12  ;;  %v12928_v9 = vpop.eup %11774  ;;  %v3182_v12 = vsel %vm2674_vm3, %v791_v62, 0  ;;  %v3320_v62 = vsel %vm2674_vm3, %v794_v24, 0 }
 0x375   :  { %11782 = vrcp.f32 %v2516_v47  ;;  %v2519_v58 = vpop.xlane.xlu0 %2518  ;;  %2557 = vadd.xlane.f32.xlu0 %v2556_v31  ;;  %v2646_v0 = vpack.c.bf16 %v2614_v63, %v2614_v63  ;;  %v2562_v16 = vsel %vm2285_vm2, %v12928_v9, 0.0  ;;  %v12938_v57 = vpop.eup %11776  ;;  %v3366_v47 = vsel %vm2674_vm3, %v795_v55, 0 }
 0x376   :  { %11784 = vrcp.f32 %v2519_v58  ;;  %v2647_v1 = vpack.c.bf16 %v2615_v6, %v2615_v6  ;;  %v2568_v52 = vsel %vm2285_vm2, %v12938_v57, 0.0 }
 0x377   :  { %10550 = vmatmul.mubr.msk.bf16.vlgmr.msra.gmra.mxu0 %vm2670_vm4, %v2646_v0 }
 0x378   :  { %10556 = vmatmul.mubr.msk.bf16.vlgmr.msra.gmra.mxu1 %vm2670_vm4, %v2647_v1  ;;  %10560 = vmatpush3.bf16.msra.mxu0 %v3136_v14 }
 0x379   :  { %10566 = vmatpush3.bf16.msra.mxu1 %v3182_v12  ;;  %2563 = vadd.xlane.f32.xlu0 %v2562_v16 }
 0x37a   :  { %v11779_v21 = vpop.eup %11778  ;;  %10561 = vmatprep.mubr.msk.bf16.mxu0 %vm11982_vm0, %v14749_v2  ;;  %10567 = vmatprep.mubr.msk.bf16.mxu1 %vm11982_vm0, %v14749_v2 }
 0x37b   :  { %v11781_v17 = vpop.eup %11780  ;;  %10571 = vmatprep.subr.bf16.mxu0 %v14749_v2  ;;  %10577 = vmatprep.subr.bf16.mxu1 %v14749_v2  ;;  %v2616_v26 = vmul.f32 %v11779_v21, %v12750_v33  ;;  %v3274_v33 = vsel %vm2674_vm3, %v793_v11, 0 }
 0x37c   :  { %v2522_v53 = vpop.xlane.xlu0 %2521  ;;  %v2617_v27 = vmul.f32 %v11781_v17, %v12753_v41 }
 0x37d   :  { %11786 = vrcp.f32 %v2522_v53  ;;  %2569 = vadd.xlane.f32.xlu0 %v2568_v52  ;;  %v2648_v25 = vpack.c.bf16 %v2616_v26, %v2616_v26 }
 0x37e   :  { %v2649_v50 = vpack.c.bf16 %v2617_v27, %v2617_v27 }
 0x37f   :  { %10562 = vmatmul.mubr.msk.bf16.vlgmr.msra.gmra.mxu0 %vm2670_vm4, %v2648_v25 }
 0x380   :  { %10568 = vmatmul.mubr.msk.bf16.vlgmr.msra.gmra.mxu1 %vm2670_vm4, %v2649_v50  ;;  %10572 = vmatpush3.bf16.msra.mxu0 %v3228_v29  ;;  %v2525_v56 = vpop.xlane.xlu0 %2524  ;;  %v11315_v29 = vunpack.i.l.bf16 %v12733_v5 }
 0x381   :  { %10578 = vmatpush3.bf16.msra.mxu1 %v3274_v33  ;;  %11788 = vrcp.f32 %v2525_v56  ;;  %10573 = vmatprep.mubr.msk.bf16.mxu0 %vm11982_vm0, %v14749_v2  ;;  %v11316_v56 = vunpack.i.h.bf16 %v12733_v5 }
 0x382   :  { %v11783_v41 = vpop.eup %11782  ;;  %11338 = vrot.lane.b32.xlu1 %v12409_v61, %s14730_s0  ;;  %10579 = vmatprep.mubr.msk.bf16.mxu1 %vm11982_vm0, %v14749_v2  ;;  %v11305_v61 = vunpack.i.l.bf16 %v12611_v46 }
 0x383   :  { %v11785_v15 = vpop.eup %11784  ;;  %10583 = vmatprep.subr.bf16.mxu0 %v14749_v2  ;;  %10589 = vmatprep.subr.bf16.mxu1 %v14749_v2  ;;  %v2618_v8 = vmul.f32 %v11783_v41, %v12759_v3 }
 0x384   :  { %v2619_v32 = vmul.f32 %v11785_v15, %v12762_v13  ;;  %v11306_v13 = vunpack.i.h.bf16 %v12611_v46  ;;  %v796_v31 = vpack.c.bf16 %v11305_v61, %v11305_v61  ;;  %v800_v15 = vpack.c.bf16 %v11315_v29, %v11315_v29 }
 0x385   :  { %v2531_v7 = vpop.xlane.xlu0 %2530  ;;  %v2650_v40 = vpack.c.bf16 %v2618_v8, %v2618_v8  ;;  %v801_v8 = vpack.c.bf16 %v11316_v56, %v11316_v56  ;;  %v11320_v61 = vunpack.i.l.bf16 %v12795_v35 }
 0x386   :  { %11790 = vrcp.f32 %v2531_v7  ;;  %v2651_v63 = vpack.c.bf16 %v2619_v32, %v2619_v32  ;;  %v797_v1 = vpack.c.bf16 %v11306_v13, %v11306_v13  ;;  %v3412_v10 = vsel %vm2674_vm3, %v796_v31, 0 }
 0x387   :  { %10574 = vmatmul.mubr.msk.bf16.vlgmr.msra.gmra.mxu0 %vm2670_vm4, %v2650_v40 }
 0x388   :  { %10580 = vmatmul.mubr.msk.bf16.vlgmr.msra.gmra.mxu1 %vm2670_vm4, %v2651_v63  ;;  %10584 = vmatpush3.bf16.msra.mxu0 %v3320_v62  ;;  %v3458_v12 = vsel %vm2674_vm3, %v797_v1, 0 }
 0x389   :  { %10590 = vmatpush3.bf16.msra.mxu1 %v3366_v47  ;;  %10585 = vmatprep.mubr.msk.bf16.mxu0 %vm11982_vm0, %v14749_v2  ;;  %v11321_v47 = vunpack.i.h.bf16 %v12795_v35  ;;  %v802_v35 = vpack.c.bf16 %v11320_v61, %v11320_v61 }
 0x38a   :  { %v11787_v3 = vpop.eup %11786  ;;  %10595 = vmatprep.subr.bf16.mxu0 %v14749_v2  ;;  %10591 = vmatprep.mubr.msk.bf16.mxu1 %vm11982_vm0, %v14749_v2 }
 0x38b   :  { %v2620_v6 = vmul.f32 %v11787_v3, %v12770_v22  ;;  %10601 = vmatprep.subr.bf16.mxu1 %v14749_v2  ;;  %v11311_v22 = vunpack.i.h.bf16 %v12601_v54  ;;  %v3642_v3 = vsel %vm2674_vm3, %v801_v8, 0 }
 0x38d   :  { %v2652_v58 = vpack.c.bf16 %v2620_v6, %v2620_v6  ;;  %v799_v16 = vpack.c.bf16 %v11311_v22, %v11311_v22 }
 0x38e   :  { %v11789_v0 = vpop.eup %11788 }
 0x38f   :  { %10586 = vmatmul.mubr.msk.bf16.vlgmr.msra.gmra.mxu0 %vm2670_vm4, %v2652_v58  ;;  %v2621_v14 = vmul.f32 %v11789_v0, %v12774_v37  ;;  %v3550_v17 = vsel %vm2674_vm3, %v799_v16, 0  ;;  %v803_v58 = vpack.c.bf16 %v11321_v47, %v11321_v47 }
 0x390   :  { %10596 = vmatpush3.bf16.msra.mxu0 %v3412_v10  ;;  %10597 = vmatprep.mubr.msk.bf16.mxu0 %vm11982_vm0, %v14749_v2 }
 0x391   :  { %v2653_v30 = vpack.c.bf16 %v2621_v14, %v2621_v14  ;;  %10607 = vmatprep.subr.bf16.mxu0 %v14749_v2 }
 0x393   :  { %v11791_v46 = vpop.eup %11790  ;;  %11333 = vrot.lane.b32.xlu0 %v12397_v59, %s14730_s0  ;;  %10592 = vmatmul.mubr.msk.bf16.vlgmr.msra.gmra.mxu1 %vm2670_vm4, %v2653_v30 }
 0x394   :  { %10602 = vmatpush3.bf16.msra.mxu1 %v3458_v12  ;;  %10603 = vmatprep.mubr.msk.bf16.mxu1 %vm11982_vm0, %v14749_v2  ;;  %v2623_v37 = vmul.f32 %v11791_v46, %v12778_v23  ;;  %v11310_v23 = vunpack.i.l.bf16 %v12601_v54  ;;  %v3688_v12 = vsel %vm2674_vm3, %v802_v35, 0 }
 0x395   :  { %10613 = vmatprep.subr.bf16.mxu1 %v14749_v2 }
 0x396   :  { %v2655_v21 = vpack.c.bf16 %v2623_v37, %v2623_v37  ;;  %v798_v27 = vpack.c.bf16 %v11310_v23, %v11310_v23 }
 0x398   :  { %v3504_v33 = vsel %vm2674_vm3, %v798_v27, 0 }
 0x39b   :  { %10604 = vmatmul.mubr.msk.bf16.vlgmr.msra.gmra.mxu1 %vm2670_vm4, %v2655_v21 }
 0x39c   :  { %10614 = vmatpush3.bf16.msra.mxu1 %v3550_v17  ;;  %10615 = vmatprep.mubr.msk.bf16.mxu1 %vm11982_vm0, %v14749_v2 }
 0x39d   :  { %10625 = vmatprep.subr.bf16.mxu1 %v14749_v2 }
 0x3b1   :  { %v2528_v59 = vpop.xlane.xlu1 %2527 }
 0x3b2   :  { %11792 = vrcp.f32 %v2528_v59 }
 0x3b5   :  { %v2534_v28 = vpop.xlane.xlu0 %2533  ;;  %v2543_v11 = vpop.xlane.xlu1 %2542 }
 0x3b6   :  { %11794 = vrcp.f32 %v2534_v28 }
 0x3b9   :  { %v2549_v43 = vpop.xlane.xlu1 %2548 }
 0x3ba   :  { %v2537_v26 = vpop.xlane.xlu0 %2536 }
 0x3bb   :  { %11796 = vrcp.f32 %v2537_v26 }
 0x3bc   :  { %11798 = vrcp.f32 %v2543_v11 }
 0x3be   :  { %v2540_v53 = vpop.xlane.xlu0 %2539 }
 0x3bf   :  { %v11793_v52 = vpop.eup %11792  ;;  %11800 = vrcp.f32 %v2540_v53 }
 0x3c0   :  { %v2622_v25 = vmul.f32 %v11793_v52, %v12824_v18 }
 0x3c2   :  { %v2654_v50 = vpack.c.bf16 %v2622_v25, %v2622_v25 }
 0x3c3   :  { %v11795_v4 = vpop.eup %11794 }
 0x3c4   :  { %10598 = vmatmul.mubr.msk.bf16.vlgmr.msra.gmra.mxu0 %vm2670_vm4, %v2654_v50  ;;  %v2624_v18 = vmul.f32 %v11795_v4, %v12833_v34  ;;  %v3596_v34 = vsel %vm2674_vm3, %v800_v15, 0 }
 0x3c5   :  { %10608 = vmatpush3.bf16.msra.mxu0 %v3504_v33  ;;  %v2546_v54 = vpop.xlane.xlu0 %2545  ;;  %10609 = vmatprep.mubr.msk.bf16.mxu0 %vm11982_vm0, %v14749_v2 }
 0x3c6   :  { %11802 = vrcp.f32 %v2546_v54  ;;  %10619 = vmatprep.subr.bf16.mxu0 %v14749_v2  ;;  %v2656_v5 = vpack.c.bf16 %v2624_v18, %v2624_v18 }
 0x3c7   :  { %11804 = vrcp.f32 %v2549_v43  ;;  %v13009_v24 = vpop.f32.mrf.mxu1  ;;  %v11329_v43 = vpop.permute.xlu1 %11328 }
 0x3c8   :  { %v11797_v41 = vpop.eup %11796  ;;  %v11331_v8 = vunpack.i.h.bf16 %v11329_v43 }
 0x3c9   :  { %v2625_v55 = vmul.f32 %v11797_v41, %v12839_v36  ;;  %v10509_v32 = vpop.f32.mrf.mxu1  ;;  %v11799_v7 = vpop.eup %11798 }
 0x3ca   :  { %v2627_v31 = vmul.f32 %v11799_v7, %v12828_v20  ;;  %v11324_v0 = vpop.permute.xlu0 %11323  ;;  %v3734_v20 = vsel %vm2674_vm3, %v803_v58, 0 }
 0x3cb   :  { %v2657_v40 = vpack.c.bf16 %v2625_v55, %v2625_v55  ;;  %v2761_v62 = vpop.f32.mrf.mxu1  ;;  %v11326_v37 = vunpack.i.h.bf16 %v11324_v0 }
 0x3cc   :  { %v11801_v63 = vpop.eup %11800  ;;  %10610 = vmatmul.mubr.msk.bf16.vlgmr.msra.gmra.mxu0 %vm2670_vm4, %v2656_v5  ;;  %v2659_v30 = vpack.c.bf16 %v2627_v31, %v2627_v31 }
 0x3cd   :  { %10616 = vmatmul.mubr.msk.bf16.vlgmr.msra.gmra.mxu1 %vm2670_vm4, %v2657_v40  ;;  %10620 = vmatpush3.bf16.msra.mxu0 %v3596_v34  ;;  %v10510_v36 = vpop.f32.mrf.mxu1  ;;  %v2626_v13 = vmul.f32 %v11801_v63, %v12854_v48  ;;  %v11325_v48 = vunpack.i.l.bf16 %v11324_v0  ;;  %v805_v26 = vpack.c.bf16 %v11326_v37, %v11326_v37  ;;  %v807_v63 = vpack.c.bf16 %v11331_v8, %v11331_v8 }
 0x3ce   :  { %10626 = vmatpush3.bf16.msra.mxu1 %v3642_v3  ;;  %10621 = vmatprep.mubr.msk.bf16.mxu0 %vm11982_vm0, %v14749_v2 }
 0x3cf   :  { %10627 = vmatprep.mubr.msk.bf16.mxu1 %vm11982_vm0, %v14749_v2  ;;  %10631 = vmatprep.subr.bf16.mxu0 %v14749_v2  ;;  %v13025_v6 = vpop.f32.mrf.mxu1  ;;  %v2658_v10 = vpack.c.bf16 %v2626_v13, %v2626_v13  ;;  %v804_v59 = vpack.c.bf16 %v11325_v48, %v11325_v48  ;;  %v3918_v31 = vsel %vm2674_vm3, %v807_v63, 0 }
 0x3d0   :  { %10637 = vmatprep.subr.bf16.mxu1 %v14749_v2 }
 0x3d1   :  { %v10521_v1 = vpop.f32.mrf.mxu1  ;;  %v3780_v52 = vsel %vm2674_vm3, %v804_v59, 0 }
 0x3d3   :  { %v11803_v14 = vpop.eup %11802  ;;  %v2853_v22 = vpop.f32.mrf.mxu1 }
 0x3d4   :  { %v11805_v46 = vpop.eup %11804  ;;  %10622 = vmatmul.mubr.msk.bf16.vlgmr.msra.gmra.mxu0 %vm2670_vm4, %v2658_v10  ;;  %v2628_v16 = vmul.f32 %v11803_v14, %v12864_v42  ;;  %v11330_v10 = vunpack.i.l.bf16 %v11329_v43 }
 0x3d5   :  { %10628 = vmatmul.mubr.msk.bf16.vlgmr.msra.gmra.mxu1 %vm2670_vm4, %v2659_v30  ;;  %10632 = vmatpush3.bf16.msra.mxu0 %v3688_v12  ;;  %v10522_v21 = vpop.f32.mrf.mxu1  ;;  %v2629_v17 = vmul.f32 %v11805_v46, %v12831_v51  ;;  %v3826_v51 = vsel %vm2674_vm3, %v805_v26, 0 }
 0x3d6   :  { %10638 = vmatpush3.bf16.msra.mxu1 %v3734_v20  ;;  %10633 = vmatprep.mubr.msk.bf16.mxu0 %vm11982_vm0, %v14749_v2  ;;  %v2660_v11 = vpack.c.bf16 %v2628_v16, %v2628_v16  ;;  %v806_v20 = vpack.c.bf16 %v11330_v10, %v11330_v10 }
 0x3d7   :  { %10639 = vmatprep.mubr.msk.bf16.mxu1 %vm11982_vm0, %v14749_v2  ;;  %10643 = vmatprep.subr.bf16.mxu0 %v14749_v2  ;;  %v13039_v28 = vpop.f32.mrf.mxu1  ;;  %v2661_v23 = vpack.c.bf16 %v2629_v17, %v2629_v17 }
 0x3d8   :  { %10649 = vmatprep.subr.bf16.mxu1 %v14749_v2 }
 0x3d9   :  { %v10533_v42 = vpop.f32.mrf.mxu1 }
 0x3db   :  { %v2945_v53 = vpop.f32.mrf.mxu1 }
 0x3dc   :  { %10634 = vmatmul.mubr.msk.bf16.vlgmr.msra.gmra.mxu0 %vm2670_vm4, %v2660_v11 }
 0x3dd   :  { %10640 = vmatmul.mubr.msk.bf16.vlgmr.msra.gmra.mxu1 %vm2670_vm4, %v2661_v23  ;;  %10644 = vmatpush3.bf16.msra.mxu0 %v3780_v52  ;;  %v10534_v27 = vpop.f32.mrf.mxu1 }
 0x3de   :  { %10650 = vmatpush3.bf16.msra.mxu1 %v3826_v51  ;;  %10651 = vmatprep.mubr.msk.bf16.mxu1 %vm11982_vm0, %v14749_v2  ;;  %v3872_v51 = vsel %vm2674_vm3, %v806_v20, 0 }
 0x3df   :  { %10661 = vmatprep.subr.bf16.mxu1 %v14749_v2  ;;  %10645 = vmatprep.mubr.msk.bf16.mxu0 %vm11982_vm0, %v14749_v2  ;;  %v13051_v25 = vpop.f32.mrf.mxu1 }
 0x3e0   :  { %10655 = vmatprep.subr.bf16.mxu0 %v14749_v2 }
 0x3e1   :  { %v10545_v50 = vpop.f32.mrf.mxu1 }
 0x3e3   :  { %v3037_v4 = vpop.f32.mrf.mxu1 }
 0x3e5   :  { %v10546_v29 = vpop.f32.mrf.mxu1 }
 0x3ee   :  { %v2555_v33 = vpop.xlane.xlu1 %2554 }
 0x3ef   :  { %11806 = vrcp.f32 %v2555_v33 }
 0x3f0   :  { %v13054_v56 = vpop.f32.mrf.mxu0 }
 0x3f2   :  { %v2561_v54 = vpop.xlane.xlu1 %2560  ;;  %v10503_v18 = vpop.f32.mrf.mxu0 }
 0x3f3   :  { %11808 = vrcp.f32 %v2561_v54 }
 0x3f4   :  { %v2715_v41 = vpop.f32.mrf.mxu0 }
 0x3f6   :  { %v10504_v15 = vpop.f32.mrf.mxu0  ;;  %v2567_v32 = vpop.xlane.xlu1 %2566 }
 0x3f8   :  { %v13056_v55 = vpop.f32.mrf.mxu0 }
 0x3fa   :  { %v2552_v5 = vpop.xlane.xlu0 %2551  ;;  %v10515_v7 = vpop.f32.mrf.mxu0 }
 0x3fb   :  { %11810 = vrcp.f32 %v2552_v5  ;;  %v2573_v35 = vpop.xlane.xlu1 %2572 }
 0x3fc   :  { %v11807_v40 = vpop.eup %11806  ;;  %11812 = vrcp.f32 %v2567_v32  ;;  %v2807_v62 = vpop.f32.mrf.mxu0 }
 0x3fd   :  { %v2631_v61 = vmul.f32 %v11807_v40, %v12899_v49  ;;  %v14750_v40 = vmov 0  }
 0x3fe   :  { %v2558_v34 = vpop.xlane.xlu0 %2557  ;;  %v10516_v3 = vpop.f32.mrf.mxu0 }
 0x3ff   :  { %v2663_v47 = vpack.c.bf16 %v2631_v61, %v2631_v61  ;;  %11814 = vrcp.f32 %v2558_v34  ;;  %v11339_v48 = vpop.permute.xlu1 %11338 }
 0x400   :  { %v11809_v36 = vpop.eup %11808  ;;  %v13059_v13 = vpop.f32.mrf.mxu0  ;;  %11816 = vrcp.f32 %v2573_v35  ;;  %v11341_v21 = vunpack.i.h.bf16 %v11339_v48  ;;  %v11340_v41 = vunpack.i.l.bf16 %v11339_v48 }
 0x401   :  { %10652 = vmatmul.mubr.msk.bf16.vlgmr.msra.gmra.mxu1 %vm2670_vm4, %v2663_v47  ;;  %v2633_v49 = vmul.f32 %v11809_v36, %v12904_v45 }
 0x402   :  { %10662 = vmatpush3.bf16.msra.mxu1 %v3918_v31  ;;  %v2564_v58 = vpop.xlane.xlu0 %2563  ;;  %10663 = vmatprep.mubr.msk.bf16.mxu1 %vm11982_vm0, %v14749_v2  ;;  %v10527_v0 = vpop.f32.mrf.mxu0  ;;  %v811_v27 = vpack.c.bf16 %v11341_v21, %v11341_v21  ;;  %v810_v5 = vpack.c.bf16 %v11340_v41, %v11340_v41 }
 0x403   :  { %10673 = vmatprep.subr.bf16.mxu1 %v14749_v2  ;;  %v2665_v30 = vpack.c.bf16 %v2633_v49, %v2633_v49  ;;  %11818 = vrcp.f32 %v2564_v58 }
 0x404   :  { %v2899_v1 = vpop.f32.mrf.mxu0  ;;  %v4102_v33 = vsel %vm2674_vm3, %v811_v27, 0  ;;  %v4056_v63 = vsel %vm2674_vm3, %v810_v5, 0 }
 0x406   :  { %v2570_v14 = vpop.xlane.xlu0 %2569  ;;  %v10528_v46 = vpop.f32.mrf.mxu0 }
 0x407   :  { %11820 = vrcp.f32 %v2570_v14 }
 0x408   :  { %v11811_v22 = vpop.eup %11810  ;;  %v13067_v12 = vpop.f32.mrf.mxu0 }
 0x409   :  { %10664 = vmatmul.mubr.msk.bf16.vlgmr.msra.gmra.mxu1 %vm2670_vm4, %v2665_v30  ;;  %v11813_v37 = vpop.eup %11812  ;;  %v2630_v45 = vmul.f32 %v11811_v22, %v12914_v60 }
 0x40a   :  { %v11334_v16 = vpop.permute.xlu0 %11333  ;;  %10675 = vmatprep.mubr.msk.bf16.mxu1 %vm11982_vm0, %v14749_v2  ;;  %v10539_v17 = vpop.f32.mrf.mxu0  ;;  %v2635_v42 = vmul.f32 %v11813_v37, %v12908_v44 }
 0x40b   :  { %v11336_v59 = vunpack.i.h.bf16 %v11334_v16  ;;  %v2662_v26 = vpack.c.bf16 %v2630_v45, %v2630_v45  ;;  %v11335_v52 = vunpack.i.l.bf16 %v11334_v16 }
 0x40c   :  { %v11815_v11 = vpop.eup %11814  ;;  %v2991_v53 = vpop.f32.mrf.mxu0  ;;  %v2667_v44 = vpack.c.bf16 %v2635_v42, %v2635_v42 }
 0x40d   :  { %v809_v23 = vpack.c.bf16 %v11336_v59, %v11336_v59  ;;  %10646 = vmatmul.mubr.msk.bf16.vlgmr.msra.gmra.mxu0 %vm2670_vm4, %v2662_v26  ;;  %v2632_v4 = vmul.f32 %v11815_v11, %v12922_v19  ;;  %v11817_v29 = vpop.eup %11816  ;;  %v808_v43 = vpack.c.bf16 %v11335_v52, %v11335_v52 }
 0x40e   :  { %v10540_v60 = vpop.f32.mrf.mxu0  ;;  %10656 = vmatpush3.bf16.msra.mxu0 %v3872_v51  ;;  %10657 = vmatprep.mubr.msk.bf16.mxu0 %vm11982_vm0, %v14749_v2  ;;  %v2637_v19 = vmul.f32 %v11817_v29, %v12910_v38 }
 0x40f   :  { %v4010_v50 = vsel %vm2674_vm3, %v809_v23, 0  ;;  %10667 = vmatprep.subr.bf16.mxu0 %v14749_v2  ;;  %v2664_v54 = vpack.c.bf16 %v2632_v4, %v2632_v4  ;;  %v3964_v15 = vsel %vm2674_vm3, %v808_v43, 0 }
 0x410   :  { %10674 = vmatpush3.bf16.msra.mxu1 %v4010_v50  ;;  %v11819_v18 = vpop.eup %11818  ;;  %v2669_v32 = vpack.c.bf16 %v2637_v19, %v2637_v19 }
 0x411   :  { %10685 = vmatprep.subr.bf16.mxu1 %v14749_v2  ;;  %v2634_v8 = vmul.f32 %v11819_v18, %v12928_v9 }
 0x413   :  { %10676 = vmatmul.mubr.msk.bf16.vlgmr.msra.gmra.mxu1 %vm2670_vm4, %v2667_v44  ;;  %v2666_v7 = vpack.c.bf16 %v2634_v8, %v2634_v8 }
 0x414   :  { %10686 = vmatpush3.bf16.msra.mxu1 %v4102_v33  ;;  %10687 = vmatprep.mubr.msk.bf16.mxu1 %vm11982_vm0, %v14749_v2  ;;  %v11821_v38 = vpop.eup %11820 }
 0x415   :  { %10658 = vmatmul.mubr.msk.bf16.vlgmr.msra.gmra.mxu0 %vm2670_vm4, %v2664_v54  ;;  %v2636_v9 = vmul.f32 %v11821_v38, %v12938_v57 }
 0x416   :  { %10668 = vmatpush3.bf16.msra.mxu0 %v3964_v15  ;;  %10669 = vmatprep.mubr.msk.bf16.mxu0 %vm11982_vm0, %v14749_v2 }
 0x417   :  { %10679 = vmatprep.subr.bf16.mxu0 %v14749_v2  ;;  %v2668_v61 = vpack.c.bf16 %v2636_v9, %v2636_v9 }
 0x41b   :  { %10688 = vmatmul.mubr.msk.bf16.vlgmr.msra.gmra.mxu1 %vm2670_vm4, %v2669_v32 }
 0x41c   :  { %4632 = vmatprep.mubr.bf16.mxu1 %v14750_v40 }
 0x41d   :  { %10670 = vmatmul.mubr.msk.bf16.vlgmr.msra.gmra.mxu0 %vm2670_vm4, %v2666_v7 }
 0x41e   :  { %10680 = vmatpush3.bf16.msra.mxu0 %v4056_v63  ;;  %10681 = vmatprep.mubr.msk.bf16.mxu0 %vm11982_vm0, %v14749_v2 }
 0x41f   :  { %10691 = vmatprep.subr.bf16.mxu0 %v14749_v2 }
 0x425   :  { %10682 = vmatmul.mubr.msk.bf16.vlgmr.msra.gmra.mxu0 %vm2670_vm4, %v2668_v61 }
 0x426   :  { %10707 = vmatprep.mubr.msk.bf16.mxu0 %vm11982_vm0, %v14749_v2 }
 0x437   :  { %v3080_v62 = vpop.f32.mrf.mxu0 }
 0x438   :  { %v3126_v34 = vpop.f32.mrf.mxu1  ;;  %4152 = vrot.lane.b32.xlu1 %v3080_v62, %s14730_s0 }
 0x439   :  { %v10551_v47 = vpop.f32.mrf.mxu0 }
 0x43a   :  { %v10557_v3 = vpop.f32.mrf.mxu1 }
 0x43b   :  { %v3083_v36 = vpop.f32.mrf.mxu0 }
 0x43c   :  { %v3129_v31 = vpop.f32.mrf.mxu1  ;;  %4154 = vrot.lane.b32.xlu1 %v3126_v34, %s14730_s0 }
 0x43d   :  { %v10552_v35 = vpop.f32.mrf.mxu0 }
 0x43e   :  { %v10558_v57 = vpop.f32.mrf.mxu1 }
 0x43f   :  { %v3172_v58 = vpop.f32.mrf.mxu0 }
 0x440   :  { %v3218_v49 = vpop.f32.mrf.mxu1  ;;  %4156 = vrot.lane.b32.xlu1 %v3172_v58, %s14730_s0 }
 0x441   :  { %v10563_v0 = vpop.f32.mrf.mxu0 }
 0x442   :  { %v10569_v1 = vpop.f32.mrf.mxu1 }
 0x443   :  { %v3175_v10 = vpop.f32.mrf.mxu0 }
 0x444   :  { %v3221_v14 = vpop.f32.mrf.mxu1  ;;  %4158 = vrot.lane.b32.xlu1 %v3218_v49, %s14730_s0 }
 0x445   :  { %v10564_v30 = vpop.f32.mrf.mxu0 }
 0x446   :  { %v10570_v46 = vpop.f32.mrf.mxu1  ;;  %v11555_v30 = vld [vmem:[%s14751_s9 + $0x38] sm:$0xff]  }
 0x447   :  { %v3264_v48 = vpop.f32.mrf.mxu0  ;;  %10692 = vmatpush3.bf16.msra.mxu0 %v11555_v30 }
 0x448   :  { %v3310_v22 = vpop.f32.mrf.mxu1  ;;  %4160 = vrot.lane.b32.xlu0 %v3264_v48, %s14730_s0  ;;  %v11556_v48 = vld [vmem:[%s14751_s9 + $0x30] sm:$0xff]   ;;  %10693 = vmatprep.subr.bf16.mxu0 %v14749_v2 }
 0x449   :  { %4162 = vrot.lane.b32.xlu1 %v3310_v22, %s14730_s0  ;;  %v10575_v37 = vpop.f32.mrf.mxu0  ;;  %v11557_v22 = vld [vmem:[%s14752_s30 + $0x70] ss:$8 sps:$4 sm:$0xff]  }
 0x44a   :  { %v10581_v20 = vpop.f32.mrf.mxu1 }
 0x44b   :  { %v3267_v45 = vpop.f32.mrf.mxu0  ;;  %v11559_v20 = vld [vmem:[%s14752_s30 + $0x74] ss:$8 sps:$4 sm:$0xff]   ;;  %10694 = vmatpush3.bf16.msra.mxu0 %v11556_v48 }
 0x44c   :  { %v3313_v16 = vpop.f32.mrf.mxu1  ;;  %4600 = vmatprep.subr.bf16.mxu1 %v11559_v20  ;;  %10695 = vmatprep.subr.bf16.mxu0 %v14749_v2 }
 0x44d   :  { %v10576_v21 = vpop.f32.mrf.mxu0  ;;  %4601 = vmatpush1.bf16.msra.mxu1 %v11557_v22 }
 0x44e   :  { %v10582_v17 = vpop.f32.mrf.mxu1 }
 0x44f   :  { %v3356_v59 = vpop.f32.mrf.mxu0 }
 0x450   :  { %4164 = vrot.lane.b32.xlu0 %v3356_v59, %s14730_s0  ;;  %v11560_v59 = vld [vmem:[%s14751_s9 + $0x28] sm:$0xff]  }
 0x451   :  { %v10587_v26 = vpop.f32.mrf.mxu0  ;;  %10696 = vmatpush3.bf16.msra.mxu0 %v11560_v59 }
 0x452   :  { %v11561_v26 = vld [vmem:[%s14752_s30 + $0x60] ss:$8 sps:$4 sm:$0xff]   ;;  %10697 = vmatprep.subr.bf16.mxu0 %v14749_v2 }
 0x453   :  { %v3359_v11 = vpop.f32.mrf.mxu0  ;;  %v3402_v42 = vpop.f32.mrf.mxu1 }
 0x454   :  { %4166 = vrot.lane.b32.xlu1 %v3402_v42, %s14730_s0  ;;  %v11563_v11 = vld [vmem:[%s14752_s30 + $0x64] ss:$8 sps:$4 sm:$0xff]   ;;  %s14757_s0 = sld [smem:[#allocation12_spill]] }
 0x455   :  { %v10588_v23 = vpop.f32.mrf.mxu0  ;;  %v10593_v53 = vpop.f32.mrf.mxu1  ;;  %4602 = vmatprep.subr.bf16.mxu1 %v11563_v11 }
 0x456   :  { %v11564_v23 = vld [vmem:[%s14751_s9 + $0x20] sm:$0xff]   ;;  %v11565_v53 = vld [vmem:[%s14752_s30 + $0x50] ss:$8 sps:$4 sm:$0xff]   ;;  %4603 = vmatpush1.bf16.msra.mxu1 %v11561_v26 }
 0x457   :  { %v3405_v52 = vpop.f32.mrf.mxu1  ;;  %10698 = vmatpush3.bf16.msra.mxu0 %v11564_v23 }
 0x458   :  { %v11567_v52 = vld [vmem:[%s14752_s30 + $0x54] ss:$8 sps:$4 sm:$0xff]   ;;  %10699 = vmatprep.subr.bf16.mxu0 %v14749_v2 }
 0x459   :  { %v10594_v51 = vpop.f32.mrf.mxu1  ;;  %4604 = vmatprep.subr.bf16.mxu1 %v11567_v52 }
 0x45a   :  { %4605 = vmatpush1.bf16.msra.mxu1 %v11565_v53 }
 0x45b   :  { %v3494_v27 = vpop.f32.mrf.mxu1 }
 0x45c   :  { %4186 = vrot.lane.b32.xlu1 %v3494_v27, %s14732_s8 }
 0x45d   :  { %v10605_v60 = vpop.f32.mrf.mxu1 }
 0x45f   :  { %v3497_v50 = vpop.f32.mrf.mxu1 }
 0x461   :  { %v10606_v4 = vpop.f32.mrf.mxu1 }
 0x462   :  { %v11568_v4 = vld [vmem:[%s14751_s9 + $0x18] sm:$0xff]  }
 0x463   :  { %10700 = vmatpush3.bf16.msra.mxu0 %v11568_v4 }
 0x464   :  { %10701 = vmatprep.subr.bf16.mxu0 %v14749_v2 }
 0x484   :  { %v3448_v44 = vpop.f32.mrf.mxu0 }
 0x485   :  { %4184 = vrot.lane.b32.xlu0 %v3448_v44, %s14732_s8  ;;  %v11571_v44 = vld [vmem:[%s14752_s30 + $0x44] ss:$8 sps:$4 sm:$0xff]  }
 0x486   :  { %v10599_v29 = vpop.f32.mrf.mxu0  ;;  %4606 = vmatprep.subr.bf16.mxu1 %v11571_v44 }
 0x488   :  { %v3451_v43 = vpop.f32.mrf.mxu0 }
 0x489   :  { %v11569_v43 = vld [vmem:[%s14752_s30 + $0x40] ss:$8 sps:$4 sm:$0xff]  }
 0x48a   :  { %v10600_v33 = vpop.f32.mrf.mxu0  ;;  %4607 = vmatpush1.bf16.msra.mxu1 %v11569_v43 }
 0x48c   :  { %v3540_v54 = vpop.f32.mrf.mxu0 }
 0x48d   :  { %v3586_v18 = vpop.f32.mrf.mxu1  ;;  %4188 = vrot.lane.b32.xlu0 %v3540_v54, %s14732_s8  ;;  %v11575_v54 = vld [vmem:[%s14752_s30 + $0x34] ss:$8 sps:$4 sm:$0xff]  }
 0x48e   :  { %4190 = vrot.lane.b32.xlu1 %v3586_v18, %s14732_s8  ;;  %v10611_v19 = vpop.f32.mrf.mxu0  ;;  %4608 = vmatprep.subr.bf16.mxu1 %v11575_v54 }
 0x48f   :  { %v10617_v41 = vpop.f32.mrf.mxu1 }
 0x490   :  { %v3543_v15 = vpop.f32.mrf.mxu0  ;;  %v11572_v41 = vld [vmem:[%s14751_s9 + $0x10] sm:$0xff]  }
 0x491   :  { %v3589_v8 = vpop.f32.mrf.mxu1  ;;  %10702 = vmatpush3.bf16.msra.mxu0 %v11572_v41 }
 0x492   :  { %v10612_v32 = vpop.f32.mrf.mxu0  ;;  %v11573_v8 = vld [vmem:[%s14752_s30 + $0x30] ss:$8 sps:$4 sm:$0xff]   ;;  %10703 = vmatprep.subr.bf16.mxu0 %v14749_v2 }
 0x493   :  { %v10618_v5 = vpop.f32.mrf.mxu1  ;;  %4609 = vmatpush1.bf16.msra.mxu1 %v11573_v8 }
 0x494   :  { %v3632_v7 = vpop.f32.mrf.mxu0 }
 0x495   :  { %v3678_v38 = vpop.f32.mrf.mxu1  ;;  %4192 = vrot.lane.b32.xlu0 %v3632_v7, %s14732_s8 }
 0x496   :  { %4194 = vrot.lane.b32.xlu1 %v3678_v38, %s14732_s8  ;;  %v10623_v63 = vpop.f32.mrf.mxu0 }
 0x497   :  { %v10629_v9 = vpop.f32.mrf.mxu1 }
 0x498   :  { %v3635_v61 = vpop.f32.mrf.mxu0 }
 0x499   :  { %v3681_v62 = vpop.f32.mrf.mxu1 }
 0x49a   :  { %v10624_v34 = vpop.f32.mrf.mxu0  ;;  %v11576_v62 = vld [vmem:[%s14751_s9 + $0x8] sm:$0xff]  }
 0x49b   :  { %v10630_v47 = vpop.f32.mrf.mxu1  ;;  %v11577_v34 = vld [vmem:[%s14752_s30 + $0x20] ss:$8 sps:$4 sm:$0xff]   ;;  %10704 = vmatpush3.bf16.msra.mxu0 %v11576_v62 }
 0x49c   :  { %v3724_v3 = vpop.f32.mrf.mxu0  ;;  %v11579_v47 = vld [vmem:[%s14752_s30 + $0x24] ss:$8 sps:$4 sm:$0xff]   ;;  %10705 = vmatprep.subr.bf16.mxu0 %v14749_v2 }
 0x49d   :  { %v3770_v36 = vpop.f32.mrf.mxu1  ;;  %4196 = vrot.lane.b32.xlu0 %v3724_v3, %s14732_s8  ;;  %4610 = vmatprep.subr.bf16.mxu1 %v11579_v47 }
 0x49e   :  { %4198 = vrot.lane.b32.xlu1 %v3770_v36, %s14732_s8  ;;  %v10635_v31 = vpop.f32.mrf.mxu0  ;;  %v11583_v36 = vld [vmem:[%s14752_s30 + $0x14] ss:$8 sps:$4 sm:$0xff]   ;;  %4611 = vmatpush1.bf16.msra.mxu1 %v11577_v34 }
 0x49f   :  { %v10641_v35 = vpop.f32.mrf.mxu1  ;;  %v11580_v31 = vld [vmem:[%s14751_s9] sm:$0xff]   ;;  %4612 = vmatprep.subr.bf16.mxu1 %v11583_v36  ;;  %s14759_s9 = smov 32  }
 0x4a0   :  { %v3727_v57 = vpop.f32.mrf.mxu0  ;;  %10706 = vmatpush3.bf16.msra.mxu0 %v11580_v31 }
 0x4a1   :  { %v3773_v58 = vpop.f32.mrf.mxu1  ;;  %v11581_v57 = vld [vmem:[%s14752_s30 + $0x10] ss:$8 sps:$4 sm:$0xff]   ;;  %10711 = vmatprep.subr.bf16.mxu0 %v14749_v2 }
 0x4a2   :  { %v10636_v49 = vpop.f32.mrf.mxu0  ;;  %v11586_v58 = vld [vmem:[%s14752_s30 + $0x4] ss:$8 sps:$4 sm:$0xff]   ;;  %4613 = vmatpush1.bf16.msra.mxu1 %v11581_v57 }
 0x4a3   :  { %v10642_v0 = vpop.f32.mrf.mxu1  ;;  %4614 = vmatprep.subr.bf16.mxu1 %v11586_v58 }
 0x4ba   :  { %v4161_v20 = vpop.permute.xlu0 %4160 }
 0x4c1   :  { %v3862_v1 = vpop.f32.mrf.mxu1 }
 0x4c2   :  { %4218 = vrot.lane.b32.xlu1 %v3862_v1, %s11984_s10  ;;  %v11584_v1 = vld [vmem:[%s14752_s30] ss:$8 sps:$4 sm:$0xff]  }
 0x4c3   :  { %v10653_v10 = vpop.f32.mrf.mxu1  ;;  %4615 = vmatpush1.bf16.msra.mxu1 %v11584_v1 }
 0x4c4   :  { %v80_v10 = vld [vmem:[%s14753_s5] sm:$0xff]   ;;  %10731 = vmatprep.subr.bf16.mxu1 %v14749_v2 }
 0x4c5   :  { %v3865_v14 = vpop.f32.mrf.mxu1 }
 0x4c6   :  { %4633 = vmatmul.mubr.bf16.vlgmr.msra.gmra.mxu1 %v80_v10 }
 0x4c7   :  { %v10654_v46 = vpop.f32.mrf.mxu1  ;;  %10733 = vmatprep.mubr.msk.bf16.mxu1 %vm11982_vm0, %v14749_v2 }
 0x4c8   :  { %v4153_v46 = vpop.permute.xlu1 %4152 }
 0x4c9   :  { %v3954_v37 = vpop.f32.mrf.mxu1 }
 0x4ca   :  { %4222 = vrot.lane.b32.xlu1 %v3954_v37, %s11984_s10 }
 0x4cb   :  { %v10665_v45 = vpop.f32.mrf.mxu1 }
 0x4cc   :  { %v4155_v48 = vpop.permute.xlu1 %4154 }
 0x4cd   :  { %v3957_v16 = vpop.f32.mrf.mxu1  ;;  %v3816_v21 = vpop.f32.mrf.mxu0 }
 0x4ce   :  { %4216 = vrot.lane.b32.xlu0 %v3816_v21, %s11984_s10  ;;  %v4165_v16 = vpop.permute.xlu0 %4164 }
 0x4cf   :  { %v10666_v17 = vpop.f32.mrf.mxu1  ;;  %v10647_v42 = vpop.f32.mrf.mxu0 }
 0x4d0   :  { %v4157_v22 = vpop.permute.xlu1 %4156 }
 0x4d1   :  { %v3819_v51 = vpop.f32.mrf.mxu0  ;;  %v4242_v4 = vsel %vm812_vm1, %v13056_v55, %v4157_v22  ;;  %v4241_v55 = vsel %vm812_vm1, %v13009_v24, %v4155_v48  ;;  %v14756_v22 = vld [vmem:[#allocation3_spill] sm:$0xff] }
 0x4d3   :  { %v4046_v27 = vpop.f32.mrf.mxu1  ;;  %v10648_v60 = vpop.f32.mrf.mxu0 }
 0x4d4   :  { %4226 = vrot.lane.b32.xlu1 %v4046_v27, %s11984_s10  ;;  %v4159_v37 = vpop.permute.xlu1 %4158 }
 0x4d5   :  { %v10677_v50 = vpop.f32.mrf.mxu1  ;;  %v3908_v29 = vpop.f32.mrf.mxu0  ;;  %v4243_v54 = vsel %vm812_vm1, %v13025_v6, %v4159_v37 }
 0x4d6   :  { %4220 = vrot.lane.b32.xlu0 %v3908_v29, %s11984_s10 }
 0x4d7   :  { %v4049_v33 = vpop.f32.mrf.mxu1  ;;  %v10659_v18 = vpop.f32.mrf.mxu0 }
 0x4d8   :  { %v4163_v45 = vpop.permute.xlu1 %4162  ;;  %v4240_v33 = vsel %vm812_vm1, %v13054_v56, %v4153_v46  ;;  %v4244_v18 = vsel %vm812_vm1, %v13059_v13, %v4161_v20 }
 0x4d9   :  { %v10678_v19 = vpop.f32.mrf.mxu1  ;;  %v3911_v15 = vpop.f32.mrf.mxu0  ;;  %v4245_v56 = vsel %vm812_vm1, %v13039_v28, %v4163_v45 }
 0x4db   :  { %v4138_v32 = vpop.f32.mrf.mxu1  ;;  %v10660_v5 = vpop.f32.mrf.mxu0 }
 0x4dc   :  { %4230 = vrot.lane.b32.xlu1 %v4138_v32, %s11984_s10  ;;  %v4167_v21 = vpop.permute.xlu1 %4166 }
 0x4dd   :  { %v10689_v7 = vpop.f32.mrf.mxu1  ;;  %v4000_v38 = vpop.f32.mrf.mxu0 }
 0x4de   :  { %4224 = vrot.lane.b32.xlu0 %v4000_v38, %s11984_s10 }
 0x4df   :  { %v4141_v63 = vpop.f32.mrf.mxu1  ;;  %v10671_v9 = vpop.f32.mrf.mxu0 }
 0x4e0   :  { %v4187_v17 = vpop.permute.xlu1 %4186  ;;  %v4246_v63 = vsel %vm812_vm1, %v13067_v12, %v4165_v16  ;;  %v4247_v9 = vsel %vm812_vm1, %v13051_v25, %v4167_v21 }
 0x4e1   :  { %v10690_v61 = vpop.f32.mrf.mxu1  ;;  %v4003_v3 = vpop.f32.mrf.mxu0  ;;  %v4250_v5 = vsel %vm4248_vm5, %v4241_v55, %v4187_v17 }
 0x4e3   :  { %v10672_v35 = vpop.f32.mrf.mxu0 }
 0x4e5   :  { %v4092_v49 = vpop.f32.mrf.mxu0 }
 0x4e6   :  { %4228 = vrot.lane.b32.xlu0 %v4092_v49, %s11984_s10 }
 0x4e7   :  { %v10683_v0 = vpop.f32.mrf.mxu0 }
 0x4e9   :  { %v4095_v14 = vpop.f32.mrf.mxu0 }
 0x4ea   :  { %v4466_v14 = vld [vmem:[%s14754_s25] sm:$0x3] }
 0x4eb   :  { %v10684_v30 = vpop.f32.mrf.mxu0  ;;  %v4507_v37 = vrot.slane %v4466_v14, %v14756_v22 }
 0x4ec   :  { %v14755_v30 = vld [vmem:[#allocation4_spill] sm:$0xff] }
 0x4ed   :  { %v4511_v46 = vrot.slane %v4466_v14, %v14755_v30 }
 0x4f7   :  { %v4185_v59 = vpop.permute.xlu0 %4184 }
 0x4f8   :  { %v4249_v41 = vsel %vm4248_vm5, %v4240_v33, %v4185_v59 }
 0x4ff   :  { %v4189_v26 = vpop.permute.xlu0 %4188 }
 0x500   :  { %v4191_v11 = vpop.permute.xlu1 %4190  ;;  %v4251_v44 = vsel %vm4248_vm5, %v4242_v4, %v4189_v26 }
 0x501   :  { %v4252_v15 = vsel %vm4248_vm5, %v4243_v54, %v4191_v11 }
 0x507   :  { %v4193_v42 = vpop.permute.xlu0 %4192 }
 0x508   :  { %v4195_v23 = vpop.permute.xlu1 %4194  ;;  %v4253_v8 = vsel %vm4248_vm5, %v4244_v18, %v4193_v42 }
 0x509   :  { %v4254_v7 = vsel %vm4248_vm5, %v4245_v56, %v4195_v23 }
 0x50f   :  { %v4197_v53 = vpop.permute.xlu0 %4196 }
 0x510   :  { %v4199_v52 = vpop.permute.xlu1 %4198  ;;  %v4255_v62 = vsel %vm4248_vm5, %v4246_v63, %v4197_v53 }
 0x511   :  { %v4256_v34 = vsel %vm4248_vm5, %v4247_v9, %v4199_v52 }
 0x534   :  { %v4219_v51 = vpop.permute.xlu1 %4218 }
 0x535   :  { %v4259_v28 = vsel %vm4257_vm6, %v4250_v5, %v4219_v51 }
 0x53c   :  { %v4223_v60 = vpop.permute.xlu1 %4222 }
 0x53d   :  { %v4261_v32 = vsel %vm4257_vm6, %v4252_v15, %v4223_v60 }
 0x540   :  { %v4217_v27 = vpop.permute.xlu0 %4216 }
 0x541   :  { %v4258_v6 = vsel %vm4257_vm6, %v4249_v41, %v4217_v27 }
 0x542   :  { %v4274_v47 = vcombine.low %v4258_v6, %v4259_v28 }
 0x544   :  { %v4282_v25 = vrot.slane %v4274_v47, %v12222_v39 }
 0x546   :  { %v4227_v29 = vpop.permute.xlu1 %4226 }
 0x547   :  { %v4263_v61 = vsel %vm4257_vm6, %v4254_v7, %v4227_v29 }
 0x548   :  { %v4221_v50 = vpop.permute.xlu0 %4220 }
 0x549   :  { %v4260_v19 = vsel %vm4257_vm6, %v4251_v44, %v4221_v50 }
 0x54a   :  { %v4275_v24 = vcombine.low %v4260_v19, %v4261_v32 }
 0x54c   :  { %v4289_v12 = vrot.slane %v4275_v24, %v12222_v39 }
 0x54e   :  { %v4231_v38 = vpop.permute.xlu1 %4230  ;;  %v4290_v0 = vcombine.low %v4282_v25, %v4289_v12 }
 0x54f   :  { %v4265_v31 = vsel %vm4257_vm6, %v4256_v34, %v4231_v38 }
 0x550   :  { %v4225_v43 = vpop.permute.xlu0 %4224 }
 0x551   :  { %v4262_v13 = vsel %vm4257_vm6, %v4253_v8, %v4225_v43 }
 0x552   :  { %v4291_v3 = vcombine.low %v4262_v13, %v4263_v61 }
 0x554   :  { %v4299_v58 = vrot.slane %v4291_v3, %v12222_v39 }
 0x558   :  { %v4229_v36 = vpop.permute.xlu0 %4228 }
 0x559   :  { %v4264_v35 = vsel %vm4257_vm6, %v4255_v62, %v4229_v36 }
 0x55a   :  { %v4292_v57 = vcombine.low %v4264_v35, %v4265_v31  ;;  %v9754_v31 = vld [vmem:[%s14757_s0] ss:$0 sm:$0xff] }
 0x55b   :  { %v11978_v35 = vld [vmem:[%s14744_s28] sm:$0xff]   ;;  %s14758_s28 = smov 64  }
 0x55c   :  { %v4306_v49 = vrot.slane %v4292_v57, %v12222_v39  ;;  %v4406_v12 = vunpack.c.l.bf16 %v11978_v35 }
 0x55e   :  { %v4307_v1 = vcombine.low %v4299_v58, %v4306_v49 }
 0x560   :  { %v4310_v10 = vpack.c.bf16 %v4307_v1, %v4290_v0  ;;  %v4407_v0 = vunpack.c.h.bf16 %v11978_v35 }
 0x562   :  { %10708 = vmatmul.mubr.bf16.vlgmr.msra.gmra.mxu0 %v4310_v10 }
 0x563   :  { %10727 = vmatprep.mubr.msk.bf16.mxu0 %vm11982_vm0, %v14749_v2 }
 0x586   :  { %v4634_v48 = vpop.f32.mrf.mxu1 }
 0x587   :  { %v4635_v16 = vadd.f32 %v4634_v48, %v4507_v37 }
 0x588   :  { %v4636_v20 = vpop.f32.mrf.mxu1 }
 0x589   :  { %v4637_v45 = vadd.f32 %v4636_v20, %v4511_v46  ;;  %v13267_v26 = vrot.slane %v4635_v16, %v12222_v39  ;;  %v4740_v44 = vcombine.high %v4635_v16, %v4635_v16 }
 0x58a   :  { %v4638_v27 = vpop.f32.mrf.mxu1 }
 0x58b   :  { %v13258_v21 = vrot.slane %v4637_v45, %v12222_v39  ;;  %v4888_v42 = vcombine.high %v4637_v45, %v4637_v45  ;;  %v4854_v53 = vpack.c.bf16 %v13267_v26, %v13267_v26  ;;  %v13281_v60 = vcombine.high %v13267_v26, %v13267_v26 }
 0x58c   :  { %v4640_v4 = vpop.f32.mrf.mxu1  ;;  %v4754_v18 = vrot.slane %v4740_v44, %v12222_v39  ;;  %v4639_v6 = vadd.f32 %v4638_v27, %v4507_v37 }
 0x58d   :  { %v5002_v17 = vpack.c.bf16 %v13258_v21, %v13258_v21  ;;  %v13264_v59 = vcombine.high %v13258_v21, %v13258_v21  ;;  %v13276_v52 = vrot.slane %v4888_v42, %v12222_v39  ;;  %v4855_v29 = vpack.c.bf16 %v13281_v60, %v13281_v60 }
 0x58e   :  { %v4641_v33 = vadd.f32 %v4640_v4, %v4511_v46  ;;  %v4856_v41 = vpack.c.bf16 %v4754_v18, %v4754_v18  ;;  %v4756_v32 = vcombine.high %v4754_v18, %v4754_v18  ;;  %v13317_v7 = vrot.slane %v4639_v6, %v12222_v39 }
 0x58f   :  { %v5186_v11 = vsel %vm812_vm1, %v5002_v17, 0  ;;  %v5003_v23 = vpack.c.bf16 %v13264_v59, %v13264_v59  ;;  %v5004_v50 = vpack.c.bf16 %v13276_v52, %v13276_v52  ;;  %v4904_v54 = vcombine.high %v13276_v52, %v13276_v52 }
 0x590   :  { %10732 = vmatpush3.bf16.xpose.msra.mxu1 %v5186_v11  ;;  %v13299_v19 = vrot.slane %v4641_v33, %v12222_v39  ;;  %v4905_v15 = vcombine.high %v4641_v33, %v4641_v33  ;;  %v4857_v24 = vpack.c.bf16 %v4756_v32, %v4756_v32  ;;  %v4757_v9 = vcombine.high %v4639_v6, %v4639_v6 }
 0x591   :  { %10737 = vmatprep.subr.bf16.mxu1 %v14749_v2  ;;  %v5232_v51 = vsel %vm812_vm1, %v5003_v23, 0  ;;  %v5278_v43 = vsel %vm812_vm1, %v5004_v50, 0  ;;  %v5005_v55 = vpack.c.bf16 %v4904_v54, %v4904_v54  ;;  %v4772_v28 = vcombine.high %v13317_v7, %v13317_v7 }
 0x592   :  { %v13305_v56 = vcombine.high %v13299_v19, %v13299_v19  ;;  %v13311_v13 = vrot.slane %v4905_v15, %v12222_v39  ;;  %v13333_v62 = vrot.slane %v4757_v9, %v12222_v39  ;;  %v13353_v48 = vpack.i.bf16 %v13264_v59, %v13258_v21 }
 0x593   :  { %v5324_v8 = vsel %vm812_vm1, %v5005_v55, 0  ;;  %v4859_v34 = vpack.c.bf16 %v4772_v28, %v4772_v28  ;;  %v13358_v37 = vpack.i.bf16 %v4904_v54, %v13276_v52  ;;  %v11357_v20 = vpack.i.bf16 %v4756_v32, %v4754_v18 }
 0x594   :  { %v5007_v5 = vpack.c.bf16 %v13305_v56, %v13305_v56  ;;  %v13322_v63 = vcombine.high %v13311_v13, %v13311_v13  ;;  %v4773_v3 = vcombine.high %v13333_v62, %v13333_v62  ;;  %v11367_v45 = vpack.i.bf16 %v4772_v28, %v13317_v7 }
 0x595   :  { %v11387_v21 = vpack.i.bf16 %v13281_v60, %v13267_v26 }
 0x596   :  { %v5416_v38 = vsel %vm812_vm1, %v5007_v5, 0  ;;  %v5009_v61 = vpack.c.bf16 %v13322_v63, %v13322_v63  ;;  %v4861_v36 = vpack.c.bf16 %v4773_v3, %v4773_v3  ;;  %v11377_v16 = vpack.i.bf16 %v4773_v3, %v13333_v62 }
 0x597   :  { %10734 = vmatmul.mubr.msk.bf16.vlgmr.msra.gmra.mxu1 %vm812_vm1, %v4854_v53 }
 0x598   :  { %10738 = vmatpush3.bf16.xpose.msra.mxu1 %v5232_v51  ;;  %10739 = vmatprep.mubr.msk.bf16.mxu1 %vm11982_vm0, %v14749_v2  ;;  %v5508_v47 = vsel %vm812_vm1, %v5009_v61, 0 }
 0x599   :  { %10743 = vmatprep.subr.bf16.mxu1 %v14749_v2 }
 0x59f   :  { %10740 = vmatmul.mubr.msk.bf16.vlgmr.msra.gmra.mxu1 %vm812_vm1, %v4855_v29 }
 0x5a0   :  { %10744 = vmatpush3.bf16.xpose.msra.mxu1 %v5278_v43  ;;  %10745 = vmatprep.mubr.msk.bf16.mxu1 %vm11982_vm0, %v14749_v2 }
 0x5a1   :  { %10749 = vmatprep.subr.bf16.mxu1 %v14749_v2 }
 0x5a7   :  { %10746 = vmatmul.mubr.msk.bf16.vlgmr.msra.gmra.mxu1 %vm812_vm1, %v4856_v41 }
 0x5a8   :  { %10750 = vmatpush3.bf16.xpose.msra.mxu1 %v5324_v8  ;;  %10751 = vmatprep.mubr.msk.bf16.mxu1 %vm11982_vm0, %v14749_v2  ;;  %v11588_v8 = vld [vmem:[%s14760_s2 + $0x38] sm:$0xff]  }
 0x5a9   :  { %10761 = vmatprep.subr.bf16.mxu1 %v14749_v2  ;;  %10712 = vmatpush3.bf16.msra.mxu0 %v11588_v8 }
 0x5aa   :  { %10713 = vmatprep.subr.bf16.mxu0 %v14749_v2 }
 0x5af   :  { %10752 = vmatmul.mubr.msk.bf16.vlgmr.msra.gmra.mxu1 %vm812_vm1, %v4857_v24 }
 0x5b0   :  { %10762 = vmatpush3.bf16.xpose.msra.mxu1 %v5416_v38  ;;  %10763 = vmatprep.mubr.msk.bf16.mxu1 %vm11982_vm0, %v14749_v2 }
 0x5b1   :  { %10773 = vmatprep.subr.bf16.mxu1 %v14749_v2 }
 0x5b7   :  { %10764 = vmatmul.mubr.msk.bf16.vlgmr.msra.gmra.mxu1 %vm812_vm1, %v4859_v34 }
 0x5b8   :  { %10774 = vmatpush3.bf16.xpose.msra.mxu1 %v5508_v47  ;;  %10775 = vmatprep.mubr.msk.bf16.mxu1 %vm11982_vm0, %v14749_v2 }
 0x5b9   :  { %10785 = vmatprep.subr.bf16.mxu1 %v14749_v2 }
 0x5bf   :  { %10776 = vmatmul.mubr.msk.bf16.vlgmr.msra.gmra.mxu1 %vm812_vm1, %v4861_v36 }
 0x5c0   :  { %10787 = vmatprep.mubr.msk.bf16.mxu1 %vm11982_vm0, %v14749_v2 }
 0x622   :  { %v4399_v57 = vpop.f32.mrf.mxu0 }
 0x623   :  { %v4400_v25 = vadd.f32 %v9754_v31, %v4399_v57  ;;  %v11589_v57 = vld [vmem:[%s14760_s2 + $0x30] sm:$0xff]  }
 0x624   :  { %v10709_v58 = vpop.f32.mrf.mxu0  ;;  %10714 = vmatpush3.bf16.msra.mxu0 %v11589_v57 }
 0x625   :  { %v4408_v49 = vadd.f32 %v4406_v12, %v4400_v25  ;;  %10715 = vmatprep.subr.bf16.mxu0 %v14749_v2  ;;  %v11590_v25 = vld [vmem:[%s14760_s2 + $0x28] sm:$0xff]   ;;  %v11362_v58 = vpack.i.bf16 %v13305_v56, %v13299_v19  ;;  %v11593_v56 = vld [vmem:[%s14760_s2 + $0x10] sm:$0xff]  }
 0x626   :  { %v4402_v1 = vpop.f32.mrf.mxu0 }
 0x627   :  { %v4403_v10 = vadd.f32 %v9754_v31, %v4402_v1  ;;  %4410 = vadd.xlane.f32.xlu0 %v4408_v49  ;;  %v11592_v1 = vld [vmem:[%s14760_s2 + $0x18] sm:$0xff]  }
 0x628   :  { %v10710_v14 = vpop.f32.mrf.mxu0  ;;  %10716 = vmatpush3.bf16.msra.mxu0 %v11590_v25 }
 0x629   :  { %v4409_v46 = vadd.f32 %v4407_v0, %v4403_v10  ;;  %10717 = vmatprep.subr.bf16.mxu0 %v14749_v2  ;;  %v11372_v0 = vpack.i.bf16 %v13322_v63, %v13311_v13  ;;  %v11594_v63 = vld [vmem:[%s14760_s2 + $0x8] sm:$0xff]   ;;  %v11595_v10 = vld [vmem:[%s14760_s2] sm:$0xff]  }
 0x62b   :  { %4412 = vadd.xlane.f32.xlu1 %v4409_v46 }
 0x63c   :  { %11343 = vrot.lane.b32.xlu1 %v13353_v48, %s11984_s10 }
 0x640   :  { %11353 = vrot.lane.b32.xlu1 %v13358_v37, %s11984_s10 }
 0x644   :  { %11358 = vrot.lane.b32.xlu1 %v11357_v20, %s11984_s10 }
 0x648   :  { %11368 = vrot.lane.b32.xlu1 %v11367_v45, %s11984_s10 }
 0x64c   :  { %11378 = vrot.lane.b32.xlu1 %v11377_v16, %s11984_s10 }
 0x650   :  { %11388 = vrot.lane.b32.xlu1 %v11387_v21, %s14758_s28 }
 0x654   :  { %11398 = vrot.lane.b32.xlu1 %v11357_v20, %s14758_s28 }
 0x657   :  { %v13377_v17 = vpop.f32.mrf.mxu1 }
 0x658   :  { %11408 = vrot.lane.b32.xlu1 %v11367_v45, %s14758_s28  ;;  %v6654_v14 = vsel %vm2285_vm2, %v13377_v17, -inf }
 0x659   :  { %v10735_v59 = vpop.f32.mrf.mxu1 }
 0x65b   :  { %v5225_v26 = vpop.f32.mrf.mxu1 }
 0x65c   :  { %11418 = vrot.lane.b32.xlu1 %v11377_v16, %s14758_s28 }
 0x65d   :  { %v10736_v11 = vpop.f32.mrf.mxu1 }
 0x65f   :  { %v13379_v42 = vpop.f32.mrf.mxu1 }
 0x660   :  { %11428 = vrot.lane.b32.xlu1 %v11387_v21, %s14759_s9  ;;  %v6657_v52 = vsel %vm2285_vm2, %v13379_v42, -inf }
 0x661   :  { %v10741_v23 = vpop.f32.mrf.mxu1 }
 0x663   :  { %v5271_v53 = vpop.f32.mrf.mxu1 }
 0x664   :  { %11438 = vrot.lane.b32.xlu1 %v11357_v20, %s14759_s9 }
 0x665   :  { %v10742_v51 = vpop.f32.mrf.mxu1 }
 0x667   :  { %v13383_v27 = vpop.f32.mrf.mxu1 }
 0x668   :  { %11448 = vrot.lane.b32.xlu1 %v11367_v45, %s14759_s9 }
 0x669   :  { %v10747_v60 = vpop.f32.mrf.mxu1 }
 0x66b   :  { %v5317_v50 = vpop.f32.mrf.mxu1 }
 0x66c   :  { %11458 = vrot.lane.b32.xlu1 %v11377_v16, %s14759_s9 }
 0x66d   :  { %v10748_v4 = vpop.f32.mrf.mxu1 }
 0x66f   :  { %v13385_v44 = vpop.f32.mrf.mxu1 }
 0x670   :  { %v6663_v20 = vsel %vm2285_vm2, %v13385_v44, -inf }
 0x671   :  { %v10753_v29 = vpop.f32.mrf.mxu1 }
 0x673   :  { %v5363_v43 = vpop.f32.mrf.mxu1 }
 0x675   :  { %v10754_v33 = vpop.f32.mrf.mxu1 }
 0x677   :  { %v13387_v54 = vpop.f32.mrf.mxu1 }
 0x679   :  { %v10765_v18 = vpop.f32.mrf.mxu1 }
 0x67b   :  { %v5455_v55 = vpop.f32.mrf.mxu1 }
 0x67d   :  { %v10766_v41 = vpop.f32.mrf.mxu1 }
 0x67f   :  { %v13389_v15 = vpop.f32.mrf.mxu1 }
 0x681   :  { %v10777_v32 = vpop.f32.mrf.mxu1 }
 0x683   :  { %v5547_v6 = vpop.f32.mrf.mxu1 }
 0x685   :  { %v10778_v5 = vpop.f32.mrf.mxu1 }
 0x686   :  { %v9763_v5 = vld [vmem:[%s14697_s6] ss:$0 sm:$0xff] }
 0x690   :  { %6658 = vmax.xlane.f32.xlu1 %v6657_v52 }
 0x6b0   :  { %v4411_v24 = vpop.xlane.xlu0 %4410 }
 0x6b1   :  { %v4415_v38 = vmul.f32 0.0078125, %v4411_v24 }
 0x6b3   :  { %v13395_v9 = vsub.f32 %v4408_v49, %v4415_v38  ;;  %v11591_v49 = vld [vmem:[%s14760_s2 + $0x20] sm:$0xff]  }
 0x6b4   :  { %v4413_v28 = vpop.xlane.xlu1 %4412  ;;  %10718 = vmatpush3.bf16.msra.mxu0 %v11591_v49 }
 0x6b5   :  { %v4416_v61 = vmul.f32 0.0078125, %v4413_v28  ;;  %v4419_v34 = vmul.f32 %v13395_v9, %v13395_v9  ;;  %10719 = vmatprep.subr.bf16.mxu0 %v14749_v2 }
 0x6b7   :  { %v13399_v47 = vsub.f32 %v4409_v46, %v4416_v61  ;;  %4421 = vadd.xlane.f32.xlu0 %v4419_v34  ;;  %v6660_v46 = vsel %vm2285_vm2, %v13383_v27, -inf }
 0x6b8   :  { %v13403_v36 = vpop.permute.xlu1 %11343  ;;  %10720 = vmatpush3.bf16.msra.mxu0 %v11592_v1 }
 0x6b9   :  { %v4420_v3 = vmul.f32 %v13399_v47, %v13399_v47  ;;  %v11346_v31 = vunpack.i.h.bf16 %v13403_v36  ;;  %10721 = vmatprep.subr.bf16.mxu0 %v14749_v2 }
 0x6bb   :  { %4423 = vadd.xlane.f32.xlu0 %v4420_v3  ;;  %v5011_v35 = vpack.c.bf16 %v11346_v31, %v11346_v31  ;;  %v9764_v31 = vld [vmem:[%s14698_s7] ss:$0 sm:$0xff] }
 0x6bc   :  { %10722 = vmatpush3.bf16.msra.mxu0 %v11593_v56  ;;  %v13465_v59 = vpop.permute.xlu1 %11353 }
 0x6bd   :  { %v5600_v12 = vsel %vm812_vm1, %v5011_v35, 0  ;;  %10723 = vmatprep.subr.bf16.mxu0 %v14749_v2  ;;  %v11356_v11 = vunpack.i.h.bf16 %v13465_v59 }
 0x6be   :  { %10786 = vmatpush3.bf16.xpose.msra.mxu1 %v5600_v12 }
 0x6bf   :  { %10797 = vmatprep.subr.bf16.mxu1 %v14749_v2  ;;  %v5013_v51 = vpack.c.bf16 %v11356_v11, %v11356_v11 }
 0x6c0   :  { %10724 = vmatpush3.bf16.msra.mxu0 %v11594_v63  ;;  %v13476_v33 = vpop.permute.xlu1 %11358 }
 0x6c1   :  { %10725 = vmatprep.subr.bf16.mxu0 %v14749_v2  ;;  %v5692_v43 = vsel %vm812_vm1, %v5013_v51, 0  ;;  %v11361_v18 = vunpack.i.h.bf16 %v13476_v33 }
 0x6c3   :  { %v4865_v32 = vpack.c.bf16 %v11361_v18, %v11361_v18 }
 0x6c4   :  { %10726 = vmatpush3.bf16.msra.mxu0 %v11595_v10  ;;  %v13491_v61 = vpop.permute.xlu1 %11368 }
 0x6c5   :  { %10755 = vmatprep.subr.bf16.mxu0 %v14749_v2  ;;  %v11371_v34 = vunpack.i.h.bf16 %v13491_v61 }
 0x6c7   :  { %v4867_v25 = vpack.c.bf16 %v11371_v34, %v11371_v34 }
 0x6c8   :  { %v13508_v63 = vpop.permute.xlu1 %11378 }
 0x6c9   :  { %v11381_v10 = vunpack.i.h.bf16 %v13508_v63 }
 0x6d1   :  { %11348 = vrot.lane.b32.xlu0 %v11387_v21, %s11984_s10 }
 0x6d5   :  { %11363 = vrot.lane.b32.xlu0 %v11362_v58, %s11984_s10 }
 0x6d9   :  { %11373 = vrot.lane.b32.xlu0 %v11372_v0, %s11984_s10 }
 0x6dd   :  { %11383 = vrot.lane.b32.xlu0 %v13353_v48, %s14758_s28 }
 0x6e1   :  { %11393 = vrot.lane.b32.xlu0 %v13358_v37, %s14758_s28 }
 0x6e5   :  { %11403 = vrot.lane.b32.xlu0 %v11362_v58, %s14758_s28 }
 0x6e9   :  { %11413 = vrot.lane.b32.xlu0 %v11372_v0, %s14758_s28 }
 0x6ed   :  { %11423 = vrot.lane.b32.xlu0 %v13353_v48, %s14759_s9  ;;  %v6669_v48 = vsel %vm2285_vm2, %v13387_v54, -inf }
 0x6f1   :  { %11433 = vrot.lane.b32.xlu0 %v13358_v37, %s14759_s9  ;;  %v6675_v37 = vsel %vm2285_vm2, %v13389_v15, -inf }
 0x6f5   :  { %11443 = vrot.lane.b32.xlu0 %v11362_v58, %s14759_s9 }
 0x6f9   :  { %11453 = vrot.lane.b32.xlu0 %v11372_v0, %s14759_s9  ;;  %v5006_v0 = vpack.c.bf16 %v13299_v19, %v13299_v19 }
 0x718   :  { %6655 = vmax.xlane.f32.xlu0 %v6654_v14  ;;  %v5370_v14 = vsel %vm812_vm1, %v5006_v0, 0 }
 0x71c   :  { %6661 = vmax.xlane.f32.xlu0 %v6660_v46 }
 0x720   :  { %6664 = vmax.xlane.f32.xlu0 %v6663_v20  ;;  %v4869_v20 = vpack.c.bf16 %v11381_v10, %v11381_v10 }
 0x724   :  { %6670 = vmax.xlane.f32.xlu0 %v6669_v48  ;;  %v5008_v48 = vpack.c.bf16 %v13311_v13, %v13311_v13 }
 0x726   :  { %v5462_v13 = vsel %vm812_vm1, %v5008_v48, 0 }
 0x728   :  { %6676 = vmax.xlane.f32.xlu0 %v6675_v37  ;;  %v4858_v37 = vpack.c.bf16 %v13317_v7, %v13317_v7 }
 0x740   :  { %v4422_v45 = vpop.xlane.xlu0 %4421 }
 0x741   :  { %v4425_v16 = vmul.f32 0.0078125, %v4422_v45 }
 0x743   :  { %v4427_v21 = vadd.f32 1e-05, %v4425_v16 }
 0x744   :  { %v4424_v26 = vpop.xlane.xlu0 %4423 }
 0x745   :  { %11822 = vrsqrt.f32 %v4427_v21  ;;  %v4426_v23 = vmul.f32 0.0078125, %v4424_v26  ;;  %v13527_v21 = vpop.permute.xlu1 %11388  ;;  %v11345_v26 = vunpack.i.l.bf16 %v13403_v36  ;;  %v4860_v36 = vpack.c.bf16 %v13333_v62, %v13333_v62 }
 0x746   :  { %v11391_v11 = vunpack.i.h.bf16 %v13527_v21 }
 0x747   :  { %v4428_v53 = vadd.f32 1e-05, %v4426_v23 }
 0x748   :  { %v13468_v52 = vpop.permute.xlu0 %11348  ;;  %v4871_v51 = vpack.c.bf16 %v11391_v11, %v11391_v11  ;;  %v11380_v11 = vunpack.i.l.bf16 %v13508_v63 }
 0x749   :  { %11824 = vrsqrt.f32 %v4428_v53  ;;  %v11351_v60 = vunpack.i.h.bf16 %v13468_v52  ;;  %v5010_v53 = vpack.c.bf16 %v11345_v26, %v11345_v26 }
 0x74b   :  { %v4863_v50 = vpack.c.bf16 %v11351_v60, %v11351_v60  ;;  %v5554_v62 = vsel %vm812_vm1, %v5010_v53, 0 }
 0x74c   :  { %v13471_v4 = vpop.permute.xlu0 %11363 }
 0x74d   :  { %v11366_v29 = vunpack.i.h.bf16 %v13471_v4  ;;  %10788 = vmatmul.mubr.msk.bf16.vlgmr.msra.gmra.mxu1 %vm812_vm1, %v4863_v50  ;;  %v11365_v34 = vunpack.i.l.bf16 %v13471_v4 }
 0x74e   :  { %10798 = vmatpush3.bf16.xpose.msra.mxu1 %v5692_v43  ;;  %10799 = vmatprep.mubr.msk.bf16.mxu1 %vm11982_vm0, %v14749_v2  ;;  %v11355_v43 = vunpack.i.l.bf16 %v13465_v59 }
 0x74f   :  { %10809 = vmatprep.subr.bf16.mxu1 %v14749_v2  ;;  %v5015_v55 = vpack.c.bf16 %v11366_v29, %v11366_v29  ;;  %v13546_v29 = vpop.permute.xlu1 %11398 }
 0x750   :  { %v13482_v8 = vpop.permute.xlu0 %11373  ;;  %v11401_v18 = vunpack.i.h.bf16 %v13546_v29  ;;  %v5012_v59 = vpack.c.bf16 %v11355_v43, %v11355_v43 }
 0x751   :  { %v11376_v24 = vunpack.i.h.bf16 %v13482_v8  ;;  %v5784_v38 = vsel %vm812_vm1, %v5015_v55, 0  ;;  %v11350_v55 = vunpack.i.l.bf16 %v13468_v52 }
 0x752   :  { %v11823_v41 = vpop.eup %11822 }
 0x753   :  { %v4431_v6 = vmul.f32 %v11823_v41, %v13395_v9  ;;  %v5017_v35 = vpack.c.bf16 %v11376_v24, %v11376_v24 }
 0x754   :  { %v13501_v57 = vpop.permute.xlu0 %11383 }
 0x755   :  { %10800 = vmatmul.mubr.msk.bf16.vlgmr.msra.gmra.mxu1 %vm812_vm1, %v4865_v32  ;;  %v4439_v3 = vmul.f32 %v9763_v5, %v4431_v6  ;;  %v11386_v1 = vunpack.i.h.bf16 %v13501_v57  ;;  %v4873_v6 = vpack.c.bf16 %v11401_v18, %v11401_v18 }
 0x756   :  { %v11825_v28 = vpop.eup %11824  ;;  %10810 = vmatpush3.bf16.xpose.msra.mxu1 %v5784_v38  ;;  %10811 = vmatprep.mubr.msk.bf16.mxu1 %vm11982_vm0, %v14749_v2 }
 0x757   :  { %v4432_v9 = vmul.f32 %v11825_v28, %v13399_v47  ;;  %10821 = vmatprep.subr.bf16.mxu1 %v14749_v2  ;;  %v4447_v58 = vadd.f32 %v9764_v31, %v4439_v3  ;;  %v5876_v47 = vsel %vm812_vm1, %v5017_v35, 0  ;;  %v5019_v19 = vpack.c.bf16 %v11386_v1, %v11386_v1  ;;  %v13564_v28 = vpop.permute.xlu1 %11408 }
 0x758   :  { %v13518_v46 = vpop.permute.xlu0 %11393  ;;  %v11411_v52 = vunpack.i.h.bf16 %v13564_v28  ;;  %v11360_v3 = vunpack.i.l.bf16 %v13476_v33  ;;  %v11375_v1 = vunpack.i.l.bf16 %v13482_v8 }
 0x759   :  { %v4440_v12 = vmul.f32 %v9763_v5, %v4432_v9  ;;  %v11396_v45 = vunpack.i.h.bf16 %v13518_v46  ;;  %v5968_v16 = vsel %vm812_vm1, %v5019_v19, 0  ;;  %v4862_v5 = vpack.c.bf16 %v11350_v55, %v11350_v55 }
 0x75a   :  { %v5646_v9 = vsel %vm812_vm1, %v5012_v59, 0  ;;  %v4864_v4 = vpack.c.bf16 %v11360_v3, %v11360_v3  ;;  %v11395_v43 = vunpack.i.l.bf16 %v13518_v46 }
 0x75b   :  { %v4448_v49 = vadd.f32 %v9764_v31, %v4440_v12  ;;  %v5021_v7 = vpack.c.bf16 %v11396_v45, %v11396_v45  ;;  %v4875_v12 = vpack.c.bf16 %v11411_v52, %v11411_v52  ;;  %v13582_v0 = vpop.permute.xlu1 %11418 }
 0x75c   :  { %v13539_v23 = vpop.permute.xlu0 %11403  ;;  %v11421_v33 = vunpack.i.h.bf16 %v13582_v0 }
 0x75d   :  { %10812 = vmatmul.mubr.msk.bf16.vlgmr.msra.gmra.mxu1 %vm812_vm1, %v4867_v25  ;;  %v4449_v56 = vpack.c.bf16 %v4448_v49, %v4447_v58  ;;  %v11406_v60 = vunpack.i.h.bf16 %v13539_v23  ;;  %v6060_v50 = vsel %vm812_vm1, %v5021_v7, 0  ;;  %v5014_v25 = vpack.c.bf16 %v11365_v34, %v11365_v34 }
 0x75e   :  { %10822 = vmatpush3.bf16.xpose.msra.mxu1 %v5876_v47  ;;  %10823 = vmatprep.mubr.msk.bf16.mxu1 %vm11982_vm0, %v14749_v2  ;;  %v4877_v19 = vpack.c.bf16 %v11421_v33, %v11421_v33  ;;  %v11405_v52 = vunpack.i.l.bf16 %v13539_v23  ;;  %v11410_v33 = vunpack.i.l.bf16 %v13564_v28 }
 0x75f   :  { %10728 = vmatmul.mubr.bf16.vlgmr.msra.gmra.mxu0 %v4449_v56  ;;  %10833 = vmatprep.subr.bf16.mxu1 %v14749_v2  ;;  %v5023_v41 = vpack.c.bf16 %v11406_v60, %v11406_v60  ;;  %v5738_v47 = vsel %vm812_vm1, %v5014_v25, 0  ;;  %v11370_v56 = vunpack.i.l.bf16 %v13491_v61  ;;  %v13600_v45 = vpop.permute.xlu1 %11428 }
 0x760   :  { %10756 = vmatpush3.bf16.xpose.msra.mxu0 %v5370_v14  ;;  %10757 = vmatprep.mubr.msk.bf16.mxu0 %vm11982_vm0, %v14749_v2  ;;  %v13559_v32 = vpop.permute.xlu0 %11413  ;;  %v11431_v61 = vunpack.i.h.bf16 %v13600_v45 }
 0x761   :  { %10767 = vmatprep.subr.bf16.mxu0 %v14749_v2  ;;  %v11416_v24 = vunpack.i.h.bf16 %v13559_v32  ;;  %v6152_v38 = vsel %vm812_vm1, %v5023_v41, 0  ;;  %v4866_v8 = vpack.c.bf16 %v11370_v56, %v11370_v56 }
 0x762   :  { %v4879_v53 = vpack.c.bf16 %v11431_v61, %v11431_v61 }
 0x763   :  { %v5025_v31 = vpack.c.bf16 %v11416_v24, %v11416_v24 }
 0x764   :  { %v13577_v35 = vpop.permute.xlu0 %11423 }
 0x765   :  { %10824 = vmatmul.mubr.msk.bf16.vlgmr.msra.gmra.mxu1 %vm812_vm1, %v4869_v20  ;;  %v11426_v58 = vunpack.i.h.bf16 %v13577_v35  ;;  %v6244_v49 = vsel %vm812_vm1, %v5025_v31, 0  ;;  %v5016_v20 = vpack.c.bf16 %v11375_v1, %v11375_v1  ;;  %v11425_v28 = vunpack.i.l.bf16 %v13577_v35 }
 0x766   :  { %10834 = vmatpush3.bf16.xpose.msra.mxu1 %v5968_v16  ;;  %10835 = vmatprep.mubr.msk.bf16.mxu1 %vm11982_vm0, %v14749_v2  ;;  %v11385_v16 = vunpack.i.l.bf16 %v13501_v57  ;;  %v4868_v57 = vpack.c.bf16 %v11380_v11, %v11380_v11 }
 0x767   :  { %10758 = vmatmul.mubr.msk.bf16.vlgmr.msra.gmra.mxu0 %vm812_vm1, %v4858_v37  ;;  %10845 = vmatprep.subr.bf16.mxu1 %v14749_v2  ;;  %v5027_v10 = vpack.c.bf16 %v11426_v58, %v11426_v58  ;;  %v5830_v26 = vsel %vm812_vm1, %v5016_v20, 0 }
 0x768   :  { %10768 = vmatpush3.bf16.xpose.msra.mxu0 %v5462_v13  ;;  %10769 = vmatprep.mubr.msk.bf16.mxu0 %vm11982_vm0, %v14749_v2  ;;  %v13595_v14 = vpop.permute.xlu0 %11433 }
 0x769   :  { %10779 = vmatprep.subr.bf16.mxu0 %v14749_v2  ;;  %v11436_v48 = vunpack.i.h.bf16 %v13595_v14  ;;  %v6336_v37 = vsel %vm812_vm1, %v5027_v10, 0 }
 0x76b   :  { %v5029_v13 = vpack.c.bf16 %v11436_v48, %v11436_v48 }
 0x76c   :  { %v13613_v7 = vpop.permute.xlu0 %11443 }
 0x76d   :  { %10836 = vmatmul.mubr.msk.bf16.vlgmr.msra.gmra.mxu1 %vm812_vm1, %v4871_v51  ;;  %v5018_v51 = vpack.c.bf16 %v11385_v16, %v11385_v16  ;;  %v6428_v60 = vsel %vm812_vm1, %v5029_v13, 0  ;;  %v11435_v16 = vunpack.i.l.bf16 %v13595_v14 }
 0x76e   :  { %10846 = vmatpush3.bf16.xpose.msra.mxu1 %v6060_v50  ;;  %10847 = vmatprep.mubr.msk.bf16.mxu1 %vm11982_vm0, %v14749_v2  ;;  %v13618_v50 = vpop.permute.xlu1 %11438 }
 0x76f   :  { %10770 = vmatmul.mubr.msk.bf16.vlgmr.msra.gmra.mxu0 %vm812_vm1, %v4860_v36  ;;  %10857 = vmatprep.subr.bf16.mxu1 %v14749_v2  ;;  %v11446_v36 = vunpack.i.h.bf16 %v13613_v7  ;;  %v11441_v63 = vunpack.i.h.bf16 %v13618_v50  ;;  %v5922_v18 = vsel %vm812_vm1, %v5018_v51, 0  ;;  %v5028_v11 = vpack.c.bf16 %v11435_v16, %v11435_v16 }
 0x770   :  { %10780 = vmatpush3.bf16.xpose.msra.mxu0 %v5554_v62  ;;  %10781 = vmatprep.mubr.msk.bf16.mxu0 %vm11982_vm0, %v14749_v2  ;;  %v11390_v62 = vunpack.i.l.bf16 %v13527_v21  ;;  %v13631_v41 = vpop.permute.xlu0 %11453  ;;  %v11445_v51 = vunpack.i.l.bf16 %v13613_v7 }
 0x771   :  { %10791 = vmatprep.subr.bf16.mxu0 %v14749_v2  ;;  %v5031_v55 = vpack.c.bf16 %v11446_v36, %v11446_v36  ;;  %v4881_v59 = vpack.c.bf16 %v11441_v63, %v11441_v63  ;;  %v11440_v36 = vunpack.i.l.bf16 %v13618_v50  ;;  %v11455_v7 = vunpack.i.l.bf16 %v13631_v41 }
 0x772   :  { %v4870_v46 = vpack.c.bf16 %v11390_v62, %v11390_v62 }
 0x773   :  { %v6520_v24 = vsel %vm812_vm1, %v5031_v55, 0  ;;  %v4880_v63 = vpack.c.bf16 %v11440_v36, %v11440_v36  ;;  %v5032_v50 = vpack.c.bf16 %v11455_v7, %v11455_v7 }
 0x775   :  { %10848 = vmatmul.mubr.msk.bf16.vlgmr.msra.gmra.mxu1 %vm812_vm1, %v4873_v6  ;;  %v5020_v6 = vpack.c.bf16 %v11395_v43, %v11395_v43  ;;  %v6566_v55 = vsel %vm812_vm1, %v5032_v50, 0 }
 0x776   :  { %10858 = vmatpush3.bf16.xpose.msra.mxu1 %v6152_v38  ;;  %10859 = vmatprep.mubr.msk.bf16.mxu1 %vm11982_vm0, %v14749_v2  ;;  %v13636_v38 = vpop.permute.xlu1 %11448 }
 0x777   :  { %10782 = vmatmul.mubr.msk.bf16.vlgmr.msra.gmra.mxu0 %vm812_vm1, %v4862_v5  ;;  %10869 = vmatprep.subr.bf16.mxu1 %v14749_v2  ;;  %v11456_v5 = vunpack.i.h.bf16 %v13631_v41  ;;  %v11451_v21 = vunpack.i.h.bf16 %v13636_v38  ;;  %v6014_v34 = vsel %vm812_vm1, %v5020_v6, 0 }
 0x778   :  { %10792 = vmatpush3.bf16.xpose.msra.mxu0 %v5646_v9  ;;  %10793 = vmatprep.mubr.msk.bf16.mxu0 %vm11982_vm0, %v14749_v2  ;;  %v11400_v9 = vunpack.i.l.bf16 %v13546_v29  ;;  %v11415_v29 = vunpack.i.l.bf16 %v13559_v32 }
 0x779   :  { %10803 = vmatprep.subr.bf16.mxu0 %v14749_v2  ;;  %v5033_v3 = vpack.c.bf16 %v11456_v5, %v11456_v5  ;;  %v4883_v31 = vpack.c.bf16 %v11451_v21, %v11451_v21 }
 0x77a   :  { %v13649_v25 = vpop.permute.xlu1 %11458  ;;  %v4872_v23 = vpack.c.bf16 %v11400_v9, %v11400_v9  ;;  %v5024_v10 = vpack.c.bf16 %v11415_v29, %v11415_v29 }
 0x77b   :  { %v11461_v58 = vunpack.i.h.bf16 %v13649_v25  ;;  %v11460_v41 = vunpack.i.l.bf16 %v13649_v25 }
 0x77c   :  { %v6198_v48 = vsel %vm812_vm1, %v5024_v10, 0 }
 0x77d   :  { %10860 = vmatmul.mubr.msk.bf16.vlgmr.msra.gmra.mxu1 %vm812_vm1, %v4875_v12  ;;  %v5022_v12 = vpack.c.bf16 %v11405_v52, %v11405_v52  ;;  %v4885_v56 = vpack.c.bf16 %v11461_v58, %v11461_v58 }
 0x77e   :  { %10870 = vmatpush3.bf16.xpose.msra.mxu1 %v6244_v49  ;;  %10871 = vmatprep.mubr.msk.bf16.mxu1 %vm11982_vm0, %v14749_v2 }
 0x77f   :  { %10794 = vmatmul.mubr.msk.bf16.vlgmr.msra.gmra.mxu0 %vm812_vm1, %v4864_v4  ;;  %10881 = vmatprep.subr.bf16.mxu1 %v14749_v2  ;;  %v6612_v4 = vsel %vm812_vm1, %v5033_v3, 0  ;;  %v6106_v49 = vsel %vm812_vm1, %v5022_v12, 0  ;;  %v9782_v12 = vld [vmem:[%s14699_s11] ss:$0 sm:$0xff] }
 0x780   :  { %10804 = vmatpush3.bf16.xpose.msra.mxu0 %v5738_v47  ;;  %10805 = vmatprep.mubr.msk.bf16.mxu0 %vm11982_vm0, %v14749_v2 }
 0x781   :  { %10815 = vmatprep.subr.bf16.mxu0 %v14749_v2 }
 0x785   :  { %10872 = vmatmul.mubr.msk.bf16.vlgmr.msra.gmra.mxu1 %vm812_vm1, %v4877_v19  ;;  %v4874_v19 = vpack.c.bf16 %v11410_v33, %v11410_v33 }
 0x786   :  { %10882 = vmatpush3.bf16.xpose.msra.mxu1 %v6336_v37  ;;  %10883 = vmatprep.mubr.msk.bf16.mxu1 %vm11982_vm0, %v14749_v2  ;;  %v11420_v37 = vunpack.i.l.bf16 %v13582_v0 }
 0x787   :  { %10806 = vmatmul.mubr.msk.bf16.vlgmr.msra.gmra.mxu0 %vm812_vm1, %v4866_v8  ;;  %10893 = vmatprep.subr.bf16.mxu1 %v14749_v2 }
 0x788   :  { %10816 = vmatpush3.bf16.xpose.msra.mxu0 %v5830_v26  ;;  %10817 = vmatprep.mubr.msk.bf16.mxu0 %vm11982_vm0, %v14749_v2  ;;  %v4876_v61 = vpack.c.bf16 %v11420_v37, %v11420_v37  ;;  %v11430_v26 = vunpack.i.l.bf16 %v13600_v45 }
 0x789   :  { %10827 = vmatprep.subr.bf16.mxu0 %v14749_v2 }
 0x78d   :  { %10884 = vmatmul.mubr.msk.bf16.vlgmr.msra.gmra.mxu1 %vm812_vm1, %v4879_v53  ;;  %v4878_v53 = vpack.c.bf16 %v11430_v26, %v11430_v26 }
 0x78e   :  { %10894 = vmatpush3.bf16.xpose.msra.mxu1 %v6428_v60  ;;  %10895 = vmatprep.mubr.msk.bf16.mxu1 %vm11982_vm0, %v14749_v2  ;;  %v5030_v60 = vpack.c.bf16 %v11445_v51, %v11445_v51 }
 0x78f   :  { %10818 = vmatmul.mubr.msk.bf16.vlgmr.msra.gmra.mxu0 %vm812_vm1, %v4868_v57  ;;  %10905 = vmatprep.subr.bf16.mxu1 %v14749_v2  ;;  %v6382_v57 = vsel %vm812_vm1, %v5028_v11, 0 }
 0x790   :  { %10828 = vmatpush3.bf16.xpose.msra.mxu0 %v5922_v18  ;;  %10829 = vmatprep.mubr.msk.bf16.mxu0 %vm11982_vm0, %v14749_v2  ;;  %v6474_v43 = vsel %vm812_vm1, %v5030_v60, 0  ;;  %v11450_v18 = vunpack.i.l.bf16 %v13636_v38 }
 0x791   :  { %10839 = vmatprep.subr.bf16.mxu0 %v14749_v2 }
 0x792   :  { %v4882_v62 = vpack.c.bf16 %v11450_v18, %v11450_v18 }
 0x795   :  { %10896 = vmatmul.mubr.msk.bf16.vlgmr.msra.gmra.mxu1 %vm812_vm1, %v4881_v59  ;;  %v4884_v59 = vpack.c.bf16 %v11460_v41, %v11460_v41 }
 0x796   :  { %10906 = vmatpush3.bf16.xpose.msra.mxu1 %v6520_v24  ;;  %10907 = vmatprep.mubr.msk.bf16.mxu1 %vm11982_vm0, %v14749_v2 }
 0x797   :  { %10830 = vmatmul.mubr.msk.bf16.vlgmr.msra.gmra.mxu0 %vm812_vm1, %v4870_v46  ;;  %10917 = vmatprep.subr.bf16.mxu1 %v14749_v2 }
 0x798   :  { %10840 = vmatpush3.bf16.xpose.msra.mxu0 %v6014_v34  ;;  %10841 = vmatprep.mubr.msk.bf16.mxu0 %vm11982_vm0, %v14749_v2 }
 0x799   :  { %10851 = vmatprep.subr.bf16.mxu0 %v14749_v2 }
 0x79d   :  { %10908 = vmatmul.mubr.msk.bf16.vlgmr.msra.gmra.mxu1 %vm812_vm1, %v4883_v31 }
 0x79e   :  { %10918 = vmatpush3.bf16.xpose.msra.mxu1 %v6612_v4  ;;  %10919 = vmatprep.mubr.msk.bf16.mxu1 %vm11982_vm0, %v14749_v2 }
 0x79f   :  { %10842 = vmatmul.mubr.msk.bf16.vlgmr.msra.gmra.mxu0 %vm812_vm1, %v4872_v23  ;;  %10929 = vmatprep.subr.bf16.mxu1 %v14749_v2 }
 0x7a0   :  { %10852 = vmatpush3.bf16.xpose.msra.mxu0 %v6106_v49  ;;  %10853 = vmatprep.mubr.msk.bf16.mxu0 %vm11982_vm0, %v14749_v2 }
 0x7a1   :  { %v6656_v1 = vpop.xlane.xlu0 %6655  ;;  %10863 = vmatprep.subr.bf16.mxu0 %v14749_v2 }
 0x7a2   :  { %v6750_v47 = vsub.f32 %v13377_v17, %v6656_v1 }
 0x7a4   :  { %v6782_v32 = vmul.f32 1.442695, %v6750_v47 }
 0x7a5   :  { %v6662_v20 = vpop.xlane.xlu0 %6661  ;;  %10920 = vmatmul.mubr.msk.bf16.vlgmr.msra.gmra.mxu1 %vm812_vm1, %v4885_v56 }
 0x7a6   :  { %11826 = vpow2.f32 %v6782_v32  ;;  %v6752_v8 = vsub.f32 %v13383_v27, %v6662_v20  ;;  %10931 = vmatprep.mubr.msk.bf16.mxu1 %vm11982_vm0, %v14749_v2  ;;  %v5026_v27 = vpack.c.bf16 %v11425_v28, %v11425_v28 }
 0x7a7   :  { %10854 = vmatmul.mubr.msk.bf16.vlgmr.msra.gmra.mxu0 %vm812_vm1, %v4874_v19 }
 0x7a8   :  { %v6786_v17 = vmul.f32 1.442695, %v6752_v8  ;;  %10864 = vmatpush3.bf16.xpose.msra.mxu0 %v6198_v48  ;;  %10865 = vmatprep.mubr.msk.bf16.mxu0 %vm11982_vm0, %v14749_v2  ;;  %v6290_v35 = vsel %vm812_vm1, %v5026_v27, 0 }
 0x7a9   :  { %10875 = vmatprep.subr.bf16.mxu0 %v14749_v2 }
 0x7aa   :  { %11828 = vpow2.f32 %v6786_v17 }
 0x7af   :  { %10866 = vmatmul.mubr.msk.bf16.vlgmr.msra.gmra.mxu0 %vm812_vm1, %v4876_v61 }
 0x7b0   :  { %10876 = vmatpush3.bf16.xpose.msra.mxu0 %v6290_v35  ;;  %10877 = vmatprep.mubr.msk.bf16.mxu0 %vm11982_vm0, %v14749_v2 }
 0x7b1   :  { %10887 = vmatprep.subr.bf16.mxu0 %v14749_v2 }
 0x7b3   :  { %v13683_v0 = vpop.eup %11826 }
 0x7b4   :  { %v6846_v13 = vsel %vm2285_vm2, %v13683_v0, 0.0 }
 0x7b5   :  { %6847 = vadd.xlane.f32.xlu1 %v6846_v13 }
 0x7b7   :  { %v13687_v14 = vpop.eup %11828  ;;  %10878 = vmatmul.mubr.msk.bf16.vlgmr.msra.gmra.mxu0 %vm812_vm1, %v4878_v53 }
 0x7b8   :  { %10888 = vmatpush3.bf16.xpose.msra.mxu0 %v6382_v57  ;;  %v6852_v45 = vsel %vm2285_vm2, %v13687_v14, 0.0  ;;  %10889 = vmatprep.mubr.msk.bf16.mxu0 %vm11982_vm0, %v14749_v2 }
 0x7b9   :  { %6853 = vadd.xlane.f32.xlu1 %v6852_v45  ;;  %10899 = vmatprep.subr.bf16.mxu0 %v14749_v2 }
 0x7bf   :  { %10890 = vmatmul.mubr.msk.bf16.vlgmr.msra.gmra.mxu0 %vm812_vm1, %v4880_v63 }
 0x7c0   :  { %10900 = vmatpush3.bf16.xpose.msra.mxu0 %v6474_v43  ;;  %10901 = vmatprep.mubr.msk.bf16.mxu0 %vm11982_vm0, %v14749_v2 }
 0x7c1   :  { %10911 = vmatprep.subr.bf16.mxu0 %v14749_v2 }
 0x7c7   :  { %10902 = vmatmul.mubr.msk.bf16.vlgmr.msra.gmra.mxu0 %vm812_vm1, %v4882_v62  ;;  %v6659_v62 = vpop.xlane.xlu1 %6658 }
 0x7c8   :  { %10912 = vmatpush3.bf16.xpose.msra.mxu0 %v6566_v55  ;;  %10913 = vmatprep.mubr.msk.bf16.mxu0 %vm11982_vm0, %v14749_v2 }
 0x7c9   :  { %10923 = vmatprep.subr.bf16.mxu0 %v14749_v2 }
 0x7cf   :  { %10914 = vmatmul.mubr.msk.bf16.vlgmr.msra.gmra.mxu0 %vm812_vm1, %v4884_v59 }
 0x7d0   :  { %10925 = vmatprep.mubr.msk.bf16.mxu0 %vm11982_vm0, %v14749_v2 }
 0x80d   :  { %v13714_v6 = vpop.f32.mrf.mxu1 }
 0x80e   :  { %v6681_v46 = vsel %vm2285_vm2, %v13714_v6, -inf }
 0x80f   :  { %6682 = vmax.xlane.f32.xlu0 %v6681_v46  ;;  %v10789_v5 = vpop.f32.mrf.mxu1 }
 0x811   :  { %v5639_v24 = vpop.f32.mrf.mxu1 }
 0x813   :  { %v10790_v38 = vpop.f32.mrf.mxu1 }
 0x814   :  { %v6751_v38 = vsub.f32 %v13379_v42, %v6659_v62 }
 0x815   :  { %v13718_v21 = vpop.f32.mrf.mxu1 }
 0x816   :  { %v6687_v52 = vsel %vm2285_vm2, %v13718_v21, -inf }
 0x817   :  { %6688 = vmax.xlane.f32.xlu0 %v6687_v52  ;;  %v10801_v34 = vpop.f32.mrf.mxu1 }
 0x819   :  { %v5731_v9 = vpop.f32.mrf.mxu1 }
 0x81b   :  { %v10802_v3 = vpop.f32.mrf.mxu1 }
 0x81d   :  { %v13722_v31 = vpop.f32.mrf.mxu1 }
 0x81e   :  { %v6693_v25 = vsel %vm2285_vm2, %v13722_v31, -inf }
 0x81f   :  { %v4731_v23 = vpop.f32.mrf.mxu0  ;;  %6694 = vmax.xlane.f32.xlu0 %v6693_v25  ;;  %v10813_v4 = vpop.f32.mrf.mxu1 }
 0x820   :  { %v4732_v58 = vadd.f32 %v9782_v12, %v4731_v23  ;;  %v6665_v25 = vpop.xlane.xlu0 %6664 }
 0x821   :  { %v10729_v29 = vpop.f32.mrf.mxu0  ;;  %v5823_v49 = vpop.f32.mrf.mxu1 }
 0x822   :  { %v5036_v33 = vcombine.high %v4732_v58, %v4732_v58  ;;  %v5043_v1 = vrot.slane %v4732_v58, %v12222_v39 }
 0x823   :  { %v4734_v47 = vpop.f32.mrf.mxu0  ;;  %v10814_v56 = vpop.f32.mrf.mxu1 }
 0x824   :  { %v13731_v10 = vrot.slane %v5036_v33, %v12222_v39  ;;  %v4735_v32 = vadd.f32 %v9782_v12, %v4734_v47  ;;  %v5150_v19 = vpack.c.bf16 %v5043_v1, %v5043_v1  ;;  %v5051_v20 = vcombine.high %v5043_v1, %v5043_v1 }
 0x825   :  { %v10730_v8 = vpop.f32.mrf.mxu0  ;;  %v13733_v28 = vpop.f32.mrf.mxu1  ;;  %v6784_v12 = vmul.f32 1.442695, %v6751_v38  ;;  %v6753_v33 = vsub.f32 %v13385_v44, %v6665_v25 }
 0x826   :  { %v5053_v48 = vcombine.high %v4735_v32, %v4735_v32  ;;  %v13736_v17 = vrot.slane %v4735_v32, %v12222_v39  ;;  %v7042_v37 = vsel %vm2674_vm3, %v5150_v19, 0  ;;  %v6699_v27 = vsel %vm2285_vm2, %v13733_v28, -inf  ;;  %v6671_v19 = vpop.xlane.xlu0 %6670 }
 0x827   :  { %v13741_v61 = vpop.f32.mrf.mxu0  ;;  %10924 = vmatpush3.bf16.msra.mxu0 %v7042_v37  ;;  %6700 = vmax.xlane.f32.xlu0 %v6699_v27  ;;  %v10825_v16 = vpop.f32.mrf.mxu1  ;;  %v5151_v35 = vpack.c.bf16 %v5051_v20, %v5051_v20  ;;  %v13749_v11 = vcombine.high %v13731_v10, %v13731_v10  ;;  %v13751_v13 = vpack.i.bf16 %v5051_v20, %v5043_v1  ;;  %11830 = vpow2.f32 %v6784_v12 }
 0x828   :  { %v13744_v26 = vrot.slane %v5053_v48, %v12222_v39  ;;  %10935 = vmatprep.subr.bf16.mxu0 %v14749_v2  ;;  %v13756_v45 = vcombine.high %v13736_v17, %v13736_v17  ;;  %v6788_v32 = vmul.f32 1.442695, %v6753_v33  ;;  %v6755_v44 = vsub.f32 %v13387_v54, %v6671_v19 }
 0x829   :  { %v10759_v53 = vpop.f32.mrf.mxu0  ;;  %v5915_v51 = vpop.f32.mrf.mxu1  ;;  %v7088_v57 = vsel %vm2674_vm3, %v5151_v35, 0  ;;  %v13765_v7 = vpack.i.bf16 %v13749_v11, %v13731_v10 }
 0x82a   :  { %10930 = vmatpush3.bf16.msra.mxu1 %v7088_v57  ;;  %v13761_v63 = vcombine.high %v13744_v26, %v13744_v26  ;;  %v13777_v41 = vpack.i.bf16 %v13756_v45, %v13736_v17 }
 0x82b   :  { %v5409_v36 = vpop.f32.mrf.mxu0  ;;  %v10826_v60 = vpop.f32.mrf.mxu1  ;;  %10941 = vmatprep.subr.bf16.mxu1 %v14749_v2 }
 0x82c   :  { %v13771_v50 = vpack.i.bf16 %v13761_v63, %v13744_v26  ;;  %v6792_v60 = vmul.f32 1.442695, %v6755_v44 }
 0x82d   :  { %v10760_v43 = vpop.f32.mrf.mxu0  ;;  %v13767_v18 = vpop.f32.mrf.mxu1 }
 0x82e   :  { %v6705_v55 = vsel %vm2285_vm2, %v13767_v18, -inf  ;;  %v6677_v43 = vpop.xlane.xlu0 %6676 }
 0x82f   :  { %v13779_v59 = vpop.f32.mrf.mxu0  ;;  %6706 = vmax.xlane.f32.xlu0 %v6705_v55  ;;  %v10837_v46 = vpop.f32.mrf.mxu1  ;;  %v6757_v38 = vsub.f32 %v13389_v15, %v6677_v43 }
 0x831   :  { %v10771_v5 = vpop.f32.mrf.mxu0  ;;  %v6007_v24 = vpop.f32.mrf.mxu1 }
 0x833   :  { %v5501_v52 = vpop.f32.mrf.mxu0  ;;  %v10838_v34 = vpop.f32.mrf.mxu1 }
 0x834   :  { %v13800_v55 = vpop.eup %11830 }
 0x835   :  { %v10772_v9 = vpop.f32.mrf.mxu0  ;;  %v13782_v3 = vpop.f32.mrf.mxu1  ;;  %v6849_v52 = vsel %vm2285_vm2, %v13800_v55, 0.0 }
 0x836   :  { %v6711_v23 = vsel %vm2285_vm2, %v13782_v3, -inf }
 0x837   :  { %v13786_v4 = vpop.f32.mrf.mxu0  ;;  %6712 = vmax.xlane.f32.xlu0 %v6711_v23  ;;  %v10849_v58 = vpop.f32.mrf.mxu1 }
 0x839   :  { %v10783_v29 = vpop.f32.mrf.mxu0  ;;  %v6099_v49 = vpop.f32.mrf.mxu1 }
 0x83a   :  { %v5152_v29 = vpack.c.bf16 %v13731_v10, %v13731_v10  ;;  %v6796_v49 = vmul.f32 1.442695, %v6757_v38 }
 0x83b   :  { %v5593_v42 = vpop.f32.mrf.mxu0  ;;  %v10850_v1 = vpop.f32.mrf.mxu1 }
 0x83d   :  { %v10784_v47 = vpop.f32.mrf.mxu0  ;;  %v13789_v56 = vpop.f32.mrf.mxu1 }
 0x83e   :  { %v6848_v20 = vpop.xlane.xlu1 %6847  ;;  %v6717_v8 = vsel %vm2285_vm2, %v13789_v56, -inf }
 0x83f   :  { %11832 = vrcp.f32 %v6848_v20  ;;  %v13793_v48 = vpop.f32.mrf.mxu0  ;;  %6718 = vmax.xlane.f32.xlu0 %v6717_v8  ;;  %v10861_v37 = vpop.f32.mrf.mxu1  ;;  %v7134_v20 = vsel %vm2674_vm3, %v5152_v29, 0 }
 0x840   :  { %11834 = vpow2.f32 %v6788_v32 }
 0x841   :  { %v10795_v27 = vpop.f32.mrf.mxu0  ;;  %v6191_v16 = vpop.f32.mrf.mxu1 }
 0x842   :  { %v6854_v35 = vpop.xlane.xlu1 %6853 }
 0x843   :  { %11836 = vrcp.f32 %v6854_v35  ;;  %v5685_v53 = vpop.f32.mrf.mxu0  ;;  %v10862_v51 = vpop.f32.mrf.mxu1  ;;  %v5154_v35 = vpack.c.bf16 %v13736_v17, %v13736_v17 }
 0x844   :  { %11838 = vpow2.f32 %v6792_v60 }
 0x845   :  { %v10796_v57 = vpop.f32.mrf.mxu0  ;;  %v13796_v36 = vpop.f32.mrf.mxu1  ;;  %11840 = vpow2.f32 %v6796_v49 }
 0x846   :  { %v6723_v62 = vsel %vm2285_vm2, %v13796_v36, -inf }
 0x847   :  { %v13802_v46 = vpop.f32.mrf.mxu0  ;;  %6724 = vmax.xlane.f32.xlu0 %v6723_v62  ;;  %v10873_v5 = vpop.f32.mrf.mxu1 }
 0x848   :  { %v7226_v5 = vsel %vm2674_vm3, %v5154_v35, 0 }
 0x849   :  { %v10807_v24 = vpop.f32.mrf.mxu0  ;;  %v6283_v54 = vpop.f32.mrf.mxu1 }
 0x84b   :  { %v5777_v34 = vpop.f32.mrf.mxu0  ;;  %6850 = vadd.xlane.f32.xlu0 %v6849_v52  ;;  %v10874_v9 = vpop.f32.mrf.mxu1 }
 0x84c   :  { %v11833_v12 = vpop.eup %11832 }
 0x84d   :  { %v6974_v25 = vmul.f32 %v11833_v12, %v13683_v0  ;;  %v10808_v23 = vpop.f32.mrf.mxu0  ;;  %v13808_v58 = vpop.f32.mrf.mxu1 }
 0x84e   :  { %v6729_v33 = vsel %vm2285_vm2, %v13808_v58, -inf  ;;  %v13814_v15 = vpop.eup %11834 }
 0x84f   :  { %v7006_v42 = vpack.c.bf16 %v6974_v25, %v6974_v25  ;;  %v13816_v1 = vpop.f32.mrf.mxu0  ;;  %6730 = vmax.xlane.f32.xlu0 %v6729_v33  ;;  %v10885_v47 = vpop.f32.mrf.mxu1  ;;  %v6855_v10 = vsel %vm2285_vm2, %v13814_v15, 0.0 }
 0x850   :  { %v11837_v32 = vpop.eup %11836 }
 0x851   :  { %v10819_v19 = vpop.f32.mrf.mxu0  ;;  %v6375_v0 = vpop.f32.mrf.mxu1  ;;  %10926 = vmatmul.mubr.msk.bf16.vlgmr.msra.gmra.mxu0 %vm2670_vm4, %v7006_v42  ;;  %v6976_v8 = vmul.f32 %v11837_v32, %v13687_v14 }
 0x852   :  { %10936 = vmatpush3.bf16.msra.mxu0 %v7134_v20  ;;  %10937 = vmatprep.mubr.msk.bf16.mxu0 %vm11982_vm0, %v14749_v2  ;;  %v13832_v51 = vpop.eup %11838 }
 0x853   :  { %v5869_v37 = vpop.f32.mrf.mxu0  ;;  %6856 = vadd.xlane.f32.xlu0 %v6855_v10  ;;  %v10886_v27 = vpop.f32.mrf.mxu1  ;;  %10947 = vmatprep.subr.bf16.mxu0 %v14749_v2  ;;  %v7008_v57 = vpack.c.bf16 %v6976_v8, %v6976_v8  ;;  %v6861_v17 = vsel %vm2285_vm2, %v13832_v51, 0.0 }
 0x854   :  { %v13847_v9 = vpop.eup %11840 }
 0x855   :  { %v10820_v16 = vpop.f32.mrf.mxu0  ;;  %v13826_v44 = vpop.f32.mrf.mxu1  ;;  %v6867_v49 = vsel %vm2285_vm2, %v13847_v9, 0.0 }
 0x856   :  { %v6735_v53 = vsel %vm2285_vm2, %v13826_v44, -inf }
 0x857   :  { %v13834_v60 = vpop.f32.mrf.mxu0  ;;  %6736 = vmax.xlane.f32.xlu0 %v6735_v53  ;;  %v10897_v14 = vpop.f32.mrf.mxu1 }
 0x859   :  { %v10831_v43 = vpop.f32.mrf.mxu0  ;;  %v6467_v62 = vpop.f32.mrf.mxu1  ;;  %10938 = vmatmul.mubr.msk.bf16.vlgmr.msra.gmra.mxu0 %vm2670_vm4, %v7008_v57 }
 0x85a   :  { %10948 = vmatpush3.bf16.msra.mxu0 %v7226_v5  ;;  %10949 = vmatprep.mubr.msk.bf16.mxu0 %vm11982_vm0, %v14749_v2 }
 0x85b   :  { %v5961_v24 = vpop.f32.mrf.mxu0  ;;  %6862 = vadd.xlane.f32.xlu0 %v6861_v17  ;;  %v10898_v54 = vpop.f32.mrf.mxu1  ;;  %10959 = vmatprep.subr.bf16.mxu0 %v14749_v2 }
 0x85d   :  { %v10832_v38 = vpop.f32.mrf.mxu0  ;;  %v13843_v52 = vpop.f32.mrf.mxu1 }
 0x85e   :  { %v6741_v34 = vsel %vm2285_vm2, %v13843_v52, -inf }
 0x85f   :  { %v13849_v12 = vpop.f32.mrf.mxu0  ;;  %6742 = vmax.xlane.f32.xlu0 %v6741_v34  ;;  %v10909_v25 = vpop.f32.mrf.mxu1 }
 0x861   :  { %v10843_v23 = vpop.f32.mrf.mxu0  ;;  %v6559_v29 = vpop.f32.mrf.mxu1 }
 0x863   :  { %v6053_v33 = vpop.f32.mrf.mxu0  ;;  %6868 = vadd.xlane.f32.xlu0 %v6867_v49  ;;  %v10910_v42 = vpop.f32.mrf.mxu1 }
 0x865   :  { %v10844_v47 = vpop.f32.mrf.mxu0  ;;  %v13853_v32 = vpop.f32.mrf.mxu1 }
 0x866   :  { %v6747_v19 = vsel %vm2285_vm2, %v13853_v32, -inf }
 0x867   :  { %v13857_v0 = vpop.f32.mrf.mxu0  ;;  %6748 = vmax.xlane.f32.xlu0 %v6747_v19  ;;  %v10921_v20 = vpop.f32.mrf.mxu1 }
 0x869   :  { %v10855_v10 = vpop.f32.mrf.mxu0  ;;  %v6651_v8 = vpop.f32.mrf.mxu1 }
 0x86b   :  { %v6145_v37 = vpop.f32.mrf.mxu0  ;;  %v10922_v27 = vpop.f32.mrf.mxu1 }
 0x86d   :  { %v10856_v16 = vpop.f32.mrf.mxu0 }
 0x86f   :  { %v13859_v35 = vpop.f32.mrf.mxu0 }
 0x871   :  { %v10867_v53 = vpop.f32.mrf.mxu0 }
 0x873   :  { %v6237_v57 = vpop.f32.mrf.mxu0 }
 0x875   :  { %v10868_v14 = vpop.f32.mrf.mxu0 }
 0x877   :  { %v13861_v43 = vpop.f32.mrf.mxu0 }
 0x879   :  { %v10879_v62 = vpop.f32.mrf.mxu0 }
 0x87b   :  { %v6329_v5 = vpop.f32.mrf.mxu0 }
 0x87d   :  { %v10880_v17 = vpop.f32.mrf.mxu0 }
 0x87f   :  { %v13863_v24 = vpop.f32.mrf.mxu0 }
 0x881   :  { %v10891_v54 = vpop.f32.mrf.mxu0 }
 0x883   :  { %v6421_v38 = vpop.f32.mrf.mxu0 }
 0x885   :  { %v10892_v34 = vpop.f32.mrf.mxu0 }
 0x887   :  { %v13865_v25 = vpop.f32.mrf.mxu0 }
 0x889   :  { %v10903_v23 = vpop.f32.mrf.mxu0 }
 0x88b   :  { %v6513_v29 = vpop.f32.mrf.mxu0 }
 0x88d   :  { %v10904_v49 = vpop.f32.mrf.mxu0 }
 0x88f   :  { %v13867_v33 = vpop.f32.mrf.mxu0 }
 0x891   :  { %v10915_v42 = vpop.f32.mrf.mxu0 }
 0x893   :  { %v6605_v47 = vpop.f32.mrf.mxu0 }
 0x895   :  { %v10916_v19 = vpop.f32.mrf.mxu0 }
 0x898   :  { %v6683_v20 = vpop.xlane.xlu0 %6682 }
 0x899   :  { %v6759_v10 = vsub.f32 %v13714_v6, %v6683_v20 }
 0x89b   :  { %v6800_v8 = vmul.f32 1.442695, %v6759_v10 }
 0x89d   :  { %11842 = vpow2.f32 %v6800_v8 }
 0x8a0   :  { %v6689_v37 = vpop.xlane.xlu0 %6688 }
 0x8a1   :  { %v6761_v27 = vsub.f32 %v13718_v21, %v6689_v37 }
 0x8a3   :  { %v6804_v16 = vmul.f32 1.442695, %v6761_v27 }
 0x8a5   :  { %11844 = vpow2.f32 %v6804_v16 }
 0x8a8   :  { %v6695_v53 = vpop.xlane.xlu0 %6694 }
 0x8a9   :  { %v6763_v57 = vsub.f32 %v13722_v31, %v6695_v53 }
 0x8aa   :  { %v13872_v14 = vpop.eup %11842 }
 0x8ab   :  { %v6808_v62 = vmul.f32 1.442695, %v6763_v57  ;;  %v6873_v5 = vsel %vm2285_vm2, %v13872_v14, 0.0 }
 0x8ac   :  { %6874 = vadd.xlane.f32.xlu0 %v6873_v5 }
 0x8ad   :  { %11846 = vpow2.f32 %v6808_v62 }
 0x8b0   :  { %v6701_v17 = vpop.xlane.xlu0 %6700 }
 0x8b1   :  { %v6765_v6 = vsub.f32 %v13733_v28, %v6701_v17 }
 0x8b2   :  { %v13877_v54 = vpop.eup %11844 }
 0x8b3   :  { %v6812_v38 = vmul.f32 1.442695, %v6765_v6  ;;  %v6879_v21 = vsel %vm2285_vm2, %v13877_v54, 0.0 }
 0x8b4   :  { %6880 = vadd.xlane.f32.xlu0 %v6879_v21 }
 0x8b5   :  { %11848 = vpow2.f32 %v6812_v38 }
 0x8b8   :  { %v6707_v31 = vpop.xlane.xlu0 %6706 }
 0x8b9   :  { %v6767_v34 = vsub.f32 %v13767_v18, %v6707_v31 }
 0x8ba   :  { %v13882_v23 = vpop.eup %11846 }
 0x8bb   :  { %v6816_v29 = vmul.f32 1.442695, %v6767_v34  ;;  %v6885_v49 = vsel %vm2285_vm2, %v13882_v23, 0.0 }
 0x8bc   :  { %6886 = vadd.xlane.f32.xlu0 %v6885_v49 }
 0x8bd   :  { %11850 = vpow2.f32 %v6816_v29 }
 0x8c0   :  { %v6713_v28 = vpop.xlane.xlu0 %6712 }
 0x8c1   :  { %v6769_v42 = vsub.f32 %v13782_v3, %v6713_v28  ;;  %v5153_v28 = vpack.c.bf16 %v13749_v11, %v13749_v11 }
 0x8c2   :  { %v13887_v47 = vpop.eup %11848 }
 0x8c3   :  { %v6820_v19 = vmul.f32 1.442695, %v6769_v42  ;;  %v6891_v20 = vsel %vm2285_vm2, %v13887_v47, 0.0 }
 0x8c4   :  { %6892 = vadd.xlane.f32.xlu0 %v6891_v20 }
 0x8c5   :  { %11852 = vpow2.f32 %v6820_v19  ;;  %v7180_v19 = vsel %vm2674_vm3, %v5153_v28, 0 }
 0x8c8   :  { %v6719_v18 = vpop.xlane.xlu0 %6718 }
 0x8c9   :  { %v6771_v10 = vsub.f32 %v13789_v56, %v6719_v18 }
 0x8ca   :  { %v13892_v8 = vpop.eup %11850 }
 0x8cb   :  { %v6824_v37 = vmul.f32 1.442695, %v6771_v10  ;;  %v6897_v27 = vsel %vm2285_vm2, %v13892_v8, 0.0  ;;  %v5155_v10 = vpack.c.bf16 %v13756_v45, %v13756_v45 }
 0x8cc   :  { %6898 = vadd.xlane.f32.xlu0 %v6897_v27 }
 0x8cd   :  { %11854 = vpow2.f32 %v6824_v37  ;;  %v7272_v27 = vsel %vm2674_vm3, %v5155_v10, 0 }
 0x8d0   :  { %v6725_v3 = vpop.xlane.xlu0 %6724 }
 0x8d1   :  { %v6773_v16 = vsub.f32 %v13796_v36, %v6725_v3  ;;  %v5157_v3 = vpack.c.bf16 %v13761_v63, %v13761_v63 }
 0x8d2   :  { %v13897_v53 = vpop.eup %11852 }
 0x8d3   :  { %v6828_v57 = vmul.f32 1.442695, %v6773_v16  ;;  %v6903_v62 = vsel %vm2285_vm2, %v13897_v53, 0.0 }
 0x8d4   :  { %v6851_v5 = vpop.xlane.xlu0 %6850  ;;  %6904 = vadd.xlane.f32.xlu0 %v6903_v62 }
 0x8d5   :  { %11856 = vpow2.f32 %v6828_v57  ;;  %v7364_v57 = vsel %vm2674_vm3, %v5157_v3, 0  ;;  %v6696_v3 = vsel %vm2285_vm2, %v13816_v1, -inf }
 0x8d6   :  { %11858 = vrcp.f32 %v6851_v5 }
 0x8d8   :  { %v13901_v56 = vpop.xlane.xlu0 %6730 }
 0x8da   :  { %v13903_v17 = vpop.eup %11854 }
 0x8db   :  { %v6909_v6 = vsel %vm2285_vm2, %v13903_v17, 0.0 }
 0x8dc   :  { %6910 = vadd.xlane.f32.xlu1 %v6909_v6  ;;  %v6857_v38 = vpop.xlane.xlu0 %6856 }
 0x8dd   :  { %11860 = vrcp.f32 %v6857_v38 }
 0x8e0   :  { %v13907_v36 = vpop.xlane.xlu0 %6736 }
 0x8e2   :  { %v13909_v21 = vpop.eup %11856 }
 0x8e3   :  { %v11859_v31 = vpop.eup %11858  ;;  %v6915_v34 = vsel %vm2285_vm2, %v13909_v21, 0.0 }
 0x8e4   :  { %v6975_v29 = vmul.f32 %v11859_v31, %v13800_v55  ;;  %6916 = vadd.xlane.f32.xlu1 %v6915_v34  ;;  %v6863_v49 = vpop.xlane.xlu0 %6862  ;;  %v6666_v34 = vsel %vm2285_vm2, %v13741_v61, -inf }
 0x8e5   :  { %11862 = vrcp.f32 %v6863_v49 }
 0x8e6   :  { %v7007_v42 = vpack.c.bf16 %v6975_v29, %v6975_v29 }
 0x8e8   :  { %10932 = vmatmul.mubr.msk.bf16.vlgmr.msra.gmra.mxu1 %vm2670_vm4, %v7007_v42  ;;  %v13918_v20 = vpop.xlane.xlu0 %6742 }
 0x8e9   :  { %10942 = vmatpush3.bf16.msra.mxu1 %v7180_v19  ;;  %10943 = vmatprep.mubr.msk.bf16.mxu1 %vm11982_vm0, %v14749_v2 }
 0x8ea   :  { %11468 = vrot.lane.b32.xlu0 %v13751_v13, %s14758_s28  ;;  %10953 = vmatprep.subr.bf16.mxu1 %v14749_v2  ;;  %v11861_v55 = vpop.eup %11860 }
 0x8eb   :  { %v6977_v11 = vmul.f32 %v11861_v55, %v13814_v15  ;;  %v6672_v55 = vsel %vm2285_vm2, %v13779_v59, -inf }
 0x8ec   :  { %v6869_v18 = vpop.xlane.xlu0 %6868 }
 0x8ed   :  { %v7009_v37 = vpack.c.bf16 %v6977_v11, %v6977_v11  ;;  %11864 = vrcp.f32 %v6869_v18  ;;  %v6678_v18 = vsel %vm2285_vm2, %v13786_v4, -inf }
 0x8ee   :  { %11473 = vrot.lane.b32.xlu0 %v13765_v7, %s11984_s10 }
 0x8f0   :  { %10944 = vmatmul.mubr.msk.bf16.vlgmr.msra.gmra.mxu1 %vm2670_vm4, %v7009_v37  ;;  %v13961_v42 = vpop.xlane.xlu0 %6748  ;;  %v6684_v37 = vsel %vm2285_vm2, %v13793_v48, -inf }
 0x8f1   :  { %10954 = vmatpush3.bf16.msra.mxu1 %v7272_v27  ;;  %10955 = vmatprep.mubr.msk.bf16.mxu1 %vm11982_vm0, %v14749_v2 }
 0x8f2   :  { %11493 = vrot.lane.b32.xlu0 %v13777_v41, %s14758_s28  ;;  %10965 = vmatprep.subr.bf16.mxu1 %v14749_v2  ;;  %v11863_v15 = vpop.eup %11862 }
 0x8f3   :  { %v6979_v45 = vmul.f32 %v11863_v15, %v13832_v51  ;;  %v6690_v15 = vsel %vm2285_vm2, %v13802_v46, -inf }
 0x8f5   :  { %11463 = vrot.lane.b32.xlu1 %v13751_v13, %s11984_s10  ;;  %v7011_v16 = vpack.c.bf16 %v6979_v45, %v6979_v45 }
 0x8f8   :  { %10956 = vmatmul.mubr.msk.bf16.vlgmr.msra.gmra.mxu1 %vm2670_vm4, %v7011_v16 }
 0x8f9   :  { %10966 = vmatpush3.bf16.msra.mxu1 %v7364_v57  ;;  %10967 = vmatprep.mubr.msk.bf16.mxu1 %vm11982_vm0, %v14749_v2 }
 0x8fa   :  { %10977 = vmatprep.subr.bf16.mxu1 %v14749_v2  ;;  %v11865_v62 = vpop.eup %11864 }
 0x8fb   :  { %v6981_v51 = vmul.f32 %v11865_v62, %v13847_v9 }
 0x8fd   :  { %v7013_v5 = vpack.c.bf16 %v6981_v51, %v6981_v51 }
 0x900   :  { %10968 = vmatmul.mubr.msk.bf16.vlgmr.msra.gmra.mxu1 %vm2670_vm4, %v7013_v5 }
 0x901   :  { %10979 = vmatprep.mubr.msk.bf16.mxu1 %vm11982_vm0, %v14749_v2 }
 0x911   :  { %v13951_v63 = vpop.f32.mrf.mxu0 }
 0x913   :  { %v10927_v6 = vpop.f32.mrf.mxu0 }
 0x915   :  { %v7081_v38 = vpop.f32.mrf.mxu0 }
 0x917   :  { %v10928_v31 = vpop.f32.mrf.mxu0 }
 0x919   :  { %v13955_v29 = vpop.f32.mrf.mxu0  ;;  %6667 = vmax.xlane.f32.xlu1 %v6666_v34 }
 0x91b   :  { %v10939_v49 = vpop.f32.mrf.mxu0 }
 0x91d   :  { %v7173_v28 = vpop.f32.mrf.mxu0 }
 0x91f   :  { %v10940_v9 = vpop.f32.mrf.mxu0 }
 0x92a   :  { %11478 = vrot.lane.b32.xlu1 %v13777_v41, %s11984_s10 }
 0x92e   :  { %11483 = vrot.lane.b32.xlu1 %v13771_v50, %s11984_s10 }
 0x935   :  { %v6875_v19 = vpop.xlane.xlu0 %6874 }
 0x936   :  { %11866 = vrcp.f32 %v6875_v19 }
 0x93d   :  { %v6881_v11 = vpop.xlane.xlu0 %6880 }
 0x93e   :  { %11868 = vrcp.f32 %v6881_v11 }
 0x943   :  { %v11867_v6 = vpop.eup %11866 }
 0x944   :  { %v6983_v49 = vmul.f32 %v11867_v6, %v13872_v14  ;;  %v6777_v6 = vsub.f32 %v13826_v44, %v13907_v36 }
 0x945   :  { %v6887_v10 = vpop.xlane.xlu0 %6886 }
 0x94b   :  { %v11869_v11 = vpop.eup %11868 }
 0x94d   :  { %v6893_v27 = vpop.xlane.xlu0 %6892 }
 0x952   :  { %6673 = vmax.xlane.f32.xlu1 %v6672_v55  ;;  %v7015_v55 = vpack.c.bf16 %v6983_v49, %v6983_v49 }
 0x955   :  { %v6899_v45 = vpop.xlane.xlu0 %6898 }
 0x956   :  { %6679 = vmax.xlane.f32.xlu1 %v6678_v18 }
 0x95a   :  { %6685 = vmax.xlane.f32.xlu1 %v6684_v37  ;;  %v6985_v37 = vmul.f32 %v11869_v11, %v13877_v54  ;;  %v6702_v54 = vsel %vm2285_vm2, %v13834_v60, -inf }
 0x95c   :  { %v7017_v14 = vpack.c.bf16 %v6985_v37, %v6985_v37 }
 0x95d   :  { %v13973_v16 = vpop.xlane.xlu0 %6904 }
 0x95e   :  { %6691 = vmax.xlane.f32.xlu1 %v6690_v15  ;;  %v6775_v15 = vsub.f32 %v13808_v58, %v13901_v56  ;;  %v6708_v56 = vsel %vm2285_vm2, %v13849_v12, -inf }
 0x961   :  { %v13975_v57 = vpop.permute.xlu0 %11468 }
 0x962   :  { %6697 = vmax.xlane.f32.xlu1 %v6696_v3  ;;  %v6832_v3 = vmul.f32 1.442695, %v6775_v15 }
 0x964   :  { %11870 = vpow2.f32 %v6832_v3 }
 0x965   :  { %v13977_v62 = vpop.xlane.xlu1 %6910  ;;  %v13981_v5 = vpop.permute.xlu0 %11473 }
 0x966   :  { %v11476_v31 = vunpack.i.h.bf16 %v13981_v5 }
 0x968   :  { %v5161_v9 = vpack.c.bf16 %v11476_v31, %v11476_v31  ;;  %v6836_v31 = vmul.f32 1.442695, %v6777_v6 }
 0x96a   :  { %v7548_v18 = vsel %vm2674_vm3, %v5161_v9, 0  ;;  %11872 = vpow2.f32 %v6836_v31 }
 0x96b   :  { %11874 = vrcp.f32 %v6887_v10 }
 0x96c   :  { %11876 = vrcp.f32 %v6893_v27 }
 0x96d   :  { %v13979_v51 = vpop.xlane.xlu1 %6916  ;;  %11878 = vrcp.f32 %v6899_v45 }
 0x971   :  { %v13983_v38 = vpop.permute.xlu1 %11463 }
 0x972   :  { %v11466_v34 = vunpack.i.h.bf16 %v13983_v38 }
 0x973   :  { %11488 = vrot.lane.b32.xlu1 %v13765_v7, %s14758_s28 }
 0x974   :  { %v5159_v28 = vpack.c.bf16 %v11466_v34, %v11466_v34  ;;  %v14007_v34 = vpop.eup %11870 }
 0x975   :  { %v6921_v58 = vsel %vm2285_vm2, %v14007_v34, 0.0 }
 0x976   :  { %v7456_v19 = vsel %vm2674_vm3, %v5159_v28, 0 }
 0x977   :  { %10978 = vmatpush3.bf16.msra.mxu1 %v7456_v19  ;;  %v14013_v49 = vpop.eup %11872  ;;  %v6714_v19 = vsel %vm2285_vm2, %v13857_v0, -inf }
 0x978   :  { %10989 = vmatprep.subr.bf16.mxu1 %v14749_v2  ;;  %v6927_v36 = vsel %vm2285_vm2, %v14013_v49, 0.0  ;;  %v11875_v28 = vpop.eup %11874 }
 0x979   :  { %v6987_v27 = vmul.f32 %v11875_v28, %v13882_v23  ;;  %v11877_v23 = vpop.eup %11876 }
 0x97a   :  { %10980 = vmatmul.mubr.msk.bf16.vlgmr.msra.gmra.mxu1 %vm2670_vm4, %v7015_v55 }
 0x97b   :  { %10990 = vmatpush3.bf16.msra.mxu1 %v7548_v18  ;;  %10991 = vmatprep.mubr.msk.bf16.mxu1 %vm11982_vm0, %v14749_v2 }
 0x97c   :  { %11001 = vmatprep.subr.bf16.mxu1 %v14749_v2 }
 0x982   :  { %10992 = vmatmul.mubr.msk.bf16.vlgmr.msra.gmra.mxu1 %vm2670_vm4, %v7017_v14 }
 0x983   :  { %11003 = vmatprep.mubr.msk.bf16.mxu1 %vm11982_vm0, %v14749_v2 }
 0x997   :  { %6703 = vmax.xlane.f32.xlu1 %v6702_v54  ;;  %v7019_v54 = vpack.c.bf16 %v6987_v27, %v6987_v27 }
 0x99b   :  { %6922 = vadd.xlane.f32.xlu1 %v6921_v58 }
 0x99f   :  { %6709 = vmax.xlane.f32.xlu1 %v6708_v56  ;;  %v6726_v56 = vsel %vm2285_vm2, %v13861_v43, -inf }
 0x9a2   :  { %v6668_v44 = vpop.xlane.xlu1 %6667 }
 0x9a3   :  { %6928 = vadd.xlane.f32.xlu1 %v6927_v36  ;;  %v6754_v9 = vsub.f32 %v13741_v61, %v6668_v44  ;;  %v6720_v61 = vsel %vm2285_vm2, %v13859_v35, -inf  ;;  %v11471_v44 = vunpack.i.h.bf16 %v13975_v57 }
 0x9a5   :  { %v6790_v37 = vmul.f32 1.442695, %v6754_v9  ;;  %v6989_v9 = vmul.f32 %v11877_v23, %v13887_v47  ;;  %v5167_v27 = vpack.c.bf16 %v11471_v44, %v11471_v44 }
 0x9a6   :  { %v14018_v10 = vpop.permute.xlu1 %11478 }
 0x9a7   :  { %v11481_v55 = vunpack.i.h.bf16 %v14018_v10  ;;  %6715 = vmax.xlane.f32.xlu1 %v6714_v19  ;;  %11880 = vpow2.f32 %v6790_v37  ;;  %v7021_v37 = vpack.c.bf16 %v6989_v9, %v6989_v9  ;;  %v7824_v47 = vsel %vm2674_vm3, %v5167_v27, 0 }
 0x9a8   :  { %v14023_v11 = vpop.f32.mrf.mxu1 }
 0x9a9   :  { %v5163_v18 = vpack.c.bf16 %v11481_v55, %v11481_v55  ;;  %v6732_v55 = vsel %vm2285_vm2, %v13863_v24, -inf }
 0x9aa   :  { %v10933_v14 = vpop.f32.mrf.mxu1  ;;  %v14026_v15 = vpop.permute.xlu1 %11483 }
 0x9ab   :  { %v11486_v3 = vunpack.i.h.bf16 %v14026_v15  ;;  %6721 = vmax.xlane.f32.xlu1 %v6720_v61  ;;  %v7640_v6 = vsel %vm2674_vm3, %v5163_v18, 0  ;;  %v11879_v14 = vpop.eup %11878 }
 0x9ac   :  { %v7127_v31 = vpop.f32.mrf.mxu1  ;;  %11002 = vmatpush3.bf16.msra.mxu1 %v7640_v6 }
 0x9ad   :  { %v5165_v58 = vpack.c.bf16 %v11486_v3, %v11486_v3  ;;  %11013 = vmatprep.subr.bf16.mxu1 %v14749_v2  ;;  %v6738_v3 = vsel %vm2285_vm2, %v13865_v25, -inf  ;;  %v6991_v31 = vmul.f32 %v11879_v14, %v13892_v8 }
 0x9ae   :  { %v10934_v45 = vpop.f32.mrf.mxu1 }
 0x9af   :  { %6727 = vmax.xlane.f32.xlu1 %v6726_v56  ;;  %11004 = vmatmul.mubr.msk.bf16.vlgmr.msra.gmra.mxu1 %vm2670_vm4, %v7019_v54  ;;  %v7732_v36 = vsel %vm2674_vm3, %v5165_v58, 0  ;;  %v6744_v58 = vsel %vm2285_vm2, %v13867_v33, -inf  ;;  %v7023_v56 = vpack.c.bf16 %v6991_v31, %v6991_v31 }
 0x9b0   :  { %v14038_v28 = vpop.f32.mrf.mxu1  ;;  %11014 = vmatpush3.bf16.msra.mxu1 %v7732_v36  ;;  %11015 = vmatprep.mubr.msk.bf16.mxu1 %vm11982_vm0, %v14749_v2 }
 0x9b1   :  { %11025 = vmatprep.subr.bf16.mxu1 %v14749_v2 }
 0x9b2   :  { %v10945_v19 = vpop.f32.mrf.mxu1 }
 0x9b3   :  { %6733 = vmax.xlane.f32.xlu1 %v6732_v55 }
 0x9b4   :  { %v7219_v18 = vpop.f32.mrf.mxu1  ;;  %v14058_v23 = vpop.eup %11880 }
 0x9b5   :  { %v6858_v36 = vsel %vm2285_vm2, %v14058_v23, 0.0 }
 0x9b6   :  { %v10946_v61 = vpop.f32.mrf.mxu1 }
 0x9b7   :  { %6739 = vmax.xlane.f32.xlu1 %v6738_v3  ;;  %11016 = vmatmul.mubr.msk.bf16.vlgmr.msra.gmra.mxu1 %vm2670_vm4, %v7021_v37 }
 0x9b8   :  { %v14050_v6 = vpop.f32.mrf.mxu1  ;;  %11026 = vmatpush3.bf16.msra.mxu1 %v7824_v47  ;;  %11027 = vmatprep.mubr.msk.bf16.mxu1 %vm11982_vm0, %v14749_v2 }
 0x9b9   :  { %11037 = vmatprep.subr.bf16.mxu1 %v14749_v2 }
 0x9ba   :  { %v10957_v54 = vpop.f32.mrf.mxu1 }
 0x9bb   :  { %6745 = vmax.xlane.f32.xlu1 %v6744_v58 }
 0x9bc   :  { %v7311_v45 = vpop.f32.mrf.mxu1 }
 0x9be   :  { %v10958_v44 = vpop.f32.mrf.mxu1 }
 0x9bf   :  { %6859 = vadd.xlane.f32.xlu1 %v6858_v36  ;;  %11028 = vmatmul.mubr.msk.bf16.vlgmr.msra.gmra.mxu1 %vm2670_vm4, %v7023_v56 }
 0x9c0   :  { %v14063_v9 = vpop.f32.mrf.mxu1  ;;  %11039 = vmatprep.mubr.msk.bf16.mxu1 %vm11982_vm0, %v14749_v2 }
 0x9c2   :  { %v10969_v8 = vpop.f32.mrf.mxu1 }
 0x9c4   :  { %v7403_v19 = vpop.f32.mrf.mxu1 }
 0x9c6   :  { %v10970_v55 = vpop.f32.mrf.mxu1 }
 0x9db   :  { %v6674_v27 = vpop.xlane.xlu1 %6673 }
 0x9dc   :  { %v6756_v18 = vsub.f32 %v13779_v59, %v6674_v27 }
 0x9de   :  { %v6794_v37 = vmul.f32 1.442695, %v6756_v18 }
 0x9df   :  { %v6680_v14 = vpop.xlane.xlu1 %6679 }
 0x9e0   :  { %11882 = vpow2.f32 %v6794_v37  ;;  %v6758_v61 = vsub.f32 %v13786_v4, %v6680_v14 }
 0x9e1   :  { %11884 = vrcp.f32 %v13973_v16  ;;  %v14076_v16 = vpop.permute.xlu0 %11493 }
 0x9e2   :  { %v6798_v3 = vmul.f32 1.442695, %v6758_v61 }
 0x9e3   :  { %v6686_v47 = vpop.xlane.xlu1 %6685 }
 0x9e4   :  { %11886 = vpow2.f32 %v6798_v3  ;;  %v6760_v31 = vsub.f32 %v13793_v48, %v6686_v47 }
 0x9e6   :  { %v6802_v54 = vmul.f32 1.442695, %v6760_v31 }
 0x9e7   :  { %v6692_v58 = vpop.xlane.xlu1 %6691 }
 0x9e8   :  { %11888 = vpow2.f32 %v6802_v54  ;;  %v6762_v45 = vsub.f32 %v13802_v46, %v6692_v58  ;;  %v11496_v46 = vunpack.i.h.bf16 %v14076_v16 }
 0x9e9   :  { %11890 = vrcp.f32 %v13977_v62 }
 0x9ea   :  { %v6806_v59 = vmul.f32 1.442695, %v6762_v45  ;;  %v5171_v37 = vpack.c.bf16 %v11496_v46, %v11496_v46 }
 0x9eb   :  { %v6698_v56 = vpop.xlane.xlu1 %6697 }
 0x9ec   :  { %11892 = vpow2.f32 %v6806_v59  ;;  %v6764_v44 = vsub.f32 %v13816_v1, %v6698_v56 }
 0x9ed   :  { %v14074_v4 = vpop.eup %11882 }
 0x9ee   :  { %v6810_v36 = vmul.f32 1.442695, %v6764_v44  ;;  %v6864_v48 = vsel %vm2285_vm2, %v14074_v4, 0.0  ;;  %v11885_v8 = vpop.eup %11884 }
 0x9ef   :  { %v14080_v19 = vpop.permute.xlu1 %11488  ;;  %6865 = vadd.xlane.f32.xlu1 %v6864_v48  ;;  %v6993_v1 = vmul.f32 %v11885_v8, %v13897_v53  ;;  %v8008_v53 = vsel %vm2674_vm3, %v5171_v37, 0 }
 0x9f0   :  { %11894 = vpow2.f32 %v6810_v36  ;;  %v11491_v62 = vunpack.i.h.bf16 %v14080_v19 }
 0x9f1   :  { %v14084_v55 = vpop.eup %11886  ;;  %v7025_v3 = vpack.c.bf16 %v6993_v1, %v6993_v1 }
 0x9f2   :  { %v5169_v27 = vpack.c.bf16 %v11491_v62, %v11491_v62  ;;  %v6870_v18 = vsel %vm2285_vm2, %v14084_v55, 0.0 }
 0x9f3   :  { %6871 = vadd.xlane.f32.xlu1 %v6870_v18 }
 0x9f4   :  { %v7916_v14 = vsel %vm2674_vm3, %v5169_v27, 0 }
 0x9f5   :  { %v14090_v61 = vpop.eup %11888  ;;  %11038 = vmatpush3.bf16.msra.mxu1 %v7916_v14 }
 0x9f6   :  { %v6876_v47 = vsel %vm2285_vm2, %v14090_v61, 0.0  ;;  %11049 = vmatprep.subr.bf16.mxu1 %v14749_v2  ;;  %v11891_v31 = vpop.eup %11890 }
 0x9f7   :  { %6877 = vadd.xlane.f32.xlu1 %v6876_v47  ;;  %v6995_v58 = vmul.f32 %v11891_v31, %v13903_v17 }
 0x9f8   :  { %11040 = vmatmul.mubr.msk.bf16.vlgmr.msra.gmra.mxu1 %vm2670_vm4, %v7025_v3 }
 0x9f9   :  { %v14097_v54 = vpop.eup %11892  ;;  %11050 = vmatpush3.bf16.msra.mxu1 %v8008_v53  ;;  %11051 = vmatprep.mubr.msk.bf16.mxu1 %vm11982_vm0, %v14749_v2  ;;  %v7027_v56 = vpack.c.bf16 %v6995_v58, %v6995_v58 }
 0x9fa   :  { %v6882_v45 = vsel %vm2285_vm2, %v14097_v54, 0.0  ;;  %11061 = vmatprep.subr.bf16.mxu1 %v14749_v2 }
 0x9fb   :  { %6883 = vadd.xlane.f32.xlu1 %v6882_v45 }
 0x9fd   :  { %v14105_v59 = vpop.eup %11894 }
 0x9fe   :  { %v6888_v44 = vsel %vm2285_vm2, %v14105_v59, 0.0 }
 0x9ff   :  { %6889 = vadd.xlane.f32.xlu0 %v6888_v44 }
 0xa00   :  { %11052 = vmatmul.mubr.msk.bf16.vlgmr.msra.gmra.mxu1 %vm2670_vm4, %v7027_v56 }
 0xa01   :  { %11063 = vmatprep.mubr.msk.bf16.mxu1 %vm11982_vm0, %v14749_v2 }
 0xa20   :  { %v6704_v36 = vpop.xlane.xlu1 %6703 }
 0xa21   :  { %v6766_v17 = vsub.f32 %v13834_v60, %v6704_v36 }
 0xa23   :  { %v6814_v48 = vmul.f32 1.442695, %v6766_v17 }
 0xa24   :  { %v14113_v8 = vpop.xlane.xlu1 %6922 }
 0xa25   :  { %11896 = vpow2.f32 %v6814_v48 }
 0xa28   :  { %v6710_v46 = vpop.xlane.xlu1 %6709 }
 0xa29   :  { %v6768_v62 = vsub.f32 %v13849_v12, %v6710_v46 }
 0xa2b   :  { %v6818_v1 = vmul.f32 1.442695, %v6768_v62 }
 0xa2c   :  { %v14116_v27 = vpop.xlane.xlu1 %6928 }
 0xa2d   :  { %11898 = vpow2.f32 %v6818_v1 }
 0xa30   :  { %v6716_v18 = vpop.xlane.xlu1 %6715 }
 0xa31   :  { %v6770_v37 = vsub.f32 %v13857_v0, %v6716_v18 }
 0xa32   :  { %v14119_v14 = vpop.eup %11896 }
 0xa33   :  { %v6822_v3 = vmul.f32 1.442695, %v6770_v37  ;;  %v6894_v60 = vsel %vm2285_vm2, %v14119_v14, 0.0 }
 0xa34   :  { %6895 = vadd.xlane.f32.xlu1 %v6894_v60  ;;  %v6722_v47 = vpop.xlane.xlu1 %6721 }
 0xa35   :  { %11900 = vpow2.f32 %v6822_v3  ;;  %v6772_v31 = vsub.f32 %v13859_v35, %v6722_v47 }
 0xa37   :  { %v6826_v53 = vmul.f32 1.442695, %v6772_v31 }
 0xa38   :  { %v6728_v12 = vpop.xlane.xlu1 %6727 }
 0xa39   :  { %11902 = vpow2.f32 %v6826_v53  ;;  %v6779_v53 = vsub.f32 %v13843_v52, %v13918_v20  ;;  %v6774_v52 = vsub.f32 %v13861_v43, %v6728_v12 }
 0xa3a   :  { %v14124_v58 = vpop.eup %11898  ;;  %v14126_v45 = vpop.f32.mrf.mxu1 }
 0xa3b   :  { %v6900_v0 = vsel %vm2285_vm2, %v14124_v58, 0.0 }
 0xa3c   :  { %v6734_v56 = vpop.xlane.xlu1 %6733  ;;  %6901 = vadd.xlane.f32.xlu0 %v6900_v0  ;;  %v10981_v44 = vpop.f32.mrf.mxu1  ;;  %v6840_v0 = vmul.f32 1.442695, %v6779_v53 }
 0xa3d   :  { %v6781_v44 = vsub.f32 %v13853_v32, %v13961_v42  ;;  %v6776_v20 = vsub.f32 %v13863_v24, %v6734_v56 }
 0xa3e   :  { %v7495_v36 = vpop.f32.mrf.mxu1 }
 0xa40   :  { %v6740_v17 = vpop.xlane.xlu1 %6739  ;;  %v10982_v48 = vpop.f32.mrf.mxu1 }
 0xa41   :  { %v6844_v48 = vmul.f32 1.442695, %v6781_v44 }
 0xa42   :  { %v14130_v46 = vpop.eup %11900  ;;  %v14132_v62 = vpop.f32.mrf.mxu1 }
 0xa43   :  { %v6906_v35 = vsel %vm2285_vm2, %v14130_v46, 0.0 }
 0xa44   :  { %v6746_v1 = vpop.xlane.xlu1 %6745  ;;  %6907 = vadd.xlane.f32.xlu0 %v6906_v35  ;;  %v10993_v18 = vpop.f32.mrf.mxu1 }
 0xa45   :  { %11498 = vrot.lane.b32.xlu1 %v13771_v50, %s14758_s28  ;;  %v5156_v18 = vpack.c.bf16 %v13744_v26, %v13744_v26  ;;  %v6830_v26 = vmul.f32 1.442695, %v6774_v52  ;;  %v6780_v53 = vsub.f32 %v13867_v33, %v6746_v1 }
 0xa46   :  { %v14138_v37 = vpop.eup %11902  ;;  %v7587_v3 = vpop.f32.mrf.mxu1 }
 0xa47   :  { %v6912_v60 = vsel %vm2285_vm2, %v14138_v37, 0.0 }
 0xa48   :  { %v6860_v47 = vpop.xlane.xlu1 %6859  ;;  %6913 = vadd.xlane.f32.xlu0 %v6912_v60  ;;  %v10994_v31 = vpop.f32.mrf.mxu1  ;;  %v7318_v60 = vsel %vm2674_vm3, %v5156_v18, 0 }
 0xa49   :  { %11904 = vrcp.f32 %v6860_v47  ;;  %v6834_v47 = vmul.f32 1.442695, %v6776_v20  ;;  %v6778_v31 = vsub.f32 %v13865_v25, %v6740_v17 }
 0xa4a   :  { %11906 = vpow2.f32 %v6840_v0  ;;  %v6842_v0 = vmul.f32 1.442695, %v6780_v53 }
 0xa4b   :  { %11908 = vpow2.f32 %v6844_v48  ;;  %v6838_v12 = vmul.f32 1.442695, %v6778_v31 }
 0xa4c   :  { %11910 = vpow2.f32 %v6830_v26 }
 0xa4d   :  { %11912 = vpow2.f32 %v6834_v47  ;;  %v11465_v47 = vunpack.i.l.bf16 %v13983_v38 }
 0xa4e   :  { %11914 = vpow2.f32 %v6838_v12 }
 0xa4f   :  { %11916 = vpow2.f32 %v6842_v0 }
 0xa56   :  { %v11905_v36 = vpop.eup %11904 }
 0xa57   :  { %v6978_v35 = vmul.f32 %v11905_v36, %v14058_v23  ;;  %v14157_v32 = vpop.eup %11906 }
 0xa58   :  { %v6933_v42 = vsel %vm2285_vm2, %v14157_v32, 0.0  ;;  %v14162_v23 = vpop.eup %11908 }
 0xa59   :  { %v7010_v3 = vpack.c.bf16 %v6978_v35, %v6978_v35  ;;  %v14168_v35 = vpop.eup %11910 }
 0xa5b   :  { %10950 = vmatmul.mubr.msk.bf16.vlgmr.msra.gmra.mxu0 %vm2670_vm4, %v7010_v3  ;;  %v6918_v3 = vsel %vm2285_vm2, %v14168_v35, 0.0 }
 0xa5c   :  { %10960 = vmatpush3.bf16.msra.mxu0 %v7318_v60  ;;  %10961 = vmatprep.mubr.msk.bf16.mxu0 %vm11982_vm0, %v14749_v2  ;;  %v14172_v60 = vpop.eup %11912 }
 0xa5d   :  { %10971 = vmatprep.subr.bf16.mxu0 %v14749_v2  ;;  %v6924_v52 = vsel %vm2285_vm2, %v14172_v60, 0.0  ;;  %v14178_v26 = vpop.eup %11914 }
 0xa5e   :  { %11503 = vrot.lane.b32.xlu0 %v13751_v13, %s14759_s9  ;;  %v6939_v13 = vsel %vm2285_vm2, %v14162_v23, 0.0  ;;  %v14185_v12 = vpop.eup %11916 }
 0xa69   :  { %6934 = vadd.xlane.f32.xlu1 %v6933_v42 }
 0xa6d   :  { %6940 = vadd.xlane.f32.xlu1 %v6939_v13  ;;  %v6930_v13 = vsel %vm2285_vm2, %v14178_v26, 0.0 }
 0xa6f   :  { %v7676_v43 = vpop.f32.mrf.mxu1 }
 0xa71   :  { %v11005_v24 = vpop.f32.mrf.mxu1 }
 0xa72   :  { %v5158_v24 = vpack.c.bf16 %v11465_v47, %v11465_v47 }
 0xa73   :  { %v7679_v56 = vpop.f32.mrf.mxu1 }
 0xa75   :  { %v11006_v44 = vpop.f32.mrf.mxu1 }
 0xa77   :  { %v7768_v36 = vpop.f32.mrf.mxu1 }
 0xa78   :  { %v6866_v48 = vpop.xlane.xlu1 %6865 }
 0xa79   :  { %11918 = vrcp.f32 %v6866_v48  ;;  %v11017_v25 = vpop.f32.mrf.mxu1  ;;  %v11475_v48 = vunpack.i.l.bf16 %v13981_v5  ;;  %v11480_v5 = vunpack.i.l.bf16 %v14018_v10  ;;  %v11485_v10 = vunpack.i.l.bf16 %v14026_v15 }
 0xa7a   :  { %v7410_v25 = vsel %vm2674_vm3, %v5158_v24, 0  ;;  %v11470_v15 = vunpack.i.l.bf16 %v13975_v57 }
 0xa7b   :  { %v7771_v17 = vpop.f32.mrf.mxu1 }
 0xa7c   :  { %v6872_v18 = vpop.xlane.xlu1 %6871 }
 0xa7d   :  { %11920 = vrcp.f32 %v6872_v18  ;;  %6919 = vadd.xlane.f32.xlu0 %v6918_v3  ;;  %v11018_v33 = vpop.f32.mrf.mxu1 }
 0xa7e   :  { %11508 = vrot.lane.b32.xlu1 %v13765_v7, %s14759_s9 }
 0xa7f   :  { %v7860_v1 = vpop.f32.mrf.mxu1 }
 0xa80   :  { %v6878_v42 = vpop.xlane.xlu1 %6877 }
 0xa81   :  { %6925 = vadd.xlane.f32.xlu0 %v6924_v52  ;;  %v11029_v20 = vpop.f32.mrf.mxu1  ;;  %11922 = vrcp.f32 %v6878_v42 }
 0xa82   :  { %11518 = vrot.lane.b32.xlu1 %v13771_v50, %s14759_s9  ;;  %v6936_v50 = vsel %vm2285_vm2, %v14185_v12, 0.0  ;;  %v5164_v20 = vpack.c.bf16 %v11485_v10, %v11485_v10 }
 0xa83   :  { %v7863_v31 = vpop.f32.mrf.mxu1 }
 0xa84   :  { %v6884_v44 = vpop.xlane.xlu1 %6883  ;;  %v7686_v47 = vsel %vm2674_vm3, %v5164_v20, 0  ;;  %v5166_v31 = vpack.c.bf16 %v11470_v15, %v11470_v15 }
 0xa85   :  { %6931 = vadd.xlane.f32.xlu0 %v6930_v13  ;;  %v11030_v7 = vpop.f32.mrf.mxu1  ;;  %11924 = vrcp.f32 %v6884_v44 }
 0xa86   :  { %v11919_v53 = vpop.eup %11918  ;;  %8520 = vrot.lane.b32.xlu1 %v14126_v45, %s14759_s9  ;;  %v5160_v45 = vpack.c.bf16 %v11475_v48, %v11475_v48 }
 0xa87   :  { %v6980_v56 = vmul.f32 %v11919_v53, %v14074_v4 }
 0xa88   :  { %v6890_v18 = vpop.xlane.xlu0 %6889  ;;  %v7502_v3 = vsel %vm2674_vm3, %v5160_v45, 0 }
 0xa89   :  { %v7012_v38 = vpack.c.bf16 %v6980_v56, %v6980_v56  ;;  %6937 = vadd.xlane.f32.xlu0 %v6936_v50  ;;  %11926 = vrcp.f32 %v6890_v18  ;;  %v11490_v18 = vunpack.i.l.bf16 %v14080_v19 }
 0xa8a   :  { %v11921_v0 = vpop.eup %11920  ;;  %8524 = vrot.lane.b32.xlu1 %v14132_v62, %s14759_s9  ;;  %11928 = vrcp.f32 %v13979_v51 }
 0xa8b   :  { %10962 = vmatmul.mubr.msk.bf16.vlgmr.msra.gmra.mxu0 %vm2670_vm4, %v7012_v38  ;;  %v6982_v4 = vmul.f32 %v11921_v0, %v14084_v55 }
 0xa8c   :  { %10972 = vmatpush3.bf16.msra.mxu0 %v7410_v25  ;;  %10973 = vmatprep.mubr.msk.bf16.mxu0 %vm11982_vm0, %v14749_v2 }
 0xa8d   :  { %10983 = vmatprep.subr.bf16.mxu0 %v14749_v2  ;;  %v7014_v17 = vpack.c.bf16 %v6982_v4, %v6982_v4 }
 0xa8e   :  { %8528 = vrot.lane.b32.xlu1 %v7676_v43, %s14759_s9  ;;  %v11923_v62 = vpop.eup %11922  ;;  %v5162_v43 = vpack.c.bf16 %v11480_v5, %v11480_v5 }
 0xa8f   :  { %v6984_v55 = vmul.f32 %v11923_v62, %v14090_v61 }
 0xa90   :  { %v7594_v52 = vsel %vm2674_vm3, %v5162_v43, 0 }
 0xa91   :  { %v7016_v33 = vpack.c.bf16 %v6984_v55, %v6984_v55 }
 0xa92   :  { %8532 = vrot.lane.b32.xlu1 %v7768_v36, %s14759_s9  ;;  %v11925_v36 = vpop.eup %11924 }
 0xa93   :  { %10974 = vmatmul.mubr.msk.bf16.vlgmr.msra.gmra.mxu0 %vm2670_vm4, %v7014_v17  ;;  %v6986_v61 = vmul.f32 %v11925_v36, %v14097_v54 }
 0xa94   :  { %10984 = vmatpush3.bf16.msra.mxu0 %v7502_v3  ;;  %10985 = vmatprep.mubr.msk.bf16.mxu0 %vm11982_vm0, %v14749_v2 }
 0xa95   :  { %10995 = vmatprep.subr.bf16.mxu0 %v14749_v2 }
 0xa96   :  { %8552 = vrot.lane.b32.xlu1 %v7860_v1, %s14758_s28  ;;  %v7018_v1 = vpack.c.bf16 %v6986_v61, %v6986_v61  ;;  %v11927_v42 = vpop.eup %11926 }
 0xa97   :  { %v6988_v54 = vmul.f32 %v11927_v42, %v14105_v59  ;;  %v11929_v50 = vpop.eup %11928 }
 0xa98   :  { %v6997_v48 = vmul.f32 %v11929_v50, %v13909_v21  ;;  %v5168_v21 = vpack.c.bf16 %v11490_v18, %v11490_v18 }
 0xa99   :  { %v7020_v13 = vpack.c.bf16 %v6988_v54, %v6988_v54 }
 0xa9a   :  { %v7029_v62 = vpack.c.bf16 %v6997_v48, %v6997_v48  ;;  %v7870_v19 = vsel %vm2674_vm3, %v5168_v21, 0 }
 0xa9b   :  { %10986 = vmatmul.mubr.msk.bf16.vlgmr.msra.gmra.mxu0 %vm2670_vm4, %v7016_v33  ;;  %v11495_v33 = vunpack.i.l.bf16 %v14076_v16 }
 0xa9c   :  { %10996 = vmatpush3.bf16.msra.mxu0 %v7594_v52  ;;  %10997 = vmatprep.mubr.msk.bf16.mxu0 %vm11982_vm0, %v14749_v2 }
 0xa9d   :  { %11007 = vmatprep.subr.bf16.mxu0 %v14749_v2  ;;  %v5170_v10 = vpack.c.bf16 %v11495_v33, %v11495_v33 }
 0xa9f   :  { %11513 = vrot.lane.b32.xlu0 %v13777_v41, %s14759_s9  ;;  %v7778_v41 = vsel %vm2674_vm3, %v5166_v31, 0 }
 0xaa3   :  { %10998 = vmatmul.mubr.msk.bf16.vlgmr.msra.gmra.mxu0 %vm2670_vm4, %v7018_v1 }
 0xaa4   :  { %11008 = vmatpush3.bf16.msra.mxu0 %v7686_v47  ;;  %11009 = vmatprep.mubr.msk.bf16.mxu0 %vm11982_vm0, %v14749_v2  ;;  %v7962_v47 = vsel %vm2674_vm3, %v5170_v10, 0 }
 0xaa5   :  { %11019 = vmatprep.subr.bf16.mxu0 %v14749_v2 }
 0xaab   :  { %11010 = vmatmul.mubr.msk.bf16.vlgmr.msra.gmra.mxu0 %vm2670_vm4, %v7020_v13 }
 0xaac   :  { %11020 = vmatpush3.bf16.msra.mxu0 %v7778_v41  ;;  %11021 = vmatprep.mubr.msk.bf16.mxu0 %vm11982_vm0, %v14749_v2 }
 0xaad   :  { %11031 = vmatprep.subr.bf16.mxu0 %v14749_v2 }
 0xab8   :  { %v7952_v57 = vpop.f32.mrf.mxu1 }
 0xab9   :  { %8556 = vrot.lane.b32.xlu1 %v7952_v57, %s14758_s28 }
 0xaba   :  { %v11041_v59 = vpop.f32.mrf.mxu1 }
 0xabc   :  { %v7955_v7 = vpop.f32.mrf.mxu1 }
 0xabd   :  { %v6896_v53 = vpop.xlane.xlu1 %6895 }
 0xabe   :  { %11930 = vrcp.f32 %v6896_v53  ;;  %v11042_v24 = vpop.f32.mrf.mxu1 }
 0xac0   :  { %v8044_v56 = vpop.f32.mrf.mxu1 }
 0xac1   :  { %v11499_v38 = vpop.permute.xlu1 %11498  ;;  %8560 = vrot.lane.b32.xlu1 %v8044_v56, %s14758_s28 }
 0xac2   :  { %v11501_v0 = vunpack.i.h.bf16 %v11499_v38  ;;  %v11053_v44 = vpop.f32.mrf.mxu1  ;;  %v11500_v42 = vunpack.i.l.bf16 %v11499_v38 }
 0xac4   :  { %v5173_v25 = vpack.c.bf16 %v11501_v0, %v11501_v0  ;;  %v8047_v4 = vpop.f32.mrf.mxu1  ;;  %v5172_v13 = vpack.c.bf16 %v11500_v42, %v11500_v42 }
 0xac5   :  { %v6902_v51 = vpop.xlane.xlu0 %6901 }
 0xac6   :  { %11932 = vrcp.f32 %v6902_v51  ;;  %v11054_v45 = vpop.f32.mrf.mxu1  ;;  %v8100_v17 = vsel %vm2674_vm3, %v5173_v25, 0  ;;  %v8054_v7 = vsel %vm2674_vm3, %v5172_v13, 0 }
 0xac7   :  { %11062 = vmatpush3.bf16.msra.mxu1 %v8100_v17  ;;  %11934 = vrcp.f32 %v14113_v8 }
 0xac8   :  { %11073 = vmatprep.subr.bf16.mxu1 %v14749_v2 }
 0xaca   :  { %11064 = vmatmul.mubr.msk.bf16.vlgmr.msra.gmra.mxu1 %vm2670_vm4, %v7029_v62 }
 0xacb   :  { %v11931_v5 = vpop.eup %11930  ;;  %11075 = vmatprep.mubr.msk.bf16.mxu1 %vm11982_vm0, %v14749_v2 }
 0xacc   :  { %v6990_v3 = vmul.f32 %v11931_v5, %v14119_v14 }
 0xacd   :  { %v6908_v55 = vpop.xlane.xlu0 %6907 }
 0xace   :  { %v7022_v43 = vpack.c.bf16 %v6990_v3, %v6990_v3  ;;  %11936 = vrcp.f32 %v6908_v55 }
 0xad0   :  { %11022 = vmatmul.mubr.msk.bf16.vlgmr.msra.gmra.mxu0 %vm2670_vm4, %v7022_v43 }
 0xad1   :  { %11032 = vmatpush3.bf16.msra.mxu0 %v7870_v19  ;;  %v6914_v8 = vpop.xlane.xlu0 %6913  ;;  %11033 = vmatprep.mubr.msk.bf16.mxu0 %vm11982_vm0, %v14749_v2 }
 0xad2   :  { %11938 = vrcp.f32 %v6914_v8  ;;  %11043 = vmatprep.subr.bf16.mxu0 %v14749_v2 }
 0xad3   :  { %v11933_v36 = vpop.eup %11932  ;;  %11940 = vrcp.f32 %v14116_v27 }
 0xad4   :  { %v6992_v14 = vmul.f32 %v11933_v36, %v14124_v58  ;;  %v11935_v52 = vpop.eup %11934 }
 0xad5   :  { %v11504_v61 = vpop.permute.xlu0 %11503  ;;  %v6999_v1 = vmul.f32 %v11935_v52, %v14007_v34 }
 0xad6   :  { %v7024_v20 = vpack.c.bf16 %v6992_v14, %v6992_v14  ;;  %v11506_v16 = vunpack.i.h.bf16 %v11504_v61  ;;  %v11505_v59 = vunpack.i.l.bf16 %v11504_v61 }
 0xad7   :  { %v7031_v31 = vpack.c.bf16 %v6999_v1, %v6999_v1 }
 0xad8   :  { %v5175_v15 = vpack.c.bf16 %v11506_v16, %v11506_v16  ;;  %11034 = vmatmul.mubr.msk.bf16.vlgmr.msra.gmra.mxu0 %vm2670_vm4, %v7024_v20  ;;  %v5174_v53 = vpack.c.bf16 %v11505_v59, %v11505_v59 }
 0xad9   :  { %11044 = vmatpush3.bf16.msra.mxu0 %v7962_v47  ;;  %11045 = vmatprep.mubr.msk.bf16.mxu0 %vm11982_vm0, %v14749_v2 }
 0xada   :  { %v8192_v54 = vsel %vm2674_vm3, %v5175_v15, 0  ;;  %11055 = vmatprep.subr.bf16.mxu0 %v14749_v2  ;;  %v8146_v56 = vsel %vm2674_vm3, %v5174_v53, 0 }
 0xadb   :  { %v11937_v58 = vpop.eup %11936  ;;  %11074 = vmatpush3.bf16.msra.mxu1 %v8192_v54 }
 0xadc   :  { %v6994_v34 = vmul.f32 %v11937_v58, %v14130_v46  ;;  %11085 = vmatprep.subr.bf16.mxu1 %v14749_v2 }
 0xade   :  { %v7026_v41 = vpack.c.bf16 %v6994_v34, %v6994_v34  ;;  %11076 = vmatmul.mubr.msk.bf16.vlgmr.msra.gmra.mxu1 %vm2670_vm4, %v7031_v31 }
 0xadf   :  { %v11939_v57 = vpop.eup %11938  ;;  %11087 = vmatprep.mubr.msk.bf16.mxu1 %vm11982_vm0, %v14749_v2 }
 0xae0   :  { %11046 = vmatmul.mubr.msk.bf16.vlgmr.msra.gmra.mxu0 %vm2670_vm4, %v7026_v41  ;;  %v6996_v46 = vmul.f32 %v11939_v57, %v14138_v37  ;;  %v11941_v0 = vpop.eup %11940 }
 0xae1   :  { %11056 = vmatpush3.bf16.msra.mxu0 %v8054_v7  ;;  %11057 = vmatprep.mubr.msk.bf16.mxu0 %vm11982_vm0, %v14749_v2  ;;  %v7001_v48 = vmul.f32 %v11941_v0, %v14013_v49 }
 0xae2   :  { %11067 = vmatprep.subr.bf16.mxu0 %v14749_v2  ;;  %v7028_v24 = vpack.c.bf16 %v6996_v46, %v6996_v46 }
 0xae3   :  { %v7033_v51 = vpack.c.bf16 %v7001_v48, %v7001_v48 }
 0xae8   :  { %11058 = vmatmul.mubr.msk.bf16.vlgmr.msra.gmra.mxu0 %vm2670_vm4, %v7028_v24 }
 0xae9   :  { %11068 = vmatpush3.bf16.msra.mxu0 %v8146_v56  ;;  %11069 = vmatprep.mubr.msk.bf16.mxu0 %vm11982_vm0, %v14749_v2 }
 0xaea   :  { %11079 = vmatprep.subr.bf16.mxu0 %v14749_v2 }
 0xaf2   :  { %v6935_v50 = vpop.xlane.xlu1 %6934 }
 0xaf6   :  { %v6941_v38 = vpop.xlane.xlu1 %6940 }
 0xafa   :  { %v11509_v37 = vpop.permute.xlu1 %11508 }
 0xafb   :  { %v11511_v44 = vunpack.i.h.bf16 %v11509_v37  ;;  %v11510_v49 = vunpack.i.l.bf16 %v11509_v37 }
 0xafd   :  { %v5177_v25 = vpack.c.bf16 %v11511_v44, %v11511_v44  ;;  %v5176_v21 = vpack.c.bf16 %v11510_v49, %v11510_v49 }
 0xafe   :  { %v11519_v5 = vpop.permute.xlu1 %11518 }
 0xaff   :  { %v8284_v4 = vsel %vm2674_vm3, %v5177_v25, 0  ;;  %v11521_v33 = vunpack.i.h.bf16 %v11519_v5  ;;  %v8238_v61 = vsel %vm2674_vm3, %v5176_v21, 0  ;;  %v11520_v34 = vunpack.i.l.bf16 %v11519_v5 }
 0xb00   :  { %11086 = vmatpush3.bf16.msra.mxu1 %v8284_v4 }
 0xb01   :  { %11097 = vmatprep.subr.bf16.mxu1 %v14749_v2  ;;  %v5181_v20 = vpack.c.bf16 %v11521_v33, %v11521_v33  ;;  %v5180_v46 = vpack.c.bf16 %v11520_v34, %v11520_v34 }
 0xb03   :  { %11088 = vmatmul.mubr.msk.bf16.vlgmr.msra.gmra.mxu1 %vm2670_vm4, %v7033_v51  ;;  %v8468_v58 = vsel %vm2674_vm3, %v5181_v20, 0  ;;  %v8422_v24 = vsel %vm2674_vm3, %v5180_v46, 0 }
 0xb04   :  { %11099 = vmatprep.mubr.msk.bf16.mxu1 %vm11982_vm0, %v14749_v2 }
 0xb06   :  { %v6920_v27 = vpop.xlane.xlu0 %6919 }
 0xb07   :  { %11942 = vrcp.f32 %v6920_v27 }
 0xb08   :  { %11944 = vrcp.f32 %v6935_v50 }
 0xb0a   :  { %v6926_v45 = vpop.xlane.xlu0 %6925 }
 0xb0b   :  { %11946 = vrcp.f32 %v6926_v45 }
 0xb0c   :  { %11948 = vrcp.f32 %v6941_v38 }
 0xb0e   :  { %v6932_v17 = vpop.xlane.xlu0 %6931 }
 0xb0f   :  { %11950 = vrcp.f32 %v6932_v17 }
 0xb12   :  { %v6938_v62 = vpop.xlane.xlu0 %6937 }
 0xb13   :  { %11952 = vrcp.f32 %v6938_v62 }
 0xb14   :  { %v11943_v18 = vpop.eup %11942 }
 0xb15   :  { %v6998_v3 = vmul.f32 %v11943_v18, %v14168_v35  ;;  %v11945_v55 = vpop.eup %11944 }
 0xb16   :  { %v11514_v43 = vpop.permute.xlu0 %11513  ;;  %v7003_v10 = vmul.f32 %v11945_v55, %v14157_v32 }
 0xb17   :  { %v7030_v19 = vpack.c.bf16 %v6998_v3, %v6998_v3  ;;  %v11516_v8 = vunpack.i.h.bf16 %v11514_v43  ;;  %v11515_v52 = vunpack.i.l.bf16 %v11514_v43 }
 0xb18   :  { %v11947_v36 = vpop.eup %11946  ;;  %v7035_v32 = vpack.c.bf16 %v7003_v10, %v7003_v10 }
 0xb19   :  { %v5179_v14 = vpack.c.bf16 %v11516_v8, %v11516_v8  ;;  %11070 = vmatmul.mubr.msk.bf16.vlgmr.msra.gmra.mxu0 %vm2670_vm4, %v7030_v19  ;;  %v7000_v35 = vmul.f32 %v11947_v36, %v14172_v60  ;;  %v5178_v42 = vpack.c.bf16 %v11515_v52, %v11515_v52  ;;  %v11949_v15 = vpop.eup %11948 }
 0xb1a   :  { %11080 = vmatpush3.bf16.msra.mxu0 %v8238_v61  ;;  %11081 = vmatprep.mubr.msk.bf16.mxu0 %vm11982_vm0, %v14749_v2  ;;  %v7005_v13 = vmul.f32 %v11949_v15, %v14162_v23 }
 0xb1b   :  { %v8376_v16 = vsel %vm2674_vm3, %v5179_v14, 0  ;;  %11091 = vmatprep.subr.bf16.mxu0 %v14749_v2  ;;  %v14290_v1 = vpop.f32.mrf.mxu0  ;;  %v7032_v54 = vpack.c.bf16 %v7000_v35, %v7000_v35  ;;  %v8330_v41 = vsel %vm2674_vm3, %v5178_v42, 0 }
 0xb1c   :  { %11098 = vmatpush3.bf16.msra.mxu1 %v8376_v16  ;;  %v11951_v60 = vpop.eup %11950  ;;  %v7037_v7 = vpack.c.bf16 %v7005_v13, %v7005_v13 }
 0xb1d   :  { %11109 = vmatprep.subr.bf16.mxu1 %v14749_v2  ;;  %v10951_v47 = vpop.f32.mrf.mxu0  ;;  %v7002_v59 = vmul.f32 %v11951_v60, %v14178_v26 }
 0xb1f   :  { %11100 = vmatmul.mubr.msk.bf16.vlgmr.msra.gmra.mxu1 %vm2670_vm4, %v7035_v32  ;;  %v7265_v31 = vpop.f32.mrf.mxu0  ;;  %v7034_v53 = vpack.c.bf16 %v7002_v59, %v7002_v59 }
 0xb20   :  { %11110 = vmatpush3.bf16.msra.mxu1 %v8468_v58  ;;  %11111 = vmatprep.mubr.msk.bf16.mxu1 %vm11982_vm0, %v14749_v2  ;;  %v11953_v23 = vpop.eup %11952 }
 0xb21   :  { %11082 = vmatmul.mubr.msk.bf16.vlgmr.msra.gmra.mxu0 %vm2670_vm4, %v7032_v54  ;;  %v10952_v57 = vpop.f32.mrf.mxu0  ;;  %v7004_v26 = vmul.f32 %v11953_v23, %v14185_v12  ;;  %v11596_v23 = vld [vmem:[%s14700_s12 + $0x38] sm:$0xff]  }
 0xb22   :  { %11092 = vmatpush3.bf16.msra.mxu0 %v8330_v41  ;;  %11093 = vmatprep.mubr.msk.bf16.mxu0 %vm11982_vm0, %v14749_v2 }
 0xb23   :  { %11103 = vmatprep.subr.bf16.mxu0 %v14749_v2  ;;  %v7036_v56 = vpack.c.bf16 %v7004_v26, %v7004_v26 }
 0xb27   :  { %11112 = vmatmul.mubr.msk.bf16.vlgmr.msra.gmra.mxu1 %vm2670_vm4, %v7037_v7 }
 0xb28   :  { %9126 = vmatprep.mubr.bf16.mxu1 %v14750_v40 }
 0xb29   :  { %11094 = vmatmul.mubr.msk.bf16.vlgmr.msra.gmra.mxu0 %vm2670_vm4, %v7034_v53 }
 0xb2a   :  { %11104 = vmatpush3.bf16.msra.mxu0 %v8422_v24  ;;  %11105 = vmatprep.mubr.msk.bf16.mxu0 %vm11982_vm0, %v14749_v2  ;;  %v11597_v24 = vld [vmem:[%s14700_s12 + $0x30] sm:$0xff]  }
 0xb2b   :  { %11115 = vmatprep.subr.bf16.mxu0 %v14749_v2 }
 0xb31   :  { %11106 = vmatmul.mubr.msk.bf16.vlgmr.msra.gmra.mxu0 %vm2670_vm4, %v7036_v56 }
 0xb32   :  { %11131 = vmatprep.mubr.msk.bf16.mxu0 %vm11982_vm0, %v14749_v2  ;;  %11116 = vmatpush3.bf16.msra.mxu0 %v11596_v23 }
 0xb33   :  { %11117 = vmatprep.subr.bf16.mxu0 %v14749_v2 }
 0xb36   :  { %11118 = vmatpush3.bf16.msra.mxu0 %v11597_v24 }
 0xb37   :  { %11119 = vmatprep.subr.bf16.mxu0 %v14749_v2 }
 0xb4b   :  { %v14315_v50 = vpop.f32.mrf.mxu0 }
 0xb4d   :  { %v10963_v38 = vpop.f32.mrf.mxu0 }
 0xb4e   :  { %v11598_v38 = vld [vmem:[%s14700_s12 + $0x28] sm:$0xff]  }
 0xb4f   :  { %v7357_v0 = vpop.f32.mrf.mxu0  ;;  %11120 = vmatpush3.bf16.msra.mxu0 %v11598_v38 }
 0xb50   :  { %11121 = vmatprep.subr.bf16.mxu0 %v14749_v2 }
 0xb51   :  { %v10964_v37 = vpop.f32.mrf.mxu0 }
 0xb53   :  { %v14317_v44 = vpop.f32.mrf.mxu0 }
 0xb55   :  { %v10975_v48 = vpop.f32.mrf.mxu0 }
 0xb57   :  { %v7449_v25 = vpop.f32.mrf.mxu0 }
 0xb58   :  { %v11599_v25 = vld [vmem:[%s14700_s12 + $0x20] sm:$0xff]  }
 0xb59   :  { %v10976_v4 = vpop.f32.mrf.mxu0  ;;  %11122 = vmatpush3.bf16.msra.mxu0 %v11599_v25 }
 0xb5a   :  { %11123 = vmatprep.subr.bf16.mxu0 %v14749_v2 }
 0xb5b   :  { %v14319_v51 = vpop.f32.mrf.mxu0 }
 0xb5d   :  { %v10987_v12 = vpop.f32.mrf.mxu0 }
 0xb5f   :  { %v7541_v27 = vpop.f32.mrf.mxu0 }
 0xb60   :  { %v11600_v27 = vld [vmem:[%s14700_s12 + $0x18] sm:$0xff]  }
 0xb61   :  { %v10988_v45 = vpop.f32.mrf.mxu0  ;;  %11124 = vmatpush3.bf16.msra.mxu0 %v11600_v27 }
 0xb62   :  { %11125 = vmatprep.subr.bf16.mxu0 %v14749_v2 }
 0xb63   :  { %v7630_v17 = vpop.f32.mrf.mxu0 }
 0xb64   :  { %8526 = vrot.lane.b32.xlu0 %v7630_v17, %s14759_s9 }
 0xb65   :  { %v10999_v49 = vpop.f32.mrf.mxu0 }
 0xb67   :  { %v7633_v62 = vpop.f32.mrf.mxu0 }
 0xb69   :  { %v11000_v18 = vpop.f32.mrf.mxu0 }
 0xb6a   :  { %v11601_v18 = vld [vmem:[%s14700_s12 + $0x10] sm:$0xff]  }
 0xb6b   :  { %v7722_v5 = vpop.f32.mrf.mxu0  ;;  %11126 = vmatpush3.bf16.msra.mxu0 %v11601_v18 }
 0xb6c   :  { %8530 = vrot.lane.b32.xlu0 %v7722_v5, %s14759_s9  ;;  %11127 = vmatprep.subr.bf16.mxu0 %v14749_v2 }
 0xb6d   :  { %v11011_v21 = vpop.f32.mrf.mxu0 }
 0xb6f   :  { %v7725_v3 = vpop.f32.mrf.mxu0 }
 0xb71   :  { %v11012_v55 = vpop.f32.mrf.mxu0 }
 0xb8a   :  { %v8136_v43 = vpop.f32.mrf.mxu1 }
 0xb8b   :  { %8564 = vrot.lane.b32.xlu1 %v8136_v43, %s14758_s28 }
 0xb8c   :  { %v11065_v33 = vpop.f32.mrf.mxu1 }
 0xb8d   :  { %v11602_v33 = vld [vmem:[%s14700_s12 + $0x8] sm:$0xff]  }
 0xb8e   :  { %v8139_v19 = vpop.f32.mrf.mxu1  ;;  %11128 = vmatpush3.bf16.msra.mxu0 %v11602_v33 }
 0xb8f   :  { %11129 = vmatprep.subr.bf16.mxu0 %v14749_v2 }
 0xb90   :  { %v7814_v8 = vpop.f32.mrf.mxu0  ;;  %v11066_v36 = vpop.f32.mrf.mxu1 }
 0xb91   :  { %8550 = vrot.lane.b32.xlu0 %v7814_v8, %s14758_s28 }
 0xb92   :  { %v11023_v10 = vpop.f32.mrf.mxu0 }
 0xb94   :  { %v7817_v14 = vpop.f32.mrf.mxu0 }
 0xb96   :  { %v11024_v52 = vpop.f32.mrf.mxu0 }
 0xb98   :  { %v7906_v61 = vpop.f32.mrf.mxu0 }
 0xb99   :  { %8554 = vrot.lane.b32.xlu0 %v7906_v61, %s14758_s28 }
 0xb9a   :  { %v11035_v20 = vpop.f32.mrf.mxu0 }
 0xb9b   :  { %v8521_v20 = vpop.permute.xlu1 %8520 }
 0xb9c   :  { %v7909_v35 = vpop.f32.mrf.mxu0 }
 0xb9e   :  { %v11036_v16 = vpop.f32.mrf.mxu0  ;;  %v8228_v32 = vpop.f32.mrf.mxu1 }
 0xb9f   :  { %8584 = vrot.lane.b32.xlu1 %v8228_v32, %s11984_s10  ;;  %v8525_v35 = vpop.permute.xlu1 %8524 }
 0xba0   :  { %v7998_v42 = vpop.f32.mrf.mxu0  ;;  %v11077_v15 = vpop.f32.mrf.mxu1 }
 0xba1   :  { %8558 = vrot.lane.b32.xlu0 %v7998_v42, %s14758_s28 }
 0xba2   :  { %v11047_v47 = vpop.f32.mrf.mxu0  ;;  %v8231_v54 = vpop.f32.mrf.mxu1 }
 0xba3   :  { %v8529_v16 = vpop.permute.xlu1 %8528 }
 0xba4   :  { %v8001_v58 = vpop.f32.mrf.mxu0  ;;  %v11078_v60 = vpop.f32.mrf.mxu1  ;;  %v8611_v27 = vsel %vm812_vm1, %v14050_v6, %v8529_v16 }
 0xba6   :  { %v11048_v31 = vpop.f32.mrf.mxu0 }
 0xba7   :  { %v8533_v32 = vpop.permute.xlu1 %8532 }
 0xba8   :  { %v8090_v13 = vpop.f32.mrf.mxu0 }
 0xba9   :  { %8562 = vrot.lane.b32.xlu0 %v8090_v13, %s14758_s28 }
 0xbaa   :  { %v11059_v34 = vpop.f32.mrf.mxu0 }
 0xbab   :  { %v8553_v42 = vpop.permute.xlu1 %8552 }
 0xbac   :  { %v8093_v41 = vpop.f32.mrf.mxu0 }
 0xbae   :  { %v11060_v57 = vpop.f32.mrf.mxu0 }
 0xbaf   :  { %v8557_v15 = vpop.permute.xlu1 %8556 }
 0xbb3   :  { %v8561_v54 = vpop.permute.xlu1 %8560 }
 0xbc3   :  { %v8320_v59 = vpop.f32.mrf.mxu1 }
 0xbc4   :  { %8588 = vrot.lane.b32.xlu1 %v8320_v59, %s11984_s10 }
 0xbc5   :  { %v11089_v7 = vpop.f32.mrf.mxu1 }
 0xbc7   :  { %v8323_v46 = vpop.f32.mrf.mxu1 }
 0xbc9   :  { %v11090_v53 = vpop.f32.mrf.mxu1 }
 0xbd6   :  { %v8527_v47 = vpop.permute.xlu0 %8526 }
 0xbd7   :  { %v8610_v25 = vsel %vm812_vm1, %v14290_v1, %v8527_v47 }
 0xbd9   :  { %v8182_v26 = vpop.f32.mrf.mxu0 }
 0xbda   :  { %8582 = vrot.lane.b32.xlu0 %v8182_v26, %s11984_s10 }
 0xbdb   :  { %v11071_v56 = vpop.f32.mrf.mxu0 }
 0xbdd   :  { %v8185_v0 = vpop.f32.mrf.mxu0 }
 0xbde   :  { %v8531_v58 = vpop.permute.xlu0 %8530 }
 0xbdf   :  { %v11072_v37 = vpop.f32.mrf.mxu0  ;;  %v8412_v48 = vpop.f32.mrf.mxu1 }
 0xbe0   :  { %8592 = vrot.lane.b32.xlu1 %v8412_v48, %s11984_s10  ;;  %v8609_v48 = vsel %vm812_vm1, %v14038_v28, %v8525_v35  ;;  %v11979_v35 = vld [vmem:[%s14753_s5] sm:$0xff]  }
 0xbe1   :  { %v8274_v4 = vpop.f32.mrf.mxu0  ;;  %v11101_v12 = vpop.f32.mrf.mxu1  ;;  %v8770_v16 = vunpack.c.l.bf16 %v11979_v35 }
 0xbe2   :  { %8586 = vrot.lane.b32.xlu0 %v8274_v4, %s11984_s10  ;;  %v8607_v12 = vsel %vm812_vm1, %v14023_v11, %v8521_v20  ;;  %v8613_v11 = vsel %vm812_vm1, %v14063_v9, %v8533_v32  ;;  %v9855_v20 = vld [vmem:[%s14701_s13] ss:$0 sm:$0xff] }
 0xbe3   :  { %v11083_v45 = vpop.f32.mrf.mxu0  ;;  %v8415_v17 = vpop.f32.mrf.mxu1  ;;  %v8615_v1 = vsel %vm4248_vm5, %v8607_v12, %v8553_v42  ;;  %v11619_v12 = vld [vmem:[%s14702_s16 + $0xa8] ss:$16 sps:$4 sm:$0xff]  }
 0xbe4   :  { %8518 = vrot.lane.b32.xlu1 %v14317_v44, %s14759_s9 }
 0xbe5   :  { %v8277_v49 = vpop.f32.mrf.mxu0  ;;  %v11102_v62 = vpop.f32.mrf.mxu1 }
 0xbe6   :  { %v8619_v49 = vsel %vm4248_vm5, %v8611_v27, %v8561_v54  ;;  %v11622_v27 = vld [vmem:[%s14702_s16 + $0x80] ss:$16 sps:$4 sm:$0xff]  }
 0xbe7   :  { %v11084_v5 = vpop.f32.mrf.mxu0  ;;  %v8504_v21 = vpop.f32.mrf.mxu1 }
 0xbe8   :  { %8522 = vrot.lane.b32.xlu1 %v14319_v51, %s14759_s9  ;;  %v11603_v51 = vld [vmem:[%s14700_s12] sm:$0xff]   ;;  %v8612_v5 = vsel %vm812_vm1, %v14315_v50, %v8531_v58 }
 0xbe9   :  { %v8366_v3 = vpop.f32.mrf.mxu0  ;;  %v11113_v55 = vpop.f32.mrf.mxu1  ;;  %11130 = vmatpush3.bf16.msra.mxu0 %v11603_v51 }
 0xbea   :  { %8590 = vrot.lane.b32.xlu0 %v8366_v3, %s11984_s10 }
 0xbeb   :  { %v11095_v44 = vpop.f32.mrf.mxu0  ;;  %v8507_v43 = vpop.f32.mrf.mxu1 }
 0xbec   :  { %8596 = vrot.lane.b32.xlu1 %v8504_v21, %s11984_s10 }
 0xbed   :  { %v8369_v19 = vpop.f32.mrf.mxu0  ;;  %v11114_v8 = vpop.f32.mrf.mxu1 }
 0xbef   :  { %v11096_v36 = vpop.f32.mrf.mxu0 }
 0xbf1   :  { %v8458_v10 = vpop.f32.mrf.mxu0 }
 0xbf2   :  { %8594 = vrot.lane.b32.xlu0 %v8458_v10, %s11984_s10 }
 0xbf3   :  { %v11107_v14 = vpop.f32.mrf.mxu0 }
 0xbf5   :  { %v8461_v52 = vpop.f32.mrf.mxu0 }
 0xbf7   :  { %v11108_v61 = vpop.f32.mrf.mxu0 }
 0xbfd   :  { %v8565_v60 = vpop.permute.xlu1 %8564 }
 0xbfe   :  { %v8621_v3 = vsel %vm4248_vm5, %v8613_v11, %v8565_v60  ;;  %v11634_v11 = vld [vmem:[%s14702_s16 + $0x40] ss:$16 sps:$4 sm:$0xff]  }
 0xc03   :  { %v8551_v31 = vpop.permute.xlu0 %8550 }
 0xc0b   :  { %v8555_v13 = vpop.permute.xlu0 %8554 }
 0xc11   :  { %v8585_v34 = vpop.permute.xlu1 %8584 }
 0xc12   :  { %v8623_v6 = vsel %vm4257_vm6, %v8615_v1, %v8585_v34  ;;  %v11607_v34 = vld [vmem:[%s14702_s16 + $0xe8] ss:$16 sps:$4 sm:$0xff]  }
 0xc13   :  { %v8559_v41 = vpop.permute.xlu0 %8558  ;;  %v11631_v1 = vld [vmem:[%s14702_s16 + $0x68] ss:$16 sps:$4 sm:$0xff]  }
 0xc1b   :  { %v8563_v59 = vpop.permute.xlu0 %8562 }
 0xc1c   :  { %v8620_v55 = vsel %vm4248_vm5, %v8612_v5, %v8563_v59  ;;  %v11637_v5 = vld [vmem:[%s14702_s16 + $0x48] ss:$16 sps:$4 sm:$0xff]  }
 0xc36   :  { %v8589_v57 = vpop.permute.xlu1 %8588 }
 0xc4c   :  { %v8583_v46 = vpop.permute.xlu0 %8582 }
 0xc52   :  { %v8593_v7 = vpop.permute.xlu1 %8592 }
 0xc53   :  { %v8627_v21 = vsel %vm4257_vm6, %v8619_v49, %v8593_v7  ;;  %v11633_v49 = vld [vmem:[%s14702_s16 + $0x6c] ss:$16 sps:$4 sm:$0xff]  }
 0xc54   :  { %v8587_v23 = vpop.permute.xlu0 %8586 }
 0xc56   :  { %v8519_v53 = vpop.permute.xlu1 %8518 }
 0xc57   :  { %v8606_v26 = vsel %vm812_vm1, %v13951_v63, %v8519_v53  ;;  %v8617_v63 = vsel %vm4248_vm5, %v8609_v48, %v8557_v15  ;;  %v11618_v48 = vld [vmem:[%s14702_s16 + $0xa4] ss:$16 sps:$4 sm:$0xff]  }
 0xc58   :  { %v8614_v0 = vsel %vm4248_vm5, %v8606_v26, %v8551_v31  ;;  %v8625_v45 = vsel %vm4257_vm6, %v8617_v63, %v8589_v57  ;;  %v11624_v63 = vld [vmem:[%s14702_s16 + $0x84] ss:$16 sps:$4 sm:$0xff]  }
 0xc59   :  { %v8622_v17 = vsel %vm4257_vm6, %v8614_v0, %v8583_v46  ;;  %v11610_v0 = vld [vmem:[%s14702_s16 + $0xc0] ss:$16 sps:$4 sm:$0xff]  }
 0xc5a   :  { %v8523_v24 = vpop.permute.xlu1 %8522  ;;  %v8638_v44 = vcombine.low %v8622_v17, %v8623_v6  ;;  %v11628_v17 = vld [vmem:[%s14702_s16 + $0x60] ss:$16 sps:$4 sm:$0xff]   ;;  %v11642_v6 = vld [vmem:[%s14702_s16 + $0x24] ss:$16 sps:$4 sm:$0xff]  }
 0xc5b   :  { %v8608_v56 = vsel %vm812_vm1, %v13955_v29, %v8523_v24  ;;  %v8618_v29 = vsel %vm4248_vm5, %v8610_v25, %v8559_v41  ;;  %v11609_v41 = vld [vmem:[%s14702_s16 + $0xec] ss:$16 sps:$4 sm:$0xff]  }
 0xc5c   :  { %v8616_v38 = vsel %vm4248_vm5, %v8608_v56, %v8555_v13  ;;  %v8591_v37 = vpop.permute.xlu0 %8590  ;;  %v8646_v50 = vrot.slane %v8638_v44, %v12222_v39  ;;  %v11606_v13 = vld [vmem:[%s14702_s16 + $0xe4] ss:$16 sps:$4 sm:$0xff]   ;;  %9137 = vmatprep.subr.bf16.mxu0 %v11609_v41  ;;  %v11621_v25 = vld [vmem:[%s14702_s16 + $0xac] ss:$16 sps:$4 sm:$0xff]  }
 0xc5d   :  { %v8624_v4 = vsel %vm4257_vm6, %v8616_v38, %v8587_v23  ;;  %v8626_v28 = vsel %vm4257_vm6, %v8618_v29, %v8591_v37  ;;  %9094 = vmatprep.subr.bf16.mxu1 %v11606_v13  ;;  %v11612_v56 = vld [vmem:[%s14702_s16 + $0xc4] ss:$16 sps:$4 sm:$0xff]   ;;  %v11615_v38 = vld [vmem:[%s14702_s16 + $0xcc] ss:$16 sps:$4 sm:$0xff]   ;;  %v11613_v37 = vld [vmem:[%s14702_s16 + $0xc8] ss:$16 sps:$4 sm:$0xff]  }
 0xc5e   :  { %v8639_v62 = vcombine.low %v8624_v4, %v8625_v45  ;;  %v8597_v18 = vpop.permute.xlu1 %8596  ;;  %v8655_v43 = vcombine.low %v8626_v28, %v8627_v21  ;;  %v11616_v4 = vld [vmem:[%s14702_s16 + $0xa0] ss:$16 sps:$4 sm:$0xff]   ;;  %v11627_v29 = vld [vmem:[%s14702_s16 + $0x8c] ss:$16 sps:$4 sm:$0xff]   ;;  %v11625_v45 = vld [vmem:[%s14702_s16 + $0x88] ss:$16 sps:$4 sm:$0xff]  }
 0xc5f   :  { %v8629_v19 = vsel %vm4257_vm6, %v8621_v3, %v8597_v18  ;;  %v11630_v28 = vld [vmem:[%s14702_s16 + $0x64] ss:$16 sps:$4 sm:$0xff]   ;;  %v11639_v18 = vld [vmem:[%s14702_s16 + $0x4c] ss:$16 sps:$4 sm:$0xff]   ;;  %v11640_v3 = vld [vmem:[%s14702_s16 + $0x20] ss:$16 sps:$4 sm:$0xff]  }
 0xc60   :  { %v8653_v9 = vrot.slane %v8639_v62, %v12222_v39  ;;  %v8663_v36 = vrot.slane %v8655_v43, %v12222_v39  ;;  %v11636_v62 = vld [vmem:[%s14702_s16 + $0x44] ss:$16 sps:$4 sm:$0xff]   ;;  %v11645_v21 = vld [vmem:[%s14702_s16 + $0x2c] ss:$16 sps:$4 sm:$0xff]  }
 0xc61   :  { %v11648_v44 = vld [vmem:[%s14702_s16 + $0x4] ss:$16 sps:$4 sm:$0xff]   ;;  %v11651_v43 = vld [vmem:[%s14702_s16 + $0xc] ss:$16 sps:$4 sm:$0xff]  }
 0xc62   :  { %v8654_v14 = vcombine.low %v8646_v50, %v8653_v9  ;;  %v11657_v13 = vld [vmem:[%s14705_s18 + $0xf0] sm:$0xff]  }
 0xc63   :  { %v11659_v41 = vld [vmem:[%s14705_s18 + $0xb0] sm:$0xff]  }
 0xc64   :  { %v8595_v33 = vpop.permute.xlu0 %8594 }
 0xc65   :  { %v8628_v8 = vsel %vm4257_vm6, %v8620_v55, %v8595_v33  ;;  %v11643_v55 = vld [vmem:[%s14702_s16 + $0x28] ss:$16 sps:$4 sm:$0xff]   ;;  %v11646_v33 = vld [vmem:[%s14702_s16] ss:$16 sps:$4 sm:$0xff]  }
 0xc66   :  { %v8656_v51 = vcombine.low %v8628_v8, %v8629_v19  ;;  %v11649_v19 = vld [vmem:[%s14702_s16 + $0x8] ss:$16 sps:$4 sm:$0xff]  }
 0xc68   :  { %v8670_v10 = vrot.slane %v8656_v51, %v12222_v39  ;;  %v8771_v39 = vunpack.c.h.bf16 %v11979_v35 }
 0xc6a   :  { %v8671_v52 = vcombine.low %v8663_v36, %v8670_v10 }
 0xc6c   :  { %v8674_v61 = vpack.c.bf16 %v8671_v52, %v8654_v14 }
 0xc6e   :  { %11132 = vmatmul.mubr.bf16.vlgmr.msra.gmra.mxu0 %v8674_v61  ;;  %v9864_v61 = vld [vmem:[%s14703_s14] ss:$0 sm:$0xff] }
 0xc6f   :  { %9169 = vmatprep.mubr.bf16.mxu0 %v14750_v40  ;;  %v11604_v40 = vld [vmem:[%s14702_s16 + $0xe0] ss:$16 sps:$4 sm:$0xff]   ;;  %9138 = vmatpush1.bf16.msra.mxu0 %v11607_v34 }
 0xc70   :  { %9095 = vmatpush1.bf16.msra.mxu1 %v11604_v40  ;;  %9139 = vmatprep.subr.bf16.mxu0 %v11615_v38  ;;  %v11656_v40 = vld [vmem:[%s14705_s18 + $0x70] sm:$0xff]   ;;  %v11669_v38 = vld [vmem:[%s14705_s18 + $0xd8] sm:$0xff]  }
 0xc71   :  { %9096 = vmatprep.subr.bf16.mxu1 %v11612_v56  ;;  %v11658_v34 = vld [vmem:[%s14705_s18 + $0x30] sm:$0xff]   ;;  %v11668_v56 = vld [vmem:[%s14705_s18 + $0x58] sm:$0xff]  }
 0xc73   :  { %9140 = vmatpush1.bf16.msra.mxu0 %v11613_v37  ;;  %v11671_v37 = vld [vmem:[%s14705_s18 + $0x98] sm:$0xff]  }
 0xc74   :  { %9097 = vmatpush1.bf16.msra.mxu1 %v11610_v0  ;;  %9141 = vmatprep.subr.bf16.mxu0 %v11621_v25  ;;  %v11670_v0 = vld [vmem:[%s14705_s18 + $0x18] sm:$0xff]   ;;  %v11673_v25 = vld [vmem:[%s14705_s18 + $0xd0] sm:$0xff]  }
 0xc75   :  { %9098 = vmatprep.subr.bf16.mxu1 %v11618_v48  ;;  %v11672_v48 = vld [vmem:[%s14705_s18 + $0x50] sm:$0xff]  }
 0xc77   :  { %9142 = vmatpush1.bf16.msra.mxu0 %v11619_v12  ;;  %v11675_v12 = vld [vmem:[%s14705_s18 + $0x90] sm:$0xff]  }
 0xc78   :  { %9099 = vmatpush1.bf16.msra.mxu1 %v11616_v4  ;;  %9143 = vmatprep.subr.bf16.mxu0 %v11627_v29  ;;  %v11674_v4 = vld [vmem:[%s14705_s18 + $0x10] sm:$0xff]   ;;  %v11677_v29 = vld [vmem:[%s14705_s18 + $0xc8] sm:$0xff]  }
 0xc79   :  { %9100 = vmatprep.subr.bf16.mxu1 %v11624_v63  ;;  %v11676_v63 = vld [vmem:[%s14705_s18 + $0x48] sm:$0xff]  }
 0xc7b   :  { %9144 = vmatpush1.bf16.msra.mxu0 %v11625_v45  ;;  %v11679_v45 = vld [vmem:[%s14705_s18 + $0x88] sm:$0xff]  }
 0xc7c   :  { %9101 = vmatpush1.bf16.msra.mxu1 %v11622_v27  ;;  %9145 = vmatprep.subr.bf16.mxu0 %v11633_v49  ;;  %v11678_v27 = vld [vmem:[%s14705_s18 + $0x8] sm:$0xff]   ;;  %v11683_v49 = vld [vmem:[%s14705_s18 + $0x80] sm:$0xff]  }
 0xc7d   :  { %9102 = vmatprep.subr.bf16.mxu1 %v11630_v28  ;;  %v11681_v28 = vld [vmem:[%s14705_s18 + $0xc0] sm:$0xff]  }
 0xc7f   :  { %9146 = vmatpush1.bf16.msra.mxu0 %v11631_v1  ;;  %v11682_v1 = vld [vmem:[%s14705_s18] sm:$0xff]  }
 0xc80   :  { %9103 = vmatpush1.bf16.msra.mxu1 %v11628_v17  ;;  %9147 = vmatprep.subr.bf16.mxu0 %v11639_v18  ;;  %v11680_v17 = vld [vmem:[%s14705_s18 + $0x40] sm:$0xff]  }
 0xc81   :  { %9104 = vmatprep.subr.bf16.mxu1 %v11636_v62  ;;  %v8845_v62 = vld [vmem:[%s14706_s17] sm:$0xf] }
 0xc82   :  { %v14761_v18 = vld [vmem:[#allocation2_spill] sm:$0xff] }
 0xc83   :  { %9148 = vmatpush1.bf16.msra.mxu0 %v11637_v5  ;;  %v8917_v5 = vrot.slane %v8845_v62, %v14756_v22 }
 0xc84   :  { %9105 = vmatpush1.bf16.msra.mxu1 %v11634_v11  ;;  %9149 = vmatprep.subr.bf16.mxu0 %v11645_v21  ;;  %v8928_v11 = vsub.s32 3, %v14761_v18 }
 0xc85   :  { %9106 = vmatprep.subr.bf16.mxu1 %v11642_v6  ;;  %v14762_v6 = vsub.s32 2, %v14761_v18 }
 0xc87   :  { %9150 = vmatpush1.bf16.msra.mxu0 %v11643_v55  ;;  %v8925_v21 = vrot.slane %v8845_v62, %v14762_v6 }
 0xc88   :  { %9107 = vmatpush1.bf16.msra.mxu1 %v11640_v3  ;;  %9151 = vmatprep.subr.bf16.mxu0 %v11651_v43  ;;  %v8929_v43 = vrot.slane %v8845_v62, %v8928_v11 }
 0xc89   :  { %9108 = vmatprep.subr.bf16.mxu1 %v11648_v44  ;;  %v8921_v44 = vrot.slane %v8845_v62, %v14755_v30 }
 0xc8b   :  { %9152 = vmatpush1.bf16.msra.mxu0 %v11649_v19 }
 0xc8c   :  { %9109 = vmatpush1.bf16.msra.mxu1 %v11646_v33 }
 0xd2e   :  { %v8763_v32 = vpop.f32.mrf.mxu0 }
 0xd2f   :  { %v8764_v42 = vadd.f32 %v9855_v20, %v8763_v32  ;;  %v9865_v32 = vld [vmem:[%s14704_s15] ss:$0 sm:$0xff] }
 0xd30   :  { %v11133_v15 = vpop.f32.mrf.mxu0 }
 0xd31   :  { %v8772_v47 = vadd.f32 %v8770_v16, %v8764_v42 }
 0xd32   :  { %v8766_v54 = vpop.f32.mrf.mxu0 }
 0xd33   :  { %v8767_v58 = vadd.f32 %v9855_v20, %v8766_v54  ;;  %8774 = vadd.xlane.f32.xlu0 %v8772_v47  ;;  %v11652_v54 = vld [vmem:[%s14705_s18 + $0x78] sm:$0xff]  }
 0xd34   :  { %v11134_v60 = vpop.f32.mrf.mxu0  ;;  %10234 = vmatprep.subr.bf16.mxu1 %v11652_v54 }
 0xd35   :  { %v8773_v31 = vadd.f32 %v8771_v39, %v8767_v58  ;;  %v11653_v58 = vld [vmem:[%s14705_s18 + $0xf8] sm:$0xff]  }
 0xd36   :  { %v11654_v60 = vld [vmem:[%s14705_s18 + $0x38] sm:$0xff]   ;;  %10256 = vmatprep.subr.bf16.mxu0 %v11653_v58 }
 0xd37   :  { %8776 = vadd.xlane.f32.xlu1 %v8773_v31 }
 0xdbc   :  { %v8775_v57 = vpop.xlane.xlu0 %8774 }
 0xdbd   :  { %v8778_v59 = vmul.f32 0.0078125, %v8775_v57  ;;  %v11660_v57 = vld [vmem:[%s14705_s18 + $0x68] sm:$0xff]  }
 0xdbf   :  { %v14426_v7 = vsub.f32 %v8772_v47, %v8778_v59  ;;  %v11661_v59 = vld [vmem:[%s14705_s18 + $0xe8] sm:$0xff]  }
 0xdc0   :  { %v8777_v46 = vpop.xlane.xlu1 %8776 }
 0xdc1   :  { %v8779_v53 = vmul.f32 0.0078125, %v8777_v46  ;;  %v8782_v23 = vmul.f32 %v14426_v7, %v14426_v7  ;;  %v11663_v46 = vld [vmem:[%s14705_s18 + $0xa8] sm:$0xff]  }
 0xdc3   :  { %v14430_v24 = vsub.f32 %v8773_v31, %v8779_v53  ;;  %8784 = vadd.xlane.f32.xlu0 %v8782_v23  ;;  %v11655_v31 = vld [vmem:[%s14705_s18 + $0xb8] sm:$0xff]   ;;  %v11664_v53 = vld [vmem:[%s14705_s18 + $0x60] sm:$0xff]  }
 0xdc4   :  { %v11665_v23 = vld [vmem:[%s14705_s18 + $0xe0] sm:$0xff]  }
 0xdc5   :  { %v8783_v26 = vmul.f32 %v14430_v24, %v14430_v24 }
 0xdc7   :  { %8786 = vadd.xlane.f32.xlu0 %v8783_v26  ;;  %v11667_v26 = vld [vmem:[%s14705_s18 + $0xa0] sm:$0xff]  }
 0xe4c   :  { %v8785_v8 = vpop.xlane.xlu0 %8784 }
 0xe4d   :  { %v8788_v9 = vmul.f32 0.0078125, %v8785_v8 }
 0xe4f   :  { %v8790_v51 = vadd.f32 1e-05, %v8788_v9 }
 0xe50   :  { %v8787_v50 = vpop.xlane.xlu0 %8786 }
 0xe51   :  { %11954 = vrsqrt.f32 %v8790_v51  ;;  %v8789_v36 = vmul.f32 0.0078125, %v8787_v50 }
 0xe53   :  { %v8791_v10 = vadd.f32 1e-05, %v8789_v36 }
 0xe55   :  { %11956 = vrsqrt.f32 %v8791_v10 }
 0xe5e   :  { %v11955_v14 = vpop.eup %11954 }
 0xe5f   :  { %v8794_v52 = vmul.f32 %v11955_v14, %v14426_v7  ;;  %v11662_v7 = vld [vmem:[%s14705_s18 + $0x28] sm:$0xff]  }
 0xe61   :  { %v8802_v16 = vmul.f32 %v9864_v61, %v8794_v52 }
 0xe62   :  { %v11957_v20 = vpop.eup %11956 }
 0xe63   :  { %v8795_v35 = vmul.f32 %v11957_v20, %v14430_v24  ;;  %v8810_v15 = vadd.f32 %v9865_v32, %v8802_v16  ;;  %v11666_v24 = vld [vmem:[%s14705_s18 + $0x20] sm:$0xff]  }
 0xe65   :  { %v8803_v42 = vmul.f32 %v9864_v61, %v8795_v35 }
 0xe67   :  { %v8811_v47 = vadd.f32 %v9865_v32, %v8803_v42 }
 0xe69   :  { %v14526_v39 = vpack.c.bf16 %v8811_v47, %v8810_v15 }
 0xe6b   :  { %9127 = vmatmul.mubr.bf16.vlgmr.msra.gmra.mxu1 %v14526_v39  ;;  %9170 = vmatmul.mubr.bf16.vlgmr.msra.gmra.mxu0 %v14526_v39 }
 0xe6c   :  { %10235 = vmatpush3.bf16.msra.mxu1 %v11654_v60  ;;  %10257 = vmatpush3.bf16.msra.mxu0 %v11655_v31 }
 0xe6d   :  { %10236 = vmatprep.subr.bf16.mxu1 %v11656_v40  ;;  %10258 = vmatprep.subr.bf16.mxu0 %v11657_v13 }
 0xe70   :  { %10237 = vmatpush3.bf16.msra.mxu1 %v11658_v34  ;;  %10259 = vmatpush3.bf16.msra.mxu0 %v11659_v41 }
 0xe71   :  { %10238 = vmatprep.subr.bf16.mxu1 %v11660_v57  ;;  %10260 = vmatprep.subr.bf16.mxu0 %v11661_v59 }
 0xe74   :  { %10239 = vmatpush3.bf16.msra.mxu1 %v11662_v7  ;;  %10261 = vmatpush3.bf16.msra.mxu0 %v11663_v46 }
 0xe75   :  { %10240 = vmatprep.subr.bf16.mxu1 %v11664_v53  ;;  %10262 = vmatprep.subr.bf16.mxu0 %v11665_v23 }
 0xe78   :  { %10241 = vmatpush3.bf16.msra.mxu1 %v11666_v24  ;;  %10263 = vmatpush3.bf16.msra.mxu0 %v11667_v26 }
 0xe79   :  { %10242 = vmatprep.subr.bf16.mxu1 %v11668_v56  ;;  %10264 = vmatprep.subr.bf16.mxu0 %v11669_v38 }
 0xe7c   :  { %10243 = vmatpush3.bf16.msra.mxu1 %v11670_v0  ;;  %10265 = vmatpush3.bf16.msra.mxu0 %v11671_v37 }
 0xe7d   :  { %10244 = vmatprep.subr.bf16.mxu1 %v11672_v48  ;;  %10266 = vmatprep.subr.bf16.mxu0 %v11673_v25 }
 0xe80   :  { %10245 = vmatpush3.bf16.msra.mxu1 %v11674_v4  ;;  %10267 = vmatpush3.bf16.msra.mxu0 %v11675_v12 }
 0xe81   :  { %10246 = vmatprep.subr.bf16.mxu1 %v11676_v63  ;;  %10268 = vmatprep.subr.bf16.mxu0 %v11677_v29 }
 0xe84   :  { %10247 = vmatpush3.bf16.msra.mxu1 %v11678_v27  ;;  %10269 = vmatpush3.bf16.msra.mxu0 %v11679_v45 }
 0xe85   :  { %10248 = vmatprep.subr.bf16.mxu1 %v11680_v17  ;;  %10270 = vmatprep.subr.bf16.mxu0 %v11681_v28 }
 0xe88   :  { %10249 = vmatpush3.bf16.msra.mxu1 %v11682_v1  ;;  %10271 = vmatpush3.bf16.msra.mxu0 %v11683_v49 }
 0xe89   :  { %11135 = vmatprep.subr.bf16.mxu1 %v14749_v2 }
 0xf2b   :  { %v9128_v3 = vpop.f32.mrf.mxu1  ;;  %v9171_v55 = vpop.f32.mrf.mxu0 }
 0xf2c   :  { %v9129_v33 = vadd.f32 %v9128_v3, %v8917_v5  ;;  %v9172_v19 = vadd.f32 %v9171_v55, %v8925_v21 }
 0xf2d   :  { %v9130_v8 = vpop.f32.mrf.mxu1  ;;  %v9173_v9 = vpop.f32.mrf.mxu0 }
 0xf2e   :  { %v9188_v51 = vmul.f32 0.70710677, %v9129_v33  ;;  %v9190_v50 = vmul.f32 0.70710677, %v9172_v19  ;;  %v9131_v36 = vadd.f32 %v9130_v8, %v8921_v44  ;;  %v9174_v10 = vadd.f32 %v9173_v9, %v8929_v43 }
 0xf2f   :  { %v9132_v14 = vpop.f32.mrf.mxu1  ;;  %v9175_v52 = vpop.f32.mrf.mxu0  ;;  %v9180_v57 = vmul.f32 0.5, %v9129_v33  ;;  %v9182_v27 = vmul.f32 0.5, %v9172_v19 }
 0xf30   :  { %v9133_v61 = vadd.f32 %v9132_v14, %v8917_v5  ;;  %v9176_v22 = vadd.f32 %v9175_v52, %v8925_v21  ;;  %11958 = verf.f32 %v9188_v51  ;;  %v9189_v20 = vmul.f32 0.70710677, %v9131_v36 }
 0xf31   :  { %v9134_v35 = vpop.f32.mrf.mxu1  ;;  %v9177_v16 = vpop.f32.mrf.mxu0  ;;  %11960 = verf.f32 %v9190_v50  ;;  %v9191_v32 = vmul.f32 0.70710677, %v9174_v10  ;;  %v9181_v59 = vmul.f32 0.5, %v9131_v36  ;;  %v9183_v4 = vmul.f32 0.5, %v9174_v10 }
 0xf32   :  { %v9192_v30 = vmul.f32 0.70710677, %v9133_v61  ;;  %11962 = verf.f32 %v9189_v20  ;;  %v9194_v42 = vmul.f32 0.70710677, %v9176_v22  ;;  %v9135_v15 = vadd.f32 %v9134_v35, %v8921_v44  ;;  %v9898_v44 = vld [vmem:[%s14707_s19] ss:$0 sm:$0xff] }
 0xf33   :  { %v9178_v47 = vadd.f32 %v9177_v16, %v8929_v43  ;;  %11964 = verf.f32 %v9191_v32  ;;  %v9184_v26 = vmul.f32 0.5, %v9133_v61  ;;  %v9186_v37 = vmul.f32 0.5, %v9176_v22 }
 0xf34   :  { %11966 = verf.f32 %v9192_v30  ;;  %v9193_v54 = vmul.f32 0.70710677, %v9135_v15  ;;  %v9185_v48 = vmul.f32 0.5, %v9135_v15  ;;  %v9504_v61 = vunpack.c.l.bf16 %v14526_v39 }
 0xf35   :  { %11968 = verf.f32 %v9194_v42  ;;  %v9195_v58 = vmul.f32 0.70710677, %v9178_v47  ;;  %v9187_v63 = vmul.f32 0.5, %v9178_v47  ;;  %v9505_v32 = vunpack.c.h.bf16 %v14526_v39  ;;  %v11684_v42 = vld [vmem:[%s14708_s22 + $0x38] sm:$0xff]   ;;  %v11685_v39 = vld [vmem:[%s14708_s22 + $0x30] sm:$0xff]  }
 0xf36   :  { %11970 = verf.f32 %v9193_v54 }
 0xf37   :  { %11972 = verf.f32 %v9195_v58 }
 0xf3d   :  { %v11959_v60 = vpop.eup %11958 }
 0xf3e   :  { %v11961_v31 = vpop.eup %11960  ;;  %v9204_v23 = vadd.f32 1.0, %v11959_v60 }
 0xf3f   :  { %v11963_v40 = vpop.eup %11962  ;;  %v9206_v0 = vadd.f32 1.0, %v11961_v31 }
 0xf40   :  { %v11965_v13 = vpop.eup %11964  ;;  %v9205_v7 = vadd.f32 1.0, %v11963_v40  ;;  %v9212_v1 = vmul.f32 %v9204_v23, %v9180_v57  ;;  %v11688_v57 = vld [vmem:[%s14708_s22 + $0x18] sm:$0xff]  }
 0xf41   :  { %v11967_v34 = vpop.eup %11966  ;;  %v9207_v24 = vadd.f32 1.0, %v11965_v13  ;;  %v9214_v18 = vmul.f32 %v9206_v0, %v9182_v27 }
 0xf42   :  { %v11969_v41 = vpop.eup %11968  ;;  %v9208_v46 = vadd.f32 1.0, %v11967_v34  ;;  %v9213_v45 = vmul.f32 %v9205_v7, %v9181_v59  ;;  %v11686_v34 = vld [vmem:[%s14708_s22 + $0x28] sm:$0xff]   ;;  %v11689_v59 = vld [vmem:[%s14708_s22 + $0x10] sm:$0xff]  }
 0xf43   :  { %v11971_v53 = vpop.eup %11970  ;;  %v9210_v56 = vadd.f32 1.0, %v11969_v41  ;;  %v9215_v49 = vmul.f32 %v9207_v24, %v9183_v4  ;;  %v11687_v41 = vld [vmem:[%s14708_s22 + $0x20] sm:$0xff]   ;;  %v11690_v7 = vld [vmem:[%s14708_s22 + $0x8] sm:$0xff]  }
 0xf44   :  { %v11973_v38 = vpop.eup %11972  ;;  %v9209_v25 = vadd.f32 1.0, %v11971_v53  ;;  %v9216_v12 = vmul.f32 %v9208_v46, %v9184_v26  ;;  %v11691_v46 = vld [vmem:[%s14708_s22] sm:$0xff]  }
 0xf45   :  { %v9211_v29 = vadd.f32 1.0, %v11973_v38  ;;  %v9218_v17 = vmul.f32 %v9210_v56, %v9186_v37 }
 0xf46   :  { %v9217_v28 = vmul.f32 %v9209_v25, %v9185_v48  ;;  %v9220_v5 = vpack.c.bf16 %v9216_v12, %v9212_v1  ;;  %v9931_v48 = vld [vmem:[%s14709_s20] ss:$0 sm:$0xff] }
 0xf47   :  { %v9219_v62 = vmul.f32 %v9211_v29, %v9187_v63  ;;  %v9222_v21 = vpack.c.bf16 %v9218_v17, %v9214_v18  ;;  %v9933_v17 = vld [vmem:[%s14711_s23] ss:$0 sm:$0xff] }
 0xf48   :  { %v9221_v11 = vpack.c.bf16 %v9217_v28, %v9213_v45 }
 0xf49   :  { %v9223_v6 = vpack.c.bf16 %v9219_v62, %v9215_v49 }
 0xf4a   :  { %9454 = vmatprep.mubr.bf16.mxu1 %v9221_v11 }
 0xf4b   :  { %9495 = vmatprep.mubr.bf16.mxu0 %v9223_v6  ;;  %9455 = vmatmul.mubr.bf16.vlgmr.msra.gmra.mxu1 %v9220_v5 }
 0xf4c   :  { %9496 = vmatmul.mubr.bf16.vlgmr.msra.gmra.mxu0 %v9222_v21  ;;  %11151 = vmatprep.mubr.msk.bf16.mxu1 %vm11982_vm0, %v14749_v2 }
 0xf4d   :  { %11136 = vmatpush3.bf16.msra.mxu1 %v11684_v42 }
 0xf4e   :  { %11137 = vmatprep.subr.bf16.mxu1 %v14749_v2 }
 0xf51   :  { %11138 = vmatpush3.bf16.msra.mxu1 %v11685_v39 }
 0xf52   :  { %11139 = vmatprep.subr.bf16.mxu1 %v14749_v2 }
 0xf55   :  { %11140 = vmatpush3.bf16.msra.mxu1 %v11686_v34 }
 0xf56   :  { %11141 = vmatprep.subr.bf16.mxu1 %v14749_v2 }
 0xf59   :  { %11142 = vmatpush3.bf16.msra.mxu1 %v11687_v41 }
 0xf5a   :  { %11143 = vmatprep.subr.bf16.mxu1 %v14749_v2 }
 0xf5d   :  { %11144 = vmatpush3.bf16.msra.mxu1 %v11688_v57 }
 0xf5e   :  { %11145 = vmatprep.subr.bf16.mxu1 %v14749_v2 }
 0xf61   :  { %11146 = vmatpush3.bf16.msra.mxu1 %v11689_v59 }
 0xf62   :  { %11147 = vmatprep.subr.bf16.mxu1 %v14749_v2 }
 0xf65   :  { %11148 = vmatpush3.bf16.msra.mxu1 %v11690_v7 }
 0xf66   :  { %11149 = vmatprep.subr.bf16.mxu1 %v14749_v2  ;;  %v9932_v2 = vld [vmem:[%s14710_s21] ss:$0 sm:$0xff] }
 0xf69   :  { %11150 = vmatpush3.bf16.msra.mxu1 %v11691_v46 }
0x100b   :  { %v10250_v3 = vpop.f32.mrf.mxu1 }
0x100c   :  { %v10272_v55 = vpop.f32.mrf.mxu0 }
0x100d   :  { %v10251_v43 = vpop.f32.mrf.mxu1 }
0x100e   :  { %v10252_v33 = vadd.f32 %v10251_v43, %v10250_v3  ;;  %v10273_v19 = vpop.f32.mrf.mxu0 }
0x100f   :  { %v10253_v8 = vpop.f32.mrf.mxu1  ;;  %v10274_v51 = vadd.f32 %v10273_v19, %v10272_v55 }
0x1010   :  { %v9457_v9 = vadd.f32 %v10252_v33, %v9898_v44  ;;  %v10275_v50 = vpop.f32.mrf.mxu0 }
0x1011   :  { %v10254_v36 = vpop.f32.mrf.mxu1 }
0x1012   :  { %v9498_v10 = vadd.f32 %v10274_v51, %v9457_v9  ;;  %v10255_v14 = vadd.f32 %v10254_v36, %v10253_v8  ;;  %v10276_v52 = vpop.f32.mrf.mxu0 }
0x1013   :  { %v10277_v20 = vadd.f32 %v10276_v52, %v10275_v50 }
0x1014   :  { %v9460_v22 = vadd.f32 %v10255_v14, %v9898_v44  ;;  %v9506_v35 = vadd.f32 %v9504_v61, %v9498_v10 }
0x1016   :  { %v9501_v16 = vadd.f32 %v10277_v20, %v9460_v22  ;;  %9508 = vadd.xlane.f32.xlu1 %v9506_v35 }
0x1018   :  { %v9507_v30 = vadd.f32 %v9505_v32, %v9501_v16 }
0x101a   :  { %9510 = vadd.xlane.f32.xlu0 %v9507_v30 }
0x109f   :  { %v9509_v15 = vpop.xlane.xlu1 %9508 }
0x10a0   :  { %v9512_v47 = vmul.f32 0.0078125, %v9509_v15 }
0x10a2   :  { %v9514_v54 = vsub.f32 %v9506_v35, %v9512_v47 }
0x10a3   :  { %v9511_v58 = vpop.xlane.xlu0 %9510 }
0x10a4   :  { %v9513_v60 = vmul.f32 0.0078125, %v9511_v58  ;;  %v9516_v31 = vmul.f32 %v9514_v54, %v9514_v54 }
0x10a6   :  { %v9515_v40 = vsub.f32 %v9507_v30, %v9513_v60  ;;  %9518 = vadd.xlane.f32.xlu1 %v9516_v31 }
0x10a8   :  { %v9517_v13 = vmul.f32 %v9515_v40, %v9515_v40 }
0x10aa   :  { %9520 = vadd.xlane.f32.xlu0 %v9517_v13 }
0x112f   :  { %v9519_v53 = vpop.xlane.xlu1 %9518 }
0x1130   :  { %v9522_v23 = vmul.f32 0.0078125, %v9519_v53 }
0x1132   :  { %v9524_v24 = vadd.f32 1e-05, %v9522_v23 }
0x1133   :  { %v9521_v26 = vpop.xlane.xlu0 %9520 }
0x1134   :  { %11974 = vrsqrt.f32 %v9524_v24  ;;  %v9523_v56 = vmul.f32 0.0078125, %v9521_v26 }
0x1136   :  { %v9525_v38 = vadd.f32 1e-05, %v9523_v56 }
0x1138   :  { %11976 = vrsqrt.f32 %v9525_v38 }
0x1141   :  { %v11975_v0 = vpop.eup %11974 }
0x1142   :  { %v9528_v37 = vmul.f32 %v11975_v0, %v9514_v54 }
0x1144   :  { %v9536_v12 = vmul.f32 %v9931_v48, %v9528_v37 }
0x1145   :  { %v11977_v25 = vpop.eup %11976 }
0x1146   :  { %v9529_v4 = vmul.f32 %v11977_v25, %v9515_v40  ;;  %v9544_v29 = vadd.f32 %v9932_v2, %v9536_v12 }
0x1148   :  { %v9537_v63 = vmul.f32 %v9931_v48, %v9529_v4 }
0x114a   :  { %v9545_v27 = vadd.f32 %v9932_v2, %v9537_v63 }
0x114c   :  { %v9546_v45 = vpack.c.bf16 %v9545_v27, %v9544_v29 }
0x114e   :  { %11152 = vmatmul.mubr.bf16.vlgmr.msra.gmra.mxu1 %v9546_v45 }
0x120e   :  { %v9652_v28 = vpop.f32.mrf.mxu1 }
0x120f   :  { %v9653_v1 = vadd.f32 %v9933_v17, %v9652_v28 }
0x1210   :  { %v11153_v49 = vpop.f32.mrf.mxu1 }
0x1211   :  { %9659 = vst [vmem:[%s14712_s24] sm:$0xff] %v9653_v1 }
0x1212   :  { %v9655_v62 = vpop.f32.mrf.mxu1 }
0x1213   :  { %v9656_v18 = vadd.f32 %v9933_v17, %v9655_v62 }
0x1214   :  { %v11154_v11 = vpop.f32.mrf.mxu1 }
0x1215   :  { %9660 = vst [vmem:[%s14712_s24 + $0x8] sm:$0xff] %v9656_v18 }

</bundles_post_ra>
